<compile_context>
chip_gen: v6e
topology: v6e:2x2x1
jax: 0.10.0
libtpu: 0.0.40
codegen_flags: <defaults>
</compile_context>

<pallas_src>
import functools

import jax
import jax.numpy as jnp
import numpy as np
from jax.experimental import pallas as pl
from jax.experimental.pallas import tpu as pltpu

EPS = 1e-5
LANE = 128
PADL = 8          # in-kernel column padding (sublane-aligned on both sides)


def _ceil_to(x, m):
    return (x + m - 1) // m * m


def _vmem_budget_bytes():
    """Generation-aware scoped-VMEM budget (v7x: 64 MiB phys, v5e/v6e: 128 MiB)."""
    cap = 64 * 1024 * 1024                      # conservative default
    try:
        info = pltpu.get_tpu_info()
        cap = int(getattr(info, "vmem_capacity_bytes", cap))
    except Exception:
        pass
    return max(32 * 1024 * 1024, min(cap * 3 // 4, 100 * 1024 * 1024))


def _est_vmem_bytes(th, W, Cinp, Cp, pool):
    """Rough per-grid-step VMEM footprint used for row-tile selection."""
    Wx = W + 2 * PADL
    io = 4 * 2 * (th * W * Cinp + 4 * W * Cinp + th * W * Cp)       # pipelined I/O
    if pool is not None:
        io += 4 * 2 * (th // pool[0]) * (W // pool[1]) * Cp
    wts = 2 * (9 * Cinp * Cp + 9 * Cp * Cp + Cinp * Cp) + 4 * 6 * Cp
    tmp = 4 * (th + 4) * Wx * 2 * Cinp                               # x / xpad
    tmp += 2 * (th + 2) * Wx * 3 * Cinp                              # conv1 im2col (bf16)
    tmp += 4 * (th + 2) * W * 3 * Cp                                 # acc1 / y1
    tmp += 4 * (th + 2) * Wx * Cp                                    # y1 padded
    tmp += 2 * (th + 2) * Wx * 3 * Cp                                # conv2 im2col (bf16)
    tmp += 4 * th * W * 3 * Cp                                       # acc2 / res / out
    return io + wts + tmp


def _pick_row_tile(N, H, W, Cinp, Cp, pool, budget):
    kh = pool[0] if pool is not None else 1
    cands = [d for d in range(H, 1, -1)
             if H % d == 0 and d % 2 == 0 and d % kh == 0]
    assert cands, "H needs an even divisor that is a multiple of the pool KH"
    th = next((d for d in cands
               if _est_vmem_bytes(d, W, Cinp, Cp, pool) <= budget), cands[-1])
    # v7x has 2 TensorCores: keep at least 2 grid steps when possible.
    if N * (H // th) < 2:
        smaller = [d for d in cands if H // d >= 2]
        if smaller:
            th = smaller[0]
    return th


# ---------------------------------------------------------------------------
# Fused ConvBlockRes kernel (one (batch, row-tile) grid step)
# ---------------------------------------------------------------------------
def _conv_block_res_kernel(xb_ref, *rest, TH, W, Cinp, Cp,
                           has_halo, has_shortcut, pool_hw):
    f32, bf16 = jnp.float32, jnp.bfloat16
    Wx = W + 2 * PADL

    i = 0
    if has_halo:
        xt_ref, xbot_ref = rest[0], rest[1]
        i = 2
    w1_ref, s1_ref, b1_ref, w2_ref, s2_ref, b2_ref = rest[i:i + 6]
    i += 6
    if has_shortcut:
        wsc_ref, bsc_ref = rest[i], rest[i + 1]
        i += 2
    out_ref = rest[i]
    pool_ref = rest[i + 1] if pool_hw is not None else None

    t = pl.program_id(1)
    last_t = pl.num_programs(1) - 1

    # ---- assemble the (TH+4, W, Cinp) row window; halo rows outside the
    #      image are zero (when the whole image is one tile, no halo DMA) ----
    if has_halo:
        top = xt_ref[...] * (t > 0).astype(f32)
        bot = xbot_ref[...] * (t < last_t).astype(f32)
    else:
        top = jnp.zeros((2, W, Cinp), f32)
        bot = top
    x = jnp.concatenate([top, xb_ref[...], bot], axis=0)

    def pad_cols(a, c):
        # Sublane-aligned zero padding on both sides (column 'SAME' halo is
        # built in-register; the HBM activation stays lane/sublane dense).
        z = jnp.zeros((a.shape[0], PADL, c), f32)
        return jnp.concatenate([z, a, z], axis=1)          # (rows, Wx, c)

    def conv3x3(srcp, nrows, w_ref, cin):
        # srcp: (nrows+2, Wx, cin) f32, image columns live at [PADL, PADL+W).
        # dy taps are folded into the contraction (K = 3*cin), one bf16
        # matmul per dx with f32 accumulation on the MXU.
        x3 = jnp.concatenate(
            [srcp[0:nrows], srcp[1:nrows + 1], srcp[2:nrows + 2]],
            axis=-1).astype(bf16)                           # (nrows, Wx, 3*cin)
        acc = jnp.zeros((nrows * W, Cp), f32)
        for dx in range(3):
            s = PADL - 1 + dx
            patch = x3[:, s:s + W, :].reshape(nrows * W, 3 * cin)
            acc = acc + jnp.dot(patch, w_ref[dx], preferred_element_type=f32)
        return acc

    # ---- conv1 + folded BN1 + ReLU over the row-extended window ----
    acc1 = conv3x3(pad_cols(x, Cinp), TH + 2, w1_ref, Cinp)
    y1 = jnp.maximum(acc1 * s1_ref[...] + b1_ref[...], 0.0)
    y1 = y1.reshape(TH + 2, W, Cp)

    # rows of the extended window outside the image are conv2's zero padding
    ridx = jax.lax.broadcasted_iota(jnp.int32, (TH + 2, 1, 1), 0)
    valid = jnp.logical_and(jnp.logical_or(ridx > 0, t > 0),
                            jnp.logical_or(ridx < TH + 1, t < last_t))
    y1 = y1 * valid.astype(f32)

    # ---- conv2 + folded BN2 + ReLU over the TH output rows ----
    acc2 = conv3x3(pad_cols(y1, Cp), TH, w2_ref, Cp)
    y2 = jnp.maximum(acc2 * s2_ref[...] + b2_ref[...], 0.0)

    # ---- residual ----
    xc = x[2:TH + 2].reshape(TH * W, Cinp)
    if has_shortcut:
        res = jnp.dot(xc.astype(bf16), wsc_ref[...],
                      preferred_element_type=f32) + bsc_ref[...]
    else:
        res = xc            # identity residual (Cinp == Cp asserted outside)

    out = (y2 + res).reshape(TH, W, Cp)
    out_ref[...] = out.astype(out_ref.dtype)    # single aligned full store

    # ---- fused AvgPool2d on the tile just written (last block only) ----
    if pool_ref is not None:
        KH, KW = pool_hw
        HO, WO = TH // KH, W // KW
        colsum = out_ref[:, pl.ds(0, WO, KW), :]
        for kw in range(1, KW):
            colsum = colsum + out_ref[:, pl.ds(kw, WO, KW), :]
        v = colsum.reshape(HO, KH, WO, Cp)
        acc = v[:, 0]
        for kh in range(1, KH):
            acc = acc + v[:, kh]
        pool_ref[...] = (acc * (1.0 / (KH * KW))).astype(pool_ref.dtype)


def _conv_block_res(xp, blk, *, pool=None, row_tile=None):
    """One fused ConvBlockRes on a channel-padded NHWC activation.

    xp: (N, H, W, Cinp) float32 (Cinp = in-channels padded to a lane multiple).
    Returns (N, H, W, Cp); with `pool` also returns the AvgPool2d(pool) output.
    """
    N, H, W, Cinp = xp.shape
    Cin, Cout = blk["w1"].shape[2], blk["w1"].shape[3]
    Cp = _ceil_to(Cout, LANE)
    assert Cinp == _ceil_to(Cin, LANE)
    assert W % 8 == 0, "width must be a sublane multiple"
    has_shortcut = Cin != Cout
    if not has_shortcut:
        assert Cinp == Cp, "identity residual needs equal padded channel counts"

    budget = _vmem_budget_bytes()
    TH = row_tile if row_tile is not None else _pick_row_tile(
        N, H, W, Cinp, Cp, pool, budget)
    assert H % TH == 0 and TH % 2 == 0
    if pool is not None:
        KH, KW = pool
        assert TH % KH == 0 and W % KW == 0
    T = H // TH
    THH = TH // 2
    has_halo = T > 1

    f32, bf16 = jnp.float32, jnp.bfloat16
    # Fold BN (eval mode) into per-channel scale/bias; pad channels to Cp.
    s1 = blk["gamma1"] / jnp.sqrt(blk["var1"] + EPS)
    b1 = blk["beta1"] - blk["mean1"] * s1
    s2 = blk["gamma2"] / jnp.sqrt(blk["var2"] + EPS)
    b2 = blk["beta2"] - blk["mean2"] * s2

    def padvec(v):
        return jnp.zeros((1, Cp), f32).at[0, :Cout].set(v.astype(f32))

    # 3x3 weights -> per-dx (3*Cin_p, Cp) bf16 slabs (dy folded into K).
    w1p = jnp.zeros((3, 3, Cinp, Cp), f32).at[:, :, :Cin, :Cout].set(blk["w1"])
    w2p = jnp.zeros((3, 3, Cp, Cp), f32).at[:, :, :Cout, :Cout].set(blk["w2"])
    w1cat = jnp.transpose(w1p, (1, 0, 2, 3)).reshape(3, 3 * Cinp, Cp).astype(bf16)
    w2cat = jnp.transpose(w2p, (1, 0, 2, 3)).reshape(3, 3 * Cp, Cp).astype(bf16)

    args = [xp]
    if has_halo:
        args += [xp, xp]
    args += [w1cat, padvec(s1), padvec(b1), w2cat, padvec(s2), padvec(b2)]
    if has_shortcut:
        wscp = (jnp.zeros((Cinp, Cp), f32)
                .at[:Cin, :Cout].set(blk["wsc"]).astype(bf16))
        args += [wscp, padvec(blk["bsc"])]

    flops = 2 * N * H * W * (9 * Cinp * Cp + 9 * Cp * Cp)
    if has_shortcut:
        flops += 2 * N * H * W * Cinp * Cp
    halo_rows = 4 * T if has_halo else 0
    bytes_accessed = (4 * N * (H + halo_rows) * W * Cinp
                      + 4 * N * H * W * Cp
                      + 2 * (9 * Cinp * Cp + 9 * Cp * Cp
                             + (Cinp * Cp if has_shortcut else 0))
                      + 4 * 6 * Cp)
    if pool is not None:
        bytes_accessed += 4 * N * (H // KH) * (W // KW) * Cp

    kernel = functools.partial(
        _conv_block_res_kernel, TH=TH, W=W, Cinp=Cinp, Cp=Cp,
        has_halo=has_halo, has_shortcut=has_shortcut, pool_hw=pool)

    def build(single_buffer_consts):
        ckw = {"pipeline_mode": pl.Buffered(1)} if single_buffer_consts else {}

        def cspec(shape):
            return pl.BlockSpec(shape, lambda *_: (0,) * len(shape), **ckw)

        in_specs = [pl.BlockSpec((None, TH, W, Cinp),
                                 lambda n, t: (n, t, 0, 0))]
        if has_halo:
            in_specs += [
                pl.BlockSpec((None, 2, W, Cinp),
                             lambda n, t: (n, jnp.maximum(t * THH - 1, 0), 0, 0)),
                pl.BlockSpec((None, 2, W, Cinp),
                             lambda n, t: (n, jnp.minimum((t + 1) * THH,
                                                          H // 2 - 1), 0, 0)),
            ]
        in_specs += [cspec((3, 3 * Cinp, Cp)), cspec((1, Cp)), cspec((1, Cp)),
                     cspec((3, 3 * Cp, Cp)), cspec((1, Cp)), cspec((1, Cp))]
        if has_shortcut:
            in_specs += [cspec((Cinp, Cp)), cspec((1, Cp))]

        out_shape = [jax.ShapeDtypeStruct((N, H, W, Cp), f32)]
        out_specs = [pl.BlockSpec((None, TH, W, Cp), lambda n, t: (n, t, 0, 0))]
        if pool is not None:
            out_shape.append(jax.ShapeDtypeStruct((N, H // KH, W // KW, Cp), f32))
            out_specs.append(pl.BlockSpec((None, TH // KH, W // KW, Cp),
                                          lambda n, t: (n, t, 0, 0)))

        return pl.pallas_call(
            kernel,
            out_shape=tuple(out_shape) if pool is not None else out_shape[0],
            grid=(N, T),
            in_specs=in_specs,
            out_specs=tuple(out_specs) if pool is not None else out_specs[0],
            compiler_params=pltpu.CompilerParams(
                dimension_semantics=("parallel", "parallel"),
                vmem_limit_bytes=budget),
            cost_estimate=pl.CostEstimate(
                flops=flops, transcendentals=0, bytes_accessed=bytes_accessed),
        )(*args)

    try:
        return build(True)
    except Exception:
        # JAX without BlockSpec(pipeline_mode=...): default double-buffering.
        return build(False)


# ---------------------------------------------------------------------------
# Standalone AvgPool2d kernel (fallback only; normally fused into last block)
# ---------------------------------------------------------------------------
def _avgpool_fallback(h, KH, KW):
    N, H, W, Cp = h.shape
    HO, WO = H // KH, W // KW
    pool_in = h.reshape(N, H, WO, KW * Cp)

    def kern(x_ref, o_ref):
        v = x_ref[...].reshape(HO, KH, WO, KW * Cp)
        acc = jnp.zeros((HO, WO, Cp), jnp.float32)
        for kh in range(KH):
            slab = v[:, kh]
            for kw in range(KW):
                acc = acc + slab[:, :, kw * Cp:(kw + 1) * Cp]
        o_ref[...] = (acc * (1.0 / (KH * KW))).astype(o_ref.dtype)

    return pl.pallas_call(
        kern,
        out_shape=jax.ShapeDtypeStruct((N, HO, WO, Cp), jnp.float32),
        grid=(N,),
        in_specs=[pl.BlockSpec((None, H, WO, KW * Cp), lambda n: (n, 0, 0, 0))],
        out_specs=pl.BlockSpec((None, HO, WO, Cp), lambda n: (n, 0, 0, 0)),
        compiler_params=pltpu.CompilerParams(dimension_semantics=("parallel",)),
    )(pool_in)


# ---------------------------------------------------------------------------
# ResEncoderBlock wrapper (NCHW in, NCHW out)
# ---------------------------------------------------------------------------
def res_encoder_block(x_nchw, params, kernel_size=(2, 2), row_tile=None):
    blocks = params["blocks"]
    N, Cin, H, W = x_nchw.shape
    Cinp = _ceil_to(Cin, LANE)

    # NCHW -> NHWC, pad channels to a lane multiple.  Row/column 'SAME'
    # padding is handled inside the kernel (no halo stored in HBM).
    x = jnp.transpose(x_nchw, (0, 2, 3, 1)).astype(jnp.float32)
    h = jnp.pad(x, ((0, 0), (0, 0), (0, 0), (0, Cinp - Cin)))

    pooled = None
    n_blocks = len(blocks)
    for i, blk in enumerate(blocks):
        pool = kernel_size if (kernel_size is not None and i == n_blocks - 1) \
            else None
        if pool is not None:
            try:
                h, pooled = _conv_block_res(h, blk, pool=pool, row_tile=row_tile)
            except Exception:
                # Fallback: un-fused pool path (known-good standalone kernel).
                h = _conv_block_res(h, blk, pool=None, row_tile=row_tile)
                pooled = _avgpool_fallback(h, *pool)
        else:
            h = _conv_block_res(h, blk, pool=None, row_tile=row_tile)

    Cout = blocks[-1]["w1"].shape[3]
    x_out = jnp.transpose(h[..., :Cout], (0, 3, 1, 2))
    if kernel_size is None:
        return x_out
    pooled = jnp.transpose(pooled[..., :Cout], (0, 3, 1, 2))
    return x_out, pooled


# ---------------------------------------------------------------------------
# Pure-JAX reference with identical semantics
# ---------------------------------------------------------------------------
def res_encoder_block_reference(x_nchw, params, kernel_size=(2, 2)):
    h = jnp.transpose(x_nchw, (0, 2, 3, 1)).astype(jnp.float32)

    def conv3x3(a, w):
        return jax.lax.conv_general_dilated(
            a, w, window_strides=(1, 1), padding="SAME",
            dimension_numbers=("NHWC", "HWIO", "NHWC"))

    for blk in params["blocks"]:
        cin, cout = blk["w1"].shape[2], blk["w1"].shape[3]
        y = conv3x3(h, blk["w1"])
        y = (y - blk["mean1"]) / jnp.sqrt(blk["var1"] + EPS) \
            * blk["gamma1"] + blk["beta1"]
        y = jnp.maximum(y, 0.0)
        y = conv3x3(y, blk["w2"])
        y = (y - blk["mean2"]) / jnp.sqrt(blk["var2"] + EPS) \
            * blk["gamma2"] + blk["beta2"]
        y = jnp.maximum(y, 0.0)
        if cin != cout:
            sc = jnp.einsum("nhwc,cd->nhwd", h, blk["wsc"]) + blk["bsc"]
        else:
            sc = h
        h = y + sc

    x_out = jnp.transpose(h, (0, 3, 1, 2))
    if kernel_size is None:
        return x_out
    KH, KW = kernel_size
    N, H, W, C = h.shape
    pooled = h.reshape(N, H // KH, KH, W // KW, KW, C).mean(axis=(2, 4))
    return x_out, jnp.transpose(pooled, (0, 3, 1, 2))


def _make_block_params(key, cin, cout):
    ks = jax.random.split(key, 3)
    ar = jnp.arange(cout, dtype=jnp.float32)
    return {
        "w1": 0.1 * jax.random.normal(ks[0], (3, 3, cin, cout), jnp.float32),
        "w2": 0.1 * jax.random.normal(ks[1], (3, 3, cout, cout), jnp.float32),
        "gamma1": 1.0 + 0.10 * ar, "beta1": 0.05 * ar,
        "mean1": 0.01 * ar, "var1": 1.0 + 0.02 * ar,
        "gamma2": 1.0 - 0.03 * ar, "beta2": -0.02 * ar,
        "mean2": 0.02 * ar, "var2": 1.0 + 0.05 * ar,
        "wsc": 0.1 * jax.random.normal(ks[2], (cin, cout), jnp.float32),
        "bsc": 0.01 * ar,
    }


def make_params(key, cin, cout, n_blocks):
    keys = jax.random.split(key, n_blocks)
    blocks = [_make_block_params(keys[0], cin, cout)]
    for i in range(1, n_blocks):
        blocks.append(_make_block_params(keys[i], cout, cout))
    return {"blocks": blocks}


if __name__ == "__main__":
    key = jax.random.PRNGKey(0)
    kx, kp = jax.random.split(key)

    N, Cin, Cout, H, W = 2, 4, 8, 16, 16
    n_blocks, kernel_size = 2, (2, 2)   # block0 uses shortcut, block1 identity

    x = jax.random.normal(kx, (N, Cin, H, W), jnp.float32)  # NCHW like PyTorch
    params = make_params(kp, Cin, Cout, n_blocks)

    out, pooled = res_encoder_block(x, params, kernel_size=kernel_size)
    out = jax.block_until_ready(out)
    pooled = jax.block_until_ready(pooled)

    ref_out, ref_pooled = res_encoder_block_reference(x, params, kernel_size)
    assert out.shape == (N, Cout, H, W)
    assert pooled.shape == (N, Cout, H // kernel_size[0], W // kernel_size[1])
    # bf16 MXU operands (f32 accumulation) -> slightly looser tolerance than f32.
    np.testing.assert_allclose(np.asarray(out), np.asarray(ref_out),
                               rtol=3e-2, atol=3e-2)
    np.testing.assert_allclose(np.asarray(pooled), np.asarray(ref_pooled),
                               rtol=3e-2, atol=3e-2)

    print("KERNEL_OK")
</pallas_src>

<mosaic_0001>
module attributes {stable_mosaic.version = 11 : i64} {
  func.func @_conv_block_res_kernel(%arg0: i32, %arg1: i32, %arg2: memref<1x16x16x128xf32, #tpu.memory_space<vmem>>, %arg3: memref<3x384x128xbf16, #tpu.memory_space<vmem>>, %arg4: memref<1x128xf32, #tpu.memory_space<vmem>>, %arg5: memref<1x128xf32, #tpu.memory_space<vmem>>, %arg6: memref<3x384x128xbf16, #tpu.memory_space<vmem>>, %arg7: memref<1x128xf32, #tpu.memory_space<vmem>>, %arg8: memref<1x128xf32, #tpu.memory_space<vmem>>, %arg9: memref<128x128xbf16, #tpu.memory_space<vmem>>, %arg10: memref<1x128xf32, #tpu.memory_space<vmem>>, %arg11: memref<1x16x16x128xf32, #tpu.memory_space<vmem>>) attributes {dimension_semantics = [#tpu.dimension_semantics<parallel>, #tpu.dimension_semantics<parallel>], iteration_bounds = array<i64: 2, 1>, scalar_prefetch = 0 : i64, scratch_operands = 0 : i64, tpu.core_type = #tpu.core_type<tc>, window_params = [{transform_indices = @transform_0, window_bounds = array<i64: 1, 16, 16, 128>}, {pipeline_mode = #tpu.pipeline_mode<synchronous>, transform_indices = @transform_1, window_bounds = array<i64: 3, 384, 128>}, {pipeline_mode = #tpu.pipeline_mode<synchronous>, transform_indices = @transform_2, window_bounds = array<i64: 1, 128>}, {pipeline_mode = #tpu.pipeline_mode<synchronous>, transform_indices = @transform_3, window_bounds = array<i64: 1, 128>}, {pipeline_mode = #tpu.pipeline_mode<synchronous>, transform_indices = @transform_4, window_bounds = array<i64: 3, 384, 128>}, {pipeline_mode = #tpu.pipeline_mode<synchronous>, transform_indices = @transform_5, window_bounds = array<i64: 1, 128>}, {pipeline_mode = #tpu.pipeline_mode<synchronous>, transform_indices = @transform_6, window_bounds = array<i64: 1, 128>}, {pipeline_mode = #tpu.pipeline_mode<synchronous>, transform_indices = @transform_7, window_bounds = array<i64: 128, 128>}, {pipeline_mode = #tpu.pipeline_mode<synchronous>, transform_indices = @transform_8, window_bounds = array<i64: 1, 128>}, {transform_indices = @transform_9, window_bounds = array<i64: 1, 16, 16, 128>}]} {
    %cst = arith.constant 0.000000e+00 : f32
    %0 = vector.broadcast %cst : f32 to vector<2x16x128xf32>
    %c0 = arith.constant 0 : index
    %c0_0 = arith.constant 0 : index
    %c0_1 = arith.constant 0 : index
    %c0_2 = arith.constant 0 : index
    %1 = vector.load %arg2[%c0, %c0_0, %c0_1, %c0_2] : memref<1x16x16x128xf32, #tpu.memory_space<vmem>>, vector<1x16x16x128xf32>
    %2 = vector.shape_cast %1 : vector<1x16x16x128xf32> to vector<16x16x128xf32>
    %3 = tpu.concatenate %0, %2, %0 in 0 : vector<2x16x128xf32>, vector<16x16x128xf32>, vector<2x16x128xf32> -> vector<20x16x128xf32>
    %cst_3 = arith.constant 0.000000e+00 : f32
    %4 = vector.broadcast %cst_3 : f32 to vector<20x8x128xf32>
    %5 = tpu.concatenate %4, %3, %4 in 1 : vector<20x8x128xf32>, vector<20x16x128xf32>, vector<20x8x128xf32> -> vector<20x32x128xf32>
    %6 = vector.extract_strided_slice %5 {offsets = [0, 0, 0], sizes = [18, 32, 128], strides = [1, 1, 1]} : vector<20x32x128xf32> to vector<18x32x128xf32>
    %7 = vector.extract_strided_slice %5 {offsets = [1, 0, 0], sizes = [18, 32, 128], strides = [1, 1, 1]} : vector<20x32x128xf32> to vector<18x32x128xf32>
    %8 = vector.extract_strided_slice %5 {offsets = [2, 0, 0], sizes = [18, 32, 128], strides = [1, 1, 1]} : vector<20x32x128xf32> to vector<18x32x128xf32>
    %9 = tpu.concatenate %6, %7, %8 in 2 : vector<18x32x128xf32>, vector<18x32x128xf32>, vector<18x32x128xf32> -> vector<18x32x384xf32>
    %10 = arith.truncf %9 : vector<18x32x384xf32> to vector<18x32x384xbf16>
    %cst_4 = arith.constant 0.000000e+00 : f32
    %11 = vector.broadcast %cst_4 : f32 to vector<288x128xf32>
    %12 = vector.extract_strided_slice %10 {offsets = [0, 7, 0], sizes = [18, 16, 384], strides = [1, 1, 1]} : vector<18x32x384xbf16> to vector<18x16x384xbf16>
    %13 = vector.shape_cast %12 : vector<18x16x384xbf16> to vector<288x384xbf16>
    %c0_5 = arith.constant 0 : index
    %c0_6 = arith.constant 0 : index
    %c0_7 = arith.constant 0 : index
    %14 = vector.load %arg3[%c0_5, %c0_6, %c0_7] : memref<3x384x128xbf16, #tpu.memory_space<vmem>>, vector<1x384x128xbf16>
    %15 = vector.shape_cast %14 : vector<1x384x128xbf16> to vector<384x128xbf16>
    %cst_8 = arith.constant dense<0.000000e+00> : vector<288x128xf32>
    %16 = tpu.matmul %13, %15, %cst_8 {dimension_numbers = #tpu.dot_dimension_numbers<[1], [0], [0], [1], [0, 0, 1, 1], [], []>} : vector<288x384xbf16>, vector<384x128xbf16>, vector<288x128xf32> -> vector<288x128xf32>
    %17 = arith.addf %11, %16 : vector<288x128xf32>
    %18 = vector.extract_strided_slice %10 {offsets = [0, 8, 0], sizes = [18, 16, 384], strides = [1, 1, 1]} : vector<18x32x384xbf16> to vector<18x16x384xbf16>
    %19 = vector.shape_cast %18 : vector<18x16x384xbf16> to vector<288x384xbf16>
    %c1 = arith.constant 1 : index
    %c0_9 = arith.constant 0 : index
    %c0_10 = arith.constant 0 : index
    %20 = vector.load %arg3[%c1, %c0_9, %c0_10] : memref<3x384x128xbf16, #tpu.memory_space<vmem>>, vector<1x384x128xbf16>
    %21 = vector.shape_cast %20 : vector<1x384x128xbf16> to vector<384x128xbf16>
    %cst_11 = arith.constant dense<0.000000e+00> : vector<288x128xf32>
    %22 = tpu.matmul %19, %21, %cst_11 {dimension_numbers = #tpu.dot_dimension_numbers<[1], [0], [0], [1], [0, 0, 1, 1], [], []>} : vector<288x384xbf16>, vector<384x128xbf16>, vector<288x128xf32> -> vector<288x128xf32>
    %23 = arith.addf %17, %22 : vector<288x128xf32>
    %24 = vector.extract_strided_slice %10 {offsets = [0, 9, 0], sizes = [18, 16, 384], strides = [1, 1, 1]} : vector<18x32x384xbf16> to vector<18x16x384xbf16>
    %25 = vector.shape_cast %24 : vector<18x16x384xbf16> to vector<288x384xbf16>
    %c2 = arith.constant 2 : index
    %c0_12 = arith.constant 0 : index
    %c0_13 = arith.constant 0 : index
    %26 = vector.load %arg3[%c2, %c0_12, %c0_13] : memref<3x384x128xbf16, #tpu.memory_space<vmem>>, vector<1x384x128xbf16>
    %27 = vector.shape_cast %26 : vector<1x384x128xbf16> to vector<384x128xbf16>
    %cst_14 = arith.constant dense<0.000000e+00> : vector<288x128xf32>
    %28 = tpu.matmul %25, %27, %cst_14 {dimension_numbers = #tpu.dot_dimension_numbers<[1], [0], [0], [1], [0, 0, 1, 1], [], []>} : vector<288x384xbf16>, vector<384x128xbf16>, vector<288x128xf32> -> vector<288x128xf32>
    %29 = arith.addf %23, %28 : vector<288x128xf32>
    %c0_15 = arith.constant 0 : index
    %c0_16 = arith.constant 0 : index
    %30 = vector.load %arg4[%c0_15, %c0_16] : memref<1x128xf32, #tpu.memory_space<vmem>>, vector<1x128xf32>
    %31 = vector.broadcast %30 : vector<1x128xf32> to vector<288x128xf32>
    %32 = arith.mulf %29, %31 : vector<288x128xf32>
    %c0_17 = arith.constant 0 : index
    %c0_18 = arith.constant 0 : index
    %33 = vector.load %arg5[%c0_17, %c0_18] : memref<1x128xf32, #tpu.memory_space<vmem>>, vector<1x128xf32>
    %34 = vector.broadcast %33 : vector<1x128xf32> to vector<288x128xf32>
    %35 = arith.addf %32, %34 : vector<288x128xf32>
    %cst_19 = arith.constant 0.000000e+00 : f32
    %36 = vector.broadcast %cst_19 : f32 to vector<288x128xf32>
    %37 = arith.maximumf %35, %36 : vector<288x128xf32>
    %38 = vector.shape_cast %37 : vector<288x128xf32> to vector<18x16x128xf32>
    %39 = tpu.iota {dimensions = array<i32: 0>} : vector<18x1x1xi32>
    %c0_i32 = arith.constant 0 : i32
    %40 = vector.broadcast %c0_i32 : i32 to vector<18x1x1xi32>
    %41 = arith.cmpi sgt, %39, %40 : vector<18x1x1xi32>
    %c0_i32_20 = arith.constant 0 : i32
    %42 = arith.cmpi sgt, %arg1, %c0_i32_20 : i32
    %43 = vector.broadcast %42 : i1 to vector<18x1x1xi1>
    %44 = arith.ori %41, %43 : vector<18x1x1xi1>
    %c17_i32 = arith.constant 17 : i32
    %45 = vector.broadcast %c17_i32 : i32 to vector<18x1x1xi32>
    %46 = arith.cmpi slt, %39, %45 : vector<18x1x1xi32>
    %c0_i32_21 = arith.constant 0 : i32
    %47 = arith.cmpi slt, %arg1, %c0_i32_21 : i32
    %48 = vector.broadcast %47 : i1 to vector<18x1x1xi1>
    %49 = arith.ori %46, %48 : vector<18x1x1xi1>
    %50 = arith.andi %44, %49 : vector<18x1x1xi1>
    %51 = arith.extui %50 : vector<18x1x1xi1> to vector<18x1x1xi32>
    %52 = arith.sitofp %51 : vector<18x1x1xi32> to vector<18x1x1xf32>
    %53 = vector.broadcast %52 : vector<18x1x1xf32> to vector<18x16x128xf32>
    %54 = arith.mulf %38, %53 : vector<18x16x128xf32>
    %cst_22 = arith.constant 0.000000e+00 : f32
    %55 = vector.broadcast %cst_22 : f32 to vector<18x8x128xf32>
    %56 = tpu.concatenate %55, %54, %55 in 1 : vector<18x8x128xf32>, vector<18x16x128xf32>, vector<18x8x128xf32> -> vector<18x32x128xf32>
    %57 = vector.extract_strided_slice %56 {offsets = [0, 0, 0], sizes = [16, 32, 128], strides = [1, 1, 1]} : vector<18x32x128xf32> to vector<16x32x128xf32>
    %58 = vector.extract_strided_slice %56 {offsets = [1, 0, 0], sizes = [16, 32, 128], strides = [1, 1, 1]} : vector<18x32x128xf32> to vector<16x32x128xf32>
    %59 = vector.extract_strided_slice %56 {offsets = [2, 0, 0], sizes = [16, 32, 128], strides = [1, 1, 1]} : vector<18x32x128xf32> to vector<16x32x128xf32>
    %60 = tpu.concatenate %57, %58, %59 in 2 : vector<16x32x128xf32>, vector<16x32x128xf32>, vector<16x32x128xf32> -> vector<16x32x384xf32>
    %61 = arith.truncf %60 : vector<16x32x384xf32> to vector<16x32x384xbf16>
    %cst_23 = arith.constant 0.000000e+00 : f32
    %62 = vector.broadcast %cst_23 : f32 to vector<256x128xf32>
    %63 = vector.extract_strided_slice %61 {offsets = [0, 7, 0], sizes = [16, 16, 384], strides = [1, 1, 1]} : vector<16x32x384xbf16> to vector<16x16x384xbf16>
    %64 = vector.shape_cast %63 : vector<16x16x384xbf16> to vector<256x384xbf16>
    %c0_24 = arith.constant 0 : index
    %c0_25 = arith.constant 0 : index
    %c0_26 = arith.constant 0 : index
    %65 = vector.load %arg6[%c0_24, %c0_25, %c0_26] : memref<3x384x128xbf16, #tpu.memory_space<vmem>>, vector<1x384x128xbf16>
    %66 = vector.shape_cast %65 : vector<1x384x128xbf16> to vector<384x128xbf16>
    %cst_27 = arith.constant dense<0.000000e+00> : vector<256x128xf32>
    %67 = tpu.matmul %64, %66, %cst_27 {dimension_numbers = #tpu.dot_dimension_numbers<[1], [0], [0], [1], [0, 0, 1, 1], [], []>} : vector<256x384xbf16>, vector<384x128xbf16>, vector<256x128xf32> -> vector<256x128xf32>
    %68 = arith.addf %62, %67 : vector<256x128xf32>
    %69 = vector.extract_strided_slice %61 {offsets = [0, 8, 0], sizes = [16, 16, 384], strides = [1, 1, 1]} : vector<16x32x384xbf16> to vector<16x16x384xbf16>
    %70 = vector.shape_cast %69 : vector<16x16x384xbf16> to vector<256x384xbf16>
    %c1_28 = arith.constant 1 : index
    %c0_29 = arith.constant 0 : index
    %c0_30 = arith.constant 0 : index
    %71 = vector.load %arg6[%c1_28, %c0_29, %c0_30] : memref<3x384x128xbf16, #tpu.memory_space<vmem>>, vector<1x384x128xbf16>
    %72 = vector.shape_cast %71 : vector<1x384x128xbf16> to vector<384x128xbf16>
    %cst_31 = arith.constant dense<0.000000e+00> : vector<256x128xf32>
    %73 = tpu.matmul %70, %72, %cst_31 {dimension_numbers = #tpu.dot_dimension_numbers<[1], [0], [0], [1], [0, 0, 1, 1], [], []>} : vector<256x384xbf16>, vector<384x128xbf16>, vector<256x128xf32> -> vector<256x128xf32>
    %74 = arith.addf %68, %73 : vector<256x128xf32>
    %75 = vector.extract_strided_slice %61 {offsets = [0, 9, 0], sizes = [16, 16, 384], strides = [1, 1, 1]} : vector<16x32x384xbf16> to vector<16x16x384xbf16>
    %76 = vector.shape_cast %75 : vector<16x16x384xbf16> to vector<256x384xbf16>
    %c2_32 = arith.constant 2 : index
    %c0_33 = arith.constant 0 : index
    %c0_34 = arith.constant 0 : index
    %77 = vector.load %arg6[%c2_32, %c0_33, %c0_34] : memref<3x384x128xbf16, #tpu.memory_space<vmem>>, vector<1x384x128xbf16>
    %78 = vector.shape_cast %77 : vector<1x384x128xbf16> to vector<384x128xbf16>
    %cst_35 = arith.constant dense<0.000000e+00> : vector<256x128xf32>
    %79 = tpu.matmul %76, %78, %cst_35 {dimension_numbers = #tpu.dot_dimension_numbers<[1], [0], [0], [1], [0, 0, 1, 1], [], []>} : vector<256x384xbf16>, vector<384x128xbf16>, vector<256x128xf32> -> vector<256x128xf32>
    %80 = arith.addf %74, %79 : vector<256x128xf32>
    %c0_36 = arith.constant 0 : index
    %c0_37 = arith.constant 0 : index
    %81 = vector.load %arg7[%c0_36, %c0_37] : memref<1x128xf32, #tpu.memory_space<vmem>>, vector<1x128xf32>
    %82 = vector.broadcast %81 : vector<1x128xf32> to vector<256x128xf32>
    %83 = arith.mulf %80, %82 : vector<256x128xf32>
    %c0_38 = arith.constant 0 : index
    %c0_39 = arith.constant 0 : index
    %84 = vector.load %arg8[%c0_38, %c0_39] : memref<1x128xf32, #tpu.memory_space<vmem>>, vector<1x128xf32>
    %85 = vector.broadcast %84 : vector<1x128xf32> to vector<256x128xf32>
    %86 = arith.addf %83, %85 : vector<256x128xf32>
    %cst_40 = arith.constant 0.000000e+00 : f32
    %87 = vector.broadcast %cst_40 : f32 to vector<256x128xf32>
    %88 = arith.maximumf %86, %87 : vector<256x128xf32>
    %89 = vector.extract_strided_slice %3 {offsets = [2, 0, 0], sizes = [16, 16, 128], strides = [1, 1, 1]} : vector<20x16x128xf32> to vector<16x16x128xf32>
    %90 = vector.shape_cast %89 : vector<16x16x128xf32> to vector<256x128xf32>
    %91 = arith.truncf %90 : vector<256x128xf32> to vector<256x128xbf16>
    %c0_41 = arith.constant 0 : index
    %c0_42 = arith.constant 0 : index
    %92 = vector.load %arg9[%c0_41, %c0_42] : memref<128x128xbf16, #tpu.memory_space<vmem>>, vector<128x128xbf16>
    %cst_43 = arith.constant dense<0.000000e+00> : vector<256x128xf32>
    %93 = tpu.matmul %91, %92, %cst_43 {dimension_numbers = #tpu.dot_dimension_numbers<[1], [0], [0], [1], [0, 0, 1, 1], [], []>} : vector<256x128xbf16>, vector<128x128xbf16>, vector<256x128xf32> -> vector<256x128xf32>
    %c0_44 = arith.constant 0 : index
    %c0_45 = arith.constant 0 : index
    %94 = vector.load %arg10[%c0_44, %c0_45] : memref<1x128xf32, #tpu.memory_space<vmem>>, vector<1x128xf32>
    %95 = vector.broadcast %94 : vector<1x128xf32> to vector<256x128xf32>
    %96 = arith.addf %93, %95 : vector<256x128xf32>
    %97 = arith.addf %88, %96 : vector<256x128xf32>
    %98 = vector.shape_cast %97 : vector<256x128xf32> to vector<16x16x128xf32>
    %c0_46 = arith.constant 0 : index
    %c0_47 = arith.constant 0 : index
    %c0_48 = arith.constant 0 : index
    %c0_49 = arith.constant 0 : index
    %99 = vector.load %arg11[%c0_46, %c0_47, %c0_48, %c0_49] : memref<1x16x16x128xf32, #tpu.memory_space<vmem>>, vector<1x16x16x128xf32>
    %100 = vector.shape_cast %99 : vector<1x16x16x128xf32> to vector<16x16x128xf32>
    %101 = vector.shape_cast %98 : vector<16x16x128xf32> to vector<1x16x16x128xf32>
    tpu.vector_store %arg11[%c0_46, %c0_47, %c0_48, %c0_49], %101 {strides = array<i32>} : memref<1x16x16x128xf32, #tpu.memory_space<vmem>>, vector<1x16x16x128xf32>,
    return
  }
  func.func @transform_0(%arg0: i32, %arg1: i32) -> (i32, i32, i32, i32) {
    %c0_i32 = arith.constant 0 : i32
    %c0_i32_0 = arith.constant 0 : i32
    %c0_i32_1 = arith.constant 0 : i32
    return %arg0, %arg1, %c0_i32, %c0_i32_0 : i32, i32, i32, i32
  }
  func.func @transform_1(%arg0: i32, %arg1: i32) -> (i32, i32, i32) {
    %c0_i32 = arith.constant 0 : i32
    %c0_i32_0 = arith.constant 0 : i32
    %c0_i32_1 = arith.constant 0 : i32
    %c0_i32_2 = arith.constant 0 : i32
    return %c0_i32, %c0_i32_0, %c0_i32_1 : i32, i32, i32
  }
  func.func @transform_2(%arg0: i32, %arg1: i32) -> (i32, i32) {
    %c0_i32 = arith.constant 0 : i32
    %c0_i32_0 = arith.constant 0 : i32
    %c0_i32_1 = arith.constant 0 : i32
    return %c0_i32, %c0_i32_0 : i32, i32
  }
  func.func @transform_3(%arg0: i32, %arg1: i32) -> (i32, i32) {
    %c0_i32 = arith.constant 0 : i32
    %c0_i32_0 = arith.constant 0 : i32
    %c0_i32_1 = arith.constant 0 : i32
    return %c0_i32, %c0_i32_0 : i32, i32
  }
  func.func @transform_4(%arg0: i32, %arg1: i32) -> (i32, i32, i32) {
    %c0_i32 = arith.constant 0 : i32
    %c0_i32_0 = arith.constant 0 : i32
    %c0_i32_1 = arith.constant 0 : i32
    %c0_i32_2 = arith.constant 0 : i32
    return %c0_i32, %c0_i32_0, %c0_i32_1 : i32, i32, i32
  }
  func.func @transform_5(%arg0: i32, %arg1: i32) -> (i32, i32) {
    %c0_i32 = arith.constant 0 : i32
    %c0_i32_0 = arith.constant 0 : i32
    %c0_i32_1 = arith.constant 0 : i32
    return %c0_i32, %c0_i32_0 : i32, i32
  }
  func.func @transform_6(%arg0: i32, %arg1: i32) -> (i32, i32) {
    %c0_i32 = arith.constant 0 : i32
    %c0_i32_0 = arith.constant 0 : i32
    %c0_i32_1 = arith.constant 0 : i32
    return %c0_i32, %c0_i32_0 : i32, i32
  }
  func.func @transform_7(%arg0: i32, %arg1: i32) -> (i32, i32) {
    %c0_i32 = arith.constant 0 : i32
    %c0_i32_0 = arith.constant 0 : i32
    %c0_i32_1 = arith.constant 0 : i32
    return %c0_i32, %c0_i32_0 : i32, i32
  }
  func.func @transform_8(%arg0: i32, %arg1: i32) -> (i32, i32) {
    %c0_i32 = arith.constant 0 : i32
    %c0_i32_0 = arith.constant 0 : i32
    %c0_i32_1 = arith.constant 0 : i32
    return %c0_i32, %c0_i32_0 : i32, i32
  }
  func.func @transform_9(%arg0: i32, %arg1: i32) -> (i32, i32, i32, i32) {
    %c0_i32 = arith.constant 0 : i32
    %c0_i32_0 = arith.constant 0 : i32
    %c0_i32_1 = arith.constant 0 : i32
    return %arg0, %arg1, %c0_i32, %c0_i32_0 : i32, i32, i32, i32
  }
}

module attributes {stable_mosaic.version = 11 : i64} {
  func.func @_conv_block_res_kernel(%arg0: i32, %arg1: i32, %arg2: memref<1x16x16x128xf32, #tpu.memory_space<vmem>>, %arg3: memref<3x384x128xbf16, #tpu.memory_space<vmem>>, %arg4: memref<1x128xf32, #tpu.memory_space<vmem>>, %arg5: memref<1x128xf32, #tpu.memory_space<vmem>>, %arg6: memref<3x384x128xbf16, #tpu.memory_space<vmem>>, %arg7: memref<1x128xf32, #tpu.memory_space<vmem>>, %arg8: memref<1x128xf32, #tpu.memory_space<vmem>>, %arg9: memref<128x128xbf16, #tpu.memory_space<vmem>>, %arg10: memref<1x128xf32, #tpu.memory_space<vmem>>, %arg11: memref<1x16x16x128xf32, #tpu.memory_space<vmem>>) attributes {dimension_semantics = [#tpu.dimension_semantics<parallel>, #tpu.dimension_semantics<parallel>], iteration_bounds = array<i64: 2, 1>, scalar_prefetch = 0 : i64, scratch_operands = 0 : i64, tpu.core_type = #tpu.core_type<tc>, window_params = [{transform_indices = @transform_0, window_bounds = array<i64: 1, 16, 16, 128>}, {pipeline_mode = #tpu.pipeline_mode<synchronous>, transform_indices = @transform_1, window_bounds = array<i64: 3, 384, 128>}, {pipeline_mode = #tpu.pipeline_mode<synchronous>, transform_indices = @transform_2, window_bounds = array<i64: 1, 128>}, {pipeline_mode = #tpu.pipeline_mode<synchronous>, transform_indices = @transform_3, window_bounds = array<i64: 1, 128>}, {pipeline_mode = #tpu.pipeline_mode<synchronous>, transform_indices = @transform_4, window_bounds = array<i64: 3, 384, 128>}, {pipeline_mode = #tpu.pipeline_mode<synchronous>, transform_indices = @transform_5, window_bounds = array<i64: 1, 128>}, {pipeline_mode = #tpu.pipeline_mode<synchronous>, transform_indices = @transform_6, window_bounds = array<i64: 1, 128>}, {pipeline_mode = #tpu.pipeline_mode<synchronous>, transform_indices = @transform_7, window_bounds = array<i64: 128, 128>}, {pipeline_mode = #tpu.pipeline_mode<synchronous>, transform_indices = @transform_8, window_bounds = array<i64: 1, 128>}, {transform_indices = @transform_9, window_bounds = array<i64: 1, 16, 16, 128>}]} {
    %cst = arith.constant 0.000000e+00 : f32
    %0 = vector.broadcast %cst : f32 to vector<2x16x128xf32>
    %c0 = arith.constant 0 : index
    %c0_0 = arith.constant 0 : index
    %c0_1 = arith.constant 0 : index
    %c0_2 = arith.constant 0 : index
    %1 = vector.load %arg2[%c0, %c0_0, %c0_1, %c0_2] : memref<1x16x16x128xf32, #tpu.memory_space<vmem>>, vector<1x16x16x128xf32>
    %2 = vector.shape_cast %1 : vector<1x16x16x128xf32> to vector<16x16x128xf32>
    %3 = tpu.concatenate %0, %2, %0 in 0 : vector<2x16x128xf32>, vector<16x16x128xf32>, vector<2x16x128xf32> -> vector<20x16x128xf32>
    %cst_3 = arith.constant 0.000000e+00 : f32
    %4 = vector.broadcast %cst_3 : f32 to vector<20x8x128xf32>
    %5 = tpu.concatenate %4, %3, %4 in 1 : vector<20x8x128xf32>, vector<20x16x128xf32>, vector<20x8x128xf32> -> vector<20x32x128xf32>
    %6 = vector.extract_strided_slice %5 {offsets = [0, 0, 0], sizes = [18, 32, 128], strides = [1, 1, 1]} : vector<20x32x128xf32> to vector<18x32x128xf32>
    %7 = vector.extract_strided_slice %5 {offsets = [1, 0, 0], sizes = [18, 32, 128], strides = [1, 1, 1]} : vector<20x32x128xf32> to vector<18x32x128xf32>
    %8 = vector.extract_strided_slice %5 {offsets = [2, 0, 0], sizes = [18, 32, 128], strides = [1, 1, 1]} : vector<20x32x128xf32> to vector<18x32x128xf32>
    %9 = tpu.concatenate %6, %7, %8 in 2 : vector<18x32x128xf32>, vector<18x32x128xf32>, vector<18x32x128xf32> -> vector<18x32x384xf32>
    %10 = arith.truncf %9 : vector<18x32x384xf32> to vector<18x32x384xbf16>
    %cst_4 = arith.constant 0.000000e+00 : f32
    %11 = vector.broadcast %cst_4 : f32 to vector<288x128xf32>
    %12 = vector.extract_strided_slice %10 {offsets = [0, 7, 0], sizes = [18, 16, 384], strides = [1, 1, 1]} : vector<18x32x384xbf16> to vector<18x16x384xbf16>
    %13 = vector.shape_cast %12 : vector<18x16x384xbf16> to vector<288x384xbf16>
    %c0_5 = arith.constant 0 : index
    %c0_6 = arith.constant 0 : index
    %c0_7 = arith.constant 0 : index
    %14 = vector.load %arg3[%c0_5, %c0_6, %c0_7] : memref<3x384x128xbf16, #tpu.memory_space<vmem>>, vector<1x384x128xbf16>
    %15 = vector.shape_cast %14 : vector<1x384x128xbf16> to vector<384x128xbf16>
    %cst_8 = arith.constant dense<0.000000e+00> : vector<288x128xf32>
    %16 = tpu.matmul %13, %15, %cst_8 {dimension_numbers = #tpu.dot_dimension_numbers<[1], [0], [0], [1], [0, 0, 1, 1], [], []>} : vector<288x384xbf16>, vector<384x128xbf16>, vector<288x128xf32> -> vector<288x128xf32>
    %17 = arith.addf %11, %16 : vector<288x128xf32>
    %18 = vector.extract_strided_slice %10 {offsets = [0, 8, 0], sizes = [18, 16, 384], strides = [1, 1, 1]} : vector<18x32x384xbf16> to vector<18x16x384xbf16>
    %19 = vector.shape_cast %18 : vector<18x16x384xbf16> to vector<288x384xbf16>
    %c1 = arith.constant 1 : index
    %c0_9 = arith.constant 0 : index
    %c0_10 = arith.constant 0 : index
    %20 = vector.load %arg3[%c1, %c0_9, %c0_10] : memref<3x384x128xbf16, #tpu.memory_space<vmem>>, vector<1x384x128xbf16>
    %21 = vector.shape_cast %20 : vector<1x384x128xbf16> to vector<384x128xbf16>
    %cst_11 = arith.constant dense<0.000000e+00> : vector<288x128xf32>
    %22 = tpu.matmul %19, %21, %cst_11 {dimension_numbers = #tpu.dot_dimension_numbers<[1], [0], [0], [1], [0, 0, 1, 1], [], []>} : vector<288x384xbf16>, vector<384x128xbf16>, vector<288x128xf32> -> vector<288x128xf32>
    %23 = arith.addf %17, %22 : vector<288x128xf32>
    %24 = vector.extract_strided_slice %10 {offsets = [0, 9, 0], sizes = [18, 16, 384], strides = [1, 1, 1]} : vector<18x32x384xbf16> to vector<18x16x384xbf16>
    %25 = vector.shape_cast %24 : vector<18x16x384xbf16> to vector<288x384xbf16>
    %c2 = arith.constant 2 : index
    %c0_12 = arith.constant 0 : index
    %c0_13 = arith.constant 0 : index
    %26 = vector.load %arg3[%c2, %c0_12, %c0_13] : memref<3x384x128xbf16, #tpu.memory_space<vmem>>, vector<1x384x128xbf16>
    %27 = vector.shape_cast %26 : vector<1x384x128xbf16> to vector<384x128xbf16>
    %cst_14 = arith.constant dense<0.000000e+00> : vector<288x128xf32>
    %28 = tpu.matmul %25, %27, %cst_14 {dimension_numbers = #tpu.dot_dimension_numbers<[1], [0], [0], [1], [0, 0, 1, 1], [], []>} : vector<288x384xbf16>, vector<384x128xbf16>, vector<288x128xf32> -> vector<288x128xf32>
    %29 = arith.addf %23, %28 : vector<288x128xf32>
    %c0_15 = arith.constant 0 : index
    %c0_16 = arith.constant 0 : index
    %30 = vector.load %arg4[%c0_15, %c0_16] : memref<1x128xf32, #tpu.memory_space<vmem>>, vector<1x128xf32>
    %31 = vector.broadcast %30 : vector<1x128xf32> to vector<288x128xf32>
    %32 = arith.mulf %29, %31 : vector<288x128xf32>
    %c0_17 = arith.constant 0 : index
    %c0_18 = arith.constant 0 : index
    %33 = vector.load %arg5[%c0_17, %c0_18] : memref<1x128xf32, #tpu.memory_space<vmem>>, vector<1x128xf32>
    %34 = vector.broadcast %33 : vector<1x128xf32> to vector<288x128xf32>
    %35 = arith.addf %32, %34 : vector<288x128xf32>
    %cst_19 = arith.constant 0.000000e+00 : f32
    %36 = vector.broadcast %cst_19 : f32 to vector<288x128xf32>
    %37 = arith.maximumf %35, %36 : vector<288x128xf32>
    %38 = vector.shape_cast %37 : vector<288x128xf32> to vector<18x16x128xf32>
    %39 = tpu.iota {dimensions = array<i32: 0>} : vector<18x1x1xi32>
    %c0_i32 = arith.constant 0 : i32
    %40 = vector.broadcast %c0_i32 : i32 to vector<18x1x1xi32>
    %41 = arith.cmpi sgt, %39, %40 : vector<18x1x1xi32>
    %c0_i32_20 = arith.constant 0 : i32
    %42 = arith.cmpi sgt, %arg1, %c0_i32_20 : i32
    %43 = vector.broadcast %42 : i1 to vector<18x1x1xi1>
    %44 = arith.ori %41, %43 : vector<18x1x1xi1>
    %c17_i32 = arith.constant 17 : i32
    %45 = vector.broadcast %c17_i32 : i32 to vector<18x1x1xi32>
    %46 = arith.cmpi slt, %39, %45 : vector<18x1x1xi32>
    %c0_i32_21 = arith.constant 0 : i32
    %47 = arith.cmpi slt, %arg1, %c0_i32_21 : i32
    %48 = vector.broadcast %47 : i1 to vector<18x1x1xi1>
    %49 = arith.ori %46, %48 : vector<18x1x1xi1>
    %50 = arith.andi %44, %49 : vector<18x1x1xi1>
    %51 = arith.extui %50 : vector<18x1x1xi1> to vector<18x1x1xi32>
    %52 = arith.sitofp %51 : vector<18x1x1xi32> to vector<18x1x1xf32>
    %53 = vector.broadcast %52 : vector<18x1x1xf32> to vector<18x16x128xf32>
    %54 = arith.mulf %38, %53 : vector<18x16x128xf32>
    %cst_22 = arith.constant 0.000000e+00 : f32
    %55 = vector.broadcast %cst_22 : f32 to vector<18x8x128xf32>
    %56 = tpu.concatenate %55, %54, %55 in 1 : vector<18x8x128xf32>, vector<18x16x128xf32>, vector<18x8x128xf32> -> vector<18x32x128xf32>
    %57 = vector.extract_strided_slice %56 {offsets = [0, 0, 0], sizes = [16, 32, 128], strides = [1, 1, 1]} : vector<18x32x128xf32> to vector<16x32x128xf32>
    %58 = vector.extract_strided_slice %56 {offsets = [1, 0, 0], sizes = [16, 32, 128], strides = [1, 1, 1]} : vector<18x32x128xf32> to vector<16x32x128xf32>
    %59 = vector.extract_strided_slice %56 {offsets = [2, 0, 0], sizes = [16, 32, 128], strides = [1, 1, 1]} : vector<18x32x128xf32> to vector<16x32x128xf32>
    %60 = tpu.concatenate %57, %58, %59 in 2 : vector<16x32x128xf32>, vector<16x32x128xf32>, vector<16x32x128xf32> -> vector<16x32x384xf32>
    %61 = arith.truncf %60 : vector<16x32x384xf32> to vector<16x32x384xbf16>
    %cst_23 = arith.constant 0.000000e+00 : f32
    %62 = vector.broadcast %cst_23 : f32 to vector<256x128xf32>
    %63 = vector.extract_strided_slice %61 {offsets = [0, 7, 0], sizes = [16, 16, 384], strides = [1, 1, 1]} : vector<16x32x384xbf16> to vector<16x16x384xbf16>
    %64 = vector.shape_cast %63 : vector<16x16x384xbf16> to vector<256x384xbf16>
    %c0_24 = arith.constant 0 : index
    %c0_25 = arith.constant 0 : index
    %c0_26 = arith.constant 0 : index
    %65 = vector.load %arg6[%c0_24, %c0_25, %c0_26] : memref<3x384x128xbf16, #tpu.memory_space<vmem>>, vector<1x384x128xbf16>
    %66 = vector.shape_cast %65 : vector<1x384x128xbf16> to vector<384x128xbf16>
    %cst_27 = arith.constant dense<0.000000e+00> : vector<256x128xf32>
    %67 = tpu.matmul %64, %66, %cst_27 {dimension_numbers = #tpu.dot_dimension_numbers<[1], [0], [0], [1], [0, 0, 1, 1], [], []>} : vector<256x384xbf16>, vector<384x128xbf16>, vector<256x128xf32> -> vector<256x128xf32>
    %68 = arith.addf %62, %67 : vector<256x128xf32>
    %69 = vector.extract_strided_slice %61 {offsets = [0, 8, 0], sizes = [16, 16, 384], strides = [1, 1, 1]} : vector<16x32x384xbf16> to vector<16x16x384xbf16>
    %70 = vector.shape_cast %69 : vector<16x16x384xbf16> to vector<256x384xbf16>
    %c1_28 = arith.constant 1 : index
    %c0_29 = arith.constant 0 : index
    %c0_30 = arith.constant 0 : index
    %71 = vector.load %arg6[%c1_28, %c0_29, %c0_30] : memref<3x384x128xbf16, #tpu.memory_space<vmem>>, vector<1x384x128xbf16>
    %72 = vector.shape_cast %71 : vector<1x384x128xbf16> to vector<384x128xbf16>
    %cst_31 = arith.constant dense<0.000000e+00> : vector<256x128xf32>
    %73 = tpu.matmul %70, %72, %cst_31 {dimension_numbers = #tpu.dot_dimension_numbers<[1], [0], [0], [1], [0, 0, 1, 1], [], []>} : vector<256x384xbf16>, vector<384x128xbf16>, vector<256x128xf32> -> vector<256x128xf32>
    %74 = arith.addf %68, %73 : vector<256x128xf32>
    %75 = vector.extract_strided_slice %61 {offsets = [0, 9, 0], sizes = [16, 16, 384], strides = [1, 1, 1]} : vector<16x32x384xbf16> to vector<16x16x384xbf16>
    %76 = vector.shape_cast %75 : vector<16x16x384xbf16> to vector<256x384xbf16>
    %c2_32 = arith.constant 2 : index
    %c0_33 = arith.constant 0 : index
    %c0_34 = arith.constant 0 : index
    %77 = vector.load %arg6[%c2_32, %c0_33, %c0_34] : memref<3x384x128xbf16, #tpu.memory_space<vmem>>, vector<1x384x128xbf16>
    %78 = vector.shape_cast %77 : vector<1x384x128xbf16> to vector<384x128xbf16>
    %cst_35 = arith.constant dense<0.000000e+00> : vector<256x128xf32>
    %79 = tpu.matmul %76, %78, %cst_35 {dimension_numbers = #tpu.dot_dimension_numbers<[1], [0], [0], [1], [0, 0, 1, 1], [], []>} : vector<256x384xbf16>, vector<384x128xbf16>, vector<256x128xf32> -> vector<256x128xf32>
    %80 = arith.addf %74, %79 : vector<256x128xf32>
    %c0_36 = arith.constant 0 : index
    %c0_37 = arith.constant 0 : index
    %81 = vector.load %arg7[%c0_36, %c0_37] : memref<1x128xf32, #tpu.memory_space<vmem>>, vector<1x128xf32>
    %82 = vector.broadcast %81 : vector<1x128xf32> to vector<256x128xf32>
    %83 = arith.mulf %80, %82 : vector<256x128xf32>
    %c0_38 = arith.constant 0 : index
    %c0_39 = arith.constant 0 : index
    %84 = vector.load %arg8[%c0_38, %c0_39] : memref<1x128xf32, #tpu.memory_space<vmem>>, vector<1x128xf32>
    %85 = vector.broadcast %84 : vector<1x128xf32> to vector<256x128xf32>
    %86 = arith.addf %83, %85 : vector<256x128xf32>
    %cst_40 = arith.constant 0.000000e+00 : f32
    %87 = vector.broadcast %cst_40 : f32 to vector<256x128xf32>
    %88 = arith.maximumf %86, %87 : vector<256x128xf32>
    %89 = vector.extract_strided_slice %3 {offsets = [2, 0, 0], sizes = [16, 16, 128], strides = [1, 1, 1]} : vector<20x16x128xf32> to vector<16x16x128xf32>
    %90 = vector.shape_cast %89 : vector<16x16x128xf32> to vector<256x128xf32>
    %91 = arith.truncf %90 : vector<256x128xf32> to vector<256x128xbf16>
    %c0_41 = arith.constant 0 : index
    %c0_42 = arith.constant 0 : index
    %92 = vector.load %arg9[%c0_41, %c0_42] : memref<128x128xbf16, #tpu.memory_space<vmem>>, vector<128x128xbf16>
    %cst_43 = arith.constant dense<0.000000e+00> : vector<256x128xf32>
    %93 = tpu.matmul %91, %92, %cst_43 {dimension_numbers = #tpu.dot_dimension_numbers<[1], [0], [0], [1], [0, 0, 1, 1], [], []>} : vector<256x128xbf16>, vector<128x128xbf16>, vector<256x128xf32> -> vector<256x128xf32>
    %c0_44 = arith.constant 0 : index
    %c0_45 = arith.constant 0 : index
    %94 = vector.load %arg10[%c0_44, %c0_45] : memref<1x128xf32, #tpu.memory_space<vmem>>, vector<1x128xf32>
    %95 = vector.broadcast %94 : vector<1x128xf32> to vector<256x128xf32>
    %96 = arith.addf %93, %95 : vector<256x128xf32>
    %97 = arith.addf %88, %96 : vector<256x128xf32>
    %98 = vector.shape_cast %97 : vector<256x128xf32> to vector<16x16x128xf32>
    %c0_46 = arith.constant 0 : index
    %c0_47 = arith.constant 0 : index
    %c0_48 = arith.constant 0 : index
    %c0_49 = arith.constant 0 : index
    %99 = vector.load %arg11[%c0_46, %c0_47, %c0_48, %c0_49] : memref<1x16x16x128xf32, #tpu.memory_space<vmem>>, vector<1x16x16x128xf32>
    %100 = vector.shape_cast %99 : vector<1x16x16x128xf32> to vector<16x16x128xf32>
    %101 = vector.shape_cast %98 : vector<16x16x128xf32> to vector<1x16x16x128xf32>
    tpu.vector_store %arg11[%c0_46, %c0_47, %c0_48, %c0_49], %101 {strides = array<i32>} : memref<1x16x16x128xf32, #tpu.memory_space<vmem>>, vector<1x16x16x128xf32>,
    return
  }
  func.func @transform_0(%arg0: i32, %arg1: i32) -> (i32, i32, i32, i32) {
    %c0_i32 = arith.constant 0 : i32
    %c0_i32_0 = arith.constant 0 : i32
    %c0_i32_1 = arith.constant 0 : i32
    return %arg0, %arg1, %c0_i32, %c0_i32_0 : i32, i32, i32, i32
  }
  func.func @transform_1(%arg0: i32, %arg1: i32) -> (i32, i32, i32) {
    %c0_i32 = arith.constant 0 : i32
    %c0_i32_0 = arith.constant 0 : i32
    %c0_i32_1 = arith.constant 0 : i32
    %c0_i32_2 = arith.constant 0 : i32
    return %c0_i32, %c0_i32_0, %c0_i32_1 : i32, i32, i32
  }
  func.func @transform_2(%arg0: i32, %arg1: i32) -> (i32, i32) {
    %c0_i32 = arith.constant 0 : i32
    %c0_i32_0 = arith.constant 0 : i32
    %c0_i32_1 = arith.constant 0 : i32
    return %c0_i32, %c0_i32_0 : i32, i32
  }
  func.func @transform_3(%arg0: i32, %arg1: i32) -> (i32, i32) {
    %c0_i32 = arith.constant 0 : i32
    %c0_i32_0 = arith.constant 0 : i32
    %c0_i32_1 = arith.constant 0 : i32
    return %c0_i32, %c0_i32_0 : i32, i32
  }
  func.func @transform_4(%arg0: i32, %arg1: i32) -> (i32, i32, i32) {
    %c0_i32 = arith.constant 0 : i32
    %c0_i32_0 = arith.constant 0 : i32
    %c0_i32_1 = arith.constant 0 : i32
    %c0_i32_2 = arith.constant 0 : i32
    return %c0_i32, %c0_i32_0, %c0_i32_1 : i32, i32, i32
  }
  func.func @transform_5(%arg0: i32, %arg1: i32) -> (i32, i32) {
    %c0_i32 = arith.constant 0 : i32
    %c0_i32_0 = arith.constant 0 : i32
    %c0_i32_1 = arith.constant 0 : i32
    return %c0_i32, %c0_i32_0 : i32, i32
  }
  func.func @transform_6(%arg0: i32, %arg1: i32) -> (i32, i32) {
    %c0_i32 = arith.constant 0 : i32
    %c0_i32_0 = arith.constant 0 : i32
    %c0_i32_1 = arith.constant 0 : i32
    return %c0_i32, %c0_i32_0 : i32, i32
  }
  func.func @transform_7(%arg0: i32, %arg1: i32) -> (i32, i32) {
    %c0_i32 = arith.constant 0 : i32
    %c0_i32_0 = arith.constant 0 : i32
    %c0_i32_1 = arith.constant 0 : i32
    return %c0_i32, %c0_i32_0 : i32, i32
  }
  func.func @transform_8(%arg0: i32, %arg1: i32) -> (i32, i32) {
    %c0_i32 = arith.constant 0 : i32
    %c0_i32_0 = arith.constant 0 : i32
    %c0_i32_1 = arith.constant 0 : i32
    return %c0_i32, %c0_i32_0 : i32, i32
  }
  func.func @transform_9(%arg0: i32, %arg1: i32) -> (i32, i32, i32, i32) {
    %c0_i32 = arith.constant 0 : i32
    %c0_i32_0 = arith.constant 0 : i32
    %c0_i32_1 = arith.constant 0 : i32
    return %arg0, %arg1, %c0_i32, %c0_i32_0 : i32, i32, i32, i32
  }
}

</mosaic_0001>

<bundles_post_ra>
// kernel: tpu_custom_call.1
= control target key start
LH: loop header
LB: loop body
LE: loop exit
PB: predicated region body
PF: predicated region fallthrough
CT: control target
= control target key end

     0   :  { %s10306_s0 = inlined_call_operand.hbm [shape: f32[2,16,16,128], index: 0, kind: input, shape index: {}]   ;;  %s10307_s1 = inlined_call_operand.hbm [shape: bf16[3,384,128], index: 1, kind: input, shape index: {}]   ;;  %s10308_s2 = inlined_call_operand.vmem [shape: f32[1,128], index: 2, kind: input, shape index: {}]   ;;  %s10309_s3 = inlined_call_operand.vmem [shape: f32[1,128], index: 3, kind: input, shape index: {}]   ;;  %s10310_s4 = inlined_call_operand.hbm [shape: bf16[3,384,128], index: 4, kind: input, shape index: {}]   ;;  %s10311_s5 = inlined_call_operand.vmem [shape: f32[1,128], index: 5, kind: input, shape index: {}]   ;;  %s10312_s6 = inlined_call_operand.vmem [shape: f32[1,128], index: 6, kind: input, shape index: {}]   ;;  %s10313_s7 = inlined_call_operand.hbm [shape: bf16[128,128], index: 7, kind: input, shape index: {}]   ;;  %s10314_s8 = inlined_call_operand.vmem [shape: f32[1,128], index: 8, kind: input, shape index: {}]   ;;  %s10315_s9 = inlined_call_operand.hbm [shape: f32[2,16,16,128], index: 9, kind: output, shape index: {}]  }
   0x1   :  { %10499 = sst [smem:[#allocation52_spill]] %s10307_s1 }
   0x2   :  { %10500 = sst [smem:[#allocation53_spill]] %s10310_s4 }
   0x3   :  { %10501 = sst [smem:[#allocation54_spill]] %s10313_s7 }
   0x4   :  { %14 = vsyncpa [#allocation3], 0 }
   0x5   :  { %16 = vsyncpa [#allocation3 + $0x1], 0 }
   0x6   :  { %17 = vsyncpa [#allocation6], 0 }
   0x7   :  { %18 = vsyncpa [#allocation9], 0 }
   0x8   :  { %19 = vsyncpa [#allocation4], 0 }
   0x9   :  { %21 = vsyncpa [#allocation4 + $0x1], 0  ;;  %s7207_s30 = smov 0   ;;  %s7209_s10 = smov 0  }
   0xa   :  { %s7211_s11 = smov 0   ;;  %s7213_s12 = smov 0  }
   0xb   :  { %s7215_s13 = smov 0   ;;  %s7217_s14 = smov 0  }
   0xc LB: > { %s5606_s15 = sadd.s32 4294967295, %s7141_s14   ;;  %s5607_s16 = sadd.s32 4294967294, %s7141_s14   ;;  %s7141_s14 = sphi %s7217_s14, %s27_s14   ;;  %s7137_s13 = sphi %s7215_s13, %s10834_s13   ;;  %s7133_s12 = sphi %s7213_s12, %s10833_s12   ;;  %s7129_s11 = sphi %s7211_s11, %s10832_s11   ;;  %s7125_s10 = sphi %s7209_s10, %s10831_s10   ;;  %s7121_s30 = sphi %s7207_s30, %s10830_s30  }
   0xd   : > { %p61_p0 = scmp.ne.s32.totalorder %s7125_s10, %s7121_s30  ;;  %p7241_p1 = scmp.eq.s32.totalorder %s5606_s15, 0 }
   0xe   : > { %p7245_p2 = scmp.eq.s32.totalorder %s5606_s15, 1  ;;  %p261_p3 = scmp.eq.s32.totalorder %s5607_s16, 1 }
   0xf   : > { %s10502_s17 = scalar_select %p7241_p1, 1, 0 }
  0x10   : > { %p7251_p4 = por %p7241_p1, %p61_p0  ;;  %p5608_p5 = scmp.ge.s32.totalorder %s7141_s14, 1 }
  0x11   : > { %p7256_p6 = por %p261_p3, %p61_p0  ;;  %p268_p7 = scmp.lt.s32.totalorder %s7141_s14, 3 }
  0x12   : > { %s10504_s19 = scalar_select %p7251_p4, 1, 0 }
  0x13   : > { %s10505_s20 = scalar_select %p7256_p6, 1, 0 }
  0x14   : > { %p7261_p8 = pnand %p5608_p5, %p268_p7  ;;  %s7143_s22 = smov [#allocation5]  }
  0x15   : > { %10506 = sst [smem:[#allocation15_spill]] %s10505_s20  ;;  %s280_s23 = sshll.u32 %s7143_s22, 4  ;;  %s281_s23 = int_to_ptr.vmem [resolvable:$true] %s280_s23 }
  0x16   : > { %s10507_s21 = scalar_select %p7261_p8, 1, 0 }
  0x17   : > { %p6676_p9 = pneg %p7261_p8  ;;  %s7144_s25 = smov [#allocation7]  }
  0x18   : > { %s299_s26 = sshll.u32 %s7144_s25, 4  ;;  %s7145_s27 = smov [#allocation8]   ;;  %s300_s26 = int_to_ptr.vmem [resolvable:$true] %s299_s26 }
  0x19   : > { %p7270_p11 = pnand %p6676_p9, %p7241_p1  ;;  %s318_s28 = sshll.u32 %s7145_s27, 4  ;;  %s319_s28 = int_to_ptr.vmem [resolvable:$true] %s318_s28 }
  0x1a   : > { %s6958_s29 = scalar_lea.vmem %s281_s23, 9216  ;;  %p6966_p5 = scmp.lt.s32.totalorder %s281_s23, %s281_s23 }
  0x1b   : > { %p6949_p12 = pneg %p7270_p11  ;;  %p6959_p13 = scmp.ne.s32.totalorder %s281_s23, %s6958_s29 }
  0x1c   : > { %p6967_p7 = scmp.lt.s32.totalorder %s6958_s29, %s6958_s29 }
  0x1d   : > { %p6961_p0 = pnand %p6959_p13, %p6949_p12 }
  0x1e   : > { %p6968_p9 = por %p6967_p7, %p6966_p5 }
  0x1f   : > { %p6962_p3 = pneg %p6961_p0 }
  0x21   : > { %p6969_p10 = pnand %p6968_p9, %p6962_p3 }
  0x23   : > { %6972 = shalt.err (!%p6969_p10)
}
  0x24   : > { %s7146_s15 = smov 64   ;;  %s7147_s16 = smov 4  }
  0x25   : > { %s10509_s1 = sld [smem:[#allocation52_spill]]  ;;  %s6984_s27 = scalar_lea.vmem %s300_s26, 9216 }
  0x26   : > { %p6985_p6 = scmp.ne.s32.totalorder %s300_s26, %s6984_s27  ;;  %p6992_p1 = scmp.lt.s32.totalorder %s300_s26, %s300_s26 }
  0x27   : > { %p6993_p4 = scmp.lt.s32.totalorder %s6984_s27, %s6984_s27 }
  0x28   : > { %p6987_p13 = pnand %p6985_p6, %p6949_p12 }
  0x29   : > { %p6994_p5 = por %p6993_p4, %p6992_p1 }
  0x2a   : > { %p6988_p0 = pneg %p6987_p13 }
  0x2b   : > { %6679 = dma.hbm_to_vmem [thread:$0]  (!%p7270_p11), %s10509_s1, 9216, %s281_s23, [#allocation6], %s7146_s15, %s7146_s15, %s7147_s16  }
  0x2c   : > { %p6995_p3 = pnand %p6994_p5, %p6988_p0 }
  0x2e   : > { %6998 = shalt.err (!%p6995_p3)
}
  0x2f   : > { %s10510_s4 = sld [smem:[#allocation53_spill]]  ;;  %s7010_s23 = scalar_lea.vmem %s319_s28, 1024 }
  0x30   : > { %p7011_p10 = scmp.ne.s32.totalorder %s319_s28, %s7010_s23  ;;  %p7018_p9 = scmp.lt.s32.totalorder %s319_s28, %s319_s28 }
  0x31   : > { %p7019_p13 = scmp.lt.s32.totalorder %s7010_s23, %s7010_s23 }
  0x32   : > { %p7013_p7 = pnand %p7011_p10, %p6949_p12 }
  0x33   : > { %p7020_p8 = por %p7019_p13, %p7018_p9 }
  0x34   : > { %p7014_p6 = pneg %p7013_p7 }
  0x35   : > { %6682 = dma.hbm_to_vmem [thread:$0]  (!%p7270_p11), %s10510_s4, 9216, %s300_s26, [#allocation6], %s7146_s15, %s7146_s15, %s7147_s16  }
  0x36   : > { %p7021_p1 = pnand %p7020_p8, %p7014_p6 }
  0x38   : > { %7024 = shalt.err (!%p7021_p1)
}
  0x39   : > { %s10511_s7 = sld [smem:[#allocation54_spill]]  ;;  %s48_s20 = sadd.s32 1, %s7129_s11 }
  0x3a   : > { %s39_s26 = sadd.s32 1, %s7137_s13  ;;  %p55_p4 = scmp.ne.s32.totalorder %s7129_s11, %s7125_s10 }
  0x3b   : > { %p41_p8 = scmp.ge.s32.totalorder %s39_s26, 2  ;;  %p56_p12 = scmp.eq.s32.totalorder %s7141_s14, 0 }
  0x3c   : > { %p7307_p0 = por %p7245_p2, %p55_p4  ;;  %p6697_p5 = scmp.lt.s32.totalorder %s7141_s14, 2 }
  0x3d   : > { %s10836_s26 = smov (%p41_p8, %s39_s26), 0  ;;  %p57_p3 = por %p56_p12, %p55_p4 }
  0x3e   : > { %10513 = sst [smem:[#allocation16_spill]] %s10836_s26  ;;  %s335_s27 = sand.u32 1, %s7129_s11  }
  0x3f   : > { %6685 = dma.hbm_to_vmem [thread:$0]  (!%p7270_p11), %s10511_s7, 1024, %s319_s28, [#allocation9], %s7146_s15, %s7146_s15, %s7147_s16  }
  0x40   : > { %s43_s29 = ssub.s32 %s7137_s13, %s10836_s26  ;;  %s5613_s28 = sshll.u32 %s335_s27, 8 }
  0x41   : > { %p46_p10 = scmp.eq.s32.totalorder %s43_s29, 0  ;;  %s5784_s15 = sshll.u32 %s7137_s13, 12 }
  0x42   : > { %s348_s18 = scalar_lea.hbm %s10306_s0, %s5784_s15  ;;  %s339_s25 = scalar_lea.vmem [#allocation2], %s5613_s28 }
  0x43   : > { %s7319_s16 = scalar_select %p46_p10, %s7129_s11, %s48_s20  }
  0x44   : > { %s349_s1 = sshll.u32 %s339_s25, 4  ;;  %p7326_p2 = pnand %p6697_p5, %p57_p3  ;;  %s350_s1 = int_to_ptr.vmem [resolvable:$true] %s349_s1 }
  0x45   : > { %s336_s7 = scalar_lea.sflag [#allocation3], %s335_s27  ;;  %s7038_s29 = scalar_lea.vmem %s350_s1, 4096 }
  0x46   : > { %p7027_p11 = pneg %p7326_p2  ;;  %p7039_p7 = scmp.ne.s32.totalorder %s350_s1, %s7038_s29 }
  0x47   : > { %s7148_s20 = smov [#allocation2]  }
  0x48   : > { %p7041_p6 = pnand %p7039_p7, %p7027_p11  ;;  %s7043_s26 = sshll.u32 %s7148_s20, 4  ;;  %s7044_s26 = int_to_ptr.vmem [resolvable:$false] %s7043_s26 }
  0x49   : > { %s7045_s15 = scalar_lea.vmem %s7044_s26, 8192  ;;  %p7046_p13 = scmp.lt.s32.totalorder %s350_s1, %s7044_s26 }
  0x4a   : > { %p7042_p9 = pneg %p7041_p6  ;;  %p7047_p1 = scmp.lt.s32.totalorder %s7045_s15, %s7038_s29 }
  0x4c   : > { %p7048_p4 = por %p7047_p1, %p7046_p13 }
  0x4e   : > { %p7049_p8 = pnand %p7048_p4, %p7042_p9 }
  0x50   : > { %7052 = shalt.err (!%p7049_p8)
}
  0x51   : > { %s7149_s28 = smov 128   ;;  %s7150_s23 = smov 8  }
  0x52   : > { %6689 = dma.hbm_to_vmem [thread:$0]  (!%p7326_p2), %s348_s18, 4096, %s350_s1, %s336_s7, %s7149_s28, %s7149_s28, %s7150_s23  }
  0x53   : > { %p10515_p12 = scmp.ne.s32.totalorder %s10507_s21, 0 }
  0x55   : > { %361 = sbr.rel (%p10515_p12) target bundleno = 1161 (0x489), region = 56 }
  0x5a   : > { %s7337_s27 = sand.u32 1, %s7125_s10   ;;  %p10516_p5 = scmp.ne.s32.totalorder %s10504_s19, 0 }
  0x5b   : > { %s5617_s26 = sshll.u32 %s7337_s27, 8  ;;  %s364_s22 = scalar_lea.sflag [#allocation3], %s7337_s27 }
  0x5c   : > { %s7343_s25 = scalar_lea.vmem [#allocation2], %s5617_s26 }
  0x5d   : > { %7104 = dma.done.wait (%p10516_p5), %s364_s22, 4096  }
  0x5e   : > { %7106 = vsyncadd (%p10516_p5), %s364_s22, 4294963200  ;;  %p10517_p3 = scmp.ne.s32.totalorder %s10502_s17, 0 }
  0x60   : > { %7108 = dma.done.wait (%p10517_p3), [#allocation6], 18432  }
  0x61   : > { %7110 = vsyncadd (%p10517_p3), [#allocation6], 4294948864 }
  0x62   : > { %7112 = dma.done.wait (%p10517_p3), [#allocation9], 1024  }
  0x63   : > { %7114 = vsyncadd (%p10517_p3), [#allocation9], 4294966272  ;;  %v10328_v0 = vmov 0   ;;  %v7152_v1 = vmov 0.0|0.0   ;;  %v6762_v3 = vld [vmem:[#allocation5 + $0xf8] sm:$0xff]   ;;  %v6764_v5 = vld [vmem:[#allocation5 + $0xf0] sm:$0xff]  }
  0x64   : > { %1123 = vmatprep.subr.bf16.mxu0 %v10328_v0  ;;  %v7358_v2 = vrot.slane %v7152_v1, 4  ;;  %v6763_v4 = vld [vmem:[#allocation5 + $0x178] sm:$0xff]   ;;  %v6765_v6 = vld [vmem:[#allocation5 + $0x170] sm:$0xff]   ;;  %v6767_v7 = vld [vmem:[#allocation5 + $0x168] sm:$0xff]   ;;  %v10322_v17 = vmov 0.0   ;;  %vm862_vm0 = vcmask 1043456  }
  0x65   : > { %1124 = vmatpush1.bf16.msra.mxu0 %v6762_v3  ;;  %6296 = vmatprep.subr.bf16.mxu1 %v6763_v4  ;;  %v6766_v8 = vld [vmem:[#allocation5 + $0xe8] sm:$0xff]   ;;  %v6769_v9 = vld [vmem:[#allocation5 + $0x160] sm:$0xff]   ;;  %v6771_v11 = vld [vmem:[#allocation5 + $0x158] sm:$0xff]   ;;  %v7629_v24 = vrot.slane %v10328_v0, 4  ;;  %vm482_vm1 = vsmask.f32 4352 }
  0x66   : > { %1155 = vmatprep.mubr.bf16.mxu0 %v7358_v2  ;;  %1125 = vmatprep.subr.bf16.mxu0 %v10328_v0  ;;  %v6768_v10 = vld [vmem:[#allocation5 + $0xe0] sm:$0xff]   ;;  %v6770_v12 = vld [vmem:[#allocation5 + $0xd8] sm:$0xff]   ;;  %v6772_v13 = vld [vmem:[#allocation5 + $0xd0] sm:$0xff]   ;;  %vm1975_vm2 = vsmask.f32 3328  ;;  %s10021_s1 = scalar_lea.vmem [#allocation10], %s5617_s26 }
  0x67   : > { %6297 = vmatpush3.bf16.msra.mxu1 %v6763_v4  ;;  %v417_v14 = vld [vmem:[%s7343_s25] sm:$0xff]  ;;  %v418_v15 = vld [vmem:[%s7343_s25 + $0x8] sm:$0xff]  ;;  %v6773_v16 = vld [vmem:[#allocation5 + $0x150] sm:$0xff]   ;;  %10529 = vst [vmem:[#allocation28_spill] sm:$0xff] %v7629_v24  ;;  %s5785_s26 = sshll.u32 %s7133_s12, 12  ;;  %s5490_s4 = sshll.u32 %s10021_s1, 4  ;;  %s10256_s4 = int_to_ptr.vmem [resolvable:$true] %s5490_s4 }
  0x68   : > { %6298 = vmatprep.subr.bf16.mxu1 %v6765_v6  ;;  %v7368_v18 = vpack.c.bf16 %v417_v14, %v10322_v17  ;;  %v7371_v19 = vpack.c.bf16 %v10322_v17, %v418_v15  ;;  %v7374_v20 = vld [vmem:[%s7343_s25 + $0x10] sm:$0xff]  ;;  %v7377_v21 = vld [vmem:[%s7343_s25 + $0x18] sm:$0xff]  ;;  %v6774_v25 = vld [vmem:[#allocation5 + $0xc8] sm:$0xff]   ;;  %s10254_s19 = scalar_lea.hbm %s10315_s9, %s5785_s26  ;;  %s5474_s12 = scalar_lea.sflag [#allocation4], %s7337_s27 }
  0x69   : > { %1126 = vmatpush1.bf16.msra.mxu0 %v6764_v5  ;;  %10520 = vst [vmem:[#allocation19_spill] sm:$0xff] %v7374_v20  ;;  %10521 = vst [vmem:[#allocation20_spill] sm:$0xff] %v7377_v21  ;;  %v6775_v26 = vld [vmem:[#allocation5 + $0x148] sm:$0xff]   ;;  %v421_v28 = vld [vmem:[%s7343_s25 + $0x20] sm:$0xff]  ;;  %v7393_v30 = vpack.c.bf16 %v7374_v20, %v10322_v17  ;;  %v7397_v31 = vpack.c.bf16 %v10322_v17, %v7377_v21  ;;  %s7053_s21 = scalar_lea.vmem %s10256_s4, 4096  ;;  %s7154_s18 = smov [#allocation10]  }
  0x6a   : > { %1127 = vmatprep.subr.bf16.mxu0 %v10328_v0  ;;  %10518 = vst [vmem:[#allocation17_spill] sm:$0xff] %v7368_v18  ;;  %10519 = vst [vmem:[#allocation18_spill] sm:$0xff] %v7371_v19  ;;  %v865_v22 = vrot.slane %v7368_v18, 4  ;;  %v866_v23 = vrot.slane %v7371_v19, 4  ;;  %v422_v29 = vld [vmem:[%s7343_s25 + $0x28] sm:$0xff]  ;;  %v7400_v32 = vpack.c.bf16 %v421_v28, %v10322_v17  ;;  %v6777_v33 = vld [vmem:[#allocation5 + $0x140] sm:$0xff]   ;;  %p7054_p10 = scmp.ne.s32.totalorder %s10256_s4, %s7053_s21 }
  0x6b   : > { %6299 = vmatpush3.bf16.msra.mxu1 %v6765_v6  ;;  %10522 = vst [vmem:[#allocation21_spill] sm:$0xff] %v7393_v30  ;;  %10523 = vst [vmem:[#allocation22_spill] sm:$0xff] %v7397_v31  ;;  %v7403_v34 = vpack.c.bf16 %v10322_v17, %v422_v29  ;;  %v6776_v35 = vld [vmem:[#allocation5 + $0xc0] sm:$0xff]   ;;  %v6778_v36 = vld [vmem:[#allocation5 + $0x138] sm:$0xff]   ;;  %v868_v37 = vrot.slane %v7393_v30, 4  ;;  %v869_v38 = vrot.slane %v7397_v31, 4 }
  0x6c   : > { %6300 = vmatprep.subr.bf16.mxu1 %v6767_v7  ;;  %v7385_v27 = vsel %vm862_vm0, %v865_v22, %v866_v23  ;;  %10524 = vst [vmem:[#allocation23_spill] sm:$0xff] %v7400_v32  ;;  %v871_v39 = vrot.slane %v7400_v32, 4  ;;  %v423_v40 = vld [vmem:[%s7343_s25 + $0x30] sm:$0xff]  ;;  %v424_v41 = vld [vmem:[%s7343_s25 + $0x38] sm:$0xff]  ;;  %v425_v43 = vld [vmem:[%s7343_s25 + $0x40] sm:$0xff]  ;;  %v10338_v21 = vshrl.u32 %v7393_v30, 16  ;;  %p7055_p2 = pnand %p7054_p10, %p7307_p0 }
  0x6d   : > { %1128 = vmatpush1.bf16.msra.mxu0 %v6766_v8  ;;  %6312 = vmatprep.mubr.bf16.mxu1 %v7385_v27  ;;  %10525 = vst [vmem:[#allocation24_spill] sm:$0xff] %v7403_v34  ;;  %v872_v42 = vrot.slane %v7403_v34, 4  ;;  %v426_v44 = vld [vmem:[%s7343_s25 + $0x48] sm:$0xff]  ;;  %v7416_v45 = vsel %vm862_vm0, %v868_v37, %v869_v38  ;;  %v6779_v46 = vld [vmem:[#allocation5 + $0x38] sm:$0xff]   ;;  %v7419_v47 = vpack.c.bf16 %v423_v40, %v10322_v17  ;;  %v6780_v52 = vld [vmem:[#allocation5 + $0x130] sm:$0xff]   ;;  %s7057_s29 = sshll.u32 %s7154_s18, 4  ;;  %s7058_s29 = int_to_ptr.vmem [resolvable:$false] %s7057_s29 }
  0x6e   : > { %1129 = vmatprep.subr.bf16.mxu0 %v10328_v0  ;;  %v7422_v48 = vpack.c.bf16 %v10322_v17, %v424_v41  ;;  %v7429_v50 = vpack.c.bf16 %v425_v43, %v10322_v17  ;;  %v7432_v51 = vpack.c.bf16 %v10322_v17, %v426_v44  ;;  %v6781_v53 = vld [vmem:[#allocation5 + $0x30] sm:$0xff]   ;;  %v6782_v54 = vld [vmem:[#allocation5 + $0x128] sm:$0xff]   ;;  %v428_v60 = vld [vmem:[%s7343_s25 + $0x58] sm:$0xff]  ;;  %p7056_p11 = pneg %p7055_p2  ;;  %s7059_s20 = scalar_lea.vmem %s7058_s29, 8192 }
  0x6f   : > { %6301 = vmatpush3.bf16.msra.mxu1 %v6767_v7  ;;  %10526 = vst [vmem:[#allocation25_spill] sm:$0xff] %v7419_v47  ;;  %v7426_v49 = vsel %vm862_vm0, %v871_v39, %v872_v42  ;;  %v874_v55 = vrot.slane %v7419_v47, 4  ;;  %v427_v57 = vld [vmem:[%s7343_s25 + $0x50] sm:$0xff]  ;;  %v429_v61 = vld [vmem:[%s7343_s25 + $0x60] sm:$0xff]  ;;  %v430_v62 = vld [vmem:[%s7343_s25 + $0x68] sm:$0xff]  ;;  %v7454_v4 = vpack.c.bf16 %v10322_v17, %v428_v60  ;;  %p7060_p7 = scmp.lt.s32.totalorder %s10256_s4, %s7058_s29  ;;  %p7061_p6 = scmp.lt.s32.totalorder %s7059_s20, %s7053_s21 }
  0x70   : > { %6302 = vmatprep.subr.bf16.mxu1 %v6769_v9  ;;  %v875_v56 = vrot.slane %v7422_v48, 4  ;;  %v877_v58 = vrot.slane %v7429_v50, 4  ;;  %v878_v59 = vrot.slane %v7432_v51, 4  ;;  %v6783_v1 = vld [vmem:[#allocation5 + $0x28] sm:$0xff]   ;;  %v7451_v3 = vpack.c.bf16 %v427_v57, %v10322_v17  ;;  %v6784_v8 = vld [vmem:[#allocation5 + $0x120] sm:$0xff]   ;;  %v6786_v22 = vld [vmem:[#allocation5 + $0x118] sm:$0xff]  }
  0x71   : > { %1130 = vmatpush1.bf16.msra.mxu0 %v6768_v10  ;;  %v7461_v6 = vpack.c.bf16 %v429_v61, %v10322_v17  ;;  %v7464_v7 = vpack.c.bf16 %v10322_v17, %v430_v62  ;;  %v6785_v10 = vld [vmem:[#allocation5 + $0x20] sm:$0xff]   ;;  %v6787_v29 = vld [vmem:[#allocation5 + $0x18] sm:$0xff]   ;;  %v6790_v39 = vld [vmem:[#allocation5 + $0x10] sm:$0xff]   ;;  %p7062_p9 = por %p7061_p6, %p7060_p7 }
  0x72   : > { %1131 = vmatprep.subr.bf16.mxu0 %v10328_v0  ;;  %v7448_v63 = vsel %vm862_vm0, %v874_v55, %v875_v56  ;;  %v7458_v5 = vsel %vm862_vm0, %v877_v58, %v878_v59  ;;  %v435_v41 = vld [vmem:[%s7343_s25 + $0x90] sm:$0xff]  ;;  %v6789_v42 = vld [vmem:[#allocation5 + $0x108] sm:$0xff]   ;;  %v436_v44 = vld [vmem:[%s7343_s25 + $0x98] sm:$0xff] }
  0x73   : > { %6303 = vmatpush3.bf16.msra.mxu1 %v6769_v9  ;;  %v431_v9 = vld [vmem:[%s7343_s25 + $0x70] sm:$0xff]  ;;  %v883_v14 = vrot.slane %v7461_v6, 4  ;;  %v884_v15 = vrot.slane %v7464_v7, 4  ;;  %v6792_v55 = vld [vmem:[#allocation5 + $0x8] sm:$0xff]   ;;  %v7515_v56 = vpack.c.bf16 %v435_v41, %v10322_v17  ;;  %v7518_v57 = vpack.c.bf16 %v10322_v17, %v436_v44  ;;  %v6791_v61 = vld [vmem:[#allocation5 + $0x100] sm:$0xff]   ;;  %p7063_p13 = pnand %p7062_p9, %p7056_p11 }
  0x74   : > { %6304 = vmatprep.subr.bf16.mxu1 %v6771_v11  ;;  %v7478_v23 = vpack.c.bf16 %v431_v9, %v10322_v17  ;;  %v6793_v62 = vld [vmem:[#allocation5] sm:$0xff]   ;;  %v6805_v41 = vld [vmem:[#allocation5 + $0xa8] sm:$0xff]   ;;  %v6796_v44 = vld [vmem:[#allocation5 + $0x70] sm:$0xff]  }
  0x75   : > { %1132 = vmatpush1.bf16.msra.mxu0 %v6770_v12  ;;  %v881_v12 = vrot.slane %v7454_v4, 4  ;;  %v893_v9 = vrot.slane %v7518_v57, 4 }
  0x76   : > { %1133 = vmatprep.subr.bf16.mxu0 %v10328_v0  ;;  %v886_v38 = vrot.slane %v7478_v23, 4 }
  0x77   : > { %6305 = vmatpush3.bf16.msra.mxu1 %v6771_v11  ;;  %v880_v11 = vrot.slane %v7451_v3, 4 }
  0x78   : > { %6306 = vmatprep.subr.bf16.mxu1 %v6773_v16 }
  0x79   : > { %1134 = vmatpush1.bf16.msra.mxu0 %v6772_v13  ;;  %v432_v13 = vld [vmem:[%s7343_s25 + $0x78] sm:$0xff]  ;;  %v7486_v28 = vsel %vm862_vm0, %v880_v11, %v881_v12  ;;  %v439_v12 = vld [vmem:[%s7343_s25 + $0xb0] sm:$0xff] }
  0x7a   : > { %1135 = vmatprep.subr.bf16.mxu0 %v10328_v0 }
  0x7b   : > { %6307 = vmatpush3.bf16.msra.mxu1 %v6773_v16  ;;  %v433_v16 = vld [vmem:[%s7343_s25 + $0x80] sm:$0xff] }
  0x7c   : > { %6308 = vmatprep.subr.bf16.mxu1 %v6775_v26 }
  0x7d   : > { %1136 = vmatpush1.bf16.msra.mxu0 %v6774_v25  ;;  %v434_v25 = vld [vmem:[%s7343_s25 + $0x88] sm:$0xff] }
  0x7e   : > { %1137 = vmatprep.subr.bf16.mxu0 %v10328_v0  ;;  %v7496_v37 = vpack.c.bf16 %v10322_v17, %v434_v25  ;;  %v6794_v25 = vld [vmem:[#allocation5 + $0x78] sm:$0xff]  }
  0x7f   : > { %6309 = vmatpush3.bf16.msra.mxu1 %v6775_v26  ;;  %v7483_v26 = vpack.c.bf16 %v10322_v17, %v432_v13  ;;  %v440_v13 = vld [vmem:[%s7343_s25 + $0xb8] sm:$0xff] }
  0x80   : > { %6310 = vmatprep.subr.bf16.mxu1 %v6777_v33 }
  0x81   : > { %1138 = vmatpush1.bf16.msra.mxu0 %v6776_v35  ;;  %v6788_v35 = vld [vmem:[#allocation5 + $0x110] sm:$0xff]   ;;  %v887_v40 = vrot.slane %v7483_v26, 4 }
  0x82   : > { %1139 = vmatprep.subr.bf16.mxu0 %v10328_v0 }
  0x83   : > { %6311 = vmatpush3.bf16.msra.mxu1 %v6777_v33  ;;  %v7489_v33 = vpack.c.bf16 %v433_v16, %v10322_v17  ;;  %v6800_v16 = vld [vmem:[#allocation5 + $0xb0] sm:$0xff]  }
  0x84   : > { %1621 = vmatprep.subr.bf16.mxu1 %v10328_v0 }
  0x85   : > { %1140 = vmatpush2.bf16.msra.mxu0 %v6778_v36  ;;  %v7493_v36 = vsel %vm862_vm0, %v883_v14, %v884_v15  ;;  %v889_v43 = vrot.slane %v7489_v33, 4  ;;  %v441_v14 = vld [vmem:[%s7343_s25 + $0xc0] sm:$0xff]  ;;  %v442_v15 = vld [vmem:[%s7343_s25 + $0xc8] sm:$0xff] }
  0x86   : > { %6313 = vmatmul.mubr.bf16.vlgmr.msra.gmra.mxu1 %v7416_v45  ;;  %1141 = vmatprep.subr.bf16.mxu0 %v10328_v0 }
  0x87   : > { %1622 = vmatpush1.bf16.msra.mxu1 %v6779_v46  ;;  %6316 = vmatprep.mubr.bf16.mxu1 %v7426_v49  ;;  %v890_v46 = vrot.slane %v7496_v37, 4 }
  0x88   : > { %1623 = vmatprep.subr.bf16.mxu1 %v10328_v0 }
  0x89   : > { %1142 = vmatpush2.bf16.msra.mxu0 %v6780_v52  ;;  %v437_v52 = vld [vmem:[%s7343_s25 + $0xa0] sm:$0xff]  ;;  %v7522_v58 = vsel %vm862_vm0, %v889_v43, %v890_v46 }
  0x8a   : > { %1143 = vmatprep.subr.bf16.mxu0 %v10328_v0  ;;  %v7525_v59 = vpack.c.bf16 %v437_v52, %v10322_v17 }
  0x8b   : > { %1624 = vmatpush1.bf16.msra.mxu1 %v6781_v53  ;;  %v438_v53 = vld [vmem:[%s7343_s25 + $0xa8] sm:$0xff] }
  0x8c   : > { %1625 = vmatprep.subr.bf16.mxu1 %v10328_v0  ;;  %v7528_v60 = vpack.c.bf16 %v10322_v17, %v438_v53  ;;  %v443_v53 = vld [vmem:[%s7343_s25 + $0xd0] sm:$0xff] }
  0x8d   : > { %1144 = vmatpush2.bf16.msra.mxu0 %v6782_v54  ;;  %v7512_v54 = vsel %vm862_vm0, %v886_v38, %v887_v40  ;;  %v7560_v40 = vpack.c.bf16 %v10322_v17, %v442_v15  ;;  %v6811_v15 = vld [vmem:[#allocation5 + $0x98] sm:$0xff]  }
  0x8e   : > { %6317 = vmatmul.mubr.bf16.gmra.mxu1 %v7448_v63  ;;  %1145 = vmatprep.subr.bf16.mxu0 %v10328_v0  ;;  %v896_v11 = vrot.slane %v7528_v60, 4 }
  0x8f   : > { %1626 = vmatpush1.bf16.msra.mxu1 %v6783_v1  ;;  %6320 = vmatprep.mubr.bf16.mxu1 %v7458_v5  ;;  %v6795_v1 = vld [vmem:[#allocation5 + $0xb8] sm:$0xff]   ;;  %v902_v52 = vrot.slane %v7560_v40, 4 }
  0x90   : > { %1627 = vmatprep.subr.bf16.mxu1 %v10328_v0 }
  0x91   : > { %1146 = vmatpush2.bf16.msra.mxu0 %v6784_v8  ;;  %v892_v8 = vrot.slane %v7515_v56, 4 }
  0x92   : > { %1147 = vmatprep.subr.bf16.mxu0 %v10328_v0 }
  0x93   : > { %1628 = vmatpush1.bf16.msra.mxu1 %v6785_v10  ;;  %v895_v10 = vrot.slane %v7525_v59, 4 }
  0x94   : > { %1629 = vmatprep.subr.bf16.mxu1 %v10328_v0 }
  0x95   : > { %1148 = vmatpush2.bf16.msra.mxu0 %v6786_v22  ;;  %v7543_v22 = vsel %vm862_vm0, %v892_v8, %v893_v9  ;;  %v7554_v38 = vsel %vm862_vm0, %v895_v10, %v896_v11  ;;  %v6797_v9 = vld [vmem:[#allocation5 + $0x68] sm:$0xff]   ;;  %v7578_v10 = vpack.c.bf16 %v443_v53, %v10322_v17 }
  0x96   : > { %6321 = vmatmul.mubr.bf16.gmra.mxu1 %v7486_v28  ;;  %1149 = vmatprep.subr.bf16.mxu0 %v10328_v0 }
  0x97   : > { %1630 = vmatpush1.bf16.msra.mxu1 %v6787_v29  ;;  %6324 = vmatprep.mubr.bf16.mxu1 %v7493_v36  ;;  %v7546_v29 = vpack.c.bf16 %v439_v12, %v10322_v17 }
  0x98   : > { %1631 = vmatprep.subr.bf16.mxu1 %v10328_v0 }
  0x99   : > { %1150 = vmatpush2.bf16.msra.mxu0 %v6788_v35  ;;  %v7549_v35 = vpack.c.bf16 %v10322_v17, %v440_v13 }
  0x9a   : > { %1151 = vmatprep.subr.bf16.mxu0 %v10328_v0 }
  0x9b   : > { %1632 = vmatpush1.bf16.msra.mxu1 %v6790_v39  ;;  %v7557_v39 = vpack.c.bf16 %v441_v14, %v10322_v17  ;;  %v899_v43 = vrot.slane %v7549_v35, 4 }
  0x9c   : > { %1633 = vmatprep.subr.bf16.mxu1 %v10328_v0 }
  0x9d   : > { %1152 = vmatpush2.bf16.msra.mxu0 %v6789_v42  ;;  %v898_v42 = vrot.slane %v7546_v29, 4  ;;  %v901_v46 = vrot.slane %v7557_v39, 4 }
  0x9e   : > { %6325 = vmatmul.mubr.bf16.gmra.mxu1 %v7512_v54  ;;  %1153 = vmatprep.subr.bf16.mxu0 %v10328_v0 }
  0x9f   : > { %1634 = vmatpush1.bf16.msra.mxu1 %v6792_v55  ;;  %6328 = vmatprep.mubr.bf16.mxu1 %v7522_v58  ;;  %v444_v55 = vld [vmem:[%s7343_s25 + $0xd8] sm:$0xff]  ;;  %v7575_v8 = vsel %vm862_vm0, %v898_v42, %v899_v43  ;;  %v7586_v12 = vsel %vm862_vm0, %v901_v46, %v902_v52  ;;  %v6798_v42 = vld [vmem:[#allocation5 + $0x60] sm:$0xff]   ;;  %v447_v46 = vld [vmem:[%s7343_s25 + $0xf0] sm:$0xff] }
  0xa0   : > { %1635 = vmatprep.subr.bf16.mxu1 %v10328_v0  ;;  %v7581_v11 = vpack.c.bf16 %v10322_v17, %v444_v55  ;;  %v6814_v52 = vld [vmem:[#allocation5 + $0x90] sm:$0xff]   ;;  %v6799_v55 = vld [vmem:[#allocation5 + $0x58] sm:$0xff]  }
  0xa1   : > { %1154 = vmatpush2.bf16.msra.mxu0 %v6791_v61  ;;  %v445_v61 = vld [vmem:[%s7343_s25 + $0xe0] sm:$0xff] }
  0xa2   : > { %6348 = vmatprep.subr.bf16.mxu0 %v6795_v1  ;;  %v7589_v13 = vpack.c.bf16 %v445_v61, %v10322_v17  ;;  %v7608_v61 = vpack.c.bf16 %v447_v46, %v10322_v17  ;;  %v6817_v46 = vld [vmem:[#allocation5 + $0x88] sm:$0xff]  }
  0xa3   : > { %1636 = vmatpush1.bf16.msra.mxu1 %v6793_v62  ;;  %v446_v62 = vld [vmem:[%s7343_s25 + $0xe8] sm:$0xff] }
  0xa4   : > { %1156 = vmatmul.mubr.bf16.vlgmr.msra.gmra.mxu0 %v7358_v2  ;;  %1637 = vmatprep.subr.bf16.mxu1 %v10328_v0  ;;  %v7592_v14 = vpack.c.bf16 %v10322_v17, %v446_v62  ;;  %v907_v43 = vrot.slane %v7589_v13, 4  ;;  %10527 = vst [vmem:[#allocation26_spill] sm:$0xff] %v7608_v61 }
  0xa5   : > { %1163 = vmatprep.mubr.bf16.mxu0 %v7385_v27  ;;  %6349 = vmatpush3.bf16.msra.mxu0 %v6795_v1  ;;  %v6808_v1 = vld [vmem:[#allocation5 + $0xa0] sm:$0xff]  }
  0xa6   : > { %6329 = vmatmul.mubr.bf16.gmra.mxu1 %v7543_v22  ;;  %6350 = vmatprep.subr.bf16.mxu0 %v6800_v16 }
  0xa7   : > { %1638 = vmatpush2.bf16.msra.mxu1 %v6794_v25  ;;  %6332 = vmatprep.mubr.bf16.mxu1 %v7554_v38  ;;  %v905_v25 = vrot.slane %v7581_v11, 4 }
  0xa8   : > { %1639 = vmatprep.subr.bf16.mxu1 %v10328_v0 }
  0xa9   : > { %6351 = vmatpush3.bf16.msra.mxu0 %v6800_v16  ;;  %v904_v16 = vrot.slane %v7578_v10, 4 }
  0xaa   : > { %6352 = vmatprep.subr.bf16.mxu0 %v6805_v41 }
  0xab   : > { %1640 = vmatpush2.bf16.msra.mxu1 %v6796_v44  ;;  %v908_v44 = vrot.slane %v7592_v14, 4  ;;  %v7605_v53 = vsel %vm862_vm0, %v904_v16, %v905_v25  ;;  %v10333_v16 = vshll.u32 %v7368_v18, 16  ;;  %v10336_v25 = vshrl.u32 %v7371_v19, 16 }
  0xac   : > { %1164 = vmatmul.mubr.bf16.gmra.mxu0 %v7358_v2  ;;  %1641 = vmatprep.subr.bf16.mxu1 %v10328_v0 }
  0xad   : > { %1171 = vmatprep.mubr.bf16.mxu0 %v7416_v45  ;;  %6353 = vmatpush3.bf16.msra.mxu0 %v6805_v41  ;;  %v448_v41 = vld [vmem:[%s7343_s25 + $0xf8] sm:$0xff] }
  0xae   : > { %6333 = vmatmul.mubr.bf16.gmra.mxu1 %v7575_v8  ;;  %6354 = vmatprep.subr.bf16.mxu0 %v6808_v1  ;;  %v7611_v62 = vpack.c.bf16 %v10322_v17, %v448_v41  ;;  %v6801_v41 = vld [vmem:[#allocation5 + $0x50] sm:$0xff]   ;;  %v498_v17 = vrot.slane %v10333_v16, 4  ;;  %v6802_v16 = vld [vmem:[#allocation5 + $0x48] sm:$0xff]  }
  0xaf   : > { %1642 = vmatpush2.bf16.msra.mxu1 %v6797_v9  ;;  %6336 = vmatprep.mubr.bf16.mxu1 %v7586_v12  ;;  %v7616_v9 = vsel %vm862_vm0, %v907_v43, %v908_v44  ;;  %v910_v43 = vrot.slane %v7608_v61, 4  ;;  %v6820_v61 = vld [vmem:[#allocation5 + $0x80] sm:$0xff]  }
  0xb0   : > { %1643 = vmatprep.subr.bf16.mxu1 %v10328_v0  ;;  %10528 = vst [vmem:[#allocation27_spill] sm:$0xff] %v7611_v62  ;;  %v911_v44 = vrot.slane %v7611_v62, 4  ;;  %v6803_v62 = vld [vmem:[#allocation5 + $0x40] sm:$0xff]  }
  0xb1   : > { %6355 = vmatpush3.bf16.msra.mxu0 %v6808_v1  ;;  %v10332_v1 = vshrl.u32 %v7368_v18, 16  ;;  %v10347_v18 = vshll.u32 %v7397_v31, 16 }
  0xb2   : > { %6356 = vmatprep.subr.bf16.mxu0 %v6811_v15 }
  0xb3   : > { %1644 = vmatpush2.bf16.msra.mxu1 %v6798_v42  ;;  %v10337_v42 = vshll.u32 %v7371_v19, 16  ;;  %v10354_v19 = vshll.u32 %v7403_v34, 16 }
  0xb4   : > { %1172 = vmatmul.mubr.bf16.gmra.mxu0 %v7385_v27  ;;  %1645 = vmatprep.subr.bf16.mxu1 %v10328_v0  ;;  %v486_v27 = vrot.slane %v10328_v0, 3 }
  0xb5   : > { %1179 = vmatprep.mubr.bf16.mxu0 %v7426_v49  ;;  %6357 = vmatpush3.bf16.msra.mxu0 %v6811_v15  ;;  %v7634_v15 = vrot.slane %v10332_v1, 3  ;;  %v506_v20 = vrot.slane %v10337_v42, 4  ;;  %v7646_v1 = vsel %vm862_vm0, %v910_v43, %v911_v44  ;;  %v10346_v42 = vshrl.u32 %v7400_v32, 16 }
  0xb6   : > { %6337 = vmatmul.mubr.bf16.gmra.mxu1 %v7605_v53  ;;  %6358 = vmatprep.subr.bf16.mxu0 %v6814_v52  ;;  %v10531_v43 = vshll.u32 %v7393_v30, 16 }
  0xb7   : > { %6340 = vmatprep.mubr.bf16.mxu1 %v7616_v9  ;;  %1646 = vmatpush2.bf16.msra.mxu1 %v6799_v55  ;;  %v503_v55 = vrot.slane %v10336_v25, 3  ;;  %v10530_v25 = vmov 0  }
  0xb8   : > { %1647 = vmatprep.subr.bf16.mxu1 %v10328_v0  ;;  %v10341_v0 = vshrl.u32 %v7397_v31, 16  ;;  %v515_v44 = vrot.slane %v10531_v43, 4  ;;  %v10533_v43 = vshll.u32 %v7400_v32, 16  ;;  %v10357_v31 = vshll.u32 %v7419_v47, 16 }
  0xb9   : > { %6359 = vmatpush3.bf16.msra.mxu0 %v6814_v52  ;;  %v512_v52 = vrot.slane %v10338_v21, 3  ;;  %v7669_v21 = vrot.slane %v10346_v42, 3  ;;  %v7681_v42 = vor.u32 %v7629_v24, %v486_v27  ;;  %v10534_v32 = vshrl.u32 %v7422_v48, 16 }
  0xba   : > { %6360 = vmatprep.subr.bf16.mxu0 %v6817_v46  ;;  %v7673_v30 = vrot.slane %v10533_v43, 4  ;;  %v507_v43 = vor.u32 %v506_v20, %v503_v55  ;;  %v6806_v20 = vld [vmem:[#allocation5 + $0x1b0] sm:$0xff]  }
  0xbb   : > { %1648 = vmatpush2.bf16.msra.mxu1 %v6801_v41  ;;  %v7661_v41 = vld [vmem:[#allocation5 + $0x238] sm:$0xff]   ;;  %v554_v24 = vrot.slane %v10534_v32, 3  ;;  %v10404_v32 = vshrl.u32 %v7451_v3, 16 }
  0xbc   : > { %1180 = vmatmul.mubr.bf16.gmra.mxu0 %v7416_v45  ;;  %1649 = vmatprep.subr.bf16.mxu1 %v10530_v25  ;;  %v520_v45 = vrot.slane %v10341_v0, 3  ;;  %10532 = vst [vmem:[#allocation29_spill] sm:$0xff] %v7661_v41  ;;  %v10351_v0 = vshrl.u32 %v7403_v34, 16 }
  0xbd   : > { %1187 = vmatprep.mubr.bf16.mxu0 %v7448_v63  ;;  %6361 = vmatpush3.bf16.msra.mxu0 %v6817_v46  ;;  %v523_v46 = vrot.slane %v10347_v18, 4  ;;  %v499_v18 = vor.u32 %v498_v17, %v7634_v15  ;;  %v10360_v17 = vshll.u32 %v7432_v51, 16  ;;  %v6807_v15 = vld [vmem:[#allocation5 + $0x1a8] sm:$0xff]  }
  0xbe   : > { %6341 = vmatmul.mubr.bf16.gmra.mxu1 %v7646_v1  ;;  %6362 = vmatprep.subr.bf16.mxu0 %v6820_v61 }
  0xbf   : > { %6344 = vmatprep.mubr.bf16.mxu1 %v7358_v2  ;;  %1650 = vmatpush2.bf16.msra.mxu1 %v6802_v16  ;;  %v10355_v16 = vshrl.u32 %v7419_v47, 16  ;;  %v10405_v47 = vshrl.u32 %v7432_v51, 16 }
  0xc0   : > { %1651 = vmatprep.subr.bf16.mxu1 %v10530_v25 }
  0xc1   : > { %6363 = vmatpush3.bf16.msra.mxu0 %v6820_v61  ;;  %v537_v61 = vrot.slane %v10351_v0, 3  ;;  %v7695_v27 = vrot.slane %v10355_v16, 3  ;;  %v10535_v0 = vshll.u32 %v7422_v48, 16  ;;  %v10406_v16 = vshll.u32 %v7429_v50, 16 }
  0xc2   : > { %6400 = vmatprep.subr.bf16.mxu0 %v7661_v41  ;;  %v6804_v41 = vld [vmem:[#allocation5 + $0x1b8] sm:$0xff]  }
  0xc3   : > { %1652 = vmatpush2.bf16.msra.mxu1 %v6803_v62  ;;  %v540_v62 = vrot.slane %v10354_v19, 4  ;;  %v557_v34 = vrot.slane %v10535_v0, 4  ;;  %v10407_v19 = vshrl.u32 %v7429_v50, 16 }
  0xc4   : > { %1188 = vmatmul.mubr.bf16.gmra.mxu0 %v7426_v49  ;;  %2302 = vmatprep.subr.bf16.mxu1 %v10530_v25  ;;  %v7699_v49 = vrot.slane %v10357_v31, 4  ;;  %v7711_v31 = vsel %vm482_vm1, %v499_v18, %v507_v43  ;;  %v516_v18 = vor.u32 %v515_v44, %v512_v52  ;;  %v6809_v43 = vld [vmem:[#allocation5 + $0x1a0] sm:$0xff]   ;;  %v571_v52 = vrot.slane %v10405_v47, 3 }
  0xc5   : > { %1195 = vmatprep.mubr.bf16.mxu0 %v7458_v5  ;;  %v7719_v0 = vrot.slane %v10407_v19, 3  ;;  %v574_v44 = vrot.slane %v10360_v17, 4 }
  0xc6   : > { %6345 = vmatmul.mubr.bf16.gmra.mxu1 %v7358_v2 }
  0xc7   : > { %1653 = vmatprep.mubr.bf16.mxu1 %v7681_v42 }
  0xcc   : > { %1196 = vmatmul.mubr.bf16.gmra.mxu0 %v7448_v63  ;;  %v524_v63 = vor.u32 %v523_v46, %v520_v45  ;;  %v533_v45 = vor.u32 %v7673_v30, %v7669_v21  ;;  %v541_v46 = vor.u32 %v540_v62, %v537_v61  ;;  %v550_v21 = vor.u32 %v7699_v49, %v7695_v27  ;;  %v6815_v49 = vld [vmem:[#allocation5 + $0x180] sm:$0xff]  }
  0xcd   : > { %1203 = vmatprep.mubr.bf16.mxu0 %v7486_v28  ;;  %v558_v30 = vor.u32 %v557_v34, %v554_v24  ;;  %v10363_v24 = vshll.u32 %v7461_v6, 16 }
  0xce   : > { %1654 = vmatmul.mubr.bf16.vlgmr.msra.gmra.mxu1 %v7681_v42  ;;  %v7726_v55 = vsel %vm482_vm1, %v516_v18, %v524_v63  ;;  %v10362_v18 = vshrl.u32 %v7454_v4, 16  ;;  %v10361_v63 = vshll.u32 %v7454_v4, 16  ;;  %v7746_v17 = vsel %vm482_vm1, %v533_v45, %v541_v46  ;;  %v6813_v45 = vld [vmem:[#allocation5 + $0x188] sm:$0xff]  }
  0xcf   : > { %2303 = vmatpush1.bf16.msra.mxu1 %v6804_v41  ;;  %1661 = vmatprep.mubr.bf16.mxu1 %v7711_v31  ;;  %v566_v41 = vrot.slane %v10406_v16, 4  ;;  %v7767_v34 = vsel %vm482_vm1, %v550_v21, %v558_v30  ;;  %v10400_v21 = vshll.u32 %v7464_v7, 16  ;;  %v10399_v30 = vshrl.u32 %v7478_v23, 16 }
  0xd0   : > { %2304 = vmatprep.subr.bf16.mxu1 %v10530_v25  ;;  %v588_v62 = vrot.slane %v10362_v18, 3  ;;  %v591_v27 = vrot.slane %v10361_v63, 4  ;;  %v600_v63 = vrot.slane %v10363_v24, 4  ;;  %v6816_v18 = vld [vmem:[#allocation5 + $0x1f8] sm:$0xff]   ;;  %v6819_v24 = vld [vmem:[#allocation5 + $0x1e8] sm:$0xff]  }
  0xd1   : > { %v567_v46 = vor.u32 %v566_v41, %v7719_v0  ;;  %v6818_v41 = vld [vmem:[#allocation5 + $0x1f0] sm:$0xff]  }
  0xd3   : > { %2305 = vmatpush1.bf16.msra.mxu1 %v6806_v20  ;;  %v6810_v20 = vld [vmem:[#allocation5 + $0x198] sm:$0xff]  }
  0xd4   : > { %1204 = vmatmul.mubr.bf16.gmra.mxu0 %v7458_v5  ;;  %2306 = vmatprep.subr.bf16.mxu1 %v10530_v25  ;;  %v10403_v5 = vshll.u32 %v7451_v3, 16 }
  0xd5   : > { %1211 = vmatprep.mubr.bf16.mxu0 %v7493_v36 }
  0xd6   : > { %1662 = vmatmul.mubr.bf16.gmra.mxu1 %v7681_v42  ;;  %v583_v61 = vrot.slane %v10403_v5, 4 }
  0xd7   : > { %1669 = vmatprep.mubr.bf16.mxu1 %v7726_v55  ;;  %2307 = vmatpush1.bf16.msra.mxu1 %v6807_v15  ;;  %v6812_v15 = vld [vmem:[#allocation5 + $0x190] sm:$0xff]  }
  0xd8   : > { %2308 = vmatprep.subr.bf16.mxu1 %v10530_v25 }
  0xdb   : > { %2309 = vmatpush1.bf16.msra.mxu1 %v6809_v43  ;;  %v10402_v43 = vshrl.u32 %v7461_v6, 16 }
  0xdc   : > { %1212 = vmatmul.mubr.bf16.gmra.mxu0 %v7486_v28  ;;  %2310 = vmatprep.subr.bf16.mxu1 %v10530_v25  ;;  %v580_v28 = vrot.slane %v10404_v32, 3 }
  0xdd   : > { %1219 = vmatprep.mubr.bf16.mxu0 %v7512_v54 }
  0xde   : > { %1670 = vmatmul.mubr.bf16.gmra.mxu1 %v7711_v31 }
  0xdf   : > { %1677 = vmatprep.mubr.bf16.mxu1 %v7746_v17  ;;  %2311 = vmatpush1.bf16.msra.mxu1 %v6810_v20  ;;  %v575_v20 = vor.u32 %v574_v44, %v571_v52  ;;  %v584_v52 = vor.u32 %v583_v61, %v580_v28  ;;  %v592_v44 = vor.u32 %v591_v27, %v588_v62  ;;  %v614_v61 = vrot.slane %v10399_v30, 3  ;;  %v6821_v62 = vld [vmem:[#allocation5 + $0x1e0] sm:$0xff]  }
  0xe0   : > { %2312 = vmatprep.subr.bf16.mxu1 %v10530_v25 }
  0xe1   : > { %v7784_v0 = vsel %vm482_vm1, %v567_v46, %v575_v20  ;;  %v10365_v46 = vshrl.u32 %v7483_v26, 16  ;;  %v10364_v20 = vshll.u32 %v7483_v26, 16 }
  0xe3   : > { %2313 = vmatpush1.bf16.msra.mxu1 %v6812_v15  ;;  %v597_v15 = vrot.slane %v10402_v43, 3  ;;  %v10556_v43 = vld [vmem:[#allocation24_spill] sm:$0xff] }
  0xe4   : > { %1220 = vmatmul.mubr.bf16.gmra.mxu0 %v7493_v36  ;;  %2314 = vmatprep.subr.bf16.mxu1 %v10530_v25  ;;  %v10401_v36 = vshrl.u32 %v7464_v7, 16  ;;  %v10558_v32 = vshll.u32 %v10556_v43, 16 }
  0xe5   : > { %1227 = vmatprep.mubr.bf16.mxu0 %v7522_v58  ;;  %v601_v28 = vor.u32 %v600_v63, %v597_v15  ;;  %v10368_v15 = vshll.u32 %v7489_v33, 16 }
  0xe6   : > { %1678 = vmatmul.mubr.bf16.gmra.mxu1 %v7726_v55  ;;  %v1998_v47 = vrot.slane %v10558_v32, 5 }
  0xe7   : > { %1685 = vmatprep.mubr.bf16.mxu1 %v7767_v34  ;;  %2315 = vmatpush1.bf16.msra.mxu1 %v6813_v45  ;;  %v605_v45 = vrot.slane %v10401_v36, 3 }
  0xe8   : > { %2316 = vmatprep.subr.bf16.mxu1 %v10530_v25 }
  0xeb   : > { %2317 = vmatpush1.bf16.msra.mxu1 %v6815_v49  ;;  %v10398_v49 = vshll.u32 %v7478_v23, 16 }
  0xec   : > { %1228 = vmatmul.mubr.bf16.gmra.mxu0 %v7512_v54  ;;  %2318 = vmatprep.subr.bf16.mxu1 %v10530_v25  ;;  %v608_v54 = vrot.slane %v10400_v21, 4 }
  0xed   : > { %1235 = vmatprep.mubr.bf16.mxu0 %v7543_v22 }
  0xee   : > { %1686 = vmatmul.mubr.bf16.gmra.mxu1 %v7746_v17  ;;  %v609_v27 = vor.u32 %v608_v54, %v605_v45  ;;  %v6824_v45 = vld [vmem:[#allocation5 + $0x1d0] sm:$0xff]  }
  0xef   : > { %1693 = vmatprep.mubr.bf16.mxu1 %v7784_v0  ;;  %2319 = vmatpush2.bf16.msra.mxu1 %v6816_v18  ;;  %v7800_v18 = vsel %vm482_vm1, %v584_v52, %v592_v44  ;;  %v625_v52 = vrot.slane %v10364_v20, 4  ;;  %v6822_v44 = vld [vmem:[#allocation5 + $0x1d8] sm:$0xff]   ;;  %v6826_v20 = vld [vmem:[#allocation5 + $0x1c8] sm:$0xff]  }
  0xf0   : > { %2320 = vmatprep.subr.bf16.mxu1 %v10530_v25  ;;  %v7817_v63 = vsel %vm482_vm1, %v601_v28, %v609_v27  ;;  %v10366_v28 = vshll.u32 %v7496_v37, 16 }
  0xf3   : > { %2321 = vmatpush2.bf16.msra.mxu1 %v6818_v41  ;;  %v622_v41 = vrot.slane %v10365_v46, 3 }
  0xf4   : > { %1236 = vmatmul.mubr.bf16.gmra.mxu0 %v7522_v58  ;;  %2322 = vmatprep.subr.bf16.mxu1 %v10530_v25  ;;  %v617_v58 = vrot.slane %v10398_v49, 4 }
  0xf5   : > { %1243 = vmatprep.mubr.bf16.mxu0 %v7554_v38 }
  0xf6   : > { %1694 = vmatmul.mubr.bf16.gmra.mxu1 %v7767_v34  ;;  %v618_v54 = vor.u32 %v617_v58, %v614_v61  ;;  %v634_v61 = vrot.slane %v10368_v15, 4 }
  0xf7   : > { %1701 = vmatprep.mubr.bf16.mxu1 %v7800_v18  ;;  %2323 = vmatpush2.bf16.msra.mxu1 %v6819_v24  ;;  %v10397_v24 = vshrl.u32 %v7489_v33, 16 }
  0xf8   : > { %2324 = vmatprep.subr.bf16.mxu1 %v10530_v25 }
  0xf9   : > { %v631_v27 = vrot.slane %v10397_v24, 3 }
  0xfb   : > { %2325 = vmatpush2.bf16.msra.mxu1 %v6821_v62  ;;  %v626_v62 = vor.u32 %v625_v52, %v622_v41  ;;  %v642_v41 = vrot.slane %v10366_v28, 4  ;;  %v10371_v52 = vshll.u32 %v7515_v56, 16  ;;  %v10370_v28 = vshll.u32 %v7518_v57, 16 }
  0xfc   : > { %1244 = vmatmul.mubr.bf16.gmra.mxu0 %v7543_v22  ;;  %2326 = vmatprep.subr.bf16.mxu1 %v10530_v25  ;;  %v10367_v22 = vshrl.u32 %v7496_v37, 16 }
  0xfd   : > { %1251 = vmatprep.mubr.bf16.mxu0 %v7575_v8  ;;  %v7832_v46 = vsel %vm482_vm1, %v618_v54, %v626_v62  ;;  %v10369_v62 = vshrl.u32 %v7518_v57, 16 }
  0xfe   : > { %1702 = vmatmul.mubr.bf16.gmra.mxu1 %v7784_v0  ;;  %v639_v58 = vrot.slane %v10367_v22, 3 }
  0xff   : > { %1709 = vmatprep.mubr.bf16.mxu1 %v7817_v63  ;;  %2327 = vmatpush2.bf16.msra.mxu1 %v6822_v44  ;;  %v6828_v44 = vld [vmem:[#allocation5 + $0x1c0] sm:$0xff]  }
 0x100   : > { %2328 = vmatprep.subr.bf16.mxu1 %v10530_v25  ;;  %v643_v54 = vor.u32 %v642_v41, %v639_v58  ;;  %v10375_v58 = vshll.u32 %v7525_v59, 16 }
 0x103   : > { %2329 = vmatpush2.bf16.msra.mxu1 %v6824_v45  ;;  %v635_v45 = vor.u32 %v634_v61, %v631_v27  ;;  %v656_v27 = vrot.slane %v10369_v62, 3  ;;  %v659_v61 = vrot.slane %v10370_v28, 4 }
 0x104   : > { %1252 = vmatmul.mubr.bf16.gmra.mxu0 %v7554_v38  ;;  %2330 = vmatprep.subr.bf16.mxu1 %v10530_v25  ;;  %v10372_v38 = vshrl.u32 %v7515_v56, 16 }
 0x105   : > { %1259 = vmatprep.mubr.bf16.mxu0 %v7586_v12  ;;  %v7853_v15 = vsel %vm482_vm1, %v635_v45, %v643_v54  ;;  %v10373_v45 = vshrl.u32 %v7528_v60, 16  ;;  %v10374_v54 = vshll.u32 %v7528_v60, 16 }
 0x106   : > { %1710 = vmatmul.mubr.bf16.gmra.mxu1 %v7800_v18  ;;  %v648_v22 = vrot.slane %v10372_v38, 3 }
 0x107   : > { %1717 = vmatprep.mubr.bf16.mxu1 %v7832_v46  ;;  %2331 = vmatpush2.bf16.msra.mxu1 %v6826_v20  ;;  %v651_v20 = vrot.slane %v10371_v52, 4  ;;  %v668_v52 = vrot.slane %v10375_v58, 4  ;;  %v673_v38 = vrot.slane %v10373_v45, 3 }
 0x108   : > { %2332 = vmatprep.subr.bf16.mxu1 %v10530_v25 }
 0x109   : > { %v652_v41 = vor.u32 %v651_v20, %v648_v22  ;;  %v676_v22 = vrot.slane %v10374_v54, 4  ;;  %v10379_v20 = vshll.u32 %v7546_v29, 16 }
 0x10b   : > { %2333 = vmatpush2.bf16.msra.mxu1 %v6828_v44  ;;  %v660_v44 = vor.u32 %v659_v61, %v656_v27  ;;  %v677_v61 = vor.u32 %v676_v22, %v673_v38  ;;  %v685_v58 = vrot.slane %v10379_v20, 4 }
 0x10c   : > { %1260 = vmatmul.mubr.bf16.gmra.mxu0 %v7575_v8  ;;  %v10376_v8 = vshrl.u32 %v7525_v59, 16 }
 0x10d   : > { %1267 = vmatprep.mubr.bf16.mxu0 %v7605_v53  ;;  %v7872_v28 = vsel %vm482_vm1, %v652_v41, %v660_v44  ;;  %v10377_v41 = vshrl.u32 %v7549_v35, 16  ;;  %v10378_v44 = vshll.u32 %v7549_v35, 16 }
 0x10e   : > { %1718 = vmatmul.mubr.bf16.gmra.mxu1 %v7817_v63  ;;  %v665_v62 = vrot.slane %v10376_v8, 3 }
 0x10f   : > { %1725 = vmatprep.mubr.bf16.mxu1 %v7853_v15  ;;  %v690_v8 = vrot.slane %v10377_v41, 3  ;;  %v693_v38 = vrot.slane %v10378_v44, 4 }
 0x110   : > { %v669_v27 = vor.u32 %v668_v52, %v665_v62  ;;  %v10383_v52 = vshll.u32 %v7557_v39, 16 }
 0x111   : > { %v694_v22 = vor.u32 %v693_v38, %v690_v8 }
 0x112   : > { %v7891_v54 = vsel %vm482_vm1, %v669_v27, %v677_v61  ;;  %v10381_v27 = vshrl.u32 %v7560_v40, 16  ;;  %v10382_v61 = vshll.u32 %v7560_v40, 16  ;;  %v702_v20 = vrot.slane %v10383_v52, 4 }
 0x114   : > { %1268 = vmatmul.mubr.bf16.gmra.mxu0 %v7586_v12  ;;  %v10380_v12 = vshrl.u32 %v7546_v29, 16  ;;  %v710_v8 = vrot.slane %v10382_v61, 4 }
 0x115   : > { %1275 = vmatprep.mubr.bf16.mxu0 %v7616_v9 }
 0x116   : > { %1726 = vmatmul.mubr.bf16.gmra.mxu1 %v7832_v46  ;;  %v682_v45 = vrot.slane %v10380_v12, 3  ;;  %v707_v12 = vrot.slane %v10381_v27, 3 }
 0x117   : > { %1733 = vmatprep.mubr.bf16.mxu1 %v7872_v28 }
 0x118   : > { %v686_v62 = vor.u32 %v685_v58, %v682_v45  ;;  %v10386_v58 = vshll.u32 %v7578_v10, 16  ;;  %v711_v38 = vor.u32 %v710_v8, %v707_v12  ;;  %v10391_v8 = vshll.u32 %v7592_v14, 16 }
 0x11a   : > { %v7910_v44 = vsel %vm482_vm1, %v686_v62, %v694_v22  ;;  %v10384_v62 = vshrl.u32 %v7581_v11, 16  ;;  %v10385_v22 = vshll.u32 %v7581_v11, 16  ;;  %v719_v61 = vrot.slane %v10386_v58, 4 }
 0x11c   : > { %1276 = vmatmul.mubr.bf16.gmra.mxu0 %v7605_v53  ;;  %v10388_v53 = vshrl.u32 %v7557_v39, 16  ;;  %v724_v52 = vrot.slane %v10384_v62, 3  ;;  %v727_v12 = vrot.slane %v10385_v22, 4  ;;  %v6825_v62 = vld [vmem:[#allocation5 + $0x230] sm:$0xff]  }
 0x11d   : > { %1283 = vmatprep.mubr.bf16.mxu0 %v7646_v1 }
 0x11e   : > { %1734 = vmatmul.mubr.bf16.gmra.mxu1 %v7853_v15  ;;  %v699_v41 = vrot.slane %v10388_v53, 3 }
 0x11f   : > { %1741 = vmatprep.mubr.bf16.mxu1 %v7891_v54 }
 0x120   : > { %v703_v45 = vor.u32 %v702_v20, %v699_v41  ;;  %v10390_v20 = vshll.u32 %v7589_v13, 16  ;;  %v10389_v41 = vshrl.u32 %v7592_v14, 16 }
 0x122   : > { %v741_v58 = vrot.slane %v10389_v41, 3  ;;  %v10537_v41 = vld [vmem:[#allocation26_spill] sm:$0xff] }
 0x124   : > { %1284 = vmatmul.mubr.bf16.gmra.mxu0 %v7616_v9  ;;  %v10387_v9 = vshrl.u32 %v7578_v10, 16 }
 0x125   : > { %1291 = vmatprep.mubr.bf16.mxu0 %v7358_v2  ;;  %v7929_v2 = vsel %vm482_vm1, %v703_v45, %v711_v38  ;;  %v728_v38 = vor.u32 %v727_v12, %v724_v52  ;;  %v10536_v52 = vld [vmem:[#allocation29_spill] sm:$0xff] }
 0x126   : > { %1742 = vmatmul.mubr.bf16.gmra.mxu1 %v7872_v28  ;;  %v716_v27 = vrot.slane %v10387_v9, 3  ;;  %v744_v9 = vrot.slane %v10391_v8, 4  ;;  %v10395_v8 = vshll.u32 %v10537_v41, 16 }
 0x127   : > { %1749 = vmatprep.mubr.bf16.mxu1 %v7910_v44 }
 0x128   : > { %v720_v45 = vor.u32 %v719_v61, %v716_v27  ;;  %v6827_v27 = vld [vmem:[#allocation5 + $0x228] sm:$0xff]   ;;  %v745_v12 = vor.u32 %v744_v9, %v741_v58  ;;  %v753_v9 = vrot.slane %v10395_v8, 4 }
 0x12a   : > { %v7954_v53 = vsel %vm482_vm1, %v720_v45, %v728_v38 }
 0x12c   : > { %1292 = vmatmul.mubr.bf16.gmra.mxu0 %v7646_v1  ;;  %v10392_v1 = vshrl.u32 %v7589_v13, 16 }
 0x12d   : > { %6364 = vmatprep.mubr.bf16.mxu0 %v7711_v31  ;;  %v736_v31 = vrot.slane %v10390_v20, 4  ;;  %v10396_v20 = vshrl.u32 %v10537_v41, 16 }
 0x12e   : > { %1750 = vmatmul.mubr.bf16.gmra.mxu1 %v7891_v54  ;;  %v733_v22 = vrot.slane %v10392_v1, 3 }
 0x12f   : > { %1757 = vmatprep.mubr.bf16.mxu1 %v7929_v2 }
 0x130   : > { %v737_v61 = vor.u32 %v736_v31, %v733_v22  ;;  %v750_v22 = vrot.slane %v10396_v20, 3 }
 0x132   : > { %v7965_v38 = vsel %vm482_vm1, %v737_v61, %v745_v12  ;;  %v6831_v61 = vld [vmem:[#allocation5 + $0x210] sm:$0xff]  }
 0x134   : > { %6365 = vmatmul.mubr.bf16.vlgmr.msra.gmra.mxu0 %v7726_v55  ;;  %v10538_v55 = vld [vmem:[#allocation27_spill] sm:$0xff] }
 0x135   : > { %6368 = vmatprep.mubr.bf16.mxu0 %v7746_v17  ;;  %6401 = vmatpush3.bf16.msra.mxu0 %v10536_v52  ;;  %v10394_v1 = vshrl.u32 %v10538_v55, 16  ;;  %v10393_v45 = vshll.u32 %v10538_v55, 16  ;;  %v6829_v17 = vld [vmem:[#allocation5 + $0x220] sm:$0xff]  }
 0x136   : > { %1758 = vmatmul.mubr.bf16.gmra.mxu1 %v7910_v44  ;;  %6402 = vmatprep.subr.bf16.mxu0 %v6825_v62 }
 0x137   : > { %1765 = vmatprep.mubr.bf16.mxu1 %v7954_v53  ;;  %v758_v58 = vrot.slane %v10394_v1, 3  ;;  %v761_v31 = vrot.slane %v10393_v45, 4  ;;  %v10544_v1 = vld [vmem:[#allocation18_spill] sm:$0xff] }
 0x138   : > { %v10545_v8 = vshrl.u32 %v10544_v1, 16  ;;  %v10546_v20 = vshll.u32 %v10544_v1, 16 }
 0x139   : > { %6403 = vmatpush3.bf16.msra.mxu0 %v6825_v62  ;;  %v6830_v62 = vld [vmem:[#allocation5 + $0x218] sm:$0xff]   ;;  %v762_v52 = vor.u32 %v761_v31, %v758_v58  ;;  %v1977_v58 = vrot.slane %v10530_v25, 5 }
 0x13a   : > { %6404 = vmatprep.subr.bf16.mxu0 %v6827_v27  ;;  %v1983_v25 = vrot.slane %v10545_v8, 4  ;;  %v1984_v24 = vrot.slane %v10546_v20, 5 }
 0x13c   : > { %6369 = vmatmul.mubr.bf16.gmra.mxu0 %v7767_v34  ;;  %v754_v34 = vor.u32 %v753_v9, %v750_v22 }
 0x13d   : > { %6372 = vmatprep.mubr.bf16.mxu0 %v7784_v0  ;;  %6405 = vmatpush3.bf16.msra.mxu0 %v6827_v27  ;;  %v6832_v27 = vld [vmem:[#allocation5 + $0x208] sm:$0xff]  }
 0x13e   : > { %1766 = vmatmul.mubr.bf16.gmra.mxu1 %v7929_v2  ;;  %6406 = vmatprep.subr.bf16.mxu0 %v6829_v17  ;;  %v7981_v12 = vsel %vm482_vm1, %v754_v34, %v762_v52  ;;  %v10539_v34 = vld [vmem:[#allocation28_spill] sm:$0xff] }
 0x13f   : > { %1773 = vmatprep.mubr.bf16.mxu1 %v7965_v38  ;;  %v8002_v52 = vor.u32 %v1977_v58, %v10539_v34  ;;  %v1985_v34 = vor.u32 %v1984_v24, %v1983_v25 }
 0x141   : > { %6407 = vmatpush3.bf16.msra.mxu0 %v6829_v17  ;;  %10540 = vst [vmem:[#allocation29_spill] sm:$0xff] %v8002_v52 }
 0x142   : > { %6408 = vmatprep.subr.bf16.mxu0 %v6830_v62 }
 0x144   : > { %6373 = vmatmul.mubr.bf16.gmra.mxu0 %v7800_v18  ;;  %v6833_v18 = vld [vmem:[#allocation5 + $0x200] sm:$0xff]  }
 0x145   : > { %6376 = vmatprep.mubr.bf16.mxu0 %v7817_v63  ;;  %6409 = vmatpush3.bf16.msra.mxu0 %v6830_v62 }
 0x146   : > { %v7984_v0 = vpop.f32.mrf.mxu1  ;;  %1774 = vmatmul.mubr.bf16.gmra.mxu1 %v7954_v53  ;;  %6410 = vmatprep.subr.bf16.mxu0 %v6831_v61 }
 0x147   : > { %1781 = vmatprep.mubr.bf16.mxu1 %v7981_v12 }
 0x148   : > { %v1334_v22 = vpop.f32.mrf.mxu1 }
 0x149   : > { %6411 = vmatpush3.bf16.msra.mxu0 %v6831_v61 }
 0x14a   : > { %v7988_v17 = vpop.f32.mrf.mxu1  ;;  %6412 = vmatprep.subr.bf16.mxu0 %v6832_v27 }
 0x14c   : > { %v1337_v9 = vpop.f32.mrf.mxu1  ;;  %6377 = vmatmul.mubr.bf16.gmra.mxu0 %v7832_v46  ;;  %v10541_v46 = vld [vmem:[#allocation17_spill] sm:$0xff] }
 0x14d   : > { %6380 = vmatprep.mubr.bf16.mxu0 %v7853_v15  ;;  %6413 = vmatpush3.bf16.msra.mxu0 %v6832_v27  ;;  %v10542_v15 = vshrl.u32 %v10541_v46, 16  ;;  %v10543_v27 = vshll.u32 %v10541_v46, 16 }
 0x14e   : > { %v7992_v63 = vpop.f32.mrf.mxu1  ;;  %1782 = vmatmul.mubr.bf16.gmra.mxu1 %v7965_v38  ;;  %6414 = vmatprep.subr.bf16.mxu0 %v6833_v18 }
 0x14f   : > { %1789 = vmatprep.mubr.bf16.mxu1 %v7681_v42  ;;  %v1980_v61 = vrot.slane %v10542_v15, 4  ;;  %v1981_v45 = vrot.slane %v10543_v27, 5 }
 0x150   : > { %v7997_v31 = vpop.f32.mrf.mxu1 }
 0x151   : > { %6415 = vmatpush3.bf16.msra.mxu0 %v6833_v18  ;;  %v1982_v58 = vor.u32 %v1981_v45, %v1980_v61  ;;  %v10550_v45 = vld [vmem:[#allocation22_spill] sm:$0xff] }
 0x152   : > { %v7999_v62 = vpop.f32.mrf.mxu1  ;;  %v10551_v24 = vshrl.u32 %v10550_v45, 16  ;;  %v10552_v25 = vshll.u32 %v10550_v45, 16 }
 0x153   : > { %v8025_v1 = vsel %vm1975_vm2, %v1982_v58, %v1985_v34 }
 0x154   : > { %v8012_v49 = vpop.f32.mrf.mxu1  ;;  %6381 = vmatmul.mubr.bf16.gmra.mxu0 %v7872_v28  ;;  %v10547_v28 = vld [vmem:[#allocation21_spill] sm:$0xff]  ;;  %v1990_v61 = vrot.slane %v10551_v24, 4  ;;  %v1991_v21 = vrot.slane %v10552_v25, 5 }
 0x155   : > { %6384 = vmatprep.mubr.bf16.mxu0 %v7891_v54  ;;  %v10548_v54 = vshrl.u32 %v10547_v28, 16  ;;  %v10549_v27 = vshll.u32 %v10547_v28, 16 }
 0x156   : > { %v8016_v18 = vpop.f32.mrf.mxu1  ;;  %1790 = vmatmul.mubr.bf16.gmra.mxu1 %v7981_v12 }
 0x157   : > { %2334 = vmatprep.mubr.bf16.mxu1 %v8002_v52  ;;  %v1987_v15 = vrot.slane %v10548_v54, 4  ;;  %v1988_v30 = vrot.slane %v10549_v27, 5  ;;  %v1992_v54 = vor.u32 %v1991_v21, %v1990_v61  ;;  %v10553_v27 = vld [vmem:[#allocation23_spill] sm:$0xff] }
 0x158   : > { %v8020_v46 = vpop.f32.mrf.mxu1  ;;  %v10554_v36 = vshrl.u32 %v10553_v27, 16  ;;  %v10555_v45 = vshll.u32 %v10553_v27, 16 }
 0x159   : > { %v1989_v34 = vor.u32 %v1988_v30, %v1987_v15 }
 0x15a   : > { %v8022_v8 = vpop.f32.mrf.mxu1  ;;  %v1994_v24 = vrot.slane %v10554_v36, 4  ;;  %v1995_v25 = vrot.slane %v10555_v45, 5 }
 0x15b   : > { %v1993_v21 = vsel %vm1975_vm2, %v1989_v34, %v1992_v54  ;;  %v10561_v54 = vld [vmem:[#allocation25_spill] sm:$0xff] }
 0x15c   : > { %v8027_v20 = vpop.f32.mrf.mxu1  ;;  %6385 = vmatmul.mubr.bf16.gmra.mxu0 %v7910_v44  ;;  %v1996_v61 = vor.u32 %v1995_v25, %v1994_v24  ;;  %v10564_v24 = vshrl.u32 %v7422_v48, 16  ;;  %v10565_v25 = vshll.u32 %v7422_v48, 16 }
 0x15d   : > { %6388 = vmatprep.mubr.bf16.mxu0 %v7929_v2  ;;  %v10557_v2 = vshrl.u32 %v10556_v43, 16 }
 0x15e   : > { %v8039_v58 = vpop.f32.mrf.mxu1  ;;  %2335 = vmatmul.mubr.bf16.vlgmr.msra.gmra.mxu1 %v8002_v52 }
 0x15f   : > { %2342 = vmatprep.mubr.bf16.mxu1 %v8025_v1  ;;  %v1997_v5 = vrot.slane %v10557_v2, 4  ;;  %v10562_v2 = vshrl.u32 %v10561_v54, 16 }
 0x160   : > { %v8043_v44 = vpop.f32.mrf.mxu1 }
 0x161   : > { %v1999_v43 = vor.u32 %v1998_v47, %v1997_v5  ;;  %v10563_v47 = vshll.u32 %v10561_v54, 16 }
 0x162   : > { %v8045_v28 = vpop.f32.mrf.mxu1 }
 0x163   : > { %v2002_v5 = vrot.slane %v10563_v47, 5 }
 0x164   : > { %v8055_v16 = vpop.f32.mrf.mxu1  ;;  %v1157_v19 = vpop.f32.mrf.mxu0  ;;  %6389 = vmatmul.mubr.bf16.gmra.mxu0 %v7954_v53 }
 0x165   : > { %v8059_v30 = vadd.f32 %v1334_v22, %v1157_v19  ;;  %6392 = vmatprep.mubr.bf16.mxu0 %v7965_v38  ;;  %v2000_v19 = vsel %vm1975_vm2, %v1996_v61, %v1999_v43 }
 0x166   : > { %v8062_v36 = vpop.f32.mrf.mxu1  ;;  %2343 = vmatmul.mubr.bf16.gmra.mxu1 %v8002_v52  ;;  %v1159_v15 = vpop.f32.mrf.mxu0 }
 0x167   : > { %10559 = vst [vmem:[#allocation26_spill] sm:$0xff] %v8062_v36  ;;  %2350 = vmatprep.mubr.bf16.mxu1 %v1993_v21  ;;  %v2001_v15 = vrot.slane %v10562_v2, 4 }
 0x168   : > { %v8065_v32 = vpop.f32.mrf.mxu1  ;;  %v1160_v27 = vpop.f32.mrf.mxu0 }
 0x169   : > { %v8067_v45 = vadd.f32 %v1337_v9, %v1160_v27  ;;  %v2004_v9 = vrot.slane %v10564_v24, 4  ;;  %v2005_v27 = vrot.slane %v10565_v25, 5  ;;  %v2003_v2 = vor.u32 %v2002_v5, %v2001_v15 }
 0x16a   : > { %v8069_v53 = vpop.f32.mrf.mxu1  ;;  %v1162_v34 = vpop.f32.mrf.mxu0 }
 0x16b   : > { %10560 = vst [vmem:[#allocation27_spill] sm:$0xff] %v8069_v53  ;;  %v2006_v47 = vor.u32 %v2005_v27, %v2004_v9  ;;  %v6834_v9 = vld [vmem:[#allocation7 + $0x178] sm:$0xff]  }
 0x16c   : > { %v8072_v22 = vpop.f32.mrf.mxu1  ;;  %v1165_v38 = vpop.f32.mrf.mxu0  ;;  %6393 = vmatmul.mubr.bf16.gmra.mxu0 %v7981_v12  ;;  %6452 = vmatprep.subr.bf16.mxu1 %v6834_v9 }
 0x16d   : > { %v8084_v34 = vadd.f32 %v7984_v0, %v1165_v38  ;;  %6396 = vmatprep.mubr.bf16.mxu0 %v7681_v42  ;;  %v10568_v38 = vshrl.u32 %v7429_v50, 16  ;;  %6453 = vmatpush3.bf16.msra.mxu1 %v6834_v9 }
 0x16e   : > { %v8087_v61 = vpop.f32.mrf.mxu1  ;;  %2351 = vmatmul.mubr.bf16.gmra.mxu1 %v8025_v1  ;;  %v1167_v12 = vpop.f32.mrf.mxu0 }
 0x16f   : > { %10566 = vst [vmem:[#allocation28_spill] sm:$0xff] %v8087_v61  ;;  %2358 = vmatprep.mubr.bf16.mxu1 %v2000_v19  ;;  %v2008_v25 = vrot.slane %v10568_v38, 4  ;;  %v10569_v61 = vshll.u32 %v7429_v50, 16  ;;  %v10570_v12 = vshrl.u32 %v7432_v51, 16 }
 0x170   : > { %v8090_v43 = vpop.f32.mrf.mxu1  ;;  %v1168_v54 = vpop.f32.mrf.mxu0 }
 0x171   : > { %10567 = vst [vmem:[#allocation17_spill] sm:$0xff] %v8090_v43  ;;  %v8093_v24 = vadd.f32 %v7988_v17, %v1168_v54  ;;  %v2009_v53 = vrot.slane %v10569_v61, 5  ;;  %v2011_v36 = vrot.slane %v10570_v12, 4  ;;  %v10571_v43 = vshll.u32 %v7432_v51, 16 }
 0x172   : > { %v8095_v48 = vpop.f32.mrf.mxu1  ;;  %v1170_v0 = vpop.f32.mrf.mxu0  ;;  %v2007_v17 = vsel %vm1975_vm2, %v2003_v2, %v2006_v47  ;;  %v10574_v12 = vshrl.u32 %v7454_v4, 16 }
 0x173   : > { %v2012_v52 = vrot.slane %v10571_v43, 5  ;;  %v2010_v51 = vor.u32 %v2009_v53, %v2008_v25  ;;  %v10572_v53 = vshrl.u32 %v7451_v3, 16 }
 0x174   : > { %v8105_v15 = vpop.f32.mrf.mxu1  ;;  %v1173_v5 = vpop.f32.mrf.mxu0  ;;  %6397 = vmatmul.mubr.bf16.gmra.mxu0 %v7681_v42 }
 0x175   : > { %v8110_v27 = vadd.f32 %v7997_v31, %v1173_v5  ;;  %6416 = vmatprep.mubr.bf16.mxu0 %v8025_v1  ;;  %v2013_v43 = vor.u32 %v2012_v52, %v2011_v36  ;;  %v2015_v52 = vrot.slane %v10572_v53, 4  ;;  %v10573_v36 = vshll.u32 %v7451_v3, 16 }
 0x176   : > { %v8113_v50 = vpop.f32.mrf.mxu1  ;;  %2359 = vmatmul.mubr.bf16.gmra.mxu1 %v1993_v21  ;;  %v1175_v61 = vpop.f32.mrf.mxu0  ;;  %v10575_v5 = vshll.u32 %v7454_v4, 16 }
 0x177   : > { %2366 = vmatprep.mubr.bf16.mxu1 %v2007_v17  ;;  %v8123_v1 = vsel %vm1975_vm2, %v2010_v51, %v2013_v43  ;;  %v2016_v25 = vrot.slane %v10573_v36, 5 }
 0x178   : > { %v8115_v54 = vpop.f32.mrf.mxu1  ;;  %v1176_v42 = vpop.f32.mrf.mxu0  ;;  %v2019_v9 = vrot.slane %v10575_v5, 5  ;;  %v10580_v5 = vshrl.u32 %v7464_v7, 16 }
 0x179   : > { %v8118_v2 = vadd.f32 %v8012_v49, %v1176_v42  ;;  %v2018_v49 = vrot.slane %v10574_v12, 4  ;;  %v2017_v42 = vor.u32 %v2016_v25, %v2015_v52  ;;  %v10579_v12 = vshll.u32 %v7461_v6, 16 }
 0x17a   : > { %v8120_v47 = vpop.f32.mrf.mxu1  ;;  %v1178_v31 = vpop.f32.mrf.mxu0 }
 0x17b   : > { %v2020_v31 = vor.u32 %v2019_v9, %v2018_v49 }
 0x17c   : > { %v8125_v0 = vpop.f32.mrf.mxu1  ;;  %v1181_v38 = vpop.f32.mrf.mxu0  ;;  %6417 = vmatmul.mubr.bf16.vlgmr.msra.gmra.mxu0 %v1993_v21 }
 0x17d   : > { %v8136_v61 = vadd.f32 %v7992_v63, %v1181_v38  ;;  %6420 = vmatprep.mubr.bf16.mxu0 %v2000_v19  ;;  %v10578_v63 = vshrl.u32 %v7461_v6, 16 }
 0x17e   : > { %v8138_v51 = vpop.f32.mrf.mxu1  ;;  %2367 = vmatmul.mubr.bf16.gmra.mxu1 %v2000_v19  ;;  %v1183_v21 = vpop.f32.mrf.mxu0  ;;  %v2023_v19 = vrot.slane %v10579_v12, 5 }
 0x17f   : > { %10576 = vst [vmem:[#allocation18_spill] sm:$0xff] %v8138_v51  ;;  %2374 = vmatprep.mubr.bf16.mxu1 %v8123_v1  ;;  %v2022_v38 = vrot.slane %v10578_v63, 4  ;;  %v2025_v21 = vrot.slane %v10580_v5, 4  ;;  %v10581_v51 = vshll.u32 %v7464_v7, 16  ;;  %v10583_v7 = vshrl.u32 %v7478_v23, 16  ;;  %v6835_v63 = vld [vmem:[#allocation7 + $0x170] sm:$0xff]  }
 0x180   : > { %v8141_v43 = vpop.f32.mrf.mxu1  ;;  %v1184_v3 = vpop.f32.mrf.mxu0  ;;  %v10586_v5 = vshrl.u32 %v7483_v26, 16  ;;  %6454 = vmatprep.subr.bf16.mxu1 %v6835_v63 }
 0x181   : > { %10577 = vst [vmem:[#allocation21_spill] sm:$0xff] %v8141_v43  ;;  %v8144_v53 = vadd.f32 %v7999_v62, %v1184_v3  ;;  %v2026_v43 = vrot.slane %v10581_v51, 5  ;;  %v8159_v62 = vsel %vm1975_vm2, %v2017_v42, %v2020_v31  ;;  %v2024_v3 = vor.u32 %v2023_v19, %v2022_v38  ;;  %6455 = vmatpush3.bf16.msra.mxu1 %v6835_v63 }
 0x182   : > { %v8146_v4 = vpop.f32.mrf.mxu1  ;;  %v1186_v36 = vpop.f32.mrf.mxu0  ;;  %v2029_v51 = vrot.slane %v10583_v7, 4 }
 0x183   : > { %v2027_v36 = vor.u32 %v2026_v43, %v2025_v21  ;;  %v10588_v43 = vshrl.u32 %v7489_v33, 16  ;;  %v10589_v21 = vshll.u32 %v7489_v33, 16 }
 0x184   : > { %v8156_v52 = vpop.f32.mrf.mxu1  ;;  %v1189_v25 = vpop.f32.mrf.mxu0  ;;  %6421 = vmatmul.mubr.bf16.gmra.mxu0 %v2007_v17 }
 0x185   : > { %v8162_v49 = vadd.f32 %v8020_v46, %v1189_v25  ;;  %6424 = vmatprep.mubr.bf16.mxu0 %v8123_v1  ;;  %v10585_v46 = vshll.u32 %v7478_v23, 16  ;;  %v2032_v25 = vrot.slane %v10586_v5, 4  ;;  %v2036_v38 = vrot.slane %v10588_v43, 4 }
 0x186   : > { %v8165_v6 = vpop.f32.mrf.mxu1  ;;  %2375 = vmatmul.mubr.bf16.gmra.mxu1 %v2007_v17  ;;  %v1191_v9 = vpop.f32.mrf.mxu0  ;;  %v10587_v17 = vshll.u32 %v7483_v26, 16  ;;  %v2037_v7 = vrot.slane %v10589_v21, 5  ;;  %v10591_v23 = vshll.u32 %v7496_v37, 16 }
 0x187   : > { %10582 = vst [vmem:[#allocation22_spill] sm:$0xff] %v8165_v6  ;;  %2382 = vmatprep.mubr.bf16.mxu1 %v8159_v62  ;;  %v2030_v31 = vrot.slane %v10585_v46, 5  ;;  %v10590_v6 = vshrl.u32 %v7496_v37, 16 }
 0x188   : > { %v8170_v12 = vpop.f32.mrf.mxu1  ;;  %v1192_v42 = vpop.f32.mrf.mxu0  ;;  %v2033_v9 = vrot.slane %v10587_v17, 5  ;;  %v2040_v46 = vrot.slane %v10591_v23, 5  ;;  %v8192_v17 = vsel %vm1975_vm2, %v2024_v3, %v2027_v36  ;;  %v10592_v36 = vshrl.u32 %v7515_v56, 16 }
 0x189   : > { %10584 = vst [vmem:[#allocation23_spill] sm:$0xff] %v8170_v12  ;;  %v8181_v19 = vadd.f32 %v8027_v20, %v1192_v42  ;;  %v2039_v12 = vrot.slane %v10590_v6, 4  ;;  %v2031_v33 = vor.u32 %v2030_v31, %v2029_v51  ;;  %v2038_v6 = vor.u32 %v2037_v7, %v2036_v38 }
 0x18a   : > { %v8189_v5 = vpop.f32.mrf.mxu1  ;;  %v1194_v26 = vpop.f32.mrf.mxu0  ;;  %v2034_v37 = vor.u32 %v2033_v9, %v2032_v25  ;;  %v2043_v63 = vrot.slane %v10592_v36, 4  ;;  %v10594_v31 = vshrl.u32 %v7518_v57, 16  ;;  %v10597_v36 = vshll.u32 %v7525_v59, 16 }
 0x18b   : > { %v2041_v21 = vor.u32 %v2040_v46, %v2039_v12  ;;  %v10595_v12 = vshll.u32 %v7518_v57, 16 }
 0x18c   : > { %v8194_v43 = vpop.f32.mrf.mxu1  ;;  %v1197_v20 = vpop.f32.mrf.mxu0  ;;  %6425 = vmatmul.mubr.bf16.gmra.mxu0 %v8159_v62  ;;  %v2046_v25 = vrot.slane %v10594_v31, 4  ;;  %v8218_v46 = vsel %vm1975_vm2, %v2031_v33, %v2034_v37  ;;  %v2051_v57 = vrot.slane %v10597_v36, 5 }
 0x18d   : > { %v8198_v42 = vadd.f32 %v8016_v18, %v1197_v20  ;;  %6428 = vmatprep.mubr.bf16.mxu0 %v8192_v17  ;;  %v10593_v18 = vshll.u32 %v7515_v56, 16  ;;  %v2047_v9 = vrot.slane %v10595_v12, 5 }
 0x18e   : > { %v1655_v23 = vpop.f32.mrf.mxu1  ;;  %2383 = vmatmul.mubr.bf16.gmra.mxu1 %v8123_v1  ;;  %v1199_v3 = vpop.f32.mrf.mxu0 }
 0x18f   : > { %v8205_v26 = vadd.f32 %v1655_v23, %v8059_v30  ;;  %2390 = vmatprep.mubr.bf16.mxu1 %v8192_v17  ;;  %v2044_v51 = vrot.slane %v10593_v18, 5  ;;  %v8221_v30 = vsel %vm1975_vm2, %v2038_v6, %v2041_v21  ;;  %v10596_v23 = vshrl.u32 %v7525_v59, 16  ;;  %v6837_v59 = vld [vmem:[#allocation7 + $0xf8] sm:$0xff]  }
 0x190   : > { %v1657_v38 = vpop.f32.mrf.mxu1  ;;  %v1200_v1 = vpop.f32.mrf.mxu0  ;;  %v10598_v18 = vshrl.u32 %v7528_v60, 16  ;;  %v2048_v6 = vor.u32 %v2047_v9, %v2046_v25 }
 0x191   : > { %v8215_v7 = vadd.f32 %v8022_v8, %v1200_v1  ;;  %v2050_v3 = vrot.slane %v10596_v23, 4  ;;  %v10599_v8 = vshll.u32 %v7528_v60, 16  ;;  %v2045_v37 = vor.u32 %v2044_v51, %v2043_v63  ;;  %v6836_v1 = vld [vmem:[#allocation7 + $0x138] sm:$0xff]  }
 0x192   : > { %v1658_v20 = vpop.f32.mrf.mxu1  ;;  %v1202_v56 = vpop.f32.mrf.mxu0  ;;  %v2053_v31 = vrot.slane %v10598_v18, 4  ;;  %5864 = vmatprep.subr.bf16.mxu0 %v6836_v1  ;;  %v10606_v1 = vshrl.u32 %v7560_v40, 16 }
 0x193   : > { %v2054_v12 = vrot.slane %v10599_v8, 5  ;;  %v8232_v33 = vadd.f32 %v1658_v20, %v8067_v45  ;;  %v2052_v36 = vor.u32 %v2051_v57, %v2050_v3  ;;  %v8245_v51 = vsel %vm1975_vm2, %v2045_v37, %v2048_v6  ;;  %5865 = vmatpush3.bf16.msra.mxu0 %v6837_v59  ;;  %v6838_v37 = vld [vmem:[#allocation7 + $0x168] sm:$0xff]  }
 0x194   : > { %v1660_v21 = vpop.f32.mrf.mxu1  ;;  %v1205_v38 = vpop.f32.mrf.mxu0  ;;  %6429 = vmatmul.mubr.bf16.gmra.mxu0 %v8218_v46  ;;  %v10602_v3 = vshrl.u32 %v7549_v35, 16  ;;  %v10604_v8 = vshrl.u32 %v7557_v39, 16  ;;  %v10607_v59 = vshll.u32 %v7560_v40, 16  ;;  %6456 = vmatprep.subr.bf16.mxu1 %v6838_v37 }
 0x195   : > { %v8236_v56 = vadd.f32 %v8043_v44, %v1205_v38  ;;  %6432 = vmatprep.mubr.bf16.mxu0 %v8221_v30  ;;  %v2055_v45 = vor.u32 %v2054_v12, %v2053_v31  ;;  %v10600_v44 = vshrl.u32 %v7546_v29, 16  ;;  %v10605_v21 = vshll.u32 %v7557_v39, 16  ;;  %6457 = vmatpush3.bf16.msra.mxu1 %v6838_v37 }
 0x196   : > { %v1663_v23 = vpop.f32.mrf.mxu1  ;;  %2391 = vmatmul.mubr.bf16.gmra.mxu1 %v8159_v62  ;;  %v1207_v60 = vpop.f32.mrf.mxu0  ;;  %v10601_v62 = vshll.u32 %v7546_v29, 16  ;;  %v2060_v57 = vrot.slane %v10602_v3, 4  ;;  %v2064_v12 = vrot.slane %v10604_v8, 4  ;;  %v2067_v29 = vrot.slane %v10606_v1, 4  ;;  %v6840_v8 = vld [vmem:[#allocation7 + $0xf0] sm:$0xff]  }
 0x197   : > { %v8241_v63 = vadd.f32 %v1663_v23, %v8084_v34  ;;  %2398 = vmatprep.mubr.bf16.mxu1 %v8218_v46  ;;  %v2057_v25 = vrot.slane %v10600_v44, 4  ;;  %v10603_v34 = vshll.u32 %v7549_v35, 16  ;;  %v2065_v38 = vrot.slane %v10605_v21, 5 }
 0x198   : > { %v1665_v9 = vpop.f32.mrf.mxu1  ;;  %v1208_v20 = vpop.f32.mrf.mxu0  ;;  %v2058_v18 = vrot.slane %v10601_v62, 5  ;;  %v2068_v23 = vrot.slane %v10607_v59, 5  ;;  %v8267_v35 = vsel %vm1975_vm2, %v2052_v36, %v2055_v45  ;;  %v6839_v36 = vld [vmem:[#allocation7 + $0x130] sm:$0xff]  }
 0x199   : > { %v2061_v31 = vrot.slane %v10603_v34, 5  ;;  %v8258_v6 = vadd.f32 %v8055_v16, %v1208_v20  ;;  %v2066_v3 = vor.u32 %v2065_v38, %v2064_v12  ;;  %5866 = vmatprep.subr.bf16.mxu0 %v6839_v36  ;;  %v10610_v12 = vshrl.u32 %v7581_v11, 16 }
 0x19a   : > { %v1666_v60 = vpop.f32.mrf.mxu1  ;;  %v1210_v44 = vpop.f32.mrf.mxu0  ;;  %v2059_v39 = vor.u32 %v2058_v18, %v2057_v25  ;;  %v2069_v34 = vor.u32 %v2068_v23, %v2067_v29  ;;  %v10608_v18 = vshrl.u32 %v7578_v10, 16  ;;  %5867 = vmatpush3.bf16.msra.mxu0 %v6840_v8 }
 0x19b   : > { %v8270_v9 = vadd.f32 %v1666_v60, %v8093_v24  ;;  %v2062_v40 = vor.u32 %v2061_v31, %v2060_v57  ;;  %v10609_v57 = vshll.u32 %v7578_v10, 16  ;;  %v2074_v38 = vrot.slane %v10610_v12, 4 }
 0x19c   : > { %v1668_v16 = vpop.f32.mrf.mxu1  ;;  %v1213_v20 = vpop.f32.mrf.mxu0  ;;  %6433 = vmatmul.mubr.bf16.gmra.mxu0 %v8245_v51  ;;  %v2071_v21 = vrot.slane %v10608_v18, 4  ;;  %v8297_v59 = vsel %vm1975_vm2, %v2066_v3, %v2069_v34  ;;  %v10612_v10 = vshrl.u32 %v7589_v13, 16  ;;  %v6841_v18 = vld [vmem:[#allocation7 + $0x128] sm:$0xff]   ;;  %v10616_v12 = vshrl.u32 %v10537_v41, 16 }
 0x19d   : > { %v8274_v62 = vadd.f32 %v8039_v58, %v1213_v20  ;;  %6436 = vmatprep.mubr.bf16.mxu0 %v8267_v35  ;;  %v2072_v31 = vrot.slane %v10609_v57, 5  ;;  %v8294_v29 = vsel %vm1975_vm2, %v2059_v39, %v2062_v40  ;;  %v10613_v16 = vshll.u32 %v7589_v13, 16  ;;  %v6842_v57 = vld [vmem:[#allocation7 + $0xe8] sm:$0xff]   ;;  %5868 = vmatprep.subr.bf16.mxu0 %v6841_v18 }
 0x19e   : > { %v1671_v45 = vpop.f32.mrf.mxu1  ;;  %2399 = vmatmul.mubr.bf16.gmra.mxu1 %v8192_v17  ;;  %v1215_v24 = vpop.f32.mrf.mxu0  ;;  %v10611_v17 = vshll.u32 %v7581_v11, 16  ;;  %v2078_v44 = vrot.slane %v10612_v10, 4  ;;  %v10614_v11 = vshrl.u32 %v7592_v14, 16  ;;  %5869 = vmatpush3.bf16.msra.mxu0 %v6842_v57  ;;  %v10620_v57 = vld [vmem:[#allocation29_spill] sm:$0xff] }
 0x19f   : > { %v8279_v37 = vadd.f32 %v1671_v45, %v8110_v27  ;;  %2406 = vmatprep.mubr.bf16.mxu1 %v8221_v30  ;;  %v2079_v20 = vrot.slane %v10613_v16, 5  ;;  %v2073_v34 = vor.u32 %v2072_v31, %v2071_v21 }
 0x1a0   : > { %v1673_v25 = vpop.f32.mrf.mxu1  ;;  %v1216_v58 = vpop.f32.mrf.mxu0  ;;  %v2075_v1 = vrot.slane %v10611_v17, 5  ;;  %v2081_v36 = vrot.slane %v10614_v11, 4  ;;  %v10617_v17 = vshll.u32 %v10537_v41, 16  ;;  %v6843_v11 = vld [vmem:[#allocation7 + $0x160] sm:$0xff]  }
 0x1a1   : > { %v8291_v27 = vadd.f32 %v8045_v28, %v1216_v58  ;;  %v10615_v28 = vshll.u32 %v7592_v14, 16  ;;  %v2080_v14 = vor.u32 %v2079_v20, %v2078_v44  ;;  %6458 = vmatprep.subr.bf16.mxu1 %v6843_v11 }
 0x1a2   : > { %v1674_v23 = vpop.f32.mrf.mxu1  ;;  %v1218_v60 = vpop.f32.mrf.mxu0  ;;  %v2076_v24 = vor.u32 %v2075_v1, %v2074_v38  ;;  %v2085_v38 = vrot.slane %v10616_v12, 4  ;;  %v2086_v1 = vrot.slane %v10617_v17, 5  ;;  %6459 = vmatpush3.bf16.msra.mxu1 %v6843_v11 }
 0x1a3   : > { %v2082_v45 = vrot.slane %v10615_v28, 5  ;;  %v8308_v39 = vadd.f32 %v1674_v23, %v8118_v2  ;;  %v10619_v60 = vshll.u32 %v10538_v55, 16 }
 0x1a4   : > { %v1676_v40 = vpop.f32.mrf.mxu1  ;;  %v1221_v3 = vpop.f32.mrf.mxu0  ;;  %6437 = vmatmul.mubr.bf16.gmra.mxu0 %v8294_v29  ;;  %v2087_v41 = vor.u32 %v2086_v1, %v2085_v38  ;;  %v6847_v1 = vld [vmem:[#allocation7 + $0xd8] sm:$0xff]  }
 0x1a5   : > { %v8312_v8 = vadd.f32 %v8065_v32, %v1221_v3  ;;  %6440 = vmatprep.mubr.bf16.mxu0 %v8297_v59  ;;  %v2083_v58 = vor.u32 %v2082_v45, %v2081_v36  ;;  %v8321_v32 = vsel %vm1975_vm2, %v2073_v34, %v2076_v24  ;;  %v2089_v10 = vrot.slane %v10619_v60, 5 }
 0x1a6   : > { %v1679_v13 = vpop.f32.mrf.mxu1  ;;  %2407 = vmatmul.mubr.bf16.gmra.mxu1 %v8218_v46  ;;  %v1223_v25 = vpop.f32.mrf.mxu0 }
 0x1a7   : > { %v8317_v2 = vadd.f32 %v1679_v13, %v8136_v61  ;;  %2414 = vmatprep.mubr.bf16.mxu1 %v8245_v51  ;;  %v10618_v61 = vshrl.u32 %v10538_v55, 16  ;;  %v8335_v20 = vsel %vm1975_vm2, %v2080_v14, %v2083_v58  ;;  %v6845_v13 = vld [vmem:[#allocation7 + $0xe0] sm:$0xff]  }
 0x1a8   : > { %v1681_v21 = vpop.f32.mrf.mxu1  ;;  %v1224_v31 = vpop.f32.mrf.mxu0 }
 0x1a9   : > { %v8326_v46 = vadd.f32 %v8072_v22, %v1224_v31  ;;  %v2088_v23 = vrot.slane %v10618_v61, 4 }
 0x1aa   : > { %v1682_v44 = vpop.f32.mrf.mxu1  ;;  %v1226_v16 = vpop.f32.mrf.mxu0 }
 0x1ab   : > { %v8338_v36 = vadd.f32 %v1682_v44, %v8144_v53  ;;  %v2090_v55 = vor.u32 %v2089_v10, %v2088_v23  ;;  %v6844_v53 = vld [vmem:[#allocation7 + $0x120] sm:$0xff]  }
 0x1ac   : > { %v1684_v22 = vpop.f32.mrf.mxu1  ;;  %v8340_v28 = vpop.f32.mrf.mxu0  ;;  %6441 = vmatmul.mubr.bf16.gmra.mxu0 %v8321_v32  ;;  %5870 = vmatprep.subr.bf16.mxu0 %v6844_v53 }
 0x1ad   : > { %6444 = vmatprep.mubr.bf16.mxu0 %v8335_v20  ;;  %v8352_v25 = vsel %vm1975_vm2, %v2087_v41, %v2090_v55  ;;  %5871 = vmatpush3.bf16.msra.mxu0 %v6845_v13  ;;  %v6849_v13 = vld [vmem:[#allocation7 + $0x110] sm:$0xff]  }
 0x1ae   : > { %v1687_v45 = vpop.f32.mrf.mxu1  ;;  %2415 = vmatmul.mubr.bf16.gmra.mxu1 %v8221_v30  ;;  %v1231_v40 = vpop.f32.mrf.mxu0 }
 0x1af   : > { %v8346_v3 = vadd.f32 %v1687_v45, %v8162_v49  ;;  %2422 = vmatprep.mubr.bf16.mxu1 %v8267_v35 }
 0x1b0   : > { %v1689_v34 = vpop.f32.mrf.mxu1  ;;  %v8349_v24 = vpop.f32.mrf.mxu0 }
 0x1b2   : > { %v1690_v14 = vpop.f32.mrf.mxu1  ;;  %v1234_v58 = vpop.f32.mrf.mxu0 }
 0x1b3   : > { %v8355_v30 = vadd.f32 %v1690_v14, %v8181_v19  ;;  %v6846_v19 = vld [vmem:[#allocation7 + $0x118] sm:$0xff]  }
 0x1b4   : > { %v1692_v18 = vpop.f32.mrf.mxu1  ;;  %v8357_v49 = vpop.f32.mrf.mxu0  ;;  %6445 = vmatmul.mubr.bf16.gmra.mxu0 %v8352_v25  ;;  %5872 = vmatprep.subr.bf16.mxu0 %v6846_v19 }
 0x1b5   : > { %6448 = vmatprep.mubr.bf16.mxu0 %v10620_v57  ;;  %5873 = vmatpush3.bf16.msra.mxu0 %v6847_v1  ;;  %v6850_v18 = vld [vmem:[#allocation7 + $0xd0] sm:$0xff]  }
 0x1b6   : > { %v1695_v21 = vpop.f32.mrf.mxu1  ;;  %2423 = vmatmul.mubr.bf16.gmra.mxu1 %v8245_v51  ;;  %v1239_v31 = vpop.f32.mrf.mxu0  ;;  %5874 = vmatprep.subr.bf16.mxu0 %v6849_v13 }
 0x1b7   : > { %v8363_v12 = vadd.f32 %v1695_v21, %v8198_v42  ;;  %2430 = vmatprep.mubr.bf16.mxu1 %v8294_v29  ;;  %v6848_v42 = vld [vmem:[#allocation7 + $0x158] sm:$0xff]  }
 0x1b8   : > { %v1697_v38 = vpop.f32.mrf.mxu1  ;;  %v8366_v17 = vpop.f32.mrf.mxu0  ;;  %6460 = vmatprep.subr.bf16.mxu1 %v6848_v42 }
 0x1b9   : > { %6461 = vmatpush3.bf16.msra.mxu1 %v6848_v42  ;;  %5875 = vmatpush3.bf16.msra.mxu0 %v6850_v18  ;;  %v6851_v38 = vld [vmem:[#allocation7 + $0x108] sm:$0xff]   ;;  %v6854_v42 = vld [vmem:[#allocation7 + $0x100] sm:$0xff]  }
 0x1ba   : > { %v1698_v61 = vpop.f32.mrf.mxu1  ;;  %v1242_v23 = vpop.f32.mrf.mxu0  ;;  %5876 = vmatprep.subr.bf16.mxu0 %v6851_v38 }
 0x1bb   : > { %v8369_v60 = vadd.f32 %v1698_v61, %v8215_v7  ;;  %v6853_v23 = vld [vmem:[#allocation7 + $0x150] sm:$0xff]  }
 0x1bc   : > { %v1700_v10 = vpop.f32.mrf.mxu1  ;;  %v8371_v51 = vpop.f32.mrf.mxu0  ;;  %6449 = vmatmul.mubr.bf16.gmra.mxu0 %v10620_v57  ;;  %6462 = vmatprep.subr.bf16.mxu1 %v6853_v23 }
 0x1bd   : > { %6463 = vmatpush3.bf16.msra.mxu1 %v6853_v23  ;;  %v10623_v23 = vld [vmem:[#allocation17_spill] sm:$0xff] }
 0x1be   : > { %v1703_v44 = vpop.f32.mrf.mxu1  ;;  %2431 = vmatmul.mubr.bf16.gmra.mxu1 %v8267_v35  ;;  %v1247_v16 = vpop.f32.mrf.mxu0 }
 0x1bf   : > { %v8376_v11 = vadd.f32 %v1703_v44, %v8236_v56  ;;  %2438 = vmatprep.mubr.bf16.mxu1 %v8297_v59 }
 0x1c0   : > { %v1705_v7 = vpop.f32.mrf.mxu1  ;;  %v8379_v22 = vpop.f32.mrf.mxu0 }
 0x1c2   : > { %v1706_v41 = vpop.f32.mrf.mxu1  ;;  %v1250_v55 = vpop.f32.mrf.mxu0 }
 0x1c3   : > { %v8382_v45 = vadd.f32 %v1706_v41, %v8258_v6 }
 0x1c4   : > { %v1708_v40 = vpop.f32.mrf.mxu1  ;;  %v8384_v53 = vpop.f32.mrf.mxu0 }
 0x1c6   : > { %v1711_v35 = vpop.f32.mrf.mxu1  ;;  %2439 = vmatmul.mubr.bf16.gmra.mxu1 %v8294_v29  ;;  %v1255_v34 = vpop.f32.mrf.mxu0 }
 0x1c7   : > { %v8388_v56 = vadd.f32 %v1711_v35, %v8274_v62  ;;  %2446 = vmatprep.mubr.bf16.mxu1 %v8321_v32  ;;  %v6852_v62 = vld [vmem:[#allocation7 + $0xc8] sm:$0xff]  }
 0x1c8   : > { %v1713_v14 = vpop.f32.mrf.mxu1  ;;  %v8391_v58 = vpop.f32.mrf.mxu0  ;;  %5877 = vmatpush3.bf16.msra.mxu0 %v6852_v62  ;;  %v6856_v34 = vld [vmem:[#allocation7 + $0x148] sm:$0xff]  }
 0x1c9   : > { %5878 = vmatprep.subr.bf16.mxu0 %v6854_v42  ;;  %6464 = vmatprep.subr.bf16.mxu1 %v6856_v34  ;;  %v1415_v42 = vadd.f32 %v10623_v23, %v8357_v49 }
 0x1ca   : > { %v1714_v6 = vpop.f32.mrf.mxu1  ;;  %v1258_v21 = vpop.f32.mrf.mxu0  ;;  %6465 = vmatpush3.bf16.msra.mxu1 %v6856_v34 }
 0x1cb   : > { %v8394_v31 = vadd.f32 %v1714_v6, %v8291_v27  ;;  %v10622_v21 = vld [vmem:[#allocation27_spill] sm:$0xff] }
 0x1cc   : > { %v1716_v29 = vpop.f32.mrf.mxu1  ;;  %v8396_v19 = vpop.f32.mrf.mxu0  ;;  %v1410_v38 = vadd.f32 %v10622_v21, %v8349_v24 }
 0x1ce   : > { %v1719_v1 = vpop.f32.mrf.mxu1  ;;  %2447 = vmatmul.mubr.bf16.gmra.mxu1 %v8297_v59  ;;  %v1263_v61 = vpop.f32.mrf.mxu0  ;;  %v6855_v59 = vld [vmem:[#allocation7 + $0xc0] sm:$0xff]  }
 0x1cf   : > { %v8400_v10 = vadd.f32 %v1719_v1, %v8312_v8  ;;  %2454 = vmatprep.mubr.bf16.mxu1 %v8335_v20  ;;  %v10621_v8 = vld [vmem:[#allocation26_spill] sm:$0xff]  ;;  %5879 = vmatpush3.bf16.msra.mxu0 %v6855_v59 }
 0x1d0   : > { %v1721_v27 = vpop.f32.mrf.mxu1  ;;  %v8403_v44 = vpop.f32.mrf.mxu0  ;;  %v1407_v35 = vadd.f32 %v10621_v8, %v8340_v28 }
 0x1d2   : > { %v1722_v16 = vpop.f32.mrf.mxu1  ;;  %v1266_v7 = vpop.f32.mrf.mxu0 }
 0x1d3   : > { %v8406_v41 = vadd.f32 %v1722_v16, %v8326_v46 }
 0x1d4   : > { %v1724_v55 = vpop.f32.mrf.mxu1  ;;  %v8408_v40 = vpop.f32.mrf.mxu0 }
 0x1d5   : > { %v1418_v55 = vadd.f32 %v8105_v15, %v8366_v17 }
 0x1d6   : > { %v1727_v13 = vpop.f32.mrf.mxu1  ;;  %2455 = vmatmul.mubr.bf16.gmra.mxu1 %v8321_v32  ;;  %v1271_v14 = vpop.f32.mrf.mxu0  ;;  %v6857_v32 = vld [vmem:[#allocation7 + $0x140] sm:$0xff]  }
 0x1d7   : > { %v8413_v18 = vadd.f32 %v1727_v13, %v1407_v35  ;;  %2462 = vmatprep.mubr.bf16.mxu1 %v8352_v25  ;;  %6466 = vmatprep.subr.bf16.mxu1 %v6857_v32 }
 0x1d8   : > { %v1729_v46 = vpop.f32.mrf.mxu1  ;;  %v8416_v6 = vpop.f32.mrf.mxu0  ;;  %6467 = vmatpush3.bf16.msra.mxu1 %v6857_v32 }
 0x1d9   : > { %v8440_v46 = vld [vmem:[#allocation7 + $0xb8] sm:$0xff]  }
 0x1da   : > { %v1730_v29 = vpop.f32.mrf.mxu1  ;;  %v1274_v28 = vpop.f32.mrf.mxu0  ;;  %6500 = vmatprep.subr.bf16.mxu0 %v8440_v46 }
 0x1db   : > { %v8420_v62 = vadd.f32 %v1730_v29, %v1410_v38  ;;  %v1426_v29 = vadd.f32 %v8095_v48, %v8379_v22  ;;  %v1434_v48 = vadd.f32 %v8125_v0, %v8391_v58 }
 0x1dc   : > { %v1732_v1 = vpop.f32.mrf.mxu1  ;;  %v8422_v61 = vpop.f32.mrf.mxu0 }
 0x1de   : > { %v1735_v27 = vpop.f32.mrf.mxu1  ;;  %2463 = vmatmul.mubr.bf16.gmra.mxu1 %v8335_v20  ;;  %v1279_v16 = vpop.f32.mrf.mxu0  ;;  %v10624_v20 = vld [vmem:[#allocation28_spill] sm:$0xff] }
 0x1df   : > { %v8427_v7 = vadd.f32 %v1735_v27, %v1415_v42  ;;  %2470 = vmatprep.mubr.bf16.mxu1 %v10620_v57  ;;  %v1423_v14 = vadd.f32 %v10624_v20, %v8371_v51 }
 0x1e0   : > { %v1737_v24 = vpop.f32.mrf.mxu1  ;;  %v8430_v59 = vpop.f32.mrf.mxu0 }
 0x1e2   : > { %v1738_v8 = vpop.f32.mrf.mxu1  ;;  %v1282_v35 = vpop.f32.mrf.mxu0 }
 0x1e3   : > { %v8434_v34 = vadd.f32 %v1738_v8, %v1418_v55 }
 0x1e4   : > { %v1740_v49 = vpop.f32.mrf.mxu1  ;;  %v8436_v13 = vpop.f32.mrf.mxu0 }
 0x1e6   : > { %v1743_v57 = vpop.f32.mrf.mxu1  ;;  %2471 = vmatmul.mubr.bf16.gmra.mxu1 %v8352_v25  ;;  %v1287_v21 = vpop.f32.mrf.mxu0  ;;  %v1431_v25 = vadd.f32 %v8115_v54, %v8384_v53 }
 0x1e7   : > { %v8443_v38 = vadd.f32 %v1743_v57, %v1423_v14  ;;  %v1439_v14 = vadd.f32 %v8113_v50, %v8396_v19 }
 0x1e8   : > { %v1745_v15 = vpop.f32.mrf.mxu1  ;;  %v8446_v17 = vpop.f32.mrf.mxu0 }
 0x1ea   : > { %v1746_v28 = vpop.f32.mrf.mxu1  ;;  %v1290_v1 = vpop.f32.mrf.mxu0 }
 0x1eb   : > { %v8450_v32 = vadd.f32 %v1746_v28, %v1426_v29  ;;  %v1442_v29 = vadd.f32 %v8120_v47, %v8403_v44 }
 0x1ec   : > { %v1748_v51 = vpop.f32.mrf.mxu1  ;;  %v8452_v23 = vpop.f32.mrf.mxu0 }
 0x1ee   : > { %v1751_v42 = vpop.f32.mrf.mxu1  ;;  %v1295_v27 = vpop.f32.mrf.mxu0 }
 0x1ef   : > { %v8456_v16 = vadd.f32 %v1751_v42, %v1431_v25  ;;  %v10625_v25 = vld [vmem:[#allocation21_spill] sm:$0xff] }
 0x1f0   : > { %v1753_v24 = vpop.f32.mrf.mxu1  ;;  %v8458_v55 = vpop.f32.mrf.mxu0  ;;  %v1447_v42 = vadd.f32 %v10625_v25, %v8408_v40 }
 0x1f2   : > { %v1754_v22 = vpop.f32.mrf.mxu1  ;;  %v1298_v8 = vpop.f32.mrf.mxu0 }
 0x1f3   : > { %v8462_v35 = vadd.f32 %v1754_v22, %v1434_v48  ;;  %v1450_v22 = vadd.f32 %v8156_v52, %v8416_v6 }
 0x1f4   : > { %v1756_v49 = vpop.f32.mrf.mxu1  ;;  %v6366_v20 = vpop.f32.mrf.mxu0 }
 0x1f5   : > { %v8467_v54 = vadd.f32 %v6366_v20, %v8241_v63 }
 0x1f6   : > { %v1759_v53 = vpop.f32.mrf.mxu1  ;;  %v1832_v57 = vpop.f32.mrf.mxu0 }
 0x1f7   : > { %v8469_v21 = vadd.f32 %v1759_v53, %v1439_v14  ;;  %v8472_v15 = vadd.f32 %v1832_v57, %v8205_v26  ;;  %v10626_v53 = vld [vmem:[#allocation18_spill] sm:$0xff] }
 0x1f8   : > { %v1761_v0 = vpop.f32.mrf.mxu1  ;;  %v6367_v58 = vpop.f32.mrf.mxu0  ;;  %v1455_v57 = vadd.f32 %v10626_v53, %v8422_v61 }
 0x1f9   : > { %v8477_v28 = vadd.f32 %v6367_v58, %v8270_v9 }
 0x1fa   : > { %v1762_v1 = vpop.f32.mrf.mxu1  ;;  %v8479_v50 = vpop.f32.mrf.mxu0 }
 0x1fb   : > { %v8481_v63 = vadd.f32 %v1762_v1, %v1442_v29  ;;  %v1458_v1 = vadd.f32 %v8146_v4, %v8430_v59 }
 0x1fc   : > { %v1764_v19 = vpop.f32.mrf.mxu1  ;;  %v6370_v51 = vpop.f32.mrf.mxu0 }
 0x1fd   : > { %v8486_v26 = vadd.f32 %v6370_v51, %v8317_v2 }
 0x1fe   : > { %v1767_v27 = vpop.f32.mrf.mxu1  ;;  %v1848_v24 = vpop.f32.mrf.mxu0 }
 0x1ff   : > { %v8488_v48 = vadd.f32 %v1767_v27, %v1447_v42  ;;  %v8491_v47 = vadd.f32 %v1848_v24, %v8279_v37  ;;  %v10627_v27 = vld [vmem:[#allocation23_spill] sm:$0xff] }
 0x200   : > { %v1769_v9 = vpop.f32.mrf.mxu1  ;;  %v6371_v44 = vpop.f32.mrf.mxu0  ;;  %v1463_v24 = vadd.f32 %v10627_v27, %v8436_v13 }
 0x201   : > { %v8496_v8 = vadd.f32 %v6371_v44, %v8338_v36  ;;  %v6861_v9 = vld [vmem:[#allocation7 + $0x78] sm:$0xff]  }
 0x202   : > { %v1770_v49 = vpop.f32.mrf.mxu1  ;;  %v8498_v40 = vpop.f32.mrf.mxu0  ;;  %6000 = vmatprep.subr.bf16.mxu1 %v6861_v9 }
 0x203   : > { %v8500_v2 = vadd.f32 %v1770_v49, %v1450_v22 }
 0x204   : > { %v1772_v20 = vpop.f32.mrf.mxu1  ;;  %v6374_v14 = vpop.f32.mrf.mxu0 }
 0x205   : > { %v8505_v37 = vadd.f32 %v6374_v14, %v8363_v12  ;;  %v1466_v20 = vadd.f32 %v8194_v43, %v8446_v17 }
 0x206   : > { %v1775_v0 = vpop.f32.mrf.mxu1  ;;  %v1864_v58 = vpop.f32.mrf.mxu0 }
 0x207   : > { %v8507_v29 = vadd.f32 %v1775_v0, %v1455_v57  ;;  %v8510_v52 = vadd.f32 %v1864_v58, %v8346_v3  ;;  %v10628_v58 = vld [vmem:[#allocation22_spill] sm:$0xff] }
 0x208   : > { %v1777_v36 = vpop.f32.mrf.mxu1  ;;  %v6375_v6 = vpop.f32.mrf.mxu0 }
 0x209   : > { %v8515_v19 = vadd.f32 %v6375_v6, %v8369_v60 }
 0x20a   : > { %v1778_v51 = vpop.f32.mrf.mxu1  ;;  %v8517_v61 = vpop.f32.mrf.mxu0 }
 0x20b   : > { %v8519_v12 = vadd.f32 %v1778_v51, %v1458_v1 }
 0x20c   : > { %v1780_v25 = vpop.f32.mrf.mxu1  ;;  %v6378_v42 = vpop.f32.mrf.mxu0 }
 0x20d   : > { %v8524_v3 = vadd.f32 %v6378_v42, %v8388_v56  ;;  %v1474_v25 = vadd.f32 %v8189_v5, %v8458_v55 }
 0x20e   : > { %v1783_v44 = vpop.f32.mrf.mxu1  ;;  %v1880_v22 = vpop.f32.mrf.mxu0 }
 0x20f   : > { %v8526_v4 = vadd.f32 %v1783_v44, %v1463_v24  ;;  %v8529_v60 = vadd.f32 %v1880_v22, %v8376_v11  ;;  %v1471_v11 = vadd.f32 %v10628_v58, %v8452_v23 }
 0x210   : > { %v1785_v59 = vpop.f32.mrf.mxu1  ;;  %v6379_v49 = vpop.f32.mrf.mxu0 }
 0x211   : > { %v8534_v14 = vadd.f32 %v6379_v49, %v8394_v31 }
 0x212   : > { %v1786_v13 = vpop.f32.mrf.mxu1  ;;  %v8536_v56 = vpop.f32.mrf.mxu0 }
 0x213   : > { %v8538_v53 = vadd.f32 %v1786_v13, %v1466_v20 }
 0x214   : > { %v1788_v57 = vpop.f32.mrf.mxu1  ;;  %v6382_v0 = vpop.f32.mrf.mxu0 }
 0x215   : > { %v8543_v36 = vadd.f32 %v6382_v0, %v8413_v18 }
 0x216   : > { %v1791_v6 = vpop.f32.mrf.mxu1  ;;  %v1896_v1 = vpop.f32.mrf.mxu0 }
 0x217   : > { %v1792_v51 = vadd.f32 %v1791_v6, %v1471_v11  ;;  %v8546_v43 = vadd.f32 %v1896_v1, %v8400_v10 }
 0x218   : > { %v1793_v31 = vpop.f32.mrf.mxu1  ;;  %v6383_v17 = vpop.f32.mrf.mxu0 }
 0x219   : > { %v8551_v42 = vadd.f32 %v6383_v17, %v8420_v62 }
 0x21a   : > { %v1794_v27 = vpop.f32.mrf.mxu1  ;;  %v8553_v24 = vpop.f32.mrf.mxu0 }
 0x21b   : > { %v1795_v23 = vadd.f32 %v1794_v27, %v1474_v25 }
 0x21c   : > { %v1796_v18 = vpop.f32.mrf.mxu1  ;;  %v6386_v9 = vpop.f32.mrf.mxu0 }
 0x21d   : > { %v8556_v44 = vadd.f32 %v6386_v9, %v8443_v38 }
 0x21e   : > { %v2336_v22 = vpop.f32.mrf.mxu1  ;;  %v1912_v10 = vpop.f32.mrf.mxu0 }
 0x21f   : > { %v8559_v59 = vadd.f32 %v1912_v10, %v8427_v7 }
 0x220   : > { %v2338_v49 = vpop.f32.mrf.mxu1  ;;  %v6387_v20 = vpop.f32.mrf.mxu0 }
 0x221   : > { %v8562_v5 = vadd.f32 %v6387_v20, %v8450_v32 }
 0x222   : > { %v2339_v62 = vpop.f32.mrf.mxu1  ;;  %v8564_v55 = vpop.f32.mrf.mxu0 }
 0x224   : > { %v2341_v13 = vpop.f32.mrf.mxu1  ;;  %v6390_v57 = vpop.f32.mrf.mxu0 }
 0x225   : > { %v8567_v0 = vadd.f32 %v6390_v57, %v8469_v21 }
 0x226   : > { %v2344_v38 = vpop.f32.mrf.mxu1  ;;  %v1928_v58 = vpop.f32.mrf.mxu0 }
 0x227   : > { %v8570_v11 = vadd.f32 %v1928_v58, %v8456_v16 }
 0x228   : > { %v2346_v7 = vpop.f32.mrf.mxu1  ;;  %v6391_v6 = vpop.f32.mrf.mxu0 }
 0x229   : > { %v8573_v1 = vadd.f32 %v6391_v6, %v8481_v63 }
 0x22a   : > { %v2347_v32 = vpop.f32.mrf.mxu1  ;;  %v8575_v31 = vpop.f32.mrf.mxu0 }
 0x22b   : > { %10629 = vst [vmem:[#allocation24_spill] sm:$0xff] %v8573_v1 }
 0x22c   : > { %v2349_v17 = vpop.f32.mrf.mxu1  ;;  %v6394_v25 = vpop.f32.mrf.mxu0 }
 0x22d   : > { %v8578_v27 = vadd.f32 %v6394_v25, %v8507_v29 }
 0x22e   : > { %v2352_v21 = vpop.f32.mrf.mxu1  ;;  %v1944_v18 = vpop.f32.mrf.mxu0 }
 0x22f   : > { %10630 = vst [vmem:[#allocation25_spill] sm:$0xff] %v8578_v27  ;;  %v8581_v9 = vadd.f32 %v1944_v18, %v8488_v48 }
 0x230   : > { %v2354_v16 = vpop.f32.mrf.mxu1  ;;  %v6395_v10 = vpop.f32.mrf.mxu0 }
 0x231   : > { %10631 = vst [vmem:[#allocation29_spill] sm:$0xff] %v8581_v9  ;;  %v8584_v49 = vadd.f32 %v6395_v10, %v8519_v12 }
 0x232   : > { %v8586_v63 = vpop.f32.mrf.mxu1  ;;  %v8588_v20 = vpop.f32.mrf.mxu0 }
 0x233   : > { %10632 = vst [vmem:[#allocation26_spill] sm:$0xff] %v8584_v49 }
 0x234   : > { %v2357_v13 = vpop.f32.mrf.mxu1  ;;  %v6398_v57 = vpop.f32.mrf.mxu0 }
 0x235   : > { %v8590_v58 = vadd.f32 %v6398_v57, %v1792_v51  ;;  %v8602_v51 = vld [vmem:[%s10308_s2] ss:$0 sm:$0xff] }
 0x236   : > { %v2360_v29 = vpop.f32.mrf.mxu1  ;;  %v1960_v7 = vpop.f32.mrf.mxu0 }
 0x237   : > { %10633 = vst [vmem:[#allocation27_spill] sm:$0xff] %v8590_v58  ;;  %v8593_v6 = vadd.f32 %v1960_v7, %v8526_v4 }
 0x238   : > { %v2362_v48 = vpop.f32.mrf.mxu1  ;;  %v6399_v17 = vpop.f32.mrf.mxu0 }
 0x239   : > { %10634 = vst [vmem:[#allocation17_spill] sm:$0xff] %v8593_v6  ;;  %v8595_v25 = vadd.f32 %v6399_v17, %v1795_v23  ;;  %v8609_v17 = vld [vmem:[%s10309_s3] ss:$0 sm:$0xff]  ;;  %v1836_v6 = vadd.f32 %v8479_v50, %v8232_v33 }
 0x23a   : > { %v2363_v18 = vpop.f32.mrf.mxu1  ;;  %v8597_v12 = vpop.f32.mrf.mxu0 }
 0x23b   : > { %10635 = vst [vmem:[#allocation28_spill] sm:$0xff] %v8595_v25 }
 0x23c   : > { %v2365_v16 = vpop.f32.mrf.mxu1  ;;  %v6418_v10 = vpop.f32.mrf.mxu0 }
 0x23d   : > { %v2522_v49 = vadd.f32 %v6418_v10, %v2344_v38 }
 0x23e   : > { %v2368_v13 = vpop.f32.mrf.mxu1  ;;  %v2513_v57 = vpop.f32.mrf.mxu0 }
 0x23f   : > { %v2658_v4 = vadd.f32 %v2522_v49, %v8467_v54  ;;  %v2514_v7 = vadd.f32 %v2513_v57, %v2336_v22 }
 0x240   : > { %v2370_v48 = vpop.f32.mrf.mxu1  ;;  %v6419_v58 = vpop.f32.mrf.mxu0 }
 0x241   : > { %v2701_v23 = vmul.f32 %v8602_v51, %v2658_v4  ;;  %v2656_v38 = vadd.f32 %v2514_v7, %v8472_v15  ;;  %v2525_v16 = vadd.f32 %v6419_v58, %v2347_v32 }
 0x242   : > { %v8612_v10 = vpop.f32.mrf.mxu1  ;;  %v2516_v25 = vpop.f32.mrf.mxu0 }
 0x243   : > { %v2699_v54 = vmul.f32 %v8602_v51, %v2656_v38  ;;  %v2659_v22 = vadd.f32 %v2525_v16, %v8477_v28  ;;  %v2517_v49 = vadd.f32 %v2516_v25, %v2339_v62  ;;  %v2744_v57 = vadd.f32 %v8609_v17, %v2701_v23 }
 0x244   : > { %v2373_v4 = vpop.f32.mrf.mxu1  ;;  %v6422_v48 = vpop.f32.mrf.mxu0 }
 0x245   : > { %v2742_v27 = vadd.f32 %v8609_v17, %v2699_v54  ;;  %v2702_v15 = vmul.f32 %v8602_v51, %v2659_v22  ;;  %v2657_v32 = vadd.f32 %v2517_v49, %v1836_v6  ;;  %v2538_v58 = vadd.f32 %v6422_v48, %v2360_v29 }
 0x246   : > { %v2376_v7 = vpop.f32.mrf.mxu1  ;;  %v2529_v9 = vpop.f32.mrf.mxu0  ;;  %v2780_v50 = vmax.f32 %v2744_v57, 0.0  ;;  %v1852_v48 = vadd.f32 %v8498_v40, %v8308_v39  ;;  %v10636_v57 = vmov 0.0   ;;  %v1868_v39 = vadd.f32 %v8517_v61, %v8355_v30 }
 0x247   : > { %v2745_v1 = vadd.f32 %v8609_v17, %v2702_v15  ;;  %v2700_v33 = vmul.f32 %v8602_v51, %v2657_v32  ;;  %v2662_v28 = vadd.f32 %v2538_v58, %v8486_v26  ;;  %v2530_v62 = vadd.f32 %v2529_v9, %v2352_v21 }
 0x248   : > { %v2378_v25 = vpop.f32.mrf.mxu1  ;;  %v6423_v23 = vpop.f32.mrf.mxu0  ;;  %v2778_v38 = vmax.f32 %v2742_v27, 0.0 }
 0x249   : > { %v2781_v16 = vmax.f32 %v2745_v1, 0.0  ;;  %v2743_v54 = vadd.f32 %v8609_v17, %v2700_v33  ;;  %v2541_v4 = vadd.f32 %v6423_v23, %v2363_v18  ;;  %v2705_v6 = vmul.f32 %v8602_v51, %v2662_v28 }
 0x24a   : > { %v2660_v29 = vadd.f32 %v2530_v62, %v8491_v47  ;;  %v2379_v22 = vpop.f32.mrf.mxu1  ;;  %v2532_v49 = vpop.f32.mrf.mxu0  ;;  %v8634_v1 = vpack.c.bf16 %v2780_v50, %v10636_v57  ;;  %v2827_v40 = vmul.f32 0.0, %v2778_v38 }
 0x24b   : > { %v8630_v15 = vpack.c.bf16 %v10636_v57, %v2781_v16  ;;  %v2779_v26 = vmax.f32 %v2743_v54, 0.0  ;;  %v2663_v21 = vadd.f32 %v2541_v4, %v8496_v8  ;;  %v2748_v27 = vadd.f32 %v8609_v17, %v2705_v6 }
 0x24c   : > { %10638 = vst [vmem:[#allocation18_spill] sm:$0xff] %v8634_v1  ;;  %v2703_v9 = vmul.f32 %v8602_v51, %v2660_v29  ;;  %v2533_v47 = vadd.f32 %v2532_v49, %v8586_v63  ;;  %v2381_v18 = vpop.f32.mrf.mxu1  ;;  %v6426_v32 = vpop.f32.mrf.mxu0  ;;  %v8644_v8 = vadd.f32 %v8536_v56, %v8382_v45  ;;  %v3310_v56 = vrot.slane %v8634_v1, 4 }
 0x24d   : > { %10637 = vst [vmem:[#allocation21_spill] sm:$0xff] %v8630_v15  ;;  %v2828_v58 = vmul.f32 0.0, %v2779_v26  ;;  %v2706_v33 = vmul.f32 %v8602_v51, %v2663_v21  ;;  %v2554_v62 = vadd.f32 %v6426_v32, %v2376_v7  ;;  %v2784_v63 = vmax.f32 %v2748_v27, 0.0 }
 0x24e   : > { %v2746_v50 = vadd.f32 %v8609_v17, %v2703_v9  ;;  %v2661_v28 = vadd.f32 %v2533_v47, %v1852_v48  ;;  %v2384_v25 = vpop.f32.mrf.mxu1  ;;  %v2545_v23 = vpop.f32.mrf.mxu0  ;;  %v3311_v30 = vrot.slane %v8630_v15, 4  ;;  %v8653_v29 = vpack.c.bf16 %v2827_v40, %v10636_v57 }
 0x24f   : > { %v2749_v16 = vadd.f32 %v8609_v17, %v2706_v33  ;;  %v2546_v54 = vadd.f32 %v2545_v23, %v2368_v13  ;;  %v2666_v4 = vadd.f32 %v2554_v62, %v8505_v37  ;;  %v8656_v7 = vpack.c.bf16 %v10636_v57, %v2828_v58 }
 0x250   : > { %v2782_v61 = vmax.f32 %v2746_v50, 0.0  ;;  %v2704_v38 = vmul.f32 %v8602_v51, %v2661_v28  ;;  %v2386_v6 = vpop.f32.mrf.mxu1  ;;  %v6427_v45 = vpop.f32.mrf.mxu0  ;;  %10639 = vst [vmem:[#allocation23_spill] sm:$0xff] %v8653_v29  ;;  %v8665_v47 = vpack.c.bf16 %v2784_v63, %v10636_v57  ;;  %v8669_v32 = vsel %vm862_vm0, %v3310_v56, %v3311_v30 }
 0x251   : > { %10640 = vst [vmem:[#allocation22_spill] sm:$0xff] %v8656_v7  ;;  %v2785_v49 = vmax.f32 %v2749_v16, 0.0  ;;  %v2664_v13 = vadd.f32 %v2546_v54, %v8510_v52  ;;  %v2709_v37 = vmul.f32 %v8602_v51, %v2666_v4  ;;  %v2557_v21 = vadd.f32 %v6427_v45, %v2379_v22  ;;  %3604 = vmatprep.mubr.bf16.mxu0 %v8669_v32  ;;  %v6859_v4 = vld [vmem:[#allocation7 + $0xb0] sm:$0xff]  }
 0x252   : > { %v8660_v48 = vpack.c.bf16 %v2782_v61, %v10636_v57  ;;  %v2747_v26 = vadd.f32 %v8609_v17, %v2704_v38  ;;  %v2387_v27 = vpop.f32.mrf.mxu1  ;;  %v2548_v9 = vpop.f32.mrf.mxu0  ;;  %10642 = vst [vmem:[#allocation31_spill] sm:$0xff] %v8665_v47  ;;  %v3307_v63 = vrot.slane %v8653_v29, 4  ;;  %v3308_v16 = vrot.slane %v8656_v7, 4 }
 0x253   : > { %v2707_v18 = vmul.f32 %v8602_v51, %v2664_v13  ;;  %v2549_v52 = vadd.f32 %v2548_v9, %v8612_v10  ;;  %v8673_v40 = vpack.c.bf16 %v10636_v57, %v2785_v49  ;;  %v2752_v33 = vadd.f32 %v8609_v17, %v2709_v37 }
 0x254   : > { %10641 = vst [vmem:[#allocation30_spill] sm:$0xff] %v8660_v48  ;;  %v2783_v58 = vmax.f32 %v2747_v26, 0.0  ;;  %v2667_v22 = vadd.f32 %v2557_v21, %v8515_v19  ;;  %v2389_v50 = vpop.f32.mrf.mxu1  ;;  %v6430_v28 = vpop.f32.mrf.mxu0  ;;  %v3313_v19 = vrot.slane %v8660_v48, 4  ;;  %v3316_v9 = vrot.slane %v8665_v47, 4 }
 0x255   : > { %10643 = vst [vmem:[#allocation32_spill] sm:$0xff] %v8673_v40  ;;  %v2750_v62 = vadd.f32 %v8609_v17, %v2707_v18  ;;  %v2665_v23 = vadd.f32 %v2549_v52, %v1868_v39  ;;  %v2788_v54 = vmax.f32 %v2752_v33, 0.0  ;;  %v3309_v39 = vsel %vm862_vm0, %v3307_v63, %v3308_v16  ;;  %v6862_v63 = vld [vmem:[#allocation7 + $0x38] sm:$0xff]  }
 0x256   : > { %v8682_v10 = vpack.c.bf16 %v10636_v57, %v2783_v58  ;;  %v2710_v30 = vmul.f32 %v8602_v51, %v2667_v22  ;;  %v2392_v61 = vpop.f32.mrf.mxu1  ;;  %v2561_v38 = vpop.f32.mrf.mxu0  ;;  %3605 = vmatmul.mubr.bf16.vlgmr.msra.gmra.mxu0 %v3309_v39  ;;  %v3317_v33 = vrot.slane %v8673_v40, 4 }
 0x257   : > { %v2786_v6 = vmax.f32 %v2750_v62, 0.0  ;;  %v2708_v45 = vmul.f32 %v8602_v51, %v2665_v23  ;;  %v2570_v56 = vadd.f32 %v6430_v28, %v2392_v61  ;;  %v2562_v13 = vadd.f32 %v2561_v38, %v2384_v25  ;;  %6501 = vmatpush3.bf16.msra.mxu0 %v8440_v46  ;;  %v6860_v46 = vld [vmem:[#allocation7 + $0xa8] sm:$0xff]   ;;  %v6863_v61 = vld [vmem:[#allocation7 + $0x70] sm:$0xff]  }
 0x258   : > { %10644 = vst [vmem:[#allocation33_spill] sm:$0xff] %v8682_v10  ;;  %v2753_v49 = vadd.f32 %v8609_v17, %v2710_v30  ;;  %v2394_v26 = vpop.f32.mrf.mxu1  ;;  %v6431_v37 = vpop.f32.mrf.mxu0  ;;  %v3314_v21 = vrot.slane %v8682_v10, 4  ;;  %v8692_v18 = vpack.c.bf16 %v2788_v54, %v10636_v57  ;;  %6502 = vmatprep.subr.bf16.mxu0 %v6859_v4 }
 0x259   : > { %v2751_v52 = vadd.f32 %v8609_v17, %v2708_v45  ;;  %v2670_v58 = vadd.f32 %v2570_v56, %v8524_v3  ;;  %v8699_v22 = vpack.c.bf16 %v2786_v6, %v10636_v57  ;;  %v2668_v50 = vadd.f32 %v2562_v13, %v8529_v60 }
 0x25a   : > { %v2789_v25 = vmax.f32 %v2753_v49, 0.0  ;;  %v2395_v28 = vpop.f32.mrf.mxu1  ;;  %v2564_v62 = vpop.f32.mrf.mxu0  ;;  %v8703_v23 = vsel %vm862_vm0, %v3313_v19, %v3314_v21  ;;  %v8713_v6 = vsel %vm862_vm0, %v3316_v9, %v3317_v33  ;;  %v3322_v21 = vrot.slane %v8692_v18, 4 }
 0x25b   : > { %v2787_v16 = vmax.f32 %v2751_v52, 0.0  ;;  %v2713_v3 = vmul.f32 %v8602_v51, %v2670_v58  ;;  %v2573_v54 = vadd.f32 %v6431_v37, %v2395_v28  ;;  %v2565_v30 = vadd.f32 %v2564_v62, %v2387_v27  ;;  %3612 = vmatprep.mubr.bf16.mxu0 %v8703_v23  ;;  %6468 = vmatprep.mubr.bf16.mxu1 %v8703_v23  ;;  %v6865_v52 = vld [vmem:[#allocation7 + $0x30] sm:$0xff]  }
 0x25c   : > { %v8709_v60 = vpack.c.bf16 %v10636_v57, %v2789_v25  ;;  %v2711_v38 = vmul.f32 %v8602_v51, %v2668_v50  ;;  %v2397_v19 = vpop.f32.mrf.mxu1  ;;  %v8715_v45 = vpop.f32.mrf.mxu0  ;;  %6469 = vmatmul.mubr.bf16.vlgmr.msra.gmra.mxu1 %v8713_v6  ;;  %6503 = vmatpush3.bf16.msra.mxu0 %v6859_v4  ;;  %v6864_v25 = vld [vmem:[#allocation7 + $0xa0] sm:$0xff]  }
 0x25d   : > { %v8718_v39 = vpack.c.bf16 %v10636_v57, %v2787_v16  ;;  %v2756_v27 = vadd.f32 %v8609_v17, %v2713_v3  ;;  %v2671_v56 = vadd.f32 %v2573_v54, %v8534_v14  ;;  %v2669_v49 = vadd.f32 %v2565_v30, %v8644_v8  ;;  %6001 = vmatpush3.bf16.msra.mxu1 %v6862_v63  ;;  %v6866_v3 = vld [vmem:[#allocation7 + $0x68] sm:$0xff]  }
 0x25e   : > { %v2754_v13 = vadd.f32 %v8609_v17, %v2711_v38  ;;  %v2400_v26 = vpop.f32.mrf.mxu1  ;;  %v2577_v37 = vpop.f32.mrf.mxu0  ;;  %v3323_v9 = vrot.slane %v8709_v60, 4  ;;  %v3319_v8 = vrot.slane %v8699_v22, 4  ;;  %6504 = vmatprep.subr.bf16.mxu0 %v6860_v46  ;;  %6002 = vmatprep.subr.bf16.mxu1 %v6863_v61 }
 0x25f   : > { %10645 = vst [vmem:[#allocation34_spill] sm:$0xff] %v8718_v39  ;;  %v2714_v58 = vmul.f32 %v8602_v51, %v2671_v56  ;;  %v2712_v33 = vmul.f32 %v8602_v51, %v2669_v49  ;;  %v2578_v14 = vadd.f32 %v2577_v37, %v2400_v26  ;;  %v2792_v50 = vmax.f32 %v2756_v27, 0.0  ;;  %3613 = vmatmul.mubr.bf16.gmra.mxu0 %v8669_v32  ;;  %v6867_v49 = vld [vmem:[#allocation7 + $0x28] sm:$0xff]  }
 0x260   : > { %v2790_v28 = vmax.f32 %v2754_v13, 0.0  ;;  %v2402_v62 = vpop.f32.mrf.mxu1  ;;  %v8731_v16 = vpop.f32.mrf.mxu0  ;;  %v3320_v4 = vrot.slane %v8718_v39, 4  ;;  %v8735_v63 = vsel %vm862_vm0, %v3322_v21, %v3323_v9  ;;  %3620 = vmatprep.mubr.bf16.mxu0 %v8713_v6  ;;  %v1900_v32 = vadd.f32 %v8553_v24, %v8406_v41  ;;  %6505 = vmatpush3.bf16.msra.mxu0 %v6860_v46  ;;  %v6868_v41 = vld [vmem:[#allocation7 + $0x60] sm:$0xff]  }
 0x261   : > { %v2757_v54 = vadd.f32 %v8609_v17, %v2714_v58  ;;  %v2755_v30 = vadd.f32 %v8609_v17, %v2712_v33  ;;  %v2672_v61 = vadd.f32 %v2578_v14, %v8546_v43  ;;  %6003 = vmatpush3.bf16.msra.mxu1 %v6865_v52  ;;  %6506 = vmatprep.subr.bf16.mxu0 %v6864_v25  ;;  %v6869_v43 = vld [vmem:[#allocation7 + $0x98] sm:$0xff]  }
 0x262   : > { %v8744_v38 = vpack.c.bf16 %v2790_v28, %v10636_v57  ;;  %v2403_v19 = vpop.f32.mrf.mxu1  ;;  %v2580_v27 = vpop.f32.mrf.mxu0  ;;  %v8747_v56 = vsel %vm862_vm0, %v3319_v8, %v3320_v4  ;;  %v8752_v24 = vpack.c.bf16 %v2792_v50, %v10636_v57  ;;  %6004 = vmatprep.subr.bf16.mxu1 %v6866_v3  ;;  %v6870_v50 = vld [vmem:[#allocation7 + $0x20] sm:$0xff]  }
 0x263   : > { %v2793_v13 = vmax.f32 %v2757_v54, 0.0  ;;  %v2791_v26 = vmax.f32 %v2755_v30, 0.0  ;;  %v2715_v37 = vmul.f32 %v8602_v51, %v2672_v61  ;;  %v2581_v21 = vadd.f32 %v2580_v27, %v2403_v19  ;;  %6472 = vmatprep.mubr.bf16.mxu1 %v8747_v56  ;;  %v6871_v30 = vld [vmem:[#allocation7 + $0x58] sm:$0xff]   ;;  %v6874_v27 = vld [vmem:[#allocation7 + $0x90] sm:$0xff]  }
 0x264   : > { %v2405_v9 = vpop.f32.mrf.mxu1  ;;  %v8754_v58 = vpop.f32.mrf.mxu0  ;;  %6473 = vmatmul.mubr.bf16.gmra.mxu1 %v8735_v63  ;;  %v3325_v28 = vrot.slane %v8744_v38, 4  ;;  %6507 = vmatpush3.bf16.msra.mxu0 %v6864_v25 }
 0x265   : > { %v8757_v46 = vpack.c.bf16 %v10636_v57, %v2793_v13  ;;  %v8760_v52 = vpack.c.bf16 %v10636_v57, %v2791_v26  ;;  %v2758_v33 = vadd.f32 %v8609_v17, %v2715_v37  ;;  %v2673_v14 = vadd.f32 %v2581_v21, %v1900_v32  ;;  %6005 = vmatpush3.bf16.msra.mxu1 %v6867_v49  ;;  %v6872_v21 = vld [vmem:[#allocation7 + $0x18] sm:$0xff]  }
 0x266   : > { %v2408_v8 = vpop.f32.mrf.mxu1  ;;  %6006 = vmatprep.subr.bf16.mxu1 %v6868_v41  ;;  %6508 = vmatprep.subr.bf16.mxu0 %v6869_v43  ;;  %v3328_v32 = vrot.slane %v8752_v24, 4  ;;  %v2593_v25 = vpop.f32.mrf.mxu0 }
 0x267   : > { %v2794_v62 = vmax.f32 %v2758_v33, 0.0  ;;  %v2716_v4 = vmul.f32 %v8602_v51, %v2673_v14  ;;  %v2586_v3 = vadd.f32 %v8715_v45, %v2408_v8  ;;  %v3326_v54 = vrot.slane %v8760_v52, 4  ;;  %3621 = vmatmul.mubr.bf16.gmra.mxu0 %v8703_v23  ;;  %v6873_v33 = vld [vmem:[#allocation7 + $0x50] sm:$0xff]  }
 0x268   : > { %v2410_v61 = vpop.f32.mrf.mxu1  ;;  %v3329_v19 = vrot.slane %v8757_v46, 4  ;;  %3628 = vmatprep.mubr.bf16.mxu0 %v8747_v56  ;;  %6509 = vmatpush3.bf16.msra.mxu0 %v6869_v43  ;;  %v8786_v8 = vpop.f32.mrf.mxu0  ;;  %v6875_v43 = vld [vmem:[#allocation7 + $0x10] sm:$0xff]  }
 0x269   : > { %v2759_v49 = vadd.f32 %v8609_v17, %v2716_v4  ;;  %v2674_v13 = vadd.f32 %v2586_v3, %v8543_v36  ;;  %v8775_v45 = vsel %vm862_vm0, %v3325_v28, %v3326_v54  ;;  %v8778_v26 = vpack.c.bf16 %v2794_v62, %v10636_v57  ;;  %6007 = vmatpush3.bf16.msra.mxu1 %v6870_v50  ;;  %v6879_v28 = vld [vmem:[#allocation7 + $0x88] sm:$0xff]  }
 0x26a   : > { %v2411_v23 = vpop.f32.mrf.mxu1  ;;  %6476 = vmatprep.mubr.bf16.mxu1 %v8775_v45  ;;  %v8782_v37 = vsel %vm862_vm0, %v3328_v32, %v3329_v19  ;;  %6008 = vmatprep.subr.bf16.mxu1 %v6871_v30  ;;  %v6876_v19 = vld [vmem:[#allocation7 + $0x48] sm:$0xff]  }
 0x26b   : > { %v2795_v41 = vmax.f32 %v2759_v49, 0.0  ;;  %v2717_v9 = vmul.f32 %v8602_v51, %v2674_v13  ;;  %v2589_v36 = vadd.f32 %v8731_v16, %v2411_v23  ;;  %6510 = vmatprep.subr.bf16.mxu0 %v6874_v27  ;;  %v3331_v16 = vrot.slane %v8778_v26, 4  ;;  %v6882_v13 = vld [vmem:[#allocation7 + $0x80] sm:$0xff]  }
 0x26c   : > { %v2413_v14 = vpop.f32.mrf.mxu1  ;;  %6477 = vmatmul.mubr.bf16.gmra.mxu1 %v8782_v37  ;;  %6511 = vmatpush3.bf16.msra.mxu0 %v6874_v27 }
 0x26d   : > { %v8789_v62 = vpack.c.bf16 %v10636_v57, %v2795_v41  ;;  %v2760_v4 = vadd.f32 %v8609_v17, %v2717_v9  ;;  %v2675_v50 = vadd.f32 %v2589_v36, %v8551_v42  ;;  %6009 = vmatpush3.bf16.msra.mxu1 %v6872_v21  ;;  %v2596_v42 = vpop.f32.mrf.mxu0  ;;  %6512 = vmatprep.subr.bf16.mxu0 %v6879_v28  ;;  %v6878_v14 = vld [vmem:[#allocation7 + $0x40] sm:$0xff]  }
 0x26e   : > { %v2416_v3 = vpop.f32.mrf.mxu1  ;;  %6010 = vmatprep.subr.bf16.mxu1 %v6873_v33  ;;  %v1916_v9 = vadd.f32 %v8564_v55, %v8434_v34  ;;  %v10412_v55 = vshll.u32 %v8630_v15, 16 }
 0x26f   : > { %v2796_v54 = vmax.f32 %v2760_v4, 0.0  ;;  %v2718_v30 = vmul.f32 %v8602_v51, %v2675_v50  ;;  %v2594_v61 = vadd.f32 %v2593_v25, %v2416_v3  ;;  %v3332_v32 = vrot.slane %v8789_v62, 4  ;;  %3629 = vmatmul.mubr.bf16.gmra.mxu0 %v8713_v6  ;;  %v6877_v6 = vld [vmem:[#allocation7 + $0x8] sm:$0xff]   ;;  %v8811_v50 = vpop.f32.mrf.mxu0 }
 0x270   : > { %v2418_v49 = vpop.f32.mrf.mxu1  ;;  %3636 = vmatprep.mubr.bf16.mxu0 %v8735_v63  ;;  %6513 = vmatpush3.bf16.msra.mxu0 %v6879_v28  ;;  %v10417_v3 = vshrl.u32 %v8630_v15, 16  ;;  %v10411_v28 = vshrl.u32 %v8634_v1, 16 }
 0x271   : > { %v2761_v23 = vadd.f32 %v8609_v17, %v2718_v30  ;;  %v2676_v21 = vadd.f32 %v2594_v61, %v8559_v59  ;;  %v8802_v41 = vsel %vm862_vm0, %v3331_v16, %v3332_v32  ;;  %v8805_v25 = vpack.c.bf16 %v2796_v54, %v10636_v57  ;;  %6011 = vmatpush3.bf16.msra.mxu1 %v6875_v43  ;;  %v6884_v16 = vld [vmem:[#allocation7 + $0x1f8] sm:$0xff]  }
 0x272   : > { %v2419_v27 = vpop.f32.mrf.mxu1  ;;  %6480 = vmatprep.mubr.bf16.mxu1 %v8802_v41  ;;  %6012 = vmatprep.subr.bf16.mxu1 %v6876_v19  ;;  %v10410_v32 = vshll.u32 %v8634_v1, 16 }
 0x273   : > { %v2797_v36 = vmax.f32 %v2761_v23, 0.0  ;;  %v2719_v33 = vmul.f32 %v8602_v51, %v2676_v21  ;;  %v2597_v59 = vadd.f32 %v2596_v42, %v2419_v27  ;;  %6514 = vmatprep.subr.bf16.mxu0 %v6882_v13  ;;  %v3334_v61 = vrot.slane %v8805_v25, 4  ;;  %v6880_v21 = vld [vmem:[#allocation7] sm:$0xff]  }
 0x274   : > { %v2421_v4 = vpop.f32.mrf.mxu1  ;;  %6515 = vmatpush3.bf16.msra.mxu0 %v6882_v13 }
 0x275   : > { %v8815_v43 = vpack.c.bf16 %v10636_v57, %v2797_v36  ;;  %v2762_v54 = vadd.f32 %v8609_v17, %v2719_v33  ;;  %v2677_v34 = vadd.f32 %v2597_v59, %v1916_v9  ;;  %6013 = vmatpush3.bf16.msra.mxu1 %v6877_v6  ;;  %v2609_v9 = vpop.f32.mrf.mxu0  ;;  %v2927_v6 = vrot.slane %v10417_v3, 3  ;;  %v8828_v36 = vld [vmem:[#allocation7 + $0x238] sm:$0xff]   ;;  %6136 = vmatprep.subr.bf16.mxu0 %v6884_v16 }
 0x276   : > { %v2424_v30 = vpop.f32.mrf.mxu1  ;;  %6014 = vmatprep.subr.bf16.mxu1 %v6878_v14  ;;  %v2919_v4 = vrot.slane %v10411_v28, 3  ;;  %v1932_v16 = vadd.f32 %v8575_v31, %v8462_v35  ;;  %v10423_v3 = vshrl.u32 %v8778_v26, 16 }
 0x277   : > { %v2798_v19 = vmax.f32 %v2762_v54, 0.0  ;;  %v2720_v49 = vmul.f32 %v8602_v51, %v2677_v34  ;;  %v2602_v42 = vadd.f32 %v8754_v58, %v2424_v30  ;;  %v3335_v23 = vrot.slane %v8815_v43, 4  ;;  %3637 = vmatmul.mubr.bf16.gmra.mxu0 %v8747_v56 }
 0x278   : > { %v2426_v27 = vpop.f32.mrf.mxu1  ;;  %3644 = vmatprep.mubr.bf16.mxu0 %v8775_v45  ;;  %v2930_v56 = vrot.slane %v10412_v55, 4 }
 0x279   : > { %v2763_v33 = vadd.f32 %v8609_v17, %v2720_v49  ;;  %v2678_v59 = vadd.f32 %v2602_v42, %v8556_v44  ;;  %v8834_v58 = vsel %vm862_vm0, %v3334_v61, %v3335_v23  ;;  %v8839_v13 = vpack.c.bf16 %v2798_v19, %v10636_v57  ;;  %6015 = vmatpush3.bf16.msra.mxu1 %v6880_v21  ;;  %v8854_v27 = vpop.f32.mrf.mxu0 }
 0x27a   : > { %v2427_v14 = vpop.f32.mrf.mxu1  ;;  %6481 = vmatmul.mubr.bf16.gmra.mxu1 %v8834_v58  ;;  %v2922_v44 = vrot.slane %v10410_v32, 4  ;;  %v10414_v61 = vshrl.u32 %v8653_v29, 16  ;;  %v10413_v19 = vshll.u32 %v8653_v29, 16  ;;  %v10416_v49 = vshrl.u32 %v8656_v7, 16  ;;  %6644 = vmatprep.subr.bf16.mxu1 %v8828_v36 }
 0x27b   : > { %v2799_v54 = vmax.f32 %v2763_v33, 0.0  ;;  %v2721_v34 = vmul.f32 %v8602_v51, %v2678_v59  ;;  %v2605_v30 = vadd.f32 %v8786_v8, %v2427_v14  ;;  %v10415_v42 = vshll.u32 %v8656_v7, 16 }
 0x27c   : > { %v2429_v23 = vpop.f32.mrf.mxu1  ;;  %v2931_v21 = vor.u32 %v2930_v56, %v2927_v6  ;;  %v8864_v33 = vadd.f32 %v8588_v20, %v8500_v2  ;;  %v8868_v59 = vadd.f32 %v8597_v12, %v8538_v53  ;;  %v2923_v32 = vor.u32 %v2922_v44, %v2919_v4  ;;  %v2612_v6 = vpop.f32.mrf.mxu0 }
 0x27d   : > { %v8858_v35 = vpack.c.bf16 %v10636_v57, %v2799_v54  ;;  %v2764_v31 = vadd.f32 %v8609_v17, %v2721_v34  ;;  %v2679_v8 = vadd.f32 %v2605_v30, %v8562_v5  ;;  %v3337_v23 = vrot.slane %v8839_v13, 4 }
 0x27e   : > { %v2432_v14 = vpop.f32.mrf.mxu1  ;;  %v8876_v2 = vrot.slane %v10414_v61, 3  ;;  %v8880_v53 = vrot.slane %v10413_v19, 4  ;;  %v8884_v20 = vrot.slane %v10416_v49, 3  ;;  %v8888_v12 = vrot.slane %v10415_v42, 4 }
 0x27f   : > { %v2800_v28 = vmax.f32 %v2764_v31, 0.0  ;;  %v2722_v54 = vmul.f32 %v8602_v51, %v2679_v8  ;;  %v2610_v55 = vadd.f32 %v2609_v9, %v2432_v14  ;;  %v3338_v34 = vrot.slane %v8858_v35, 4  ;;  %3645 = vmatmul.mubr.bf16.gmra.mxu0 %v8735_v63 }
 0x280   : > { %v2434_v5 = vpop.f32.mrf.mxu1  ;;  %3652 = vmatprep.mubr.bf16.mxu0 %v8782_v37  ;;  %v8897_v4 = vsel %vm482_vm1, %v2923_v32, %v2931_v21  ;;  %v8908_v21 = vpop.f32.mrf.mxu0  ;;  %v10419_v19 = vshll.u32 %v8752_v24, 16  ;;  %v10421_v49 = vshll.u32 %v8757_v46, 16 }
 0x281   : > { %v2765_v63 = vadd.f32 %v8609_v17, %v2722_v54  ;;  %v2680_v9 = vadd.f32 %v2610_v55, %v8570_v11  ;;  %v8894_v56 = vsel %vm862_vm0, %v3337_v23, %v3338_v34  ;;  %v8900_v44 = vpack.c.bf16 %v2800_v28, %v10636_v57 }
 0x282   : > { %v2435_v30 = vpop.f32.mrf.mxu1  ;;  %6484 = vmatprep.mubr.bf16.mxu1 %v8894_v56  ;;  %v10418_v11 = vshrl.u32 %v8752_v24, 16  ;;  %v10420_v54 = vshrl.u32 %v8682_v10, 16  ;;  %v3024_v42 = vrot.slane %v10419_v19, 4 }
 0x283   : > { %10646 = vst [vmem:[#allocation35_spill] sm:$0xff] %v8900_v44  ;;  %v2801_v55 = vmax.f32 %v2765_v63, 0.0  ;;  %v2723_v14 = vmul.f32 %v8602_v51, %v2680_v9  ;;  %v2613_v23 = vadd.f32 %v2612_v6, %v2435_v30  ;;  %v10422_v9 = vshrl.u32 %v8757_v46, 16 }
 0x284   : > { %v2437_v32 = vpop.f32.mrf.mxu1  ;;  %v3021_v5 = vrot.slane %v10418_v11, 3  ;;  %v8931_v8 = vrot.slane %v10420_v54, 3  ;;  %v10424_v54 = vshll.u32 %v8778_v26, 16  ;;  %v10444_v15 = vshrl.u32 %v8900_v44, 16 }
 0x285   : > { %v8916_v61 = vpack.c.bf16 %v10636_v57, %v2801_v55  ;;  %v2766_v63 = vadd.f32 %v8609_v17, %v2723_v14  ;;  %v2681_v6 = vadd.f32 %v2613_v23, %v1932_v16  ;;  %v3340_v32 = vrot.slane %v8900_v44, 4  ;;  %v2625_v23 = vpop.f32.mrf.mxu0 }
 0x286   : > { %v2440_v30 = vpop.f32.mrf.mxu1  ;;  %v3025_v19 = vor.u32 %v3024_v42, %v3021_v5  ;;  %v3029_v31 = vrot.slane %v10422_v9, 3  ;;  %v3038_v5 = vrot.slane %v10423_v3, 3  ;;  %v10435_v3 = vshrl.u32 %v8805_v25, 16 }
 0x287   : > { %10647 = vst [vmem:[#allocation36_spill] sm:$0xff] %v8916_v61  ;;  %v2802_v11 = vmax.f32 %v2766_v63, 0.0  ;;  %v2724_v34 = vmul.f32 %v8602_v51, %v2681_v6  ;;  %v2618_v55 = vadd.f32 %v8811_v50, %v2440_v30  ;;  %v3341_v14 = vrot.slane %v8916_v61, 4  ;;  %3653 = vmatmul.mubr.bf16.gmra.mxu0 %v8775_v45 }
 0x288   : > { %v2442_v16 = vpop.f32.mrf.mxu1  ;;  %v3032_v63 = vrot.slane %v10421_v49, 4  ;;  %3660 = vmatprep.mubr.bf16.mxu0 %v8802_v41 }
 0x289   : > { %v8938_v6 = vpack.c.bf16 %v2802_v11, %v10636_v57  ;;  %v2767_v50 = vadd.f32 %v8609_v17, %v2724_v34  ;;  %v2682_v45 = vadd.f32 %v2618_v55, %v8567_v0  ;;  %v8944_v30 = vsel %vm862_vm0, %v3340_v32, %v3341_v14  ;;  %v8954_v14 = vpop.f32.mrf.mxu0 }
 0x28a   : > { %v2443_v16 = vpop.f32.mrf.mxu1  ;;  %6485 = vmatmul.mubr.bf16.gmra.mxu1 %v8944_v30  ;;  %v3033_v42 = vor.u32 %v3032_v63, %v3029_v31  ;;  %v10425_v11 = vshrl.u32 %v8789_v62, 16  ;;  %v3041_v31 = vrot.slane %v10424_v54, 4  ;;  %v10434_v54 = vshll.u32 %v8805_v25, 16 }
 0x28b   : > { %v2803_v49 = vmax.f32 %v2767_v50, 0.0  ;;  %v2725_v34 = vmul.f32 %v8602_v51, %v2682_v45  ;;  %v2621_v0 = vadd.f32 %v8854_v27, %v2443_v16  ;;  %v3343_v55 = vrot.slane %v8938_v6, 4  ;;  %v10649_v16 = vld [vmem:[#allocation24_spill] sm:$0xff] }
 0x28c   : > { %v2445_v32 = vpop.f32.mrf.mxu1  ;;  %v8957_v9 = vsel %vm482_vm1, %v3025_v19, %v3033_v42  ;;  %v3046_v63 = vrot.slane %v10425_v11, 3  ;;  %v10432_v50 = vshll.u32 %v8789_v62, 16  ;;  %v3042_v19 = vor.u32 %v3041_v31, %v3038_v5 }
 0x28d   : > { %10648 = vst [vmem:[#allocation37_spill] sm:$0xff] %v8957_v9  ;;  %v8965_v45 = vpack.c.bf16 %v10636_v57, %v2803_v49  ;;  %v2768_v27 = vadd.f32 %v8609_v17, %v2725_v34  ;;  %v2683_v32 = vadd.f32 %v2621_v0, %v10649_v16  ;;  %v10433_v11 = vshrl.u32 %v8815_v43, 16  ;;  %v2628_v0 = vpop.f32.mrf.mxu0 }
 0x28e   : > { %v2448_v28 = vpop.f32.mrf.mxu1  ;;  %v3049_v42 = vrot.slane %v10432_v50, 4  ;;  %v3055_v5 = vrot.slane %v10435_v3, 3  ;;  %v3058_v31 = vrot.slane %v10434_v54, 4 }
 0x28f   : > { %v2804_v29 = vmax.f32 %v2768_v27, 0.0  ;;  %v2726_v7 = vmul.f32 %v8602_v51, %v2683_v32  ;;  %v2626_v49 = vadd.f32 %v2625_v23, %v2448_v28  ;;  %v3344_v1 = vrot.slane %v8965_v45, 4  ;;  %3661 = vmatmul.mubr.bf16.gmra.mxu0 %v8782_v37  ;;  %v10651_v23 = vld [vmem:[#allocation29_spill] sm:$0xff] }
 0x290   : > { %v2450_v34 = vpop.f32.mrf.mxu1  ;;  %v3050_v16 = vor.u32 %v3049_v42, %v3046_v63  ;;  %v3063_v50 = vrot.slane %v10433_v11, 3  ;;  %3668 = vmatprep.mubr.bf16.mxu0 %v8834_v58  ;;  %v10436_v11 = vshll.u32 %v8815_v43, 16 }
 0x291   : > { %v8984_v27 = vpack.c.bf16 %v2804_v29, %v10636_v57  ;;  %v2769_v28 = vadd.f32 %v8609_v17, %v2726_v7  ;;  %v2684_v32 = vadd.f32 %v2626_v49, %v10651_v23  ;;  %v8990_v37 = vsel %vm862_vm0, %v3343_v55, %v3344_v1  ;;  %v9000_v1 = vpop.f32.mrf.mxu0 }
 0x292   : > { %v2451_v63 = vpop.f32.mrf.mxu1  ;;  %6488 = vmatprep.mubr.bf16.mxu1 %v8990_v37  ;;  %v8994_v42 = vsel %vm482_vm1, %v3042_v19, %v3050_v16  ;;  %v3059_v34 = vor.u32 %v3058_v31, %v3055_v5  ;;  %v10437_v29 = vshrl.u32 %v8839_v13, 16  ;;  %v3066_v55 = vrot.slane %v10436_v11, 4 }
 0x293   : > { %10650 = vst [vmem:[#allocation24_spill] sm:$0xff] %v8984_v27  ;;  %10652 = vst [vmem:[#allocation29_spill] sm:$0xff] %v8994_v42  ;;  %v2805_v54 = vmax.f32 %v2769_v28, 0.0  ;;  %v2727_v7 = vmul.f32 %v8602_v51, %v2684_v32  ;;  %v2629_v49 = vadd.f32 %v2628_v0, %v2451_v63  ;;  %v3346_v23 = vrot.slane %v8984_v27, 4 }
 0x294   : > { %v2453_v3 = vpop.f32.mrf.mxu1  ;;  %v3072_v19 = vrot.slane %v10437_v29, 3  ;;  %v10443_v16 = vshll.u32 %v8839_v13, 16  ;;  %v10442_v5 = vshrl.u32 %v8858_v35, 16  ;;  %v3067_v63 = vor.u32 %v3066_v55, %v3063_v50 }
 0x295   : > { %v9009_v31 = vpack.c.bf16 %v10636_v57, %v2805_v54  ;;  %v2770_v0 = vadd.f32 %v8609_v17, %v2727_v7  ;;  %v2685_v28 = vadd.f32 %v2629_v49, %v8864_v33  ;;  %v10445_v3 = vshll.u32 %v8858_v35, 16  ;;  %v2641_v49 = vpop.f32.mrf.mxu0 }
 0x296   : > { %v2456_v32 = vpop.f32.mrf.mxu1  ;;  %v3075_v11 = vrot.slane %v10443_v16, 4  ;;  %v3080_v29 = vrot.slane %v10442_v5, 3  ;;  %v9024_v50 = vsel %vm482_vm1, %v3059_v34, %v3067_v63  ;;  %v10449_v63 = vshrl.u32 %v8916_v61, 16 }
 0x297   : > { %v2806_v42 = vmax.f32 %v2770_v0, 0.0  ;;  %v2728_v54 = vmul.f32 %v8602_v51, %v2685_v28  ;;  %v2634_v9 = vadd.f32 %v8908_v21, %v2456_v32  ;;  %v3347_v7 = vrot.slane %v9009_v31, 4  ;;  %3669 = vmatmul.mubr.bf16.gmra.mxu0 %v8802_v41  ;;  %10653 = vst [vmem:[#allocation38_spill] sm:$0xff] %v9024_v50  ;;  %v10654_v32 = vld [vmem:[#allocation25_spill] sm:$0xff] }
 0x298   : > { %v2458_v33 = vpop.f32.mrf.mxu1  ;;  %v3076_v55 = vor.u32 %v3075_v11, %v3072_v19  ;;  %v3083_v5 = vrot.slane %v10445_v3, 4  ;;  %v3089_v0 = vrot.slane %v10444_v15, 3  ;;  %3676 = vmatprep.mubr.bf16.mxu0 %v8894_v56  ;;  %v10447_v19 = vshll.u32 %v8900_v44, 16 }
 0x299   : > { %v9031_v28 = vpack.c.bf16 %v2806_v42, %v10636_v57  ;;  %v2771_v21 = vadd.f32 %v8609_v17, %v2728_v54  ;;  %v2686_v16 = vadd.f32 %v2634_v9, %v10654_v32  ;;  %v9037_v41 = vsel %vm862_vm0, %v3346_v23, %v3347_v7  ;;  %v9046_v23 = vpop.f32.mrf.mxu0 }
 0x29a   : > { %v2459_v34 = vpop.f32.mrf.mxu1  ;;  %6489 = vmatmul.mubr.bf16.gmra.mxu1 %v9037_v41  ;;  %v3084_v11 = vor.u32 %v3083_v5, %v3080_v29  ;;  %v10452_v42 = vshll.u32 %v8916_v61, 16  ;;  %v3092_v29 = vrot.slane %v10447_v19, 4  ;;  %v3097_v5 = vrot.slane %v10449_v63, 3 }
 0x29b   : > { %v2807_v33 = vmax.f32 %v2771_v21, 0.0  ;;  %v2729_v54 = vmul.f32 %v8602_v51, %v2686_v16  ;;  %v2637_v9 = vadd.f32 %v8954_v14, %v2459_v34  ;;  %v3349_v32 = vrot.slane %v9031_v28, 4  ;;  %v2644_v44 = vpop.f32.mrf.mxu0 }
 0x29c   : > { %v2461_v15 = vpop.f32.mrf.mxu1  ;;  %v9049_v7 = vsel %vm482_vm1, %v3076_v55, %v3084_v11  ;;  %v3100_v21 = vrot.slane %v10452_v42, 4  ;;  %v10460_v3 = vshrl.u32 %v8938_v6, 16  ;;  %v3093_v11 = vor.u32 %v3092_v29, %v3089_v0 }
 0x29d   : > { %10655 = vst [vmem:[#allocation25_spill] sm:$0xff] %v9049_v7  ;;  %v9058_v16 = vpack.c.bf16 %v10636_v57, %v2807_v33  ;;  %v2772_v14 = vadd.f32 %v8609_v17, %v2729_v54  ;;  %v10656_v15 = vld [vmem:[#allocation26_spill] sm:$0xff]  ;;  %v10459_v19 = vshll.u32 %v8938_v6, 16  ;;  %v10456_v50 = vshrl.u32 %v8965_v45, 16 }
 0x29e   : > { %v2687_v34 = vadd.f32 %v2637_v9, %v10656_v15  ;;  %v2464_v55 = vpop.f32.mrf.mxu1  ;;  %v3101_v7 = vor.u32 %v3100_v21, %v3097_v5  ;;  %v3106_v0 = vrot.slane %v10460_v3, 3 }
 0x29f   : > { %v2808_v63 = vmax.f32 %v2772_v14, 0.0  ;;  %v2642_v42 = vadd.f32 %v2641_v49, %v2464_v55  ;;  %v3350_v33 = vrot.slane %v9058_v16, 4  ;;  %3677 = vmatmul.mubr.bf16.gmra.mxu0 %v8834_v58  ;;  %v3109_v29 = vrot.slane %v10459_v19, 4  ;;  %v10658_v58 = vld [vmem:[#allocation17_spill] sm:$0xff] }
 0x2a0   : > { %v2730_v61 = vmul.f32 %v8602_v51, %v2687_v34  ;;  %v2466_v54 = vpop.f32.mrf.mxu1  ;;  %v9069_v9 = vsel %vm482_vm1, %v3093_v11, %v3101_v7  ;;  %v3114_v5 = vrot.slane %v10456_v50, 3  ;;  %3684 = vmatprep.mubr.bf16.mxu0 %v8944_v30  ;;  %v10455_v34 = vshll.u32 %v8965_v45, 16 }
 0x2a1   : > { %10657 = vst [vmem:[#allocation26_spill] sm:$0xff] %v9069_v9  ;;  %v9078_v51 = vpack.c.bf16 %v2808_v63, %v10636_v57  ;;  %v2688_v21 = vadd.f32 %v2642_v42, %v10658_v58  ;;  %v9084_v7 = vsel %vm862_vm0, %v3349_v32, %v3350_v33  ;;  %v3110_v15 = vor.u32 %v3109_v29, %v3106_v0 }
 0x2a2   : > { %v2773_v49 = vadd.f32 %v8609_v17, %v2730_v61  ;;  %v2467_v14 = vpop.f32.mrf.mxu1  ;;  %6492 = vmatprep.mubr.bf16.mxu1 %v9084_v7  ;;  %v10457_v55 = vshrl.u32 %v8984_v27, 16  ;;  %v10458_v63 = vshll.u32 %v8984_v27, 16  ;;  %v6914_v17 = vld [vmem:[%s10308_s2] ss:$0 sm:$0xff]  ;;  %v3117_v54 = vrot.slane %v10455_v34, 4 }
 0x2a3   : > { %v2731_v61 = vmul.f32 %v6914_v17, %v2688_v21  ;;  %v2645_v42 = vadd.f32 %v2644_v44, %v2467_v14  ;;  %v3352_v32 = vrot.slane %v9078_v51, 4  ;;  %v6915_v44 = vld [vmem:[%s10309_s3] ss:$0 sm:$0xff]  ;;  %v10464_v19 = vshrl.u32 %v9031_v28, 16 }
 0x2a4   : > { %v2809_v11 = vmax.f32 %v2773_v49, 0.0  ;;  %v2469_v33 = vpop.f32.mrf.mxu1  ;;  %v3123_v0 = vrot.slane %v10457_v55, 3  ;;  %v3126_v29 = vrot.slane %v10458_v63, 4  ;;  %v10477_v49 = vshrl.u32 %v9009_v31, 16 }
 0x2a5   : > { %v2774_v21 = vadd.f32 %v6915_v44, %v2731_v61  ;;  %v2689_v14 = vadd.f32 %v2645_v42, %v8868_v59  ;;  %v10466_v33 = vshll.u32 %v9009_v31, 16  ;;  %v3118_v50 = vor.u32 %v3117_v54, %v3114_v5 }
 0x2a6   : > { %v9102_v58 = vpack.c.bf16 %v10636_v57, %v2809_v11  ;;  %v2472_v34 = vpop.f32.mrf.mxu1  ;;  %v3127_v55 = vor.u32 %v3126_v29, %v3123_v0  ;;  %v3131_v63 = vrot.slane %v10477_v49, 3  ;;  %v3140_v42 = vrot.slane %v10464_v19, 3 }
 0x2a7   : > { %v2810_v3 = vmax.f32 %v2774_v21, 0.0  ;;  %v2732_v11 = vmul.f32 %v6914_v17, %v2689_v14  ;;  %v2650_v9 = vadd.f32 %v9000_v1, %v2472_v34  ;;  %3685 = vmatmul.mubr.bf16.gmra.mxu0 %v8894_v56  ;;  %v9116_v59 = vsel %vm482_vm1, %v3110_v15, %v3118_v50  ;;  %v10659_v34 = vld [vmem:[#allocation27_spill] sm:$0xff] }
 0x2a8   : > { %v3353_v27 = vrot.slane %v9102_v58, 4  ;;  %v2474_v61 = vpop.f32.mrf.mxu1  ;;  %v3134_v5 = vrot.slane %v10466_v33, 4  ;;  %v10465_v54 = vshll.u32 %v9031_v28, 16  ;;  %3692 = vmatprep.mubr.bf16.mxu0 %v8990_v37  ;;  %v10467_v14 = vshrl.u32 %v9058_v16, 16 }
 0x2a9   : > { %v9124_v0 = vpack.c.bf16 %v2810_v3, %v10636_v57  ;;  %v2775_v1 = vadd.f32 %v6915_v44, %v2732_v11  ;;  %v2690_v29 = vadd.f32 %v2650_v9, %v10659_v34  ;;  %v10476_v3 = vshll.u32 %v9058_v16, 16 }
 0x2aa   : > { %v9129_v56 = vsel %vm862_vm0, %v3352_v32, %v3353_v27  ;;  %v2475_v50 = vpop.f32.mrf.mxu1  ;;  %v3135_v15 = vor.u32 %v3134_v5, %v3131_v63  ;;  %v3143_v21 = vrot.slane %v10465_v54, 4  ;;  %v3148_v63 = vrot.slane %v10467_v14, 3 }
 0x2ab   : > { %6493 = vmatmul.mubr.bf16.gmra.mxu1 %v9129_v56  ;;  %v2811_v61 = vmax.f32 %v2775_v1, 0.0  ;;  %v2733_v11 = vmul.f32 %v6914_v17, %v2690_v29  ;;  %v2653_v9 = vadd.f32 %v9046_v23, %v2475_v50  ;;  %v3355_v34 = vrot.slane %v9124_v0, 4  ;;  %v10660_v29 = vld [vmem:[#allocation28_spill] sm:$0xff] }
 0x2ac   : > { %v2477_v19 = vpop.f32.mrf.mxu1  ;;  %v9139_v27 = vsel %vm482_vm1, %v3127_v55, %v3135_v15  ;;  %v3144_v32 = vor.u32 %v3143_v21, %v3140_v42  ;;  %v3151_v5 = vrot.slane %v10476_v3, 4  ;;  %v10474_v23 = vshrl.u32 %v9078_v51, 16 }
 0x2ad   : > { %v9146_v54 = vpack.c.bf16 %v10636_v57, %v2811_v61  ;;  %v2776_v1 = vadd.f32 %v6915_v44, %v2733_v11  ;;  %v2691_v33 = vadd.f32 %v2653_v9, %v10660_v29  ;;  %v10469_v19 = vshll.u32 %v9078_v51, 16 }
 0x2ae   : > { %v3152_v50 = vor.u32 %v3151_v5, %v3148_v63  ;;  %v10468_v55 = vshrl.u32 %v9102_v58, 16  ;;  %v10471_v42 = vshll.u32 %v9102_v58, 16  ;;  %v3157_v61 = vrot.slane %v10474_v23, 3 }
 0x2af   : > { %v2812_v15 = vmax.f32 %v2776_v1, 0.0  ;;  %v2734_v21 = vmul.f32 %v6914_v17, %v2691_v33  ;;  %v3356_v14 = vrot.slane %v9146_v54, 4  ;;  %3693 = vmatmul.mubr.bf16.gmra.mxu0 %v8944_v30  ;;  %v3160_v9 = vrot.slane %v10469_v19, 4 }
 0x2b0   : > { %v9158_v11 = vsel %vm482_vm1, %v3144_v32, %v3152_v50  ;;  %v3165_v63 = vrot.slane %v10468_v55, 3  ;;  %v3168_v5 = vrot.slane %v10471_v42, 4  ;;  %3700 = vmatprep.mubr.bf16.mxu0 %v9037_v41  ;;  %v10470_v30 = vshrl.u32 %v9124_v0, 16 }
 0x2b1   : > { %v2861_v17 = vmul.f32 0.0, %v2812_v15  ;;  %v2777_v33 = vadd.f32 %v6915_v44, %v2734_v21  ;;  %v9168_v1 = vsel %vm862_vm0, %v3355_v34, %v3356_v14  ;;  %v3161_v32 = vor.u32 %v3160_v9, %v3157_v61 }
 0x2b2   : > { %6496 = vmatprep.mubr.bf16.mxu1 %v9168_v1  ;;  %v3169_v29 = vor.u32 %v3168_v5, %v3165_v63  ;;  %v10472_v50 = vshll.u32 %v9124_v0, 16  ;;  %v10473_v55 = vshrl.u32 %v9146_v54, 16  ;;  %v3174_v44 = vrot.slane %v10470_v30, 3 }
 0x2b3   : > { %v9175_v19 = vpack.c.bf16 %v2861_v17, %v10636_v57  ;;  %v2813_v15 = vmax.f32 %v2777_v33, 0.0  ;;  %v10475_v14 = vshll.u32 %v9146_v54, 16  ;;  %v10480_v5 = vshrl.u32 %v8673_v40, 16 }
 0x2b4   : > { %v9182_v21 = vsel %vm482_vm1, %v3161_v32, %v3169_v29  ;;  %v3177_v61 = vrot.slane %v10472_v50, 4  ;;  %v3182_v9 = vrot.slane %v10473_v55, 3  ;;  %v10481_v30 = vshll.u32 %v8673_v40, 16 }
 0x2b5   : > { %v2862_v63 = vmul.f32 0.0, %v2813_v15  ;;  %v3185_v17 = vrot.slane %v10475_v14, 4  ;;  %v10479_v33 = vshrl.u32 %v9175_v19, 16  ;;  %v10484_v32 = vshrl.u32 %v8718_v39, 16 }
 0x2b6   : > { %v10478_v29 = vshll.u32 %v9175_v19, 16  ;;  %v10487_v15 = vshll.u32 %v8718_v39, 16  ;;  %v3178_v55 = vor.u32 %v3177_v61, %v3174_v44  ;;  %v3358_v14 = vrot.slane %v9175_v19, 4 }
 0x2b7   : > { %v9197_v50 = vpack.c.bf16 %v10636_v57, %v2862_v63  ;;  %v3186_v23 = vor.u32 %v3185_v17, %v3182_v9  ;;  %3701 = vmatmul.mubr.bf16.gmra.mxu0 %v8990_v37  ;;  %v3191_v49 = vrot.slane %v10479_v33, 3  ;;  %v10662_v61 = vshll.u32 %v8682_v10, 16 }
 0x2b8   : > { %v3194_v42 = vrot.slane %v10478_v29, 4  ;;  %3708 = vmatprep.mubr.bf16.mxu0 %v9084_v7  ;;  %v2961_v17 = vrot.slane %v10480_v5, 3  ;;  %v2964_v29 = vrot.slane %v10481_v30, 4  ;;  %v2978_v33 = vrot.slane %v10484_v32, 3 }
 0x2b9   : > { %v3359_v57 = vrot.slane %v9197_v50, 4  ;;  %v9210_v63 = vsel %vm482_vm1, %v3178_v55, %v3186_v23  ;;  %v10488_v44 = vshrl.u32 %v9197_v50, 16  ;;  %v10489_v37 = vshll.u32 %v9197_v50, 16 }
 0x2ba   : > { %10661 = vst [vmem:[#allocation17_spill] sm:$0xff] %v9210_v63  ;;  %v2947_v9 = vrot.slane %v10662_v61, 4  ;;  %v2981_v23 = vrot.slane %v10487_v15, 4  ;;  %v10663_v5 = vshrl.u32 %v8660_v48, 16  ;;  %v10664_v30 = vshll.u32 %v8660_v48, 16 }
 0x2bb   : > { %v3360_v3 = vsel %vm862_vm0, %v3358_v14, %v3359_v57  ;;  %v3199_v55 = vrot.slane %v10488_v44, 3  ;;  %v3202_v61 = vrot.slane %v10489_v37, 4  ;;  %v10665_v32 = vshrl.u32 %v8665_v47, 16 }
 0x2bc   : > { %6497 = vmatmul.mubr.bf16.gmra.mxu1 %v3360_v3  ;;  %v2936_v34 = vrot.slane %v10663_v5, 3  ;;  %v2939_v40 = vrot.slane %v10664_v30, 4  ;;  %v10666_v14 = vshll.u32 %v8665_v47, 16  ;;  %v10667_v15 = vshrl.u32 %v8699_v22, 16 }
 0x2bd   : > { %v2953_v10 = vrot.slane %v10665_v32, 3  ;;  %4070 = vmatprep.mubr.bf16.mxu1 %v8897_v4  ;;  %v10668_v37 = vshll.u32 %v8699_v22, 16  ;;  %v3195_v39 = vor.u32 %v3194_v42, %v3191_v49  ;;  %v3203_v63 = vor.u32 %v3202_v61, %v3199_v55  ;;  %v9255_v42 = vld [vmem:[#allocation7 + $0x230] sm:$0xff]  }
 0x2be   : > { %v2956_v57 = vrot.slane %v10666_v14, 4  ;;  %v2970_v44 = vrot.slane %v10667_v15, 3  ;;  %v2914_v5 = vor.u32 %v8888_v12, %v8884_v20  ;;  %v2948_v30 = vor.u32 %v2947_v9, %v8931_v8 }
 0x2bf   : > { %v2973_v3 = vrot.slane %v10668_v37, 4  ;;  %v2965_v48 = vor.u32 %v2964_v29, %v2961_v17  ;;  %v2982_v32 = vor.u32 %v2981_v23, %v2978_v33  ;;  %v9246_v47 = vsel %vm482_vm1, %v3195_v39, %v3203_v63  ;;  %3709 = vmatmul.mubr.bf16.gmra.mxu0 %v9037_v41 }
 0x2c0   : > { %v2985_v14 = vshrl.u32 %v8692_v18, 16  ;;  %v10498_v15 = vshll.u32 %v8692_v18, 16  ;;  %v2993_v37 = vshrl.u32 %v8709_v60, 16  ;;  %3716 = vmatprep.mubr.bf16.mxu0 %v9129_v56  ;;  %v2906_v20 = vor.u32 %v8880_v53, %v8876_v2 }
 0x2c1   : > { %v2940_v12 = vor.u32 %v2939_v40, %v2936_v34  ;;  %v2957_v8 = vor.u32 %v2956_v57, %v2953_v10  ;;  %v2974_v49 = vor.u32 %v2973_v3, %v2970_v44  ;;  %v2996_v39 = vshll.u32 %v8709_v60, 16 }
 0x2c2   : > { %v10497_v41 = vshrl.u32 %v8760_v52, 16  ;;  %v2915_v33 = vsel %vm482_vm1, %v2906_v20, %v2914_v5  ;;  %v9271_v40 = vrot.slane %v2985_v14, 3  ;;  %v9275_v10 = vrot.slane %v10498_v15, 4 }
 0x2c3   : > { %v9261_v29 = vsel %vm482_vm1, %v2940_v12, %v2948_v30  ;;  %v9264_v63 = vsel %vm482_vm1, %v2957_v8, %v2965_v48  ;;  %v9267_v9 = vsel %vm482_vm1, %v2974_v49, %v2982_v32  ;;  %v9279_v2 = vrot.slane %v2993_v37, 3 }
 0x2c4   : > { %4071 = vmatmul.mubr.bf16.vlgmr.msra.gmra.mxu1 %v2915_v33  ;;  %v10669_v53 = vshrl.u32 %v8752_v24, 16  ;;  %v3002_v34 = vshrl.u32 %v8744_v38, 16  ;;  %v3005_v44 = vshll.u32 %v8744_v38, 16  ;;  %v10670_v17 = vshll.u32 %v8752_v24, 16 }
 0x2c5   : > { %4078 = vmatprep.mubr.bf16.mxu1 %v9261_v29  ;;  %6652 = vmatpush3.bf16.msra.mxu1 %v8828_v36  ;;  %v10671_v55 = vshrl.u32 %v8757_v46, 16  ;;  %v9294_v57 = vrot.slane %v2996_v39, 4  ;;  %v9298_v3 = vrot.slane %v10497_v41, 3  ;;  %v9300_v36 = vld [vmem:[#allocation7 + $0x228] sm:$0xff]   ;;  %v10672_v5 = vshll.u32 %v8757_v46, 16 }
 0x2c6   : > { %v4409_v48 = vrot.slane %v10669_v53, 4  ;;  %v4410_v23 = vrot.slane %v10670_v17, 5  ;;  %6645 = vmatprep.subr.bf16.mxu1 %v9255_v42  ;;  %v10673_v24 = vshrl.u32 %v8778_v26, 16  ;;  %v10674_v12 = vshll.u32 %v8778_v26, 16 }
 0x2c7   : > { %v4412_v61 = vrot.slane %v10671_v55, 4  ;;  %v4413_v30 = vrot.slane %v10672_v5, 5  ;;  %v10675_v49 = vshrl.u32 %v8789_v62, 16  ;;  %v10676_v53 = vshll.u32 %v8789_v62, 16  ;;  %3717 = vmatmul.mubr.bf16.gmra.mxu0 %v9084_v7 }
 0x2c8   : > { %v4416_v32 = vrot.slane %v10673_v24, 4  ;;  %v4411_v20 = vor.u32 %v4410_v23, %v4409_v48  ;;  %v4417_v8 = vrot.slane %v10674_v12, 5  ;;  %v3013_v55 = vshll.u32 %v8760_v52, 16  ;;  %3724 = vmatprep.mubr.bf16.mxu0 %v9168_v1 }
 0x2c9   : > { %v4419_v33 = vrot.slane %v10675_v49, 4  ;;  %v4420_v17 = vrot.slane %v10676_v53, 5  ;;  %v4414_v41 = vor.u32 %v4413_v30, %v4412_v61  ;;  %v10677_v46 = vshrl.u32 %v8805_v25, 16  ;;  %6653 = vmatpush3.bf16.msra.mxu1 %v9255_v42  ;;  %v9325_v61 = vld [vmem:[#allocation7 + $0x220] sm:$0xff]  }
 0x2ca   : > { %v10678_v24 = vshll.u32 %v8805_v25, 16  ;;  %v4418_v26 = vor.u32 %v4417_v8, %v4416_v32  ;;  %v10679_v62 = vshrl.u32 %v8815_v43, 16  ;;  %v10680_v7 = vshll.u32 %v8815_v43, 16  ;;  %6646 = vmatprep.subr.bf16.mxu1 %v9300_v36 }
 0x2cb   : > { %v4423_v5 = vrot.slane %v10677_v46, 4  ;;  %v4421_v23 = vor.u32 %v4420_v17, %v4419_v33  ;;  %v9328_v30 = vsel %vm1975_vm2, %v4411_v20, %v4414_v41  ;;  %v10681_v1 = vshrl.u32 %v8839_v13, 16  ;;  %v10685_v20 = vld [vmem:[#allocation35_spill] sm:$0xff] }
 0x2cc   : > { %v4424_v48 = vrot.slane %v10678_v24, 5  ;;  %v4426_v12 = vrot.slane %v10679_v62, 4  ;;  %v4427_v49 = vrot.slane %v10680_v7, 5  ;;  %v10682_v32 = vshll.u32 %v8839_v13, 16  ;;  %4079 = vmatmul.mubr.bf16.gmra.mxu1 %v8897_v4 }
 0x2cd   : > { %v4430_v53 = vrot.slane %v10681_v1, 4  ;;  %v9335_v33 = vsel %vm1975_vm2, %v4418_v26, %v4421_v23  ;;  %v10683_v43 = vshrl.u32 %v8858_v35, 16  ;;  %v10684_v24 = vshll.u32 %v8858_v35, 16  ;;  %v10688_v1 = vld [vmem:[#allocation36_spill] sm:$0xff]  ;;  %4086 = vmatprep.mubr.bf16.mxu1 %v9264_v63  ;;  %6654 = vmatpush3.bf16.msra.mxu1 %v9300_v36 }
 0x2ce   : > { %v4425_v25 = vor.u32 %v4424_v48, %v4423_v5  ;;  %v4431_v8 = vrot.slane %v10682_v32, 5  ;;  %v4428_v17 = vor.u32 %v4427_v49, %v4426_v12  ;;  %v10686_v5 = vshrl.u32 %v10685_v20, 16  ;;  %6647 = vmatprep.subr.bf16.mxu1 %v9325_v61 }
 0x2cf   : > { %v4433_v46 = vrot.slane %v10683_v43, 4  ;;  %v4434_v62 = vrot.slane %v10684_v24, 5  ;;  %v10687_v7 = vshll.u32 %v10685_v20, 16  ;;  %v10689_v32 = vshrl.u32 %v10688_v1, 16  ;;  %3725 = vmatmul.mubr.bf16.gmra.mxu0 %v9129_v56 }
 0x2d0   : > { %v4432_v41 = vor.u32 %v4431_v8, %v4430_v53  ;;  %v4437_v48 = vrot.slane %v10686_v5, 4  ;;  %v9351_v23 = vsel %vm1975_vm2, %v4425_v25, %v4428_v17  ;;  %v10690_v4 = vshll.u32 %v10688_v1, 16  ;;  %v9358_v8 = vld [vmem:[#allocation7 + $0x218] sm:$0xff]   ;;  %6516 = vmatprep.mubr.bf16.mxu0 %v9261_v29 }
 0x2d1   : > { %v4438_v13 = vrot.slane %v10687_v7, 5  ;;  %v4440_v26 = vrot.slane %v10689_v32, 4  ;;  %v4435_v35 = vor.u32 %v4434_v62, %v4433_v46  ;;  %v10691_v49 = vshrl.u32 %v8938_v6, 16  ;;  %v10695_v1 = vld [vmem:[#allocation24_spill] sm:$0xff]  ;;  %6655 = vmatpush3.bf16.msra.mxu1 %v9325_v61 }
 0x2d2   : > { %v4441_v12 = vrot.slane %v10690_v4, 5  ;;  %v10692_v24 = vshll.u32 %v8938_v6, 16  ;;  %v10693_v5 = vshrl.u32 %v8965_v45, 16  ;;  %v10694_v25 = vshll.u32 %v8965_v45, 16  ;;  %6648 = vmatprep.subr.bf16.mxu1 %v9358_v8 }
 0x2d3   : > { %v4444_v53 = vrot.slane %v10691_v49, 4  ;;  %v4439_v43 = vor.u32 %v4438_v13, %v4437_v48  ;;  %v9367_v46 = vsel %vm1975_vm2, %v4432_v41, %v4435_v35  ;;  %v10696_v32 = vshrl.u32 %v10695_v1, 16 }
 0x2d4   : > { %v4445_v20 = vrot.slane %v10692_v24, 5  ;;  %v4447_v7 = vrot.slane %v10693_v5, 4  ;;  %v4448_v17 = vrot.slane %v10694_v25, 5  ;;  %v4442_v62 = vor.u32 %v4441_v12, %v4440_v26  ;;  %4087 = vmatmul.mubr.bf16.gmra.mxu1 %v9261_v29 }
 0x2d5   : > { %v4451_v4 = vrot.slane %v10696_v32, 4  ;;  %v10697_v49 = vshll.u32 %v10695_v1, 16  ;;  %v10698_v13 = vshrl.u32 %v9009_v31, 16  ;;  %v10699_v45 = vshll.u32 %v9009_v31, 16  ;;  %4094 = vmatprep.mubr.bf16.mxu1 %v9267_v9  ;;  %6656 = vmatpush3.bf16.msra.mxu1 %v9358_v8 }
 0x2d6   : > { %v4446_v6 = vor.u32 %v4445_v20, %v4444_v53  ;;  %v4449_v48 = vor.u32 %v4448_v17, %v4447_v7  ;;  %v9381_v41 = vsel %vm1975_vm2, %v4439_v43, %v4442_v62  ;;  %v10700_v35 = vshrl.u32 %v9031_v28, 16  ;;  %v9388_v20 = vld [vmem:[#allocation7 + $0x210] sm:$0xff]  }
 0x2d7   : > { %v4452_v15 = vrot.slane %v10697_v49, 5  ;;  %v4454_v24 = vrot.slane %v10698_v13, 4  ;;  %v4455_v5 = vrot.slane %v10699_v45, 5  ;;  %v10701_v56 = vshll.u32 %v9031_v28, 16  ;;  %6649 = vmatprep.subr.bf16.mxu1 %v9388_v20  ;;  %6517 = vmatmul.mubr.bf16.vlgmr.msra.gmra.mxu0 %v9264_v63 }
 0x2d8   : > { %v4458_v12 = vrot.slane %v10700_v35, 4  ;;  %v9391_v31 = vsel %vm1975_vm2, %v4446_v6, %v4449_v48  ;;  %v10702_v25 = vshrl.u32 %v9058_v16, 16  ;;  %v10703_v43 = vshll.u32 %v9058_v16, 16  ;;  %v6885_v35 = vld [vmem:[#allocation7 + $0x1b8] sm:$0xff]   ;;  %6520 = vmatprep.mubr.bf16.mxu0 %v9267_v9 }
 0x2d9   : > { %v4453_v26 = vor.u32 %v4452_v15, %v4451_v4  ;;  %v4459_v53 = vrot.slane %v10701_v56, 5  ;;  %v4456_v7 = vor.u32 %v4455_v5, %v4454_v24  ;;  %v10704_v1 = vshrl.u32 %v9078_v51, 16  ;;  %6137 = vmatpush3.bf16.msra.mxu0 %v6885_v35  ;;  %6657 = vmatpush3.bf16.msra.mxu1 %v9388_v20  ;;  %v9453_v35 = vld [vmem:[#allocation7 + $0x200] sm:$0xff]  }
 0x2da   : > { %v4461_v17 = vrot.slane %v10702_v25, 4  ;;  %v4462_v15 = vrot.slane %v10703_v43, 5  ;;  %v10705_v28 = vshll.u32 %v9078_v51, 16  ;;  %v10706_v49 = vshrl.u32 %v9102_v58, 16 }
 0x2db   : > { %v4460_v62 = vor.u32 %v4459_v53, %v4458_v12  ;;  %v4465_v32 = vrot.slane %v10704_v1, 4  ;;  %v9405_v6 = vsel %vm1975_vm2, %v4453_v26, %v4456_v7  ;;  %v10707_v24 = vshll.u32 %v9102_v58, 16  ;;  %v6886_v58 = vld [vmem:[#allocation7 + $0x1f0] sm:$0xff]  }
 0x2dc   : > { %v4466_v4 = vrot.slane %v10705_v28, 5  ;;  %v4468_v13 = vrot.slane %v10706_v49, 4  ;;  %v4463_v48 = vor.u32 %v4462_v15, %v4461_v17  ;;  %v10708_v45 = vshrl.u32 %v9124_v0, 16  ;;  %6138 = vmatprep.subr.bf16.mxu0 %v6886_v58  ;;  %4095 = vmatmul.mubr.bf16.gmra.mxu1 %v9264_v63  ;;  %v6893_v63 = vld [vmem:[#allocation7 + $0x1a0] sm:$0xff]  }
 0x2dd   : > { %v4469_v16 = vrot.slane %v10707_v24, 5  ;;  %v10709_v12 = vshll.u32 %v9124_v0, 16  ;;  %v10710_v29 = vshrl.u32 %v9146_v54, 16  ;;  %v10711_v53 = vshll.u32 %v9146_v54, 16 }
 0x2de   : > { %v4472_v5 = vrot.slane %v10708_v45, 4  ;;  %v4467_v51 = vor.u32 %v4466_v4, %v4465_v32  ;;  %v9421_v25 = vsel %vm1975_vm2, %v4460_v62, %v4463_v48  ;;  %v10712_v43 = vshrl.u32 %v9175_v19, 16  ;;  %v9427_v32 = vld [vmem:[#allocation7 + $0x208] sm:$0xff]  }
 0x2df   : > { %v4473_v56 = vrot.slane %v10709_v12, 5  ;;  %v4475_v26 = vrot.slane %v10710_v29, 4  ;;  %v4476_v7 = vrot.slane %v10711_v53, 5  ;;  %v4470_v17 = vor.u32 %v4469_v16, %v4468_v13  ;;  %v6888_v16 = vld [vmem:[#allocation7 + $0x1b0] sm:$0xff]   ;;  %6650 = vmatprep.subr.bf16.mxu1 %v9427_v32  ;;  %v6890_v29 = vld [vmem:[#allocation7 + $0x1a8] sm:$0xff]   ;;  %v6891_v53 = vld [vmem:[#allocation7 + $0x1e0] sm:$0xff]  }
 0x2e0   : > { %v4479_v15 = vrot.slane %v10712_v43, 4  ;;  %v10713_v1 = vshll.u32 %v9175_v19, 16  ;;  %v10714_v54 = vshrl.u32 %v9197_v50, 16  ;;  %v10715_v24 = vshll.u32 %v9197_v50, 16  ;;  %6139 = vmatpush3.bf16.msra.mxu0 %v6888_v16  ;;  %6658 = vmatpush3.bf16.msra.mxu1 %v9427_v32  ;;  %v6896_v43 = vld [vmem:[#allocation7 + $0x1d0] sm:$0xff]  }
 0x2e1   : > { %v4474_v28 = vor.u32 %v4473_v56, %v4472_v5  ;;  %v4477_v4 = vor.u32 %v4476_v7, %v4475_v26  ;;  %v2999_v62 = vor.u32 %v9294_v57, %v9279_v2  ;;  %v3015_v13 = vrot.slane %v3013_v55, 4  ;;  %6651 = vmatprep.subr.bf16.mxu1 %v9453_v35  ;;  %v9463_v7 = vld [vmem:[#allocation8 + $0x38] sm:$0xff]  }
 0x2e2   : > { %v4480_v0 = vrot.slane %v10713_v1, 5  ;;  %v4482_v49 = vrot.slane %v10714_v54, 4  ;;  %v4483_v45 = vrot.slane %v10715_v24, 5  ;;  %v9439_v19 = vsel %vm1975_vm2, %v4467_v51, %v4470_v17  ;;  %v6889_v51 = vld [vmem:[#allocation7 + $0x1e8] sm:$0xff]   ;;  %v6895_v17 = vld [vmem:[#allocation7 + $0x198] sm:$0xff]   ;;  %v10717_v1 = vld [vmem:[#allocation29_spill] sm:$0xff] }
 0x2e3   : > { %v9443_v5 = vsel %vm1975_vm2, %v4474_v28, %v4477_v4  ;;  %v2991_v12 = vor.u32 %v9275_v10, %v9271_v40  ;;  %v3004_v2 = vrot.slane %v3002_v34, 3  ;;  %v3007_v57 = vrot.slane %v3005_v44, 4  ;;  %6140 = vmatprep.subr.bf16.mxu0 %v6889_v51  ;;  %v6899_v28 = vld [vmem:[#allocation7 + $0x1c8] sm:$0xff]   ;;  %v6902_v24 = vld [vmem:[#allocation7 + $0x180] sm:$0xff]  }
 0x2e4   : > { %v4481_v48 = vor.u32 %v4480_v0, %v4479_v15  ;;  %v4484_v50 = vor.u32 %v4483_v45, %v4482_v49  ;;  %v3016_v10 = vor.u32 %v3015_v13, %v9298_v3  ;;  %6141 = vmatpush3.bf16.msra.mxu0 %v6890_v29  ;;  %v6894_v3 = vld [vmem:[#allocation7 + $0x1d8] sm:$0xff]   ;;  %6659 = vmatpush3.bf16.msra.mxu1 %v9453_v35  ;;  %v10716_v15 = vld [vmem:[#allocation37_spill] sm:$0xff]  ;;  %v6898_v0 = vld [vmem:[#allocation7 + $0x190] sm:$0xff]  }
 0x2e5   : > { %v3000_v40 = vsel %vm482_vm1, %v2991_v12, %v2999_v62  ;;  %v3008_v26 = vor.u32 %v3007_v57, %v3004_v2  ;;  %6142 = vmatprep.subr.bf16.mxu0 %v6891_v53  ;;  %6596 = vmatprep.subr.bf16.mxu1 %v9463_v7  ;;  %v6900_v4 = vld [vmem:[#allocation7 + $0x188] sm:$0xff]   ;;  %v10719_v49 = vld [vmem:[#allocation25_spill] sm:$0xff]  ;;  %v6916_v45 = vld [vmem:[#allocation7 + $0x238] sm:$0xff]  }
 0x2e6   : > { %v9456_v56 = vsel %vm1975_vm2, %v4481_v48, %v4484_v50  ;;  %4102 = vmatprep.mubr.bf16.mxu1 %v3000_v40  ;;  %6521 = vmatmul.mubr.bf16.gmra.mxu0 %v3000_v40  ;;  %v10718_v54 = vld [vmem:[#allocation38_spill] sm:$0xff]  ;;  %v10721_v13 = vld [vmem:[#allocation21_spill] sm:$0xff] }
 0x2e7   : > { %v3017_v58 = vsel %vm482_vm1, %v3008_v26, %v3016_v10  ;;  %4103 = vmatmul.mubr.bf16.gmra.mxu1 %v9267_v9  ;;  %v6901_v9 = vld [vmem:[#allocation7 + $0x1c0] sm:$0xff]   ;;  %v10720_v62 = vld [vmem:[#allocation26_spill] sm:$0xff]  ;;  %v10722_v48 = vshrl.u32 %v10721_v13, 16  ;;  %v10723_v50 = vshll.u32 %v10721_v13, 16 }
 0x2e8   : > { %6524 = vmatprep.mubr.bf16.mxu0 %v3017_v58  ;;  %4110 = vmatprep.mubr.bf16.mxu1 %v3017_v58  ;;  %v10724_v2 = vld [vmem:[#allocation17_spill] sm:$0xff]  ;;  %v10725_v57 = vld [vmem:[#allocation18_spill] sm:$0xff] }
 0x2e9   : > { %6143 = vmatpush3.bf16.msra.mxu0 %v6893_v63  ;;  %v4370_v16 = vrot.slane %v10722_v48, 4  ;;  %v4371_v12 = vrot.slane %v10723_v50, 5  ;;  %v10726_v51 = vshrl.u32 %v10725_v57, 16  ;;  %v10727_v10 = vshll.u32 %v10725_v57, 16  ;;  %v10737_v50 = vld [vmem:[#allocation30_spill] sm:$0xff] }
 0x2ea   : > { %6144 = vmatprep.subr.bf16.mxu0 %v6894_v3 }
 0x2eb   : > { %v4368_v29 = vrot.slane %v10727_v10, 5  ;;  %v4372_v26 = vor.u32 %v4371_v12, %v4370_v16  ;;  %v10738_v12 = vshrl.u32 %v10737_v50, 16 }
 0x2ed   : > { %6145 = vmatpush3.bf16.msra.mxu0 %v6895_v17  ;;  %v4374_v57 = vrot.slane %v10738_v12, 4 }
 0x2ee   : > { %6525 = vmatmul.mubr.bf16.gmra.mxu0 %v10716_v15  ;;  %6146 = vmatprep.subr.bf16.mxu0 %v6896_v43 }
 0x2ef   : > { %6528 = vmatprep.mubr.bf16.mxu0 %v10717_v1  ;;  %4111 = vmatmul.mubr.bf16.gmra.mxu1 %v3000_v40  ;;  %v4367_v40 = vrot.slane %v10726_v51, 4 }
 0x2f0   : > { %4118 = vmatprep.mubr.bf16.mxu1 %v10716_v15 }
 0x2f1   : > { %6147 = vmatpush3.bf16.msra.mxu0 %v6898_v0  ;;  %v4369_v53 = vor.u32 %v4368_v29, %v4367_v40 }
 0x2f2   : > { %6148 = vmatprep.subr.bf16.mxu0 %v6899_v28 }
 0x2f5   : > { %6149 = vmatpush3.bf16.msra.mxu0 %v6900_v4 }
 0x2f6   : > { %6529 = vmatmul.mubr.bf16.gmra.mxu0 %v10718_v54  ;;  %6150 = vmatprep.subr.bf16.mxu0 %v6901_v9 }
 0x2f7   : > { %6532 = vmatprep.mubr.bf16.mxu0 %v10719_v49  ;;  %4119 = vmatmul.mubr.bf16.gmra.mxu1 %v3017_v58  ;;  %v10728_v58 = vld [vmem:[#allocation22_spill] sm:$0xff] }
 0x2f8   : > { %4126 = vmatprep.mubr.bf16.mxu1 %v10717_v1  ;;  %v10729_v63 = vshrl.u32 %v10728_v58, 16  ;;  %v10730_v17 = vshll.u32 %v10728_v58, 16 }
 0x2f9   : > { %6151 = vmatpush3.bf16.msra.mxu0 %v6902_v24 }
 0x2fa   : > { %6548 = vmatprep.subr.bf16.mxu0 %v6916_v45  ;;  %v4363_v3 = vrot.slane %v10729_v63, 4  ;;  %v4364_v43 = vrot.slane %v10730_v17, 5  ;;  %v10740_v17 = vld [vmem:[#allocation32_spill] sm:$0xff] }
 0x2fc   : > { %v4365_v40 = vor.u32 %v4364_v43, %v4363_v3  ;;  %v10743_v43 = vld [vmem:[#allocation31_spill] sm:$0xff] }
 0x2fe   : > { %6533 = vmatmul.mubr.bf16.gmra.mxu0 %v10720_v62 }
 0x2ff   : > { %6536 = vmatprep.mubr.bf16.mxu0 %v9116_v59  ;;  %4127 = vmatmul.mubr.bf16.gmra.mxu1 %v10716_v15  ;;  %v4373_v15 = vsel %vm1975_vm2, %v4369_v53, %v4372_v26 }
 0x300   : > { %4134 = vmatprep.mubr.bf16.mxu1 %v10718_v54 }
 0x306   : > { %6537 = vmatmul.mubr.bf16.gmra.mxu0 %v9139_v27 }
 0x307   : > { %6540 = vmatprep.mubr.bf16.mxu0 %v9158_v11  ;;  %4135 = vmatmul.mubr.bf16.gmra.mxu1 %v10717_v1  ;;  %v10731_v1 = vld [vmem:[#allocation33_spill] sm:$0xff] }
 0x308   : > { %4142 = vmatprep.mubr.bf16.mxu1 %v10719_v49  ;;  %v10732_v0 = vshrl.u32 %v10731_v1, 16  ;;  %v10733_v4 = vshll.u32 %v10731_v1, 16  ;;  %v10741_v1 = vshrl.u32 %v10740_v17, 16 }
 0x30a   : > { %v4377_v28 = vrot.slane %v10732_v0, 4  ;;  %v4378_v9 = vrot.slane %v10733_v4, 5  ;;  %v4384_v0 = vrot.slane %v10741_v1, 4  ;;  %v10742_v4 = vshll.u32 %v10740_v17, 16 }
 0x30b   : > { %v10749_v1 = vshrl.u32 %v8699_v22, 16 }
 0x30c   : > { %v4379_v10 = vor.u32 %v4378_v9, %v4377_v28  ;;  %v4385_v3 = vrot.slane %v10742_v4, 5  ;;  %v10744_v28 = vshrl.u32 %v10743_v43, 16 }
 0x30e   : > { %6541 = vmatmul.mubr.bf16.gmra.mxu0 %v9182_v21  ;;  %v4381_v9 = vrot.slane %v10744_v28, 4 }
 0x30f   : > { %6544 = vmatprep.mubr.bf16.mxu0 %v10724_v2  ;;  %4143 = vmatmul.mubr.bf16.gmra.mxu1 %v10718_v54  ;;  %v10734_v54 = vld [vmem:[#allocation23_spill] sm:$0xff] }
 0x310   : > { %4150 = vmatprep.mubr.bf16.mxu1 %v10720_v62  ;;  %v10735_v24 = vshrl.u32 %v10734_v54, 16  ;;  %v10736_v48 = vshll.u32 %v10734_v54, 16  ;;  %v10745_v54 = vshll.u32 %v10743_v43, 16 }
 0x312   : > { %v4360_v13 = vrot.slane %v10735_v24, 4  ;;  %v4361_v16 = vrot.slane %v10736_v48, 5  ;;  %v4382_v24 = vrot.slane %v10745_v54, 5 }
 0x314   : > { %v4362_v29 = vor.u32 %v4361_v16, %v4360_v13  ;;  %v4386_v16 = vor.u32 %v4385_v3, %v4384_v0  ;;  %v4383_v12 = vor.u32 %v4382_v24, %v4381_v9  ;;  %v10750_v0 = vshll.u32 %v8699_v22, 16 }
 0x316   : > { %6545 = vmatmul.mubr.bf16.gmra.mxu0 %v9246_v47  ;;  %v10739_v47 = vshll.u32 %v10737_v50, 16  ;;  %v4366_v53 = vsel %vm1975_vm2, %v4362_v29, %v4365_v40  ;;  %v5880_v58 = vpop.f32.mrf.mxu0  ;;  %v4389_v4 = vrot.slane %v10750_v0, 5  ;;  %v4403_v0 = vrot.slane %v3005_v44, 5 }
 0x317   : > { %4729 = vmatprep.mubr.bf16.mxu0 %v4373_v15  ;;  %4151 = vmatmul.mubr.bf16.gmra.mxu1 %v10719_v49 }
 0x318   : > { %v4375_v51 = vrot.slane %v10739_v47, 5  ;;  %4158 = vmatprep.mubr.bf16.mxu1 %v9116_v59  ;;  %v5881_v49 = vpop.f32.mrf.mxu0 }
 0x319   : > { %v5882_v13 = vadd.f32 %v5881_v49, %v5880_v58 }
 0x31a   : > { %v4376_v26 = vor.u32 %v4375_v51, %v4374_v57  ;;  %v5883_v48 = vpop.f32.mrf.mxu0 }
 0x31c   : > { %v9517_v63 = vsel %vm1975_vm2, %v4376_v26, %v4379_v10  ;;  %v6470_v50 = vpop.f32.mrf.mxu1  ;;  %v9536_v10 = vsel %vm1975_vm2, %v4383_v12, %v4386_v16 }
 0x31e   : > { %4730 = vmatmul.mubr.bf16.vlgmr.msra.gmra.mxu0 %v4366_v53  ;;  %v3767_v47 = vpop.f32.mrf.mxu1 }
 0x31f   : > { %4737 = vmatprep.mubr.bf16.mxu0 %v9517_v63  ;;  %6549 = vmatpush3.bf16.msra.mxu0 %v6916_v45  ;;  %v5884_v45 = vpop.f32.mrf.mxu0  ;;  %v9533_v40 = vadd.f32 %v5882_v13, %v3767_v47  ;;  %v10751_v47 = vshll.u32 %v8692_v18, 16 }
 0x320   : > { %6550 = vmatprep.subr.bf16.mxu0 %v9255_v42  ;;  %4159 = vmatmul.mubr.bf16.gmra.mxu1 %v10720_v62  ;;  %v5885_v57 = vadd.f32 %v5884_v45, %v5883_v48  ;;  %v10746_v62 = vld [vmem:[#allocation34_spill] sm:$0xff] }
 0x321   : > { %4166 = vmatprep.mubr.bf16.mxu1 %v9139_v27  ;;  %v5886_v51 = vpop.f32.mrf.mxu0  ;;  %v10747_v29 = vshrl.u32 %v10746_v62, 16  ;;  %v10748_v53 = vshll.u32 %v10746_v62, 16 }
 0x323   : > { %6551 = vmatpush3.bf16.msra.mxu0 %v9255_v42  ;;  %v4391_v26 = vrot.slane %v10747_v29, 4  ;;  %v4392_v58 = vrot.slane %v10748_v53, 5  ;;  %v6471_v42 = vpop.f32.mrf.mxu1  ;;  %v5887_v17 = vpop.f32.mrf.mxu0 }
 0x324   : > { %6552 = vmatprep.subr.bf16.mxu0 %v9300_v36  ;;  %v5888_v3 = vadd.f32 %v5887_v17, %v5886_v51  ;;  %v4396_v51 = vrot.slane %v10751_v47, 5  ;;  %v4406_v17 = vrot.slane %v3013_v55, 5 }
 0x325   : > { %v3770_v49 = vpop.f32.mrf.mxu1  ;;  %v5889_v43 = vpop.f32.mrf.mxu0  ;;  %v4393_v9 = vor.u32 %v4392_v58, %v4391_v26 }
 0x326   : > { %4738 = vmatmul.mubr.bf16.gmra.mxu0 %v4373_v15  ;;  %v4388_v15 = vrot.slane %v10749_v1, 4  ;;  %v9549_v28 = vadd.f32 %v5885_v57, %v3770_v49  ;;  %v9552_v54 = vadd.f32 %v6470_v50, %v5888_v3  ;;  %v4399_v50 = vrot.slane %v2996_v39, 5 }
 0x327   : > { %4745 = vmatprep.mubr.bf16.mxu0 %v9536_v10  ;;  %6553 = vmatpush3.bf16.msra.mxu0 %v9300_v36  ;;  %v6474_v36 = vpop.f32.mrf.mxu1  ;;  %v5890_v24 = vpop.f32.mrf.mxu0  ;;  %v4395_v57 = vrot.slane %v2985_v14, 4 }
 0x328   : > { %6554 = vmatprep.subr.bf16.mxu0 %v9325_v61  ;;  %4167 = vmatmul.mubr.bf16.gmra.mxu1 %v9116_v59  ;;  %v4390_v22 = vor.u32 %v4389_v4, %v4388_v15  ;;  %v5891_v13 = vadd.f32 %v5890_v24, %v5889_v43  ;;  %v4398_v59 = vrot.slane %v2993_v37, 4  ;;  %v4402_v15 = vrot.slane %v3002_v34, 4 }
 0x329   : > { %4174 = vmatprep.mubr.bf16.mxu1 %v9158_v11  ;;  %v5892_v48 = vpop.f32.mrf.mxu0  ;;  %v3783_v16 = vpop.f32.mrf.mxu1  ;;  %v4397_v26 = vor.u32 %v4396_v51, %v4395_v57  ;;  %v6907_v57 = vld [vmem:[#allocation8 + $0x30] sm:$0xff]  }
 0x32a   : > { %v9559_v45 = vsel %vm1975_vm2, %v4390_v22, %v4393_v9  ;;  %v9565_v12 = vadd.f32 %v6471_v42, %v5891_v13  ;;  %v4400_v60 = vor.u32 %v4399_v50, %v4398_v59  ;;  %v4404_v43 = vor.u32 %v4403_v0, %v4402_v15  ;;  %v6910_v15 = vld [vmem:[#allocation8 + $0x18] sm:$0xff]  }
 0x32b   : > { %6555 = vmatpush3.bf16.msra.mxu0 %v9325_v61  ;;  %v5893_v61 = vpop.f32.mrf.mxu0  ;;  %v6475_v37 = vpop.f32.mrf.mxu1 }
 0x32c   : > { %6556 = vmatprep.subr.bf16.mxu0 %v9358_v8  ;;  %v5894_v62 = vadd.f32 %v5893_v61, %v5892_v48  ;;  %v9582_v58 = vsel %vm1975_vm2, %v4397_v26, %v4400_v60 }
 0x32d   : > { %v5895_v29 = vpop.f32.mrf.mxu0  ;;  %v3786_v14 = vpop.f32.mrf.mxu1 }
 0x32e   : > { %4746 = vmatmul.mubr.bf16.gmra.mxu0 %v9517_v63  ;;  %v9575_v39 = vadd.f32 %v5894_v62, %v3783_v16 }
 0x32f   : > { %4753 = vmatprep.mubr.bf16.mxu0 %v9559_v45  ;;  %6557 = vmatpush3.bf16.msra.mxu0 %v9358_v8  ;;  %v5896_v8 = vpop.f32.mrf.mxu0  ;;  %v6478_v3 = vpop.f32.mrf.mxu1 }
 0x330   : > { %6558 = vmatprep.subr.bf16.mxu0 %v9388_v20  ;;  %4175 = vmatmul.mubr.bf16.gmra.mxu1 %v9139_v27  ;;  %v5897_v18 = vadd.f32 %v5896_v8, %v5895_v29  ;;  %v10752_v27 = vshrl.u32 %v8760_v52, 16  ;;  %v6908_v29 = vld [vmem:[#allocation8 + $0x28] sm:$0xff]  }
 0x331   : > { %4182 = vmatprep.mubr.bf16.mxu1 %v9182_v21  ;;  %v5898_v53 = vpop.f32.mrf.mxu0  ;;  %v3799_v9 = vpop.f32.mrf.mxu1 }
 0x332   : > { %v4405_v42 = vrot.slane %v10752_v27, 4  ;;  %v9588_v1 = vadd.f32 %v5897_v18, %v3786_v14 }
 0x333   : > { %6559 = vmatpush3.bf16.msra.mxu0 %v9388_v20  ;;  %v5899_v20 = vpop.f32.mrf.mxu0 }
 0x334   : > { %6560 = vmatprep.subr.bf16.mxu0 %v9427_v32  ;;  %v5900_v4 = vadd.f32 %v5899_v20, %v5898_v53  ;;  %v4407_v52 = vor.u32 %v4406_v17, %v4405_v42  ;;  %v6909_v53 = vld [vmem:[#allocation8 + $0x20] sm:$0xff]  }
 0x335   : > { %v5901_v49 = vpop.f32.mrf.mxu0 }
 0x336   : > { %4754 = vmatmul.mubr.bf16.gmra.mxu0 %v9536_v10  ;;  %v9598_v55 = vadd.f32 %v6474_v36, %v5900_v4  ;;  %v4408_v44 = vsel %vm1975_vm2, %v4404_v43, %v4407_v52  ;;  %v6479_v36 = vpop.f32.mrf.mxu1  ;;  %v6911_v43 = vld [vmem:[#allocation8 + $0x10] sm:$0xff]  }
 0x337   : > { %4761 = vmatprep.mubr.bf16.mxu0 %v9582_v58  ;;  %6561 = vmatpush3.bf16.msra.mxu0 %v9427_v32  ;;  %v5902_v32 = vpop.f32.mrf.mxu0 }
 0x338   : > { %6562 = vmatprep.subr.bf16.mxu0 %v9453_v35  ;;  %4183 = vmatmul.mubr.bf16.gmra.mxu1 %v9158_v11  ;;  %v5903_v34 = vadd.f32 %v5902_v32, %v5901_v49  ;;  %v3802_v16 = vpop.f32.mrf.mxu1 }
 0x339   : > { %4190 = vmatprep.mubr.bf16.mxu1 %v10724_v2  ;;  %v5904_v38 = vpop.f32.mrf.mxu0 }
 0x33a   : > { %v9604_v24 = vadd.f32 %v6475_v37, %v5903_v34  ;;  %v6482_v51 = vpop.f32.mrf.mxu1 }
 0x33b   : > { %6563 = vmatpush3.bf16.msra.mxu0 %v9453_v35  ;;  %v5905_v11 = vpop.f32.mrf.mxu0 }
 0x33c   : > { %v5906_v22 = vadd.f32 %v5905_v11, %v5904_v38  ;;  %v3815_v8 = vpop.f32.mrf.mxu1  ;;  %v6912_v11 = vld [vmem:[#allocation8 + $0x8] sm:$0xff]  }
 0x33d   : > { %v5907_v13 = vpop.f32.mrf.mxu0 }
 0x33e   : > { %4762 = vmatmul.mubr.bf16.gmra.mxu0 %v9559_v45  ;;  %v9607_v2 = vadd.f32 %v5906_v22, %v3799_v9  ;;  %v6483_v42 = vpop.f32.mrf.mxu1 }
 0x33f   : > { %4769 = vmatprep.mubr.bf16.mxu0 %v4408_v44  ;;  %v5908_v35 = vpop.f32.mrf.mxu0 }
 0x340   : > { %4191 = vmatmul.mubr.bf16.gmra.mxu1 %v9182_v21  ;;  %v5909_v48 = vadd.f32 %v5908_v35, %v5907_v13  ;;  %v3818_v4 = vpop.f32.mrf.mxu1 }
 0x341   : > { %6572 = vmatprep.mubr.bf16.mxu1 %v4408_v44  ;;  %v5910_v59 = vpop.f32.mrf.mxu0 }
 0x342   : > { %v9610_v50 = vadd.f32 %v5909_v48, %v3802_v16  ;;  %v6913_v16 = vld [vmem:[#allocation8] sm:$0xff]  }
 0x343   : > { %v5911_v61 = vpop.f32.mrf.mxu0 }
 0x344   : > { %v5912_v47 = vadd.f32 %v5911_v61, %v5910_v59 }
 0x345   : > { %v5913_v62 = vpop.f32.mrf.mxu0 }
 0x346   : > { %4770 = vmatmul.mubr.bf16.gmra.mxu0 %v9582_v58  ;;  %v9614_v21 = vadd.f32 %v6478_v3, %v5912_v47 }
 0x347   : > { %4777 = vmatprep.mubr.bf16.mxu0 %v9328_v30  ;;  %v5914_v37 = vpop.f32.mrf.mxu0 }
 0x348   : > { %6573 = vmatmul.mubr.bf16.vlgmr.msra.gmra.mxu1 %v9328_v30  ;;  %v5915_v60 = vadd.f32 %v5914_v37, %v5913_v62 }
 0x349   : > { %6576 = vmatprep.mubr.bf16.mxu1 %v9335_v33  ;;  %6597 = vmatpush3.bf16.msra.mxu1 %v9463_v7  ;;  %v5916_v26 = vpop.f32.mrf.mxu0 }
 0x34a   : > { %6598 = vmatprep.subr.bf16.mxu1 %v6907_v57  ;;  %v9618_v18 = vadd.f32 %v6479_v36, %v5915_v60  ;;  %v6486_v52 = vpop.f32.mrf.mxu1 }
 0x34b   : > { %v5917_v14 = vpop.f32.mrf.mxu0 }
 0x34c   : > { %v5918_v27 = vadd.f32 %v5917_v14, %v5916_v26 }
 0x34d   : > { %6599 = vmatpush3.bf16.msra.mxu1 %v6907_v57  ;;  %v5919_v17 = vpop.f32.mrf.mxu0 }
 0x34e   : > { %4778 = vmatmul.mubr.bf16.gmra.mxu0 %v4408_v44  ;;  %6600 = vmatprep.subr.bf16.mxu1 %v6908_v29  ;;  %v9622_v7 = vadd.f32 %v5918_v27, %v3815_v8  ;;  %v3831_v44 = vpop.f32.mrf.mxu1 }
 0x34f   : > { %4785 = vmatprep.mubr.bf16.mxu0 %v9335_v33  ;;  %v5920_v20 = vpop.f32.mrf.mxu0 }
 0x350   : > { %6577 = vmatmul.mubr.bf16.gmra.mxu1 %v9351_v23  ;;  %v5921_v0 = vadd.f32 %v5920_v20, %v5919_v17  ;;  %v6487_v35 = vpop.f32.mrf.mxu1 }
 0x351   : > { %6580 = vmatprep.mubr.bf16.mxu1 %v9367_v46  ;;  %6601 = vmatpush3.bf16.msra.mxu1 %v6908_v29  ;;  %v5922_v3 = vpop.f32.mrf.mxu0 }
 0x352   : > { %6602 = vmatprep.subr.bf16.mxu1 %v6909_v53  ;;  %v9626_v49 = vadd.f32 %v5921_v0, %v3818_v4  ;;  %v3834_v47 = vpop.f32.mrf.mxu1  ;;  %v6918_v0 = vld [vmem:[%s7343_s25 + $0x8] sm:$0xff] }
 0x353   : > { %v5923_v32 = vpop.f32.mrf.mxu0 }
 0x354   : > { %v5924_v34 = vadd.f32 %v5923_v32, %v5922_v3 }
 0x355   : > { %6603 = vmatpush3.bf16.msra.mxu1 %v6909_v53  ;;  %v5925_v9 = vpop.f32.mrf.mxu0 }
 0x356   : > { %4786 = vmatmul.mubr.bf16.gmra.mxu0 %v9328_v30  ;;  %6604 = vmatprep.subr.bf16.mxu1 %v6910_v15  ;;  %v9630_v38 = vadd.f32 %v6482_v51, %v5924_v34 }
 0x357   : > { %4793 = vmatprep.mubr.bf16.mxu0 %v9351_v23  ;;  %v5926_v30 = vpop.f32.mrf.mxu0 }
 0x358   : > { %6581 = vmatmul.mubr.bf16.gmra.mxu1 %v9381_v41  ;;  %v5927_v22 = vadd.f32 %v5926_v30, %v5925_v9 }
 0x359   : > { %6584 = vmatprep.mubr.bf16.mxu1 %v9391_v31  ;;  %6605 = vmatpush3.bf16.msra.mxu1 %v6910_v15  ;;  %v5928_v36 = vpop.f32.mrf.mxu0  ;;  %v6917_v15 = vld [vmem:[%s7343_s25] sm:$0xff] }
 0x35a   : > { %6606 = vmatprep.subr.bf16.mxu1 %v6911_v43  ;;  %v9634_v13 = vadd.f32 %v6483_v42, %v5927_v22  ;;  %v6490_v62 = vpop.f32.mrf.mxu1  ;;  %v5161_v4 = vpack.c.bf16 %v6918_v0, %v6917_v15  ;;  %v6919_v22 = vld [vmem:[%s7343_s25 + $0x20] sm:$0xff]  ;;  %v6924_v15 = vld [vmem:[%s7343_s25 + $0x48] sm:$0xff] }
 0x35b   : > { %v5929_v48 = vpop.f32.mrf.mxu0 }
 0x35c   : > { %v5930_v59 = vadd.f32 %v5929_v48, %v5928_v36  ;;  %v3847_v26 = vpop.f32.mrf.mxu1  ;;  %v6920_v36 = vld [vmem:[%s7343_s25 + $0x28] sm:$0xff] }
 0x35d   : > { %6607 = vmatpush3.bf16.msra.mxu1 %v6911_v43  ;;  %v5931_v61 = vpop.f32.mrf.mxu0 }
 0x35e   : > { %4794 = vmatmul.mubr.bf16.gmra.mxu0 %v9335_v33  ;;  %6608 = vmatprep.subr.bf16.mxu1 %v6912_v11  ;;  %v9638_v57 = vadd.f32 %v5930_v59, %v3831_v44 }
 0x35f   : > { %4801 = vmatprep.mubr.bf16.mxu0 %v9367_v46  ;;  %v5932_v33 = vpop.f32.mrf.mxu0 }
 0x360   : > { %6585 = vmatmul.mubr.bf16.gmra.mxu1 %v9405_v6  ;;  %v5933_v51 = vadd.f32 %v5932_v33, %v5931_v61  ;;  %v10753_v61 = vld [vmem:[#allocation20_spill] sm:$0xff] }
 0x361   : > { %6588 = vmatprep.mubr.bf16.mxu1 %v9421_v25  ;;  %6609 = vmatpush3.bf16.msra.mxu1 %v6912_v11  ;;  %v5934_v37 = vpop.f32.mrf.mxu0 }
 0x362   : > { %6610 = vmatprep.subr.bf16.mxu1 %v6913_v16  ;;  %v9642_v29 = vadd.f32 %v5933_v51, %v3834_v47  ;;  %v10754_v47 = vld [vmem:[#allocation19_spill] sm:$0xff] }
 0x363   : > { %v5935_v60 = vpop.f32.mrf.mxu0  ;;  %v10755_v33 = vpack.c.bf16 %v10753_v61, %v10754_v47 }
 0x364   : > { %v5936_v8 = vadd.f32 %v5935_v60, %v5934_v37 }
 0x365   : > { %6611 = vmatpush3.bf16.msra.mxu1 %v6913_v16  ;;  %v5937_v14 = vpop.f32.mrf.mxu0 }
 0x366   : > { %4802 = vmatmul.mubr.bf16.gmra.mxu0 %v9351_v23  ;;  %v9646_v53 = vadd.f32 %v6486_v52, %v5936_v8  ;;  %v6491_v23 = vpop.f32.mrf.mxu1 }
 0x367   : > { %4809 = vmatprep.mubr.bf16.mxu0 %v9381_v41  ;;  %v5938_v27 = vpop.f32.mrf.mxu0 }
 0x368   : > { %6589 = vmatmul.mubr.bf16.gmra.mxu1 %v9439_v19  ;;  %v5939_v42 = vadd.f32 %v5938_v27, %v5937_v14  ;;  %v3850_v32 = vpop.f32.mrf.mxu1  ;;  %v6922_v14 = vld [vmem:[%s7343_s25 + $0x38] sm:$0xff] }
 0x369   : > { %6592 = vmatprep.mubr.bf16.mxu1 %v9443_v5  ;;  %v5940_v17 = vpop.f32.mrf.mxu0 }
 0x36a   : > { %v9650_v20 = vadd.f32 %v6487_v35, %v5939_v42  ;;  %v5163_v35 = vpack.c.bf16 %v6920_v36, %v6919_v22  ;;  %v6925_v22 = vld [vmem:[%s7343_s25 + $0x50] sm:$0xff]  ;;  %v6926_v36 = vld [vmem:[%s7343_s25 + $0x58] sm:$0xff] }
 0x36b   : > { %v5941_v3 = vpop.f32.mrf.mxu0  ;;  %v6494_v9 = vpop.f32.mrf.mxu1 }
 0x36c   : > { %v5942_v52 = vadd.f32 %v5941_v3, %v5940_v17  ;;  %v6923_v17 = vld [vmem:[%s7343_s25 + $0x40] sm:$0xff] }
 0x36d   : > { %v5943_v43 = vpop.f32.mrf.mxu0  ;;  %v3863_v48 = vpop.f32.mrf.mxu1  ;;  %v5165_v0 = vpack.c.bf16 %v6924_v15, %v6923_v17 }
 0x36e   : > { %4810 = vmatmul.mubr.bf16.gmra.mxu0 %v9367_v46  ;;  %v9656_v34 = vadd.f32 %v5942_v52, %v3847_v26  ;;  %v6921_v26 = vld [vmem:[%s7343_s25 + $0x30] sm:$0xff] }
 0x36f   : > { %4817 = vmatprep.mubr.bf16.mxu0 %v9391_v31  ;;  %v5944_v46 = vpop.f32.mrf.mxu0  ;;  %v6495_v51 = vpop.f32.mrf.mxu1  ;;  %v5164_v27 = vpack.c.bf16 %v6922_v14, %v6921_v26 }
 0x370   : > { %6593 = vmatmul.mubr.bf16.gmra.mxu1 %v9456_v56  ;;  %v5945_v44 = vadd.f32 %v5944_v46, %v5943_v43 }
 0x371   : > { %6612 = vmatprep.mubr.bf16.mxu1 %v5161_v4  ;;  %v5946_v30 = vpop.f32.mrf.mxu0 }
 0x372   : > { %v9659_v11 = vadd.f32 %v5945_v44, %v3850_v32 }
 0x373   : > { %v5947_v56 = vpop.f32.mrf.mxu0 }
 0x374   : > { %v5948_v16 = vadd.f32 %v5947_v56, %v5946_v30 }
 0x375   : > { %v5949_v59 = vpop.f32.mrf.mxu0 }
 0x376   : > { %4818 = vmatmul.mubr.bf16.gmra.mxu0 %v9381_v41  ;;  %v9667_v41 = vadd.f32 %v6490_v62, %v5948_v16  ;;  %v3866_v62 = vpop.f32.mrf.mxu1  ;;  %v6927_v16 = vld [vmem:[%s7343_s25 + $0x60] sm:$0xff] }
 0x377   : > { %4825 = vmatprep.mubr.bf16.mxu0 %v9405_v6  ;;  %v5950_v37 = vpop.f32.mrf.mxu0 }
 0x378   : > { %6613 = vmatmul.mubr.bf16.vlgmr.msra.gmra.mxu1 %v10755_v33  ;;  %v5951_v60 = vadd.f32 %v5950_v37, %v5949_v59  ;;  %v6928_v59 = vld [vmem:[%s7343_s25 + $0x68] sm:$0xff] }
 0x379   : > { %6616 = vmatprep.mubr.bf16.mxu1 %v5163_v35  ;;  %v5952_v8 = vpop.f32.mrf.mxu0  ;;  %v5166_v35 = vpack.c.bf16 %v6926_v36, %v6925_v22 }
 0x37a   : > { %v9672_v42 = vadd.f32 %v6491_v23, %v5951_v60 }
 0x37b   : > { %v5953_v4 = vpop.f32.mrf.mxu0 }
 0x37c   : > { %v5954_v3 = vadd.f32 %v5953_v4, %v5952_v8  ;;  %v9677_v32 = vpop.f32.mrf.mxu1 }
 0x37d   : > { %v5955_v52 = vpop.f32.mrf.mxu0 }
 0x37e   : > { %4826 = vmatmul.mubr.bf16.gmra.mxu0 %v9391_v31  ;;  %v9679_v31 = vadd.f32 %v5954_v3, %v3863_v48  ;;  %v3879_v43 = vpop.f32.mrf.mxu1  ;;  %v5167_v48 = vpack.c.bf16 %v6928_v59, %v6927_v16 }
 0x37f   : > { %4833 = vmatprep.mubr.bf16.mxu0 %v9421_v25  ;;  %v5956_v23 = vpop.f32.mrf.mxu0 }
 0x380   : > { %6617 = vmatmul.mubr.bf16.gmra.mxu1 %v5164_v27  ;;  %v5957_v46 = vadd.f32 %v5956_v23, %v5955_v52  ;;  %v9682_v30 = vpop.f32.mrf.mxu1  ;;  %v6931_v52 = vld [vmem:[%s7343_s25 + $0x80] sm:$0xff]  ;;  %v6932_v23 = vld [vmem:[%s7343_s25 + $0x88] sm:$0xff] }
 0x381   : > { %6620 = vmatprep.mubr.bf16.mxu1 %v5165_v0  ;;  %v5958_v44 = vpop.f32.mrf.mxu0  ;;  %v6929_v0 = vld [vmem:[%s7343_s25 + $0x70] sm:$0xff] }
 0x382   : > { %v9686_v56 = vadd.f32 %v5957_v46, %v3866_v62  ;;  %v3882_v47 = vpop.f32.mrf.mxu1  ;;  %v6930_v62 = vld [vmem:[%s7343_s25 + $0x78] sm:$0xff] }
 0x383   : > { %v5959_v61 = vpop.f32.mrf.mxu0  ;;  %v5168_v4 = vpack.c.bf16 %v6930_v62, %v6929_v0 }
 0x384   : > { %v5960_v33 = vadd.f32 %v5959_v61, %v5958_v44  ;;  %v6016_v60 = vpop.f32.mrf.mxu1 }
 0x385   : > { %v5961_v37 = vpop.f32.mrf.mxu0 }
 0x386   : > { %4834 = vmatmul.mubr.bf16.gmra.mxu0 %v9405_v6  ;;  %v9691_v6 = vadd.f32 %v6494_v9, %v5960_v33  ;;  %v6017_v26 = vpop.f32.mrf.mxu1  ;;  %v5169_v9 = vpack.c.bf16 %v6932_v23, %v6931_v52 }
 0x387   : > { %4841 = vmatprep.mubr.bf16.mxu0 %v9439_v19  ;;  %v5962_v8 = vpop.f32.mrf.mxu0  ;;  %v6018_v27 = vadd.f32 %v6017_v26, %v6016_v60  ;;  %v6933_v60 = vld [vmem:[%s7343_s25 + $0x90] sm:$0xff] }
 0x388   : > { %6621 = vmatmul.mubr.bf16.gmra.mxu1 %v5166_v35  ;;  %v5963_v14 = vadd.f32 %v5962_v8, %v5961_v37  ;;  %v6019_v15 = vpop.f32.mrf.mxu1  ;;  %v6934_v8 = vld [vmem:[%s7343_s25 + $0x98] sm:$0xff] }
 0x389   : > { %6624 = vmatprep.mubr.bf16.mxu1 %v5167_v48  ;;  %v5964_v17 = vpop.f32.mrf.mxu0  ;;  %v4073_v46 = vadd.f32 %v6018_v27, %v9533_v40  ;;  %v5170_v26 = vpack.c.bf16 %v6934_v8, %v6933_v60  ;;  %v6935_v27 = vld [vmem:[%s7343_s25 + $0xa0] sm:$0xff] }
 0x38a   : > { %v9696_v3 = vadd.f32 %v6495_v51, %v5963_v14  ;;  %v6020_v22 = vpop.f32.mrf.mxu1 }
 0x38b   : > { %v5965_v44 = vpop.f32.mrf.mxu0  ;;  %v6021_v35 = vadd.f32 %v6020_v22, %v6019_v15 }
 0x38c   : > { %v5966_v36 = vadd.f32 %v5965_v44, %v5964_v17  ;;  %v6022_v16 = vpop.f32.mrf.mxu1  ;;  %v6936_v17 = vld [vmem:[%s7343_s25 + $0xa8] sm:$0xff] }
 0x38e   : > { %4842 = vmatmul.mubr.bf16.gmra.mxu0 %v9421_v25  ;;  %v5967_v25 = vpop.f32.mrf.mxu0  ;;  %v9702_v59 = vadd.f32 %v5966_v36, %v3879_v43  ;;  %v6023_v48 = vpop.f32.mrf.mxu1 }
 0x38f   : > { %4849 = vmatprep.mubr.bf16.mxu0 %v9443_v5  ;;  %v4076_v5 = vadd.f32 %v6021_v35, %v9549_v28  ;;  %v6024_v40 = vadd.f32 %v6023_v48, %v6022_v16  ;;  %v5171_v28 = vpack.c.bf16 %v6936_v17, %v6935_v27  ;;  %v6937_v35 = vld [vmem:[%s7343_s25 + $0xb0] sm:$0xff]  ;;  %v6939_v48 = vld [vmem:[%s7343_s25 + $0xc0] sm:$0xff] }
 0x390   : > { %6625 = vmatmul.mubr.bf16.gmra.mxu1 %v5168_v4  ;;  %v5968_v51 = vpop.f32.mrf.mxu0  ;;  %v6025_v37 = vpop.f32.mrf.mxu1 }
 0x391   : > { %6628 = vmatprep.mubr.bf16.mxu1 %v5169_v9  ;;  %v5969_v61 = vadd.f32 %v5968_v51, %v5967_v25  ;;  %v4081_v43 = vadd.f32 %v6024_v40, %v9552_v54  ;;  %v6938_v25 = vld [vmem:[%s7343_s25 + $0xb8] sm:$0xff] }
 0x392   : > { %v5970_v33 = vpop.f32.mrf.mxu0  ;;  %v6026_v0 = vpop.f32.mrf.mxu1  ;;  %v5172_v16 = vpack.c.bf16 %v6938_v25, %v6937_v35 }
 0x393   : > { %v9708_v14 = vadd.f32 %v5969_v61, %v3882_v47  ;;  %v6027_v4 = vadd.f32 %v6026_v0, %v6025_v37  ;;  %v6940_v61 = vld [vmem:[%s7343_s25 + $0xc8] sm:$0xff]  ;;  %v6942_v0 = vld [vmem:[%s7343_s25 + $0xd8] sm:$0xff] }
 0x394   : > { %v5971_v15 = vpop.f32.mrf.mxu0  ;;  %v6028_v52 = vpop.f32.mrf.mxu1  ;;  %v5173_v40 = vpack.c.bf16 %v6940_v61, %v6939_v48  ;;  %v6945_v61 = vld [vmem:[%s7343_s25 + $0xf0] sm:$0xff] }
 0x395   : > { %v5972_v62 = vadd.f32 %v5971_v15, %v5970_v33  ;;  %v4084_v47 = vadd.f32 %v6027_v4, %v9565_v12  ;;  %v6941_v15 = vld [vmem:[%s7343_s25 + $0xd0] sm:$0xff] }
 0x396   : > { %4850 = vmatmul.mubr.bf16.gmra.mxu0 %v9439_v19  ;;  %v5973_v19 = vpop.f32.mrf.mxu0  ;;  %v6029_v54 = vpop.f32.mrf.mxu1 }
 0x397   : > { %6564 = vmatprep.mubr.bf16.mxu0 %v9517_v63  ;;  %v9715_v23 = vadd.f32 %v9677_v32, %v5972_v62  ;;  %v6030_v44 = vadd.f32 %v6029_v54, %v6028_v52  ;;  %v5174_v62 = vpack.c.bf16 %v6942_v0, %v6941_v15  ;;  %v6944_v52 = vld [vmem:[%s7343_s25 + $0xe8] sm:$0xff] }
 0x398   : > { %6629 = vmatmul.mubr.bf16.gmra.mxu1 %v5170_v26  ;;  %v5974_v63 = vpop.f32.mrf.mxu0  ;;  %v6031_v36 = vpop.f32.mrf.mxu1 }
 0x399   : > { %6632 = vmatprep.mubr.bf16.mxu1 %v5171_v28  ;;  %v5975_v9 = vadd.f32 %v5974_v63, %v5973_v19  ;;  %v4089_v12 = vadd.f32 %v6030_v44, %v9575_v39  ;;  %v6943_v19 = vld [vmem:[%s7343_s25 + $0xe0] sm:$0xff] }
 0x39a   : > { %v6518_v22 = vpop.f32.mrf.mxu0  ;;  %v6032_v37 = vpop.f32.mrf.mxu1 }
 0x39b   : > { %v9722_v51 = vadd.f32 %v9682_v30, %v5975_v9  ;;  %v9724_v32 = vadd.f32 %v6518_v22, %v4081_v43  ;;  %v6033_v60 = vadd.f32 %v6032_v37, %v6031_v36 }
 0x39c   : > { %v4233_v33 = vpop.f32.mrf.mxu0  ;;  %v6034_v26 = vpop.f32.mrf.mxu1 }
 0x39d   : > { %10756 = vst [vmem:[#allocation27_spill] sm:$0xff] %v9724_v32 }
 0x39e   : > { %6565 = vmatmul.mubr.bf16.vlgmr.msra.gmra.mxu0 %v9536_v10  ;;  %v9730_v10 = vadd.f32 %v4233_v33, %v4073_v46  ;;  %v6519_v8 = vpop.f32.mrf.mxu0  ;;  %v6035_v43 = vpop.f32.mrf.mxu1 }
 0x39f   : > { %6568 = vmatprep.mubr.bf16.mxu0 %v9559_v45  ;;  %v9732_v30 = vadd.f32 %v6519_v8, %v4084_v47  ;;  %v4092_v45 = vadd.f32 %v6033_v60, %v9588_v1  ;;  %v6036_v17 = vadd.f32 %v6035_v43, %v6034_v26  ;;  %v5175_v47 = vpack.c.bf16 %v6944_v52, %v6943_v19 }
 0x3a0   : > { %10757 = vst [vmem:[#allocation28_spill] sm:$0xff] %v9730_v10  ;;  %6633 = vmatmul.mubr.bf16.gmra.mxu1 %v5172_v16  ;;  %v4236_v39 = vpop.f32.mrf.mxu0  ;;  %v6037_v46 = vpop.f32.mrf.mxu1 }
 0x3a1   : > { %10758 = vst [vmem:[#allocation35_spill] sm:$0xff] %v9732_v30  ;;  %6636 = vmatprep.mubr.bf16.mxu1 %v5173_v40  ;;  %v9735_v27 = vadd.f32 %v4236_v39, %v4076_v5  ;;  %v4097_v4 = vadd.f32 %v6036_v17, %v9598_v55  ;;  %v6946_v40 = vld [vmem:[%s7343_s25 + $0xf8] sm:$0xff] }
 0x3a2   : > { %v6038_v1 = vpop.f32.mrf.mxu1  ;;  %v5176_v33 = vpack.c.bf16 %v6946_v40, %v6945_v61 }
 0x3a3   : > { %10759 = vst [vmem:[#allocation36_spill] sm:$0xff] %v9735_v27  ;;  %v6039_v5 = vadd.f32 %v6038_v1, %v6037_v46 }
 0x3a5   : > { %v4100_v22 = vadd.f32 %v6039_v5, %v9604_v24 }
 0x3a6   : > { %v6522_v28 = vpop.f32.mrf.mxu0  ;;  %6569 = vmatmul.mubr.bf16.gmra.mxu0 %v9582_v58 }
 0x3a7   : > { %v9745_v9 = vadd.f32 %v6522_v28, %v4097_v4  ;;  %v6040_v58 = vpop.f32.mrf.mxu1 }
 0x3a8   : > { %v4249_v63 = vpop.f32.mrf.mxu0  ;;  %6637 = vmatmul.mubr.bf16.gmra.mxu1 %v5174_v62 }
 0x3a9   : > { %v9743_v54 = vadd.f32 %v4249_v63, %v4089_v12  ;;  %10761 = vst [vmem:[#allocation37_spill] sm:$0xff] %v9745_v9  ;;  %6640 = vmatprep.mubr.bf16.mxu1 %v5175_v47  ;;  %v6041_v55 = vpop.f32.mrf.mxu1 }
 0x3aa   : > { %v6523_v44 = vpop.f32.mrf.mxu0  ;;  %v6042_v25 = vadd.f32 %v6041_v55, %v6040_v58 }
 0x3ab   : > { %10760 = vst [vmem:[#allocation24_spill] sm:$0xff] %v9743_v54  ;;  %v9750_v16 = vadd.f32 %v6523_v44, %v4100_v22  ;;  %v6043_v12 = vpop.f32.mrf.mxu1 }
 0x3ac   : > { %v4252_v36 = vpop.f32.mrf.mxu0  ;;  %v4105_v37 = vadd.f32 %v6042_v25, %v9607_v2 }
 0x3ad   : > { %v9748_v35 = vadd.f32 %v4252_v36, %v4092_v45  ;;  %10763 = vst [vmem:[#allocation38_spill] sm:$0xff] %v9750_v16  ;;  %v6044_v8 = vpop.f32.mrf.mxu1 }
 0x3ae   : > { %v6526_v48 = vpop.f32.mrf.mxu0  ;;  %v6045_v24 = vadd.f32 %v6044_v8, %v6043_v12 }
 0x3af   : > { %10762 = vst [vmem:[#allocation29_spill] sm:$0xff] %v9748_v35  ;;  %v6046_v43 = vpop.f32.mrf.mxu1 }
 0x3b0   : > { %v4265_v60 = vpop.f32.mrf.mxu0  ;;  %6641 = vmatmul.mubr.bf16.gmra.mxu1 %v5176_v33  ;;  %v4108_v45 = vadd.f32 %v6045_v24, %v9610_v50 }
 0x3b1   : > { %v9755_v26 = vadd.f32 %v4265_v60, %v4105_v37  ;;  %v6047_v28 = vpop.f32.mrf.mxu1 }
 0x3b2   : > { %v6527_v39 = vpop.f32.mrf.mxu0  ;;  %v6048_v15 = vadd.f32 %v6047_v28, %v6046_v43 }
 0x3b3   : > { %v6049_v62 = vpop.f32.mrf.mxu1 }
 0x3b4   : > { %v4268_v17 = vpop.f32.mrf.mxu0  ;;  %v4113_v4 = vadd.f32 %v6048_v15, %v9614_v21 }
 0x3b5   : > { %v9758_v46 = vadd.f32 %v4268_v17, %v4108_v45  ;;  %v6050_v19 = vpop.f32.mrf.mxu1 }
 0x3b6   : > { %v6530_v0 = vpop.f32.mrf.mxu0  ;;  %v6051_v52 = vadd.f32 %v6050_v19, %v6049_v62  ;;  %v9761_v47 = vadd.f32 %v6526_v48, %v4113_v4 }
 0x3b7   : > { %v6052_v1 = vpop.f32.mrf.mxu1 }
 0x3b8   : > { %v4281_v2 = vpop.f32.mrf.mxu0  ;;  %v4116_v5 = vadd.f32 %v6051_v52, %v9618_v18 }
 0x3b9   : > { %v6053_v50 = vpop.f32.mrf.mxu1 }
 0x3ba   : > { %v6531_v63 = vpop.f32.mrf.mxu0  ;;  %v6054_v58 = vadd.f32 %v6053_v50, %v6052_v1  ;;  %v9764_v22 = vadd.f32 %v6527_v39, %v4116_v5 }
 0x3bb   : > { %v6055_v55 = vpop.f32.mrf.mxu1 }
 0x3bc   : > { %v4284_v44 = vpop.f32.mrf.mxu0  ;;  %v4121_v25 = vadd.f32 %v6054_v58, %v9622_v7 }
 0x3bd   : > { %v6056_v21 = vpop.f32.mrf.mxu1 }
 0x3be   : > { %v6534_v36 = vpop.f32.mrf.mxu0  ;;  %v6057_v61 = vadd.f32 %v6056_v21, %v6055_v55  ;;  %v9767_v40 = vadd.f32 %v4281_v2, %v4121_v25 }
 0x3bf   : > { %v6058_v33 = vpop.f32.mrf.mxu1 }
 0x3c0   : > { %v4297_v12 = vpop.f32.mrf.mxu0  ;;  %v4124_v37 = vadd.f32 %v6057_v61, %v9626_v49 }
 0x3c1   : > { %v6059_v18 = vpop.f32.mrf.mxu1 }
 0x3c2   : > { %v6535_v48 = vpop.f32.mrf.mxu0  ;;  %v6060_v8 = vadd.f32 %v6059_v18, %v6058_v33  ;;  %v9770_v24 = vadd.f32 %v4284_v44, %v4124_v37 }
 0x3c3   : > { %v6061_v43 = vpop.f32.mrf.mxu1 }
 0x3c4   : > { %v4300_v60 = vpop.f32.mrf.mxu0  ;;  %v4129_v45 = vadd.f32 %v6060_v8, %v9630_v38 }
 0x3c5   : > { %v6062_v17 = vpop.f32.mrf.mxu1 }
 0x3c6   : > { %v9772_v39 = vpop.f32.mrf.mxu0  ;;  %v9775_v28 = vadd.f32 %v6530_v0, %v4129_v45  ;;  %v6063_v15 = vadd.f32 %v6062_v17, %v6061_v43 }
 0x3c7   : > { %v6064_v4 = vpop.f32.mrf.mxu1 }
 0x3c8   : > { %v4313_v7 = vpop.f32.mrf.mxu0  ;;  %v4132_v49 = vadd.f32 %v6063_v15, %v9634_v13 }
 0x3c9   : > { %v6065_v19 = vpop.f32.mrf.mxu1 }
 0x3ca   : > { %v9777_v62 = vpop.f32.mrf.mxu0  ;;  %v9780_v52 = vadd.f32 %v6531_v63, %v4132_v49  ;;  %v6066_v1 = vadd.f32 %v6065_v19, %v6064_v4 }
 0x3cb   : > { %v6067_v44 = vpop.f32.mrf.mxu1 }
 0x3cc   : > { %v4316_v2 = vpop.f32.mrf.mxu0  ;;  %v4137_v38 = vadd.f32 %v6066_v1, %v9638_v57 }
 0x3cd   : > { %v6068_v58 = vpop.f32.mrf.mxu1 }
 0x3ce   : > { %v9782_v5 = vpop.f32.mrf.mxu0  ;;  %v9785_v0 = vadd.f32 %v4297_v12, %v4137_v38  ;;  %v6069_v55 = vadd.f32 %v6068_v58, %v6067_v44 }
 0x3cf   : > { %v6070_v21 = vpop.f32.mrf.mxu1 }
 0x3d0   : > { %v4329_v50 = vpop.f32.mrf.mxu0  ;;  %v4140_v13 = vadd.f32 %v6069_v55, %v9642_v29 }
 0x3d1   : > { %v6071_v63 = vpop.f32.mrf.mxu1 }
 0x3d2   : > { %v9787_v25 = vpop.f32.mrf.mxu0  ;;  %v9792_v33 = vadd.f32 %v4300_v60, %v4140_v13  ;;  %v6072_v37 = vadd.f32 %v6071_v63, %v6070_v21 }
 0x3d3   : > { %v6073_v8 = vpop.f32.mrf.mxu1 }
 0x3d4   : > { %v9790_v61 = vpop.f32.mrf.mxu0  ;;  %v4145_v57 = vadd.f32 %v6072_v37, %v9646_v53 }
 0x3d5   : > { %v6074_v12 = vpop.f32.mrf.mxu1 }
 0x3d6   : > { %v9794_v18 = vpop.f32.mrf.mxu0  ;;  %v9799_v45 = vadd.f32 %v6534_v36, %v4145_v57  ;;  %v6075_v17 = vadd.f32 %v6074_v12, %v6073_v8 }
 0x3d7   : > { %v6076_v29 = vpop.f32.mrf.mxu1 }
 0x3d8   : > { %v9797_v43 = vpop.f32.mrf.mxu0  ;;  %v4148_v4 = vadd.f32 %v6075_v17, %v9650_v20 }
 0x3d9   : > { %v6077_v60 = vpop.f32.mrf.mxu1 }
 0x3da   : > { %v9801_v15 = vpop.f32.mrf.mxu0  ;;  %v9806_v19 = vadd.f32 %v6535_v48, %v4148_v4  ;;  %v6078_v1 = vadd.f32 %v6077_v60, %v6076_v29 }
 0x3db   : > { %v6079_v38 = vpop.f32.mrf.mxu1 }
 0x3dc   : > { %v9804_v49 = vpop.f32.mrf.mxu0  ;;  %v4153_v53 = vadd.f32 %v6078_v1, %v9656_v34 }
 0x3dd   : > { %v6080_v55 = vpop.f32.mrf.mxu1 }
 0x3de   : > { %v6152_v44 = vpop.f32.mrf.mxu0  ;;  %v9809_v36 = vadd.f32 %v4313_v7, %v4153_v53  ;;  %v6081_v13 = vadd.f32 %v6080_v55, %v6079_v38 }
 0x3e0   : > { %v6153_v58 = vpop.f32.mrf.mxu0  ;;  %v6082_v37 = vpop.f32.mrf.mxu1  ;;  %v4156_v20 = vadd.f32 %v6081_v13, %v9659_v11 }
 0x3e1   : > { %v9811_v21 = vadd.f32 %v6153_v58, %v6152_v44 }
 0x3e2   : > { %v6155_v63 = vpop.f32.mrf.mxu0  ;;  %v6083_v57 = vpop.f32.mrf.mxu1  ;;  %v9814_v48 = vadd.f32 %v4316_v2, %v4156_v20 }
 0x3e3   : > { %10764 = vst [vmem:[#allocation25_spill] sm:$0xff] %v9811_v21  ;;  %v6084_v17 = vadd.f32 %v6083_v57, %v6082_v37 }
 0x3e4   : > { %v6156_v8 = vpop.f32.mrf.mxu0  ;;  %v6085_v34 = vpop.f32.mrf.mxu1 }
 0x3e5   : > { %v9816_v12 = vadd.f32 %v6156_v8, %v6155_v63  ;;  %v4161_v4 = vadd.f32 %v6084_v17, %v9667_v41 }
 0x3e6   : > { %v6158_v29 = vpop.f32.mrf.mxu0  ;;  %v6086_v60 = vpop.f32.mrf.mxu1 }
 0x3e7   : > { %10765 = vst [vmem:[#allocation26_spill] sm:$0xff] %v9816_v12  ;;  %v9820_v1 = vadd.f32 %v9772_v39, %v4161_v4  ;;  %v6087_v38 = vadd.f32 %v6086_v60, %v6085_v34 }
 0x3e8   : > { %v6159_v7 = vpop.f32.mrf.mxu0  ;;  %v6088_v53 = vpop.f32.mrf.mxu1 }
 0x3e9   : > { %10766 = vst [vmem:[#allocation21_spill] sm:$0xff] %v9820_v1  ;;  %v9822_v44 = vadd.f32 %v6159_v7, %v6158_v29  ;;  %v4164_v2 = vadd.f32 %v6087_v38, %v9672_v42 }
 0x3ea   : > { %v6161_v11 = vpop.f32.mrf.mxu0  ;;  %v6089_v55 = vpop.f32.mrf.mxu1 }
 0x3eb   : > { %10767 = vst [vmem:[#allocation17_spill] sm:$0xff] %v9822_v44  ;;  %v9826_v13 = vadd.f32 %v9777_v62, %v4164_v2  ;;  %v6090_v41 = vadd.f32 %v6089_v55, %v6088_v53 }
 0x3ec   : > { %v6162_v58 = vpop.f32.mrf.mxu0  ;;  %v6091_v20 = vpop.f32.mrf.mxu1 }
 0x3ed   : > { %10768 = vst [vmem:[#allocation18_spill] sm:$0xff] %v9826_v13  ;;  %v9828_v63 = vadd.f32 %v6162_v58, %v6161_v11  ;;  %v4169_v39 = vadd.f32 %v6090_v41, %v9679_v31 }
 0x3ee   : > { %v6164_v37 = vpop.f32.mrf.mxu0  ;;  %v6092_v57 = vpop.f32.mrf.mxu1 }
 0x3ef   : > { %10769 = vst [vmem:[#allocation22_spill] sm:$0xff] %v9828_v63  ;;  %v9831_v17 = vadd.f32 %v4329_v50, %v4169_v39  ;;  %v6093_v34 = vadd.f32 %v6092_v57, %v6091_v20 }
 0x3f0   : > { %v6165_v8 = vpop.f32.mrf.mxu0  ;;  %v6094_v4 = vpop.f32.mrf.mxu1 }
 0x3f1   : > { %10770 = vst [vmem:[#allocation33_spill] sm:$0xff] %v9831_v17  ;;  %v9833_v29 = vadd.f32 %v6165_v8, %v6164_v37  ;;  %v4172_v7 = vadd.f32 %v6093_v34, %v9686_v56 }
 0x3f2   : > { %v6167_v42 = vpop.f32.mrf.mxu0  ;;  %v6095_v60 = vpop.f32.mrf.mxu1 }
 0x3f3   : > { %10771 = vst [vmem:[#allocation23_spill] sm:$0xff] %v9833_v29  ;;  %v9837_v38 = vadd.f32 %v9790_v61, %v4172_v7  ;;  %v6096_v53 = vadd.f32 %v6095_v60, %v6094_v4 }
 0x3f4   : > { %v6168_v62 = vpop.f32.mrf.mxu0  ;;  %v6097_v2 = vpop.f32.mrf.mxu1 }
 0x3f5   : > { %10772 = vst [vmem:[#allocation30_spill] sm:$0xff] %v9837_v38  ;;  %v9839_v11 = vadd.f32 %v6168_v62, %v6167_v42  ;;  %v4177_v50 = vadd.f32 %v6096_v53, %v9691_v6 }
 0x3f6   : > { %v6170_v31 = vpop.f32.mrf.mxu0  ;;  %v6098_v55 = vpop.f32.mrf.mxu1 }
 0x3f7   : > { %10773 = vst [vmem:[#allocation32_spill] sm:$0xff] %v9839_v11  ;;  %v9843_v41 = vadd.f32 %v9782_v5, %v4177_v50  ;;  %v6099_v56 = vadd.f32 %v6098_v55, %v6097_v2 }
 0x3f8   : > { %v6171_v58 = vpop.f32.mrf.mxu0  ;;  %v6100_v39 = vpop.f32.mrf.mxu1 }
 0x3f9   : > { %10774 = vst [vmem:[#allocation31_spill] sm:$0xff] %v9843_v41  ;;  %v9845_v37 = vadd.f32 %v6171_v58, %v6170_v31  ;;  %v4180_v61 = vadd.f32 %v6099_v56, %v9696_v3 }
 0x3fa   : > { %v6173_v20 = vpop.f32.mrf.mxu0  ;;  %v6101_v57 = vpop.f32.mrf.mxu1 }
 0x3fb   : > { %10775 = vst [vmem:[#allocation34_spill] sm:$0xff] %v9845_v37  ;;  %v9849_v34 = vadd.f32 %v9787_v25, %v4180_v61  ;;  %v6102_v6 = vadd.f32 %v6101_v57, %v6100_v39 }
 0x3fc   : > { %v6174_v8 = vpop.f32.mrf.mxu0  ;;  %v6103_v7 = vpop.f32.mrf.mxu1 }
 0x3fd   : > { %10776 = vst [vmem:[#allocation20_spill] sm:$0xff] %v9849_v34  ;;  %v9851_v42 = vadd.f32 %v6174_v8, %v6173_v20  ;;  %v4185_v5 = vadd.f32 %v6102_v6, %v9702_v59 }
 0x3fe   : > { %v6176_v4 = vpop.f32.mrf.mxu0  ;;  %v6104_v60 = vpop.f32.mrf.mxu1 }
 0x3ff   : > { %10777 = vst [vmem:[#allocation19_spill] sm:$0xff] %v9851_v42  ;;  %v9855_v53 = vadd.f32 %v9797_v43, %v4185_v5  ;;  %v6105_v2 = vadd.f32 %v6104_v60, %v6103_v7 }
 0x400   : > { %v6177_v62 = vpop.f32.mrf.mxu0  ;;  %v6106_v50 = vpop.f32.mrf.mxu1 }
 0x401   : > { %10778 = vst [vmem:[#allocation39_spill] sm:$0xff] %v9855_v53  ;;  %v6178_v31 = vadd.f32 %v6177_v62, %v6176_v4  ;;  %v4188_v58 = vadd.f32 %v6105_v2, %v9708_v14 }
 0x402   : > { %v6179_v3 = vpop.f32.mrf.mxu0  ;;  %v6107_v55 = vpop.f32.mrf.mxu1 }
 0x403   : > { %v9859_v56 = vadd.f32 %v9804_v49, %v4188_v58  ;;  %v6108_v39 = vadd.f32 %v6107_v55, %v6106_v50 }
 0x404   : > { %v6180_v25 = vpop.f32.mrf.mxu0  ;;  %v6109_v59 = vpop.f32.mrf.mxu1 }
 0x405   : > { %10779 = vst [vmem:[#allocation40_spill] sm:$0xff] %v9859_v56  ;;  %v6181_v20 = vadd.f32 %v6180_v25, %v6179_v3  ;;  %v4193_v8 = vadd.f32 %v6108_v39, %v9715_v23 }
 0x406   : > { %v6182_v61 = vpop.f32.mrf.mxu0  ;;  %v6110_v43 = vpop.f32.mrf.mxu1 }
 0x407   : > { %v9863_v6 = vadd.f32 %v9794_v18, %v4193_v8  ;;  %v6111_v4 = vadd.f32 %v6110_v43, %v6109_v59 }
 0x408   : > { %v6183_v57 = vpop.f32.mrf.mxu0  ;;  %v6574_v5 = vpop.f32.mrf.mxu1 }
 0x409   : > { %10780 = vst [vmem:[#allocation41_spill] sm:$0xff] %v9863_v6  ;;  %v4196_v14 = vadd.f32 %v6111_v4, %v9722_v51  ;;  %v6184_v6 = vadd.f32 %v6183_v57, %v6182_v61 }
 0x40a   : > { %v6185_v7 = vpop.f32.mrf.mxu0  ;;  %v4924_v60 = vpop.f32.mrf.mxu1 }
 0x40b   : > { %v9867_v49 = vadd.f32 %v9801_v15, %v4196_v14  ;;  %v4925_v2 = vadd.f32 %v6178_v31, %v4924_v60  ;;  %v4933_v41 = vadd.f32 %v6574_v5, %v6184_v6 }
 0x40c   : > { %v6186_v62 = vpop.f32.mrf.mxu0  ;;  %v6575_v50 = vpop.f32.mrf.mxu1 }
 0x40d   : > { %10781 = vst [vmem:[#allocation42_spill] sm:$0xff] %v9867_v49  ;;  %v9870_v23 = vadd.f32 %v4925_v2, %v9755_v26  ;;  %v5029_v6 = vadd.f32 %v4933_v41, %v9761_v47 }
 0x40e   : > { %v6188_v3 = vpop.f32.mrf.mxu0  ;;  %v4927_v25 = vpop.f32.mrf.mxu1 }
 0x40f   : > { %v4928_v18 = vadd.f32 %v6181_v20, %v4927_v25 }
 0x410   : > { %v6189_v58 = vpop.f32.mrf.mxu0  ;;  %v6578_v39 = vpop.f32.mrf.mxu1 }
 0x411   : > { %v9873_v59 = vadd.f32 %v4928_v18, %v9758_v46  ;;  %v6190_v13 = vadd.f32 %v6189_v58, %v6188_v3 }
 0x412   : > { %v6191_v55 = vpop.f32.mrf.mxu0  ;;  %v4940_v8 = vpop.f32.mrf.mxu1 }
 0x414   : > { %v6192_v51 = vpop.f32.mrf.mxu0  ;;  %v6579_v4 = vpop.f32.mrf.mxu1 }
 0x416   : > { %v6194_v43 = vpop.f32.mrf.mxu0  ;;  %v4943_v14 = vpop.f32.mrf.mxu1 }
 0x418   : > { %v6195_v15 = vpop.f32.mrf.mxu0  ;;  %v9875_v60 = vpop.f32.mrf.mxu1 }
 0x41a   : > { %v6197_v31 = vpop.f32.mrf.mxu0  ;;  %v4956_v26 = vpop.f32.mrf.mxu1 }
 0x41c   : > { %v6198_v35 = vpop.f32.mrf.mxu0  ;;  %v9877_v11 = vpop.f32.mrf.mxu1 }
 0x41d   : > { %v6199_v1 = vadd.f32 %v6198_v35, %v6197_v31  ;;  %v9917_v35 = vld [vmem:[%s10311_s5] ss:$0 sm:$0xff] }
 0x41e   : > { %v6200_v2 = vpop.f32.mrf.mxu0  ;;  %v9879_v25 = vpop.f32.mrf.mxu1  ;;  %v5068_v41 = vmul.f32 %v9917_v35, %v5029_v6 }
 0x420   : > { %v6201_v20 = vpop.f32.mrf.mxu0  ;;  %v9881_v46 = vpop.f32.mrf.mxu1 }
 0x421   : > { %10782 = vst [vmem:[#allocation43_spill] sm:$0xff] %v9881_v46 }
 0x422   : > { %v6203_v16 = vpop.f32.mrf.mxu0  ;;  %v9883_v54 = vpop.f32.mrf.mxu1 }
 0x424   : > { %v6204_v18 = vpop.f32.mrf.mxu0  ;;  %v9885_v29 = vpop.f32.mrf.mxu1 }
 0x425   : > { %10783 = vst [vmem:[#allocation44_spill] sm:$0xff] %v9885_v29 }
 0x426   : > { %v6206_v42 = vpop.f32.mrf.mxu0  ;;  %v9887_v37 = vpop.f32.mrf.mxu1 }
 0x428   : > { %v6207_v9 = vpop.f32.mrf.mxu0  ;;  %v9889_v12 = vpop.f32.mrf.mxu1 }
 0x429   : > { %10784 = vst [vmem:[#allocation45_spill] sm:$0xff] %v9889_v12  ;;  %v6187_v12 = vadd.f32 %v6186_v62, %v6185_v7  ;;  %v6202_v7 = vadd.f32 %v6201_v20, %v6200_v2  ;;  %v6208_v58 = vadd.f32 %v6207_v9, %v6206_v42  ;;  %v9938_v9 = vld [vmem:[%s10312_s6] ss:$0 sm:$0xff] }
 0x42a   : > { %v6209_v27 = vpop.f32.mrf.mxu0  ;;  %v9891_v49 = vpop.f32.mrf.mxu1 }
 0x42b   : > { %10785 = vst [vmem:[#allocation46_spill] sm:$0xff] %v9891_v49  ;;  %v6196_v49 = vadd.f32 %v6195_v15, %v6194_v43  ;;  %v4936_v46 = vadd.f32 %v6575_v50, %v6187_v12  ;;  %v6205_v50 = vadd.f32 %v6204_v18, %v6203_v16 }
 0x42c   : > { %v6210_v30 = vpop.f32.mrf.mxu0  ;;  %v9893_v63 = vpop.f32.mrf.mxu1 }
 0x42d   : > { %10786 = vst [vmem:[#allocation47_spill] sm:$0xff] %v9893_v63  ;;  %v6193_v63 = vadd.f32 %v6192_v51, %v6191_v55  ;;  %v4949_v5 = vadd.f32 %v6578_v39, %v6196_v49  ;;  %v5030_v12 = vadd.f32 %v4936_v46, %v9764_v22  ;;  %v6211_v39 = vadd.f32 %v6210_v30, %v6209_v27 }
 0x42e   : > { %v6212_v56 = vpop.f32.mrf.mxu0  ;;  %v9895_v21 = vpop.f32.mrf.mxu1  ;;  %v5066_v22 = vmul.f32 %v9917_v35, %v9870_v23  ;;  %v4957_v51 = vadd.f32 %v6202_v7, %v4956_v26 }
 0x42f   : > { %10787 = vst [vmem:[#allocation48_spill] sm:$0xff] %v9895_v21  ;;  %v4944_v61 = vadd.f32 %v6193_v63, %v4943_v14  ;;  %v5033_v49 = vadd.f32 %v4949_v5, %v9775_v28  ;;  %v5069_v16 = vmul.f32 %v9917_v35, %v5030_v12 }
 0x430   : > { %v6213_v10 = vpop.f32.mrf.mxu0  ;;  %v9897_v44 = vpop.f32.mrf.mxu1  ;;  %v5035_v15 = vadd.f32 %v4957_v51, %v9785_v0  ;;  %v5105_v31 = vadd.f32 %v9938_v9, %v5066_v22 }
 0x431   : > { %10788 = vst [vmem:[#allocation49_spill] sm:$0xff] %v9897_v44  ;;  %v4941_v44 = vadd.f32 %v6190_v13, %v4940_v8  ;;  %v5032_v63 = vadd.f32 %v4944_v61, %v9770_v24  ;;  %v5067_v24 = vmul.f32 %v9917_v35, %v9873_v59  ;;  %v6214_v30 = vadd.f32 %v6213_v10, %v6212_v56 }
 0x432   : > { %v6215_v32 = vpop.f32.mrf.mxu0  ;;  %v9899_v34 = vpop.f32.mrf.mxu1  ;;  %v5072_v8 = vmul.f32 %v9917_v35, %v5033_v49  ;;  %v5107_v59 = vadd.f32 %v9938_v9, %v5068_v41  ;;  %v9959_v26 = vadd.f32 %v9938_v9, %v5069_v16  ;;  %v5074_v6 = vmul.f32 %v9917_v35, %v5035_v15 }
 0x433   : > { %10789 = vst [vmem:[#allocation50_spill] sm:$0xff] %v9899_v34  ;;  %v5031_v13 = vadd.f32 %v4941_v44, %v9767_v40  ;;  %v5071_v27 = vmul.f32 %v9917_v35, %v5032_v63  ;;  %v9962_v2 = vadd.f32 %v9938_v9, %v5067_v24  ;;  %v5137_v12 = vmax.f32 %v5105_v31, 0.0 }
 0x434   : > { %v6216_v53 = vpop.f32.mrf.mxu0  ;;  %v9903_v17 = vpop.f32.mrf.mxu1  ;;  %v5139_v46 = vmax.f32 %v5107_v59, 0.0  ;;  %v9976_v18 = vadd.f32 %v9938_v9, %v5072_v8 }
 0x435   : > { %10790 = vst [vmem:[#allocation51_spill] sm:$0xff] %v9903_v17  ;;  %v4952_v17 = vadd.f32 %v6579_v4, %v6199_v1  ;;  %v5070_v28 = vmul.f32 %v9917_v35, %v5031_v13  ;;  %v4968_v4 = vadd.f32 %v9877_v11, %v6211_v39  ;;  %v6217_v10 = vadd.f32 %v6216_v53, %v6215_v32 }
 0x436   : > { %v9901_v38 = vpop.f32.mrf.mxu0  ;;  %v9907_v21 = vpop.f32.mrf.mxu1  ;;  %v5140_v13 = vmax.f32 %v9959_v26, 0.0  ;;  %v5138_v63 = vmax.f32 %v9962_v2, 0.0  ;;  %v5143_v22 = vmax.f32 %v9976_v18, 0.0  ;;  %v10793_v2 = vld [vmem:[#allocation21_spill] sm:$0xff] }
 0x437   : > { %v5034_v55 = vadd.f32 %v4952_v17, %v9780_v52  ;;  %v4960_v52 = vadd.f32 %v6205_v50, %v9879_v25  ;;  %v4965_v17 = vadd.f32 %v9875_v60, %v6208_v58  ;;  %v4973_v60 = vadd.f32 %v6214_v30, %v9883_v54 }
 0x438   : > { %v9905_v29 = vpop.f32.mrf.mxu0  ;;  %v9911_v34 = vpop.f32.mrf.mxu1  ;;  %v9965_v11 = vadd.f32 %v9938_v9, %v5070_v28  ;;  %v9972_v25 = vadd.f32 %v9938_v9, %v5071_v27  ;;  %v5038_v54 = vadd.f32 %v4968_v4, %v9806_v19  ;;  %v10008_v27 = vadd.f32 %v9938_v9, %v5074_v6  ;;  %v10792_v4 = vld [vmem:[#allocation44_spill] sm:$0xff] }
 0x439   : > { %v5073_v43 = vmul.f32 %v9917_v35, %v5034_v55  ;;  %v5036_v20 = vadd.f32 %v4960_v52, %v9792_v33  ;;  %v5037_v32 = vadd.f32 %v4965_v17, %v9799_v45  ;;  %v4976_v33 = vadd.f32 %v6217_v10, %v9887_v37  ;;  %v10795_v6 = vld [vmem:[#allocation48_spill] sm:$0xff] }
 0x43a   : > { %v9909_v57 = vpop.f32.mrf.mxu0  ;;  %v9919_v3 = vpop.f32.mrf.mxu1  ;;  %v6220_v45 = vadd.f32 %v9905_v29, %v9901_v38  ;;  %v5039_v19 = vadd.f32 %v4973_v60, %v9809_v36  ;;  %v5141_v50 = vmax.f32 %v9965_v11, 0.0  ;;  %v9997_v29 = vld [vmem:[%s10314_s8] ss:$0 sm:$0xff]  ;;  %v5142_v36 = vmax.f32 %v9972_v25, 0.0 }
 0x43b   : > { %v9979_v61 = vadd.f32 %v9938_v9, %v5073_v43  ;;  %v5075_v58 = vmul.f32 %v9917_v35, %v5036_v20  ;;  %v5076_v41 = vmul.f32 %v9917_v35, %v5037_v32  ;;  %v5077_v55 = vmul.f32 %v9917_v35, %v5038_v54  ;;  %v10794_v32 = vld [vmem:[#allocation46_spill] sm:$0xff] }
 0x43c   : > { %v6222_v62 = vpop.f32.mrf.mxu0  ;;  %v9926_v1 = vpop.f32.mrf.mxu1  ;;  %v5040_v16 = vadd.f32 %v4976_v33, %v9814_v48  ;;  %v5078_v52 = vmul.f32 %v9917_v35, %v5039_v19  ;;  %v5145_v18 = vmax.f32 %v10008_v27, 0.0  ;;  %v10796_v19 = vld [vmem:[#allocation18_spill] sm:$0xff]  ;;  %v10810_v27 = vld [vmem:[#allocation25_spill] sm:$0xff] }
 0x43d   : > { %v6223_v37 = vadd.f32 %v6222_v62, %v9909_v57  ;;  %v5144_v51 = vmax.f32 %v9979_v61, 0.0  ;;  %v10791_v57 = vld [vmem:[#allocation43_spill] sm:$0xff]  ;;  %v10014_v31 = vadd.f32 %v9938_v9, %v5076_v41  ;;  %v10026_v60 = vadd.f32 %v9938_v9, %v5077_v55  ;;  %v10797_v41 = vld [vmem:[#allocation45_spill] sm:$0xff] }
 0x43e   : > { %v9924_v47 = vpop.f32.mrf.mxu0  ;;  %v9933_v44 = vpop.f32.mrf.mxu1  ;;  %v4981_v62 = vadd.f32 %v10791_v57, %v6220_v45  ;;  %v5079_v26 = vmul.f32 %v9917_v35, %v5040_v16  ;;  %v10798_v16 = vld [vmem:[#allocation47_spill] sm:$0xff]  ;;  %v10804_v61 = vld [vmem:[#allocation49_spill] sm:$0xff] }
 0x43f   : > { %v4984_v59 = vadd.f32 %v10792_v4, %v6223_v37  ;;  %v5147_v55 = vmax.f32 %v10014_v31, 0.0 }
 0x440   : > { %v6225_v40 = vpop.f32.mrf.mxu0  ;;  %v9947_v23 = vpop.f32.mrf.mxu1  ;;  %v5041_v20 = vadd.f32 %v4981_v62, %v10793_v2  ;;  %v10053_v4 = vadd.f32 %v9938_v9, %v5079_v26 }
 0x441   : > { %v6226_v24 = vadd.f32 %v6225_v40, %v9924_v47  ;;  %v10017_v47 = vadd.f32 %v9938_v9, %v5075_v58  ;;  %v5042_v58 = vadd.f32 %v4984_v59, %v10796_v19  ;;  %v10800_v59 = vld [vmem:[#allocation30_spill] sm:$0xff] }
 0x442   : > { %v6227_v42 = vpop.f32.mrf.mxu0  ;;  %v9954_v14 = vpop.f32.mrf.mxu1 }
 0x444   : > { %v6228_v56 = vpop.f32.mrf.mxu0  ;;  %v9969_v53 = vpop.f32.mrf.mxu1 }
 0x445   : > { %v6229_v17 = vadd.f32 %v6228_v56, %v6227_v42 }
 0x446   : > { %v6230_v0 = vpop.f32.mrf.mxu0  ;;  %v9985_v7 = vpop.f32.mrf.mxu1 }
 0x447   : > { %v4992_v33 = vadd.f32 %v6229_v17, %v10795_v6 }
 0x448   : > { %v6231_v5 = vpop.f32.mrf.mxu0  ;;  %v6622_v49 = vpop.f32.mrf.mxu1 }
 0x449   : > { %v5323_v39 = vadd.f32 %v6622_v49, %v9997_v29  ;;  %v6232_v15 = vadd.f32 %v6231_v5, %v6230_v0  ;;  %v4989_v0 = vadd.f32 %v6226_v24, %v10794_v32  ;;  %v5148_v24 = vmax.f32 %v10026_v60, 0.0 }
 0x44a   : > { %v6233_v38 = vpop.f32.mrf.mxu0  ;;  %v5314_v30 = vpop.f32.mrf.mxu1  ;;  %v10067_v32 = vadd.f32 %v9926_v1, %v9997_v29 }
 0x44b   : > { %v5419_v8 = vadd.f32 %v5323_v39, %v5139_v46  ;;  %v5315_v43 = vadd.f32 %v9997_v29, %v5314_v30  ;;  %v4997_v37 = vadd.f32 %v10797_v41, %v6232_v15  ;;  %v5146_v39 = vmax.f32 %v10017_v47, 0.0  ;;  %v10803_v41 = vld [vmem:[#allocation50_spill] sm:$0xff] }
 0x44c   : > { %v6234_v28 = vpop.f32.mrf.mxu0  ;;  %v6623_v10 = vpop.f32.mrf.mxu1  ;;  %v10049_v30 = vadd.f32 %v9911_v34, %v9997_v29  ;;  %v10062_v34 = vadd.f32 %v9997_v29, %v9919_v3 }
 0x44d   : > { %v6235_v40 = vadd.f32 %v6234_v28, %v6233_v38  ;;  %5451 = vst [vmem:[%s10021_s1 + $0x50] sm:$0xff] %v5419_v8  ;;  %v5417_v42 = vadd.f32 %v5315_v43, %v5137_v12  ;;  %v5326_v56 = vadd.f32 %v6623_v10, %v9997_v29  ;;  %v10036_v12 = vadd.f32 %v9938_v9, %v5078_v52  ;;  %v10799_v52 = vld [vmem:[#allocation33_spill] sm:$0xff] }
 0x44e   : > { %v6236_v48 = vpop.f32.mrf.mxu0  ;;  %v5317_v46 = vpop.f32.mrf.mxu1  ;;  %v5080_v28 = vmul.f32 %v9917_v35, %v5041_v20  ;;  %v5043_v17 = vadd.f32 %v4989_v0, %v10799_v52 }
 0x44f   : > { %5449 = vst [vmem:[%s10021_s1 + $0x40] sm:$0xff] %v5417_v42  ;;  %v5420_v45 = vadd.f32 %v5326_v56, %v5140_v13  ;;  %v5318_v5 = vadd.f32 %v9997_v29, %v5317_v46  ;;  %v5000_v57 = vadd.f32 %v10798_v16, %v6235_v40  ;;  %v5149_v31 = vmax.f32 %v10036_v12, 0.0  ;;  %v10801_v42 = vld [vmem:[#allocation31_spill] sm:$0xff] }
 0x450   : > { %v6237_v54 = vpop.f32.mrf.mxu0  ;;  %v6626_v49 = vpop.f32.mrf.mxu1  ;;  %v5081_v40 = vmul.f32 %v9917_v35, %v5042_v58  ;;  %v5045_v56 = vadd.f32 %v4997_v37, %v10801_v42  ;;  %v5082_v3 = vmul.f32 %v9917_v35, %v5043_v17  ;;  %v10080_v1 = vadd.f32 %v9938_v9, %v5080_v28 }
 0x451   : > { %5452 = vst [vmem:[%s10021_s1 + $0x58] sm:$0xff] %v5420_v45  ;;  %v5418_v13 = vadd.f32 %v5318_v5, %v5138_v63  ;;  %v5339_v62 = vadd.f32 %v6626_v49, %v9997_v29  ;;  %v5044_v63 = vadd.f32 %v4992_v33, %v10800_v59  ;;  %v6238_v2 = vadd.f32 %v6237_v54, %v6236_v48 }
 0x452   : > { %v6239_v38 = vpop.f32.mrf.mxu0  ;;  %v5330_v43 = vpop.f32.mrf.mxu1  ;;  %v10077_v33 = vadd.f32 %v9997_v29, %v9933_v44  ;;  %v5150_v45 = vmax.f32 %v10053_v4, 0.0  ;;  %v10090_v44 = vadd.f32 %v9947_v23, %v9997_v29  ;;  %v5084_v58 = vmul.f32 %v9917_v35, %v5045_v56 }
 0x453   : > { %5450 = vst [vmem:[%s10021_s1 + $0x48] sm:$0xff] %v5418_v13  ;;  %v5423_v15 = vadd.f32 %v5339_v62, %v5143_v22  ;;  %v5331_v10 = vadd.f32 %v9997_v29, %v5330_v43  ;;  %v10802_v22 = vld [vmem:[#allocation20_spill] sm:$0xff]  ;;  %v5083_v5 = vmul.f32 %v9917_v35, %v5044_v63  ;;  %v5005_v37 = vadd.f32 %v6238_v2, %v10803_v41 }
 0x454   : > { %v6240_v8 = vpop.f32.mrf.mxu0  ;;  %v6627_v20 = vpop.f32.mrf.mxu1  ;;  %v5046_v0 = vadd.f32 %v5000_v57, %v10802_v22  ;;  %v10095_v57 = vadd.f32 %v9938_v9, %v5081_v40  ;;  %v10105_v28 = vadd.f32 %v9997_v29, %v9954_v14  ;;  %v5151_v59 = vmax.f32 %v10080_v1, 0.0  ;;  %v10806_v40 = vld [vmem:[#allocation41_spill] sm:$0xff] }
 0x455   : > { %5455 = vst [vmem:[%s10021_s1 + $0x70] sm:$0xff] %v5423_v15  ;;  %v5421_v46 = vadd.f32 %v5331_v10, %v5141_v50  ;;  %v5342_v6 = vadd.f32 %v6627_v20, %v9997_v29  ;;  %v6241_v52 = vadd.f32 %v6240_v8, %v6239_v38  ;;  %v10109_v63 = vadd.f32 %v9938_v9, %v5082_v3  ;;  %v10805_v38 = vld [vmem:[#allocation39_spill] sm:$0xff] }
 0x456   : > { %v6242_v26 = vpop.f32.mrf.mxu0  ;;  %v5333_v54 = vpop.f32.mrf.mxu1  ;;  %v5085_v13 = vmul.f32 %v9917_v35, %v5046_v0  ;;  %v10118_v14 = vadd.f32 %v9969_v53, %v9997_v29  ;;  %v5047_v8 = vadd.f32 %v5005_v37, %v10805_v38  ;;  %v5152_v0 = vmax.f32 %v10095_v57, 0.0 }
 0x457   : > { %5453 = vst [vmem:[%s10021_s1 + $0x60] sm:$0xff] %v5421_v46  ;;  %v5424_v50 = vadd.f32 %v5342_v6, %v5144_v51  ;;  %v5334_v19 = vadd.f32 %v9997_v29, %v5333_v54  ;;  %v5008_v46 = vadd.f32 %v6241_v52, %v9907_v21  ;;  %v10808_v6 = vld [vmem:[#allocation51_spill] sm:$0xff] }
 0x458   : > { %v6243_v48 = vpop.f32.mrf.mxu0  ;;  %v6630_v16 = vpop.f32.mrf.mxu1  ;;  %v10131_v53 = vadd.f32 %v9938_v9, %v5085_v13  ;;  %v5086_v21 = vmul.f32 %v9917_v35, %v5047_v8 }
 0x459   : > { %v6244_v11 = vadd.f32 %v6243_v48, %v6242_v26  ;;  %5456 = vst [vmem:[%s10021_s1 + $0x78] sm:$0xff] %v5424_v50  ;;  %v5422_v62 = vadd.f32 %v5334_v19, %v5142_v36  ;;  %v5355_v23 = vadd.f32 %v6630_v16, %v9997_v29  ;;  %v10114_v36 = vadd.f32 %v9938_v9, %v5083_v5 }
 0x45a   : > { %v6245_v49 = vpop.f32.mrf.mxu0  ;;  %v5346_v43 = vpop.f32.mrf.mxu1  ;;  %v10123_v26 = vadd.f32 %v9938_v9, %v5084_v58  ;;  %v5153_v5 = vmax.f32 %v10109_v63, 0.0  ;;  %v5156_v52 = vmax.f32 %v10131_v53, 0.0 }
 0x45b   : > { %v5013_v51 = vadd.f32 %v10804_v61, %v6244_v11  ;;  %5454 = vst [vmem:[%s10021_s1 + $0x68] sm:$0xff] %v5422_v62  ;;  %v5427_v10 = vadd.f32 %v5355_v23, %v5147_v55  ;;  %v5347_v25 = vadd.f32 %v9997_v29, %v5346_v43  ;;  %v10807_v55 = vld [vmem:[#allocation17_spill] sm:$0xff]  ;;  %v10809_v11 = vld [vmem:[#allocation27_spill] sm:$0xff]  ;;  %v5154_v58 = vmax.f32 %v10114_v36, 0.0  ;;  %v10811_v61 = vld [vmem:[#allocation28_spill] sm:$0xff] }
 0x45c   : > { %v6246_v17 = vpop.f32.mrf.mxu0  ;;  %v6631_v2 = vpop.f32.mrf.mxu1  ;;  %v5155_v57 = vmax.f32 %v10123_v26, 0.0  ;;  %v10812_v62 = vld [vmem:[#allocation22_spill] sm:$0xff] }
 0x45d   : > { %v6247_v15 = vadd.f32 %v6246_v17, %v6245_v49  ;;  %v5049_v42 = vadd.f32 %v5013_v51, %v10806_v40  ;;  %5459 = vst [vmem:[%s10021_s1 + $0x90] sm:$0xff] %v5427_v10  ;;  %v5425_v22 = vadd.f32 %v5347_v25, %v5145_v18  ;;  %v5358_v54 = vadd.f32 %v6631_v2, %v9997_v29  ;;  %v10813_v17 = vld [vmem:[#allocation40_spill] sm:$0xff]  ;;  %v10816_v2 = vld [vmem:[#allocation26_spill] sm:$0xff] }
 0x45e   : > { %v6566_v56 = vpop.f32.mrf.mxu0  ;;  %v5349_v1 = vpop.f32.mrf.mxu1  ;;  %v10152_v43 = vadd.f32 %v5008_v46, %v10813_v17 }
 0x45f   : > { %v4901_v20 = vadd.f32 %v6566_v56, %v10807_v55  ;;  %v5016_v3 = vadd.f32 %v10808_v6, %v6247_v15  ;;  %5457 = vst [vmem:[%s10021_s1 + $0x80] sm:$0xff] %v5425_v22  ;;  %v5350_v19 = vadd.f32 %v9997_v29, %v5349_v1  ;;  %v5088_v41 = vmul.f32 %v9917_v35, %v5049_v42  ;;  %v10814_v15 = vld [vmem:[#allocation42_spill] sm:$0xff]  ;;  %v10815_v42 = vld [vmem:[#allocation35_spill] sm:$0xff]  ;;  %v10817_v1 = vld [vmem:[#allocation36_spill] sm:$0xff] }
 0x460   : > { %v4892_v48 = vpop.f32.mrf.mxu0  ;;  %v5428_v37 = vadd.f32 %v5358_v54, %v5148_v24  ;;  %v6634_v16 = vpop.f32.mrf.mxu1  ;;  %v10169_v6 = vadd.f32 %v9938_v9, %v5086_v21 }
 0x461   : > { %v5021_v50 = vadd.f32 %v4901_v20, %v10809_v11  ;;  %v4893_v18 = vadd.f32 %v10810_v27, %v4892_v48  ;;  %v5050_v10 = vadd.f32 %v5016_v3, %v10814_v15  ;;  %v5426_v60 = vadd.f32 %v5350_v19, %v5146_v39 }
 0x462   : > { %v6567_v49 = vpop.f32.mrf.mxu0  ;;  %5460 = vst [vmem:[%s10021_s1 + $0x98] sm:$0xff] %v5428_v37  ;;  %v5371_v25 = vadd.f32 %v6634_v16, %v9997_v29  ;;  %v5362_v38 = vpop.f32.mrf.mxu1  ;;  %v10166_v39 = vadd.f32 %v9938_v9, %v5088_v41 }
 0x463   : > { %v5060_v13 = vmul.f32 %v9917_v35, %v5021_v50  ;;  %v5019_v51 = vadd.f32 %v4893_v18, %v10811_v61  ;;  %v4904_v23 = vadd.f32 %v6567_v49, %v10812_v62  ;;  %5458 = vst [vmem:[%s10021_s1 + $0x88] sm:$0xff] %v5426_v60  ;;  %v5363_v46 = vadd.f32 %v9997_v29, %v5362_v38  ;;  %v10818_v50 = vld [vmem:[#allocation34_spill] sm:$0xff]  ;;  %v10819_v61 = vld [vmem:[#allocation37_spill] sm:$0xff]  ;;  %v10820_v62 = vld [vmem:[#allocation23_spill] sm:$0xff] }
 0x464   : > { %v4895_v24 = vpop.f32.mrf.mxu0  ;;  %v5431_v20 = vadd.f32 %v5371_v25, %v5151_v59  ;;  %v6635_v47 = vpop.f32.mrf.mxu1  ;;  %v5089_v59 = vmul.f32 %v9917_v35, %v5050_v10  ;;  %v5159_v63 = vmax.f32 %v10166_v39, 0.0  ;;  %v5157_v39 = vmax.f32 %v10169_v6, 0.0 }
 0x465   : > { %v5099_v8 = vadd.f32 %v9938_v9, %v5060_v13  ;;  %v5058_v40 = vmul.f32 %v9917_v35, %v5019_v51  ;;  %v5022_v56 = vadd.f32 %v4904_v23, %v10815_v42  ;;  %v4896_v55 = vadd.f32 %v10816_v2, %v4895_v24  ;;  %v10821_v24 = vld [vmem:[#allocation19_spill] sm:$0xff] }
 0x466   : > { %v6570_v22 = vpop.f32.mrf.mxu0  ;;  %5463 = vst [vmem:[%s10021_s1 + $0xb0] sm:$0xff] %v5431_v20  ;;  %v5429_v18 = vadd.f32 %v5363_v46, %v5149_v31  ;;  %v5374_v21 = vadd.f32 %v6635_v47, %v9997_v29  ;;  %v5365_v41 = vpop.f32.mrf.mxu1  ;;  %v10823_v20 = vld [vmem:[#allocation38_spill] sm:$0xff]  ;;  %v10824_v46 = vld [vmem:[#allocation32_spill] sm:$0xff] }
 0x467   : > { %v5131_v3 = vmax.f32 %v5099_v8, 0.0  ;;  %v5097_v48 = vadd.f32 %v9938_v9, %v5058_v40  ;;  %v5061_v54 = vmul.f32 %v9917_v35, %v5022_v56  ;;  %v5020_v11 = vadd.f32 %v4896_v55, %v10817_v1  ;;  %v10822_v8 = vld [vmem:[#allocation24_spill] sm:$0xff] }
 0x468   : > { %v4917_v27 = vadd.f32 %v6570_v22, %v10818_v50  ;;  %v4908_v19 = vpop.f32.mrf.mxu0  ;;  %5461 = vst [vmem:[%s10021_s1 + $0xa0] sm:$0xff] %v5429_v18  ;;  %v5432_v12 = vadd.f32 %v5374_v21, %v5152_v0  ;;  %v5366_v17 = vadd.f32 %v9997_v29, %v5365_v41  ;;  %v6638_v15 = vpop.f32.mrf.mxu1  ;;  %v5087_v18 = vmul.f32 %v9917_v35, %v10152_v43 }
 0x469   : > { %v5411_v37 = vadd.f32 %v10049_v30, %v5131_v3  ;;  %v5129_v49 = vmax.f32 %v5097_v48, 0.0  ;;  %v5100_v16 = vadd.f32 %v9938_v9, %v5061_v54  ;;  %v5059_v13 = vmul.f32 %v9917_v35, %v5020_v11  ;;  %v10825_v11 = vld [vmem:[#allocation29_spill] sm:$0xff] }
 0x46a   : > { %v5025_v51 = vadd.f32 %v4917_v27, %v10819_v61  ;;  %v4909_v23 = vadd.f32 %v10820_v62, %v4908_v19  ;;  %v6571_v31 = vpop.f32.mrf.mxu0  ;;  %5464 = vst [vmem:[%s10021_s1 + $0xb8] sm:$0xff] %v5432_v12  ;;  %v5430_v0 = vadd.f32 %v5366_v17, %v5150_v45  ;;  %v5387_v56 = vadd.f32 %v6638_v15, %v9997_v29  ;;  %v5378_v2 = vpop.f32.mrf.mxu1 }
 0x46b   : > { %5443 = vst [vmem:[%s10021_s1 + $0x10] sm:$0xff] %v5411_v37  ;;  %v5409_v30 = vadd.f32 %v10062_v34, %v5129_v49  ;;  %v5132_v10 = vmax.f32 %v5100_v16, 0.0  ;;  %v5098_v60 = vadd.f32 %v9938_v9, %v5059_v13  ;;  %v4920_v25 = vadd.f32 %v6571_v31, %v10821_v24 }
 0x46c   : > { %v5064_v38 = vmul.f32 %v9917_v35, %v5025_v51  ;;  %v5023_v40 = vadd.f32 %v4909_v23, %v10822_v8  ;;  %v4911_v42 = vpop.f32.mrf.mxu0  ;;  %5462 = vst [vmem:[%s10021_s1 + $0xa8] sm:$0xff] %v5430_v0  ;;  %v5435_v4 = vadd.f32 %v5387_v56, %v5155_v57  ;;  %v5379_v45 = vadd.f32 %v9997_v29, %v5378_v2  ;;  %v6639_v54 = vpop.f32.mrf.mxu1 }
 0x46d   : > { %5441 = vst [vmem:[%s10021_s1] sm:$0xff] %v5409_v30  ;;  %v5412_v34 = vadd.f32 %v10067_v32, %v5132_v10  ;;  %v5130_v55 = vmax.f32 %v5098_v60, 0.0  ;;  %v5026_v22 = vadd.f32 %v4920_v25, %v10823_v20  ;;  %v4912_v47 = vadd.f32 %v10824_v46, %v4911_v42 }
 0x46e   : > { %v5103_v3 = vadd.f32 %v9938_v9, %v5064_v38  ;;  %v5062_v48 = vmul.f32 %v9917_v35, %v5023_v40  ;;  %v5390_v27 = vadd.f32 %v6639_v54, %v9997_v29  ;;  %5467 = vst [vmem:[%s10021_s1 + $0xd0] sm:$0xff] %v5435_v4  ;;  %v5433_v57 = vadd.f32 %v5379_v45, %v5153_v5  ;;  %v5381_v21 = vpop.f32.mrf.mxu1 }
 0x46f   : > { %5444 = vst [vmem:[%s10021_s1 + $0x18] sm:$0xff] %v5412_v34  ;;  %v5410_v32 = vadd.f32 %v10077_v33, %v5130_v55  ;;  %v5065_v1 = vmul.f32 %v9917_v35, %v5026_v22  ;;  %v5024_v50 = vadd.f32 %v4912_v47, %v10825_v11  ;;  %v5382_v43 = vadd.f32 %v9997_v29, %v5381_v21 }
 0x470   : > { %v5135_v19 = vmax.f32 %v5103_v3, 0.0  ;;  %v5101_v26 = vadd.f32 %v9938_v9, %v5062_v48  ;;  %v5436_v37 = vadd.f32 %v5390_v27, %v5156_v52  ;;  %5465 = vst [vmem:[%s10021_s1 + $0xc0] sm:$0xff] %v5433_v57  ;;  %v6642_v5 = vpop.f32.mrf.mxu1  ;;  %v5128_v13 = vadd.f32 %v9938_v9, %v5089_v59 }
 0x471   : > { %5442 = vst [vmem:[%s10021_s1 + $0x8] sm:$0xff] %v5410_v32  ;;  %v5104_v33 = vadd.f32 %v9938_v9, %v5065_v1  ;;  %v5063_v41 = vmul.f32 %v9917_v35, %v5024_v50  ;;  %v5434_v35 = vadd.f32 %v5382_v43, %v5154_v58  ;;  %v5403_v53 = vadd.f32 %v6642_v5, %v9997_v29 }
 0x472   : > { %v5415_v49 = vadd.f32 %v10090_v44, %v5135_v19  ;;  %v5133_v16 = vmax.f32 %v5101_v26, 0.0  ;;  %5468 = vst [vmem:[%s10021_s1 + $0xd8] sm:$0xff] %v5436_v37  ;;  %v5302_v44 = vadd.f32 %v9997_v29, %v9985_v7  ;;  %v5394_v59 = vpop.f32.mrf.mxu1  ;;  %v5126_v62 = vadd.f32 %v9938_v9, %v5087_v18 }
 0x473   : > { %v5136_v61 = vmax.f32 %v5104_v33, 0.0  ;;  %v5102_v51 = vadd.f32 %v9938_v9, %v5063_v41  ;;  %5466 = vst [vmem:[%s10021_s1 + $0xc8] sm:$0xff] %v5434_v35  ;;  %v5439_v23 = vadd.f32 %v5403_v53, %v5159_v63  ;;  %v5395_v12 = vadd.f32 %v9997_v29, %v5394_v59 }
 0x474   : > { %5447 = vst [vmem:[%s10021_s1 + $0x30] sm:$0xff] %v5415_v49  ;;  %v5413_v52 = vadd.f32 %v10105_v28, %v5133_v16  ;;  %v6643_v7 = vpop.f32.mrf.mxu1  ;;  %v5160_v31 = vmax.f32 %v5128_v13, 0.0  ;;  %v5158_v15 = vmax.f32 %v5126_v62, 0.0 }
 0x475   : > { %v5416_v36 = vadd.f32 %v10118_v14, %v5136_v61  ;;  %v5134_v58 = vmax.f32 %v5102_v51, 0.0  ;;  %5471 = vst [vmem:[%s10021_s1 + $0xf0] sm:$0xff] %v5439_v23  ;;  %v5437_v6 = vadd.f32 %v5395_v12, %v5157_v39  ;;  %v5406_v9 = vadd.f32 %v6643_v7, %v9997_v29 }
 0x476   : > { %5445 = vst [vmem:[%s10021_s1 + $0x20] sm:$0xff] %v5413_v52  ;;  %v5397_v14 = vpop.f32.mrf.mxu1 }
 0x477   : > { %5448 = vst [vmem:[%s10021_s1 + $0x38] sm:$0xff] %v5416_v36  ;;  %v5414_v28 = vadd.f32 %v5302_v44, %v5134_v58  ;;  %5469 = vst [vmem:[%s10021_s1 + $0xe0] sm:$0xff] %v5437_v6  ;;  %v5440_v17 = vadd.f32 %v5406_v9, %v5160_v31  ;;  %v5398_v30 = vadd.f32 %v9997_v29, %v5397_v14 }
 0x479   : > { %5446 = vst [vmem:[%s10021_s1 + $0x28] sm:$0xff] %v5414_v28  ;;  %5472 = vst [vmem:[%s10021_s1 + $0xf8] sm:$0xff] %v5440_v17  ;;  %v5438_v10 = vadd.f32 %v5398_v30, %v5158_v15 }
 0x47b   : > { %5470 = vst [vmem:[%s10021_s1 + $0xe8] sm:$0xff] %v5438_v10 }
 0x47c   : > { %7066 = shalt.err (!%p7063_p13)
}
 0x47d   : > { %s7067_s15 = scalar_lea.hbm %s10254_s19, 4096  ;;  %s7071_s22 = scalar_lea.hbm %s10315_s9, 8192 }
 0x47e   : > { %p7068_p1 = scmp.ne.s32.totalorder %s10254_s19, %s7067_s15  ;;  %p7072_p12 = scmp.lt.s32.totalorder %s10254_s19, %s10315_s9 }
 0x47f   : > { %p7073_p5 = scmp.lt.s32.totalorder %s7071_s22, %s7067_s15 }
 0x480   : > { %p7069_p4 = pnand %p7068_p1, %p7307_p0 }
 0x481   : > { %p7074_p3 = por %p7073_p5, %p7072_p12 }
 0x482   : > { %p7070_p8 = pneg %p7069_p4 }
 0x484   : > { %p7075_p10 = pnand %p7074_p3, %p7070_p8 }
 0x486   : > { %7078 = shalt.err (!%p7075_p10)
}
 0x487   : > { %s7155_s26 = smov 128   ;;  %s7156_s7 = smov 8  }
 0x488   : > { %6674 = dma.vmem_to_hbm [thread:$0]  (%p7307_p0), %s10256_s4, 4096, %s10254_s19, %s5474_s12, %s7155_s26, %s7155_s26, %s7156_s7  }
 0x489 PF: > { %s10826_s17 = sld [smem:[#allocation15_spill]]  ;;  %s5505_s21 = sand.u32 1, %s7121_s30  }
 0x48a   : > { %p10828_p11 = scmp.ge.s32.totalorder %s7141_s14, 2  ;;  %s5506_s18 = scalar_lea.sflag [#allocation4], %s5505_s21 }
 0x48f   : > { %p10827_p2 = scmp.ne.s32.totalorder %s10826_s17, 0 }
 0x491   : > { %p6691_p7 = pnand %p10828_p11, %p10827_p2 }
 0x493   : > { %p6692_p6 = pneg %p6691_p7 }
 0x495   : > { %7116 = dma.done.wait (%p6692_p6), %s5506_s18, 4096  }
 0x496   : > { %7118 = vsyncadd (%p6692_p6), %s5506_s18, 4294963200  ;;  %s27_s14 = sadd.s32 1, %s7141_s14   ;;  %s10829_s24 = sld [smem:[#allocation16_spill]] }
 0x497   : > { %p24_p9 = scmp.ge.s32.totalorder %s27_s14, 4   ;;  %s10830_s30 = smov %s7125_s10 }
 0x498   : > { %s10831_s10 = smov %s7129_s11  ;;  %s10832_s11 = smov %s7319_s16 }
 0x499   : > { %s10833_s12 = smov %s7137_s13  ;;  %26 = sbr.rel (!%p24_p9) target bundleno = 12 (0xc), region = 117 }
 0x49c   : > { %s10834_s13 = smov %s10829_s24 }
 0x49e   :  { %5511 = vsyncpa [#allocation3], 1 }
 0x49f   :  { %5513 = vsyncpa [#allocation3 + $0x1], 1 }
 0x4a0   :  { %5514 = vsyncpa [#allocation6], 1 }
 0x4a1   :  { %5515 = vsyncpa [#allocation9], 1 }
 0x4a2   :  { %5516 = vsyncpa [#allocation4], 1 }
 0x4a3   :  { %5518 = vsyncpa [#allocation4 + $0x1], 1 }

// kernel: tpu_custom_call.1
= control target key start
LH: loop header
LB: loop body
LE: loop exit
PB: predicated region body
PF: predicated region fallthrough
CT: control target
= control target key end

     0   :  { %s10306_s0 = inlined_call_operand.hbm [shape: f32[2,16,16,128], index: 0, kind: input, shape index: {}]   ;;  %s10307_s1 = inlined_call_operand.hbm [shape: bf16[3,384,128], index: 1, kind: input, shape index: {}]   ;;  %s10308_s2 = inlined_call_operand.vmem [shape: f32[1,128], index: 2, kind: input, shape index: {}]   ;;  %s10309_s3 = inlined_call_operand.vmem [shape: f32[1,128], index: 3, kind: input, shape index: {}]   ;;  %s10310_s4 = inlined_call_operand.hbm [shape: bf16[3,384,128], index: 4, kind: input, shape index: {}]   ;;  %s10311_s5 = inlined_call_operand.vmem [shape: f32[1,128], index: 5, kind: input, shape index: {}]   ;;  %s10312_s6 = inlined_call_operand.vmem [shape: f32[1,128], index: 6, kind: input, shape index: {}]   ;;  %s10313_s7 = inlined_call_operand.hbm [shape: bf16[128,128], index: 7, kind: input, shape index: {}]   ;;  %s10314_s8 = inlined_call_operand.vmem [shape: f32[1,128], index: 8, kind: input, shape index: {}]   ;;  %s10315_s9 = inlined_call_operand.hbm [shape: f32[2,16,16,128], index: 9, kind: output, shape index: {}]  }
   0x1   :  { %10499 = sst [smem:[#allocation52_spill]] %s10307_s1 }
   0x2   :  { %10500 = sst [smem:[#allocation53_spill]] %s10310_s4 }
   0x3   :  { %10501 = sst [smem:[#allocation54_spill]] %s10313_s7 }
   0x4   :  { %14 = vsyncpa [#allocation3], 0 }
   0x5   :  { %16 = vsyncpa [#allocation3 + $0x1], 0 }
   0x6   :  { %17 = vsyncpa [#allocation6], 0 }
   0x7   :  { %18 = vsyncpa [#allocation9], 0 }
   0x8   :  { %19 = vsyncpa [#allocation4], 0 }
   0x9   :  { %21 = vsyncpa [#allocation4 + $0x1], 0  ;;  %s7207_s30 = smov 0   ;;  %s7209_s10 = smov 0  }
   0xa   :  { %s7211_s11 = smov 0   ;;  %s7213_s12 = smov 0  }
   0xb   :  { %s7215_s13 = smov 0   ;;  %s7217_s14 = smov 0  }
   0xc LB: > { %s5606_s15 = sadd.s32 4294967295, %s7141_s14   ;;  %s5607_s16 = sadd.s32 4294967294, %s7141_s14   ;;  %s7141_s14 = sphi %s7217_s14, %s27_s14   ;;  %s7137_s13 = sphi %s7215_s13, %s10834_s13   ;;  %s7133_s12 = sphi %s7213_s12, %s10833_s12   ;;  %s7129_s11 = sphi %s7211_s11, %s10832_s11   ;;  %s7125_s10 = sphi %s7209_s10, %s10831_s10   ;;  %s7121_s30 = sphi %s7207_s30, %s10830_s30  }
   0xd   : > { %p61_p0 = scmp.ne.s32.totalorder %s7125_s10, %s7121_s30  ;;  %p7241_p1 = scmp.eq.s32.totalorder %s5606_s15, 0 }
   0xe   : > { %p7245_p2 = scmp.eq.s32.totalorder %s5606_s15, 1  ;;  %p261_p3 = scmp.eq.s32.totalorder %s5607_s16, 1 }
   0xf   : > { %s10502_s17 = scalar_select %p7241_p1, 1, 0 }
  0x10   : > { %p7251_p4 = por %p7241_p1, %p61_p0  ;;  %p5608_p5 = scmp.ge.s32.totalorder %s7141_s14, 1 }
  0x11   : > { %p7256_p6 = por %p261_p3, %p61_p0  ;;  %p268_p7 = scmp.lt.s32.totalorder %s7141_s14, 3 }
  0x12   : > { %s10504_s19 = scalar_select %p7251_p4, 1, 0 }
  0x13   : > { %s10505_s20 = scalar_select %p7256_p6, 1, 0 }
  0x14   : > { %p7261_p8 = pnand %p5608_p5, %p268_p7  ;;  %s7143_s22 = smov [#allocation5]  }
  0x15   : > { %10506 = sst [smem:[#allocation15_spill]] %s10505_s20  ;;  %s280_s23 = sshll.u32 %s7143_s22, 4  ;;  %s281_s23 = int_to_ptr.vmem [resolvable:$true] %s280_s23 }
  0x16   : > { %s10507_s21 = scalar_select %p7261_p8, 1, 0 }
  0x17   : > { %p6676_p9 = pneg %p7261_p8  ;;  %s7144_s25 = smov [#allocation7]  }
  0x18   : > { %s299_s26 = sshll.u32 %s7144_s25, 4  ;;  %s7145_s27 = smov [#allocation8]   ;;  %s300_s26 = int_to_ptr.vmem [resolvable:$true] %s299_s26 }
  0x19   : > { %p7270_p11 = pnand %p6676_p9, %p7241_p1  ;;  %s318_s28 = sshll.u32 %s7145_s27, 4  ;;  %s319_s28 = int_to_ptr.vmem [resolvable:$true] %s318_s28 }
  0x1a   : > { %s6958_s29 = scalar_lea.vmem %s281_s23, 9216  ;;  %p6966_p5 = scmp.lt.s32.totalorder %s281_s23, %s281_s23 }
  0x1b   : > { %p6949_p12 = pneg %p7270_p11  ;;  %p6959_p13 = scmp.ne.s32.totalorder %s281_s23, %s6958_s29 }
  0x1c   : > { %p6967_p7 = scmp.lt.s32.totalorder %s6958_s29, %s6958_s29 }
  0x1d   : > { %p6961_p0 = pnand %p6959_p13, %p6949_p12 }
  0x1e   : > { %p6968_p9 = por %p6967_p7, %p6966_p5 }
  0x1f   : > { %p6962_p3 = pneg %p6961_p0 }
  0x21   : > { %p6969_p10 = pnand %p6968_p9, %p6962_p3 }
  0x23   : > { %6972 = shalt.err (!%p6969_p10)
}
  0x24   : > { %s7146_s15 = smov 64   ;;  %s7147_s16 = smov 4  }
  0x25   : > { %s10509_s1 = sld [smem:[#allocation52_spill]]  ;;  %s6984_s27 = scalar_lea.vmem %s300_s26, 9216 }
  0x26   : > { %p6985_p6 = scmp.ne.s32.totalorder %s300_s26, %s6984_s27  ;;  %p6992_p1 = scmp.lt.s32.totalorder %s300_s26, %s300_s26 }
  0x27   : > { %p6993_p4 = scmp.lt.s32.totalorder %s6984_s27, %s6984_s27 }
  0x28   : > { %p6987_p13 = pnand %p6985_p6, %p6949_p12 }
  0x29   : > { %p6994_p5 = por %p6993_p4, %p6992_p1 }
  0x2a   : > { %p6988_p0 = pneg %p6987_p13 }
  0x2b   : > { %6679 = dma.hbm_to_vmem [thread:$0]  (!%p7270_p11), %s10509_s1, 9216, %s281_s23, [#allocation6], %s7146_s15, %s7146_s15, %s7147_s16  }
  0x2c   : > { %p6995_p3 = pnand %p6994_p5, %p6988_p0 }
  0x2e   : > { %6998 = shalt.err (!%p6995_p3)
}
  0x2f   : > { %s10510_s4 = sld [smem:[#allocation53_spill]]  ;;  %s7010_s23 = scalar_lea.vmem %s319_s28, 1024 }
  0x30   : > { %p7011_p10 = scmp.ne.s32.totalorder %s319_s28, %s7010_s23  ;;  %p7018_p9 = scmp.lt.s32.totalorder %s319_s28, %s319_s28 }
  0x31   : > { %p7019_p13 = scmp.lt.s32.totalorder %s7010_s23, %s7010_s23 }
  0x32   : > { %p7013_p7 = pnand %p7011_p10, %p6949_p12 }
  0x33   : > { %p7020_p8 = por %p7019_p13, %p7018_p9 }
  0x34   : > { %p7014_p6 = pneg %p7013_p7 }
  0x35   : > { %6682 = dma.hbm_to_vmem [thread:$0]  (!%p7270_p11), %s10510_s4, 9216, %s300_s26, [#allocation6], %s7146_s15, %s7146_s15, %s7147_s16  }
  0x36   : > { %p7021_p1 = pnand %p7020_p8, %p7014_p6 }
  0x38   : > { %7024 = shalt.err (!%p7021_p1)
}
  0x39   : > { %s10511_s7 = sld [smem:[#allocation54_spill]]  ;;  %s48_s20 = sadd.s32 1, %s7129_s11 }
  0x3a   : > { %s39_s26 = sadd.s32 1, %s7137_s13  ;;  %p55_p4 = scmp.ne.s32.totalorder %s7129_s11, %s7125_s10 }
  0x3b   : > { %p41_p8 = scmp.ge.s32.totalorder %s39_s26, 2  ;;  %p56_p12 = scmp.eq.s32.totalorder %s7141_s14, 0 }
  0x3c   : > { %p7307_p0 = por %p7245_p2, %p55_p4  ;;  %p6697_p5 = scmp.lt.s32.totalorder %s7141_s14, 2 }
  0x3d   : > { %s10836_s26 = smov (%p41_p8, %s39_s26), 0  ;;  %p57_p3 = por %p56_p12, %p55_p4 }
  0x3e   : > { %10513 = sst [smem:[#allocation16_spill]] %s10836_s26  ;;  %s335_s27 = sand.u32 1, %s7129_s11  }
  0x3f   : > { %6685 = dma.hbm_to_vmem [thread:$0]  (!%p7270_p11), %s10511_s7, 1024, %s319_s28, [#allocation9], %s7146_s15, %s7146_s15, %s7147_s16  }
  0x40   : > { %s43_s29 = ssub.s32 %s7137_s13, %s10836_s26  ;;  %s5613_s28 = sshll.u32 %s335_s27, 8 }
  0x41   : > { %p46_p10 = scmp.eq.s32.totalorder %s43_s29, 0  ;;  %s5784_s15 = sshll.u32 %s7137_s13, 12 }
  0x42   : > { %s348_s18 = scalar_lea.hbm %s10306_s0, %s5784_s15  ;;  %s339_s25 = scalar_lea.vmem [#allocation2], %s5613_s28 }
  0x43   : > { %s7319_s16 = scalar_select %p46_p10, %s7129_s11, %s48_s20  }
  0x44   : > { %s349_s1 = sshll.u32 %s339_s25, 4  ;;  %p7326_p2 = pnand %p6697_p5, %p57_p3  ;;  %s350_s1 = int_to_ptr.vmem [resolvable:$true] %s349_s1 }
  0x45   : > { %s336_s7 = scalar_lea.sflag [#allocation3], %s335_s27  ;;  %s7038_s29 = scalar_lea.vmem %s350_s1, 4096 }
  0x46   : > { %p7027_p11 = pneg %p7326_p2  ;;  %p7039_p7 = scmp.ne.s32.totalorder %s350_s1, %s7038_s29 }
  0x47   : > { %s7148_s20 = smov [#allocation2]  }
  0x48   : > { %p7041_p6 = pnand %p7039_p7, %p7027_p11  ;;  %s7043_s26 = sshll.u32 %s7148_s20, 4  ;;  %s7044_s26 = int_to_ptr.vmem [resolvable:$false] %s7043_s26 }
  0x49   : > { %s7045_s15 = scalar_lea.vmem %s7044_s26, 8192  ;;  %p7046_p13 = scmp.lt.s32.totalorder %s350_s1, %s7044_s26 }
  0x4a   : > { %p7042_p9 = pneg %p7041_p6  ;;  %p7047_p1 = scmp.lt.s32.totalorder %s7045_s15, %s7038_s29 }
  0x4c   : > { %p7048_p4 = por %p7047_p1, %p7046_p13 }
  0x4e   : > { %p7049_p8 = pnand %p7048_p4, %p7042_p9 }
  0x50   : > { %7052 = shalt.err (!%p7049_p8)
}
  0x51   : > { %s7149_s28 = smov 128   ;;  %s7150_s23 = smov 8  }
  0x52   : > { %6689 = dma.hbm_to_vmem [thread:$0]  (!%p7326_p2), %s348_s18, 4096, %s350_s1, %s336_s7, %s7149_s28, %s7149_s28, %s7150_s23  }
  0x53   : > { %p10515_p12 = scmp.ne.s32.totalorder %s10507_s21, 0 }
  0x55   : > { %361 = sbr.rel (%p10515_p12) target bundleno = 1161 (0x489), region = 56 }
  0x5a   : > { %s7337_s27 = sand.u32 1, %s7125_s10   ;;  %p10516_p5 = scmp.ne.s32.totalorder %s10504_s19, 0 }
  0x5b   : > { %s5617_s26 = sshll.u32 %s7337_s27, 8  ;;  %s364_s22 = scalar_lea.sflag [#allocation3], %s7337_s27 }
  0x5c   : > { %s7343_s25 = scalar_lea.vmem [#allocation2], %s5617_s26 }
  0x5d   : > { %7104 = dma.done.wait (%p10516_p5), %s364_s22, 4096  }
  0x5e   : > { %7106 = vsyncadd (%p10516_p5), %s364_s22, 4294963200  ;;  %p10517_p3 = scmp.ne.s32.totalorder %s10502_s17, 0 }
  0x60   : > { %7108 = dma.done.wait (%p10517_p3), [#allocation6], 18432  }
  0x61   : > { %7110 = vsyncadd (%p10517_p3), [#allocation6], 4294948864 }
  0x62   : > { %7112 = dma.done.wait (%p10517_p3), [#allocation9], 1024  }
  0x63   : > { %7114 = vsyncadd (%p10517_p3), [#allocation9], 4294966272  ;;  %v10328_v0 = vmov 0   ;;  %v7152_v1 = vmov 0.0|0.0   ;;  %v6762_v3 = vld [vmem:[#allocation5 + $0xf8] sm:$0xff]   ;;  %v6764_v5 = vld [vmem:[#allocation5 + $0xf0] sm:$0xff]  }
  0x64   : > { %1123 = vmatprep.subr.bf16.mxu0 %v10328_v0  ;;  %v7358_v2 = vrot.slane %v7152_v1, 4  ;;  %v6763_v4 = vld [vmem:[#allocation5 + $0x178] sm:$0xff]   ;;  %v6765_v6 = vld [vmem:[#allocation5 + $0x170] sm:$0xff]   ;;  %v6767_v7 = vld [vmem:[#allocation5 + $0x168] sm:$0xff]   ;;  %v10322_v17 = vmov 0.0   ;;  %vm862_vm0 = vcmask 1043456  }
  0x65   : > { %1124 = vmatpush1.bf16.msra.mxu0 %v6762_v3  ;;  %6296 = vmatprep.subr.bf16.mxu1 %v6763_v4  ;;  %v6766_v8 = vld [vmem:[#allocation5 + $0xe8] sm:$0xff]   ;;  %v6769_v9 = vld [vmem:[#allocation5 + $0x160] sm:$0xff]   ;;  %v6771_v11 = vld [vmem:[#allocation5 + $0x158] sm:$0xff]   ;;  %v7629_v24 = vrot.slane %v10328_v0, 4  ;;  %vm482_vm1 = vsmask.f32 4352 }
  0x66   : > { %1155 = vmatprep.mubr.bf16.mxu0 %v7358_v2  ;;  %1125 = vmatprep.subr.bf16.mxu0 %v10328_v0  ;;  %v6768_v10 = vld [vmem:[#allocation5 + $0xe0] sm:$0xff]   ;;  %v6770_v12 = vld [vmem:[#allocation5 + $0xd8] sm:$0xff]   ;;  %v6772_v13 = vld [vmem:[#allocation5 + $0xd0] sm:$0xff]   ;;  %vm1975_vm2 = vsmask.f32 3328  ;;  %s10021_s1 = scalar_lea.vmem [#allocation10], %s5617_s26 }
  0x67   : > { %6297 = vmatpush3.bf16.msra.mxu1 %v6763_v4  ;;  %v417_v14 = vld [vmem:[%s7343_s25] sm:$0xff]  ;;  %v418_v15 = vld [vmem:[%s7343_s25 + $0x8] sm:$0xff]  ;;  %v6773_v16 = vld [vmem:[#allocation5 + $0x150] sm:$0xff]   ;;  %10529 = vst [vmem:[#allocation28_spill] sm:$0xff] %v7629_v24  ;;  %s5785_s26 = sshll.u32 %s7133_s12, 12  ;;  %s5490_s4 = sshll.u32 %s10021_s1, 4  ;;  %s10256_s4 = int_to_ptr.vmem [resolvable:$true] %s5490_s4 }
  0x68   : > { %6298 = vmatprep.subr.bf16.mxu1 %v6765_v6  ;;  %v7368_v18 = vpack.c.bf16 %v417_v14, %v10322_v17  ;;  %v7371_v19 = vpack.c.bf16 %v10322_v17, %v418_v15  ;;  %v7374_v20 = vld [vmem:[%s7343_s25 + $0x10] sm:$0xff]  ;;  %v7377_v21 = vld [vmem:[%s7343_s25 + $0x18] sm:$0xff]  ;;  %v6774_v25 = vld [vmem:[#allocation5 + $0xc8] sm:$0xff]   ;;  %s10254_s19 = scalar_lea.hbm %s10315_s9, %s5785_s26  ;;  %s5474_s12 = scalar_lea.sflag [#allocation4], %s7337_s27 }
  0x69   : > { %1126 = vmatpush1.bf16.msra.mxu0 %v6764_v5  ;;  %10520 = vst [vmem:[#allocation19_spill] sm:$0xff] %v7374_v20  ;;  %10521 = vst [vmem:[#allocation20_spill] sm:$0xff] %v7377_v21  ;;  %v6775_v26 = vld [vmem:[#allocation5 + $0x148] sm:$0xff]   ;;  %v421_v28 = vld [vmem:[%s7343_s25 + $0x20] sm:$0xff]  ;;  %v7393_v30 = vpack.c.bf16 %v7374_v20, %v10322_v17  ;;  %v7397_v31 = vpack.c.bf16 %v10322_v17, %v7377_v21  ;;  %s7053_s21 = scalar_lea.vmem %s10256_s4, 4096  ;;  %s7154_s18 = smov [#allocation10]  }
  0x6a   : > { %1127 = vmatprep.subr.bf16.mxu0 %v10328_v0  ;;  %10518 = vst [vmem:[#allocation17_spill] sm:$0xff] %v7368_v18  ;;  %10519 = vst [vmem:[#allocation18_spill] sm:$0xff] %v7371_v19  ;;  %v865_v22 = vrot.slane %v7368_v18, 4  ;;  %v866_v23 = vrot.slane %v7371_v19, 4  ;;  %v422_v29 = vld [vmem:[%s7343_s25 + $0x28] sm:$0xff]  ;;  %v7400_v32 = vpack.c.bf16 %v421_v28, %v10322_v17  ;;  %v6777_v33 = vld [vmem:[#allocation5 + $0x140] sm:$0xff]   ;;  %p7054_p10 = scmp.ne.s32.totalorder %s10256_s4, %s7053_s21 }
  0x6b   : > { %6299 = vmatpush3.bf16.msra.mxu1 %v6765_v6  ;;  %10522 = vst [vmem:[#allocation21_spill] sm:$0xff] %v7393_v30  ;;  %10523 = vst [vmem:[#allocation22_spill] sm:$0xff] %v7397_v31  ;;  %v7403_v34 = vpack.c.bf16 %v10322_v17, %v422_v29  ;;  %v6776_v35 = vld [vmem:[#allocation5 + $0xc0] sm:$0xff]   ;;  %v6778_v36 = vld [vmem:[#allocation5 + $0x138] sm:$0xff]   ;;  %v868_v37 = vrot.slane %v7393_v30, 4  ;;  %v869_v38 = vrot.slane %v7397_v31, 4 }
  0x6c   : > { %6300 = vmatprep.subr.bf16.mxu1 %v6767_v7  ;;  %v7385_v27 = vsel %vm862_vm0, %v865_v22, %v866_v23  ;;  %10524 = vst [vmem:[#allocation23_spill] sm:$0xff] %v7400_v32  ;;  %v871_v39 = vrot.slane %v7400_v32, 4  ;;  %v423_v40 = vld [vmem:[%s7343_s25 + $0x30] sm:$0xff]  ;;  %v424_v41 = vld [vmem:[%s7343_s25 + $0x38] sm:$0xff]  ;;  %v425_v43 = vld [vmem:[%s7343_s25 + $0x40] sm:$0xff]  ;;  %v10338_v21 = vshrl.u32 %v7393_v30, 16  ;;  %p7055_p2 = pnand %p7054_p10, %p7307_p0 }
  0x6d   : > { %1128 = vmatpush1.bf16.msra.mxu0 %v6766_v8  ;;  %6312 = vmatprep.mubr.bf16.mxu1 %v7385_v27  ;;  %10525 = vst [vmem:[#allocation24_spill] sm:$0xff] %v7403_v34  ;;  %v872_v42 = vrot.slane %v7403_v34, 4  ;;  %v426_v44 = vld [vmem:[%s7343_s25 + $0x48] sm:$0xff]  ;;  %v7416_v45 = vsel %vm862_vm0, %v868_v37, %v869_v38  ;;  %v6779_v46 = vld [vmem:[#allocation5 + $0x38] sm:$0xff]   ;;  %v7419_v47 = vpack.c.bf16 %v423_v40, %v10322_v17  ;;  %v6780_v52 = vld [vmem:[#allocation5 + $0x130] sm:$0xff]   ;;  %s7057_s29 = sshll.u32 %s7154_s18, 4  ;;  %s7058_s29 = int_to_ptr.vmem [resolvable:$false] %s7057_s29 }
  0x6e   : > { %1129 = vmatprep.subr.bf16.mxu0 %v10328_v0  ;;  %v7422_v48 = vpack.c.bf16 %v10322_v17, %v424_v41  ;;  %v7429_v50 = vpack.c.bf16 %v425_v43, %v10322_v17  ;;  %v7432_v51 = vpack.c.bf16 %v10322_v17, %v426_v44  ;;  %v6781_v53 = vld [vmem:[#allocation5 + $0x30] sm:$0xff]   ;;  %v6782_v54 = vld [vmem:[#allocation5 + $0x128] sm:$0xff]   ;;  %v428_v60 = vld [vmem:[%s7343_s25 + $0x58] sm:$0xff]  ;;  %p7056_p11 = pneg %p7055_p2  ;;  %s7059_s20 = scalar_lea.vmem %s7058_s29, 8192 }
  0x6f   : > { %6301 = vmatpush3.bf16.msra.mxu1 %v6767_v7  ;;  %10526 = vst [vmem:[#allocation25_spill] sm:$0xff] %v7419_v47  ;;  %v7426_v49 = vsel %vm862_vm0, %v871_v39, %v872_v42  ;;  %v874_v55 = vrot.slane %v7419_v47, 4  ;;  %v427_v57 = vld [vmem:[%s7343_s25 + $0x50] sm:$0xff]  ;;  %v429_v61 = vld [vmem:[%s7343_s25 + $0x60] sm:$0xff]  ;;  %v430_v62 = vld [vmem:[%s7343_s25 + $0x68] sm:$0xff]  ;;  %v7454_v4 = vpack.c.bf16 %v10322_v17, %v428_v60  ;;  %p7060_p7 = scmp.lt.s32.totalorder %s10256_s4, %s7058_s29  ;;  %p7061_p6 = scmp.lt.s32.totalorder %s7059_s20, %s7053_s21 }
  0x70   : > { %6302 = vmatprep.subr.bf16.mxu1 %v6769_v9  ;;  %v875_v56 = vrot.slane %v7422_v48, 4  ;;  %v877_v58 = vrot.slane %v7429_v50, 4  ;;  %v878_v59 = vrot.slane %v7432_v51, 4  ;;  %v6783_v1 = vld [vmem:[#allocation5 + $0x28] sm:$0xff]   ;;  %v7451_v3 = vpack.c.bf16 %v427_v57, %v10322_v17  ;;  %v6784_v8 = vld [vmem:[#allocation5 + $0x120] sm:$0xff]   ;;  %v6786_v22 = vld [vmem:[#allocation5 + $0x118] sm:$0xff]  }
  0x71   : > { %1130 = vmatpush1.bf16.msra.mxu0 %v6768_v10  ;;  %v7461_v6 = vpack.c.bf16 %v429_v61, %v10322_v17  ;;  %v7464_v7 = vpack.c.bf16 %v10322_v17, %v430_v62  ;;  %v6785_v10 = vld [vmem:[#allocation5 + $0x20] sm:$0xff]   ;;  %v6787_v29 = vld [vmem:[#allocation5 + $0x18] sm:$0xff]   ;;  %v6790_v39 = vld [vmem:[#allocation5 + $0x10] sm:$0xff]   ;;  %p7062_p9 = por %p7061_p6, %p7060_p7 }
  0x72   : > { %1131 = vmatprep.subr.bf16.mxu0 %v10328_v0  ;;  %v7448_v63 = vsel %vm862_vm0, %v874_v55, %v875_v56  ;;  %v7458_v5 = vsel %vm862_vm0, %v877_v58, %v878_v59  ;;  %v435_v41 = vld [vmem:[%s7343_s25 + $0x90] sm:$0xff]  ;;  %v6789_v42 = vld [vmem:[#allocation5 + $0x108] sm:$0xff]   ;;  %v436_v44 = vld [vmem:[%s7343_s25 + $0x98] sm:$0xff] }
  0x73   : > { %6303 = vmatpush3.bf16.msra.mxu1 %v6769_v9  ;;  %v431_v9 = vld [vmem:[%s7343_s25 + $0x70] sm:$0xff]  ;;  %v883_v14 = vrot.slane %v7461_v6, 4  ;;  %v884_v15 = vrot.slane %v7464_v7, 4  ;;  %v6792_v55 = vld [vmem:[#allocation5 + $0x8] sm:$0xff]   ;;  %v7515_v56 = vpack.c.bf16 %v435_v41, %v10322_v17  ;;  %v7518_v57 = vpack.c.bf16 %v10322_v17, %v436_v44  ;;  %v6791_v61 = vld [vmem:[#allocation5 + $0x100] sm:$0xff]   ;;  %p7063_p13 = pnand %p7062_p9, %p7056_p11 }
  0x74   : > { %6304 = vmatprep.subr.bf16.mxu1 %v6771_v11  ;;  %v7478_v23 = vpack.c.bf16 %v431_v9, %v10322_v17  ;;  %v6793_v62 = vld [vmem:[#allocation5] sm:$0xff]   ;;  %v6805_v41 = vld [vmem:[#allocation5 + $0xa8] sm:$0xff]   ;;  %v6796_v44 = vld [vmem:[#allocation5 + $0x70] sm:$0xff]  }
  0x75   : > { %1132 = vmatpush1.bf16.msra.mxu0 %v6770_v12  ;;  %v881_v12 = vrot.slane %v7454_v4, 4  ;;  %v893_v9 = vrot.slane %v7518_v57, 4 }
  0x76   : > { %1133 = vmatprep.subr.bf16.mxu0 %v10328_v0  ;;  %v886_v38 = vrot.slane %v7478_v23, 4 }
  0x77   : > { %6305 = vmatpush3.bf16.msra.mxu1 %v6771_v11  ;;  %v880_v11 = vrot.slane %v7451_v3, 4 }
  0x78   : > { %6306 = vmatprep.subr.bf16.mxu1 %v6773_v16 }
  0x79   : > { %1134 = vmatpush1.bf16.msra.mxu0 %v6772_v13  ;;  %v432_v13 = vld [vmem:[%s7343_s25 + $0x78] sm:$0xff]  ;;  %v7486_v28 = vsel %vm862_vm0, %v880_v11, %v881_v12  ;;  %v439_v12 = vld [vmem:[%s7343_s25 + $0xb0] sm:$0xff] }
  0x7a   : > { %1135 = vmatprep.subr.bf16.mxu0 %v10328_v0 }
  0x7b   : > { %6307 = vmatpush3.bf16.msra.mxu1 %v6773_v16  ;;  %v433_v16 = vld [vmem:[%s7343_s25 + $0x80] sm:$0xff] }
  0x7c   : > { %6308 = vmatprep.subr.bf16.mxu1 %v6775_v26 }
  0x7d   : > { %1136 = vmatpush1.bf16.msra.mxu0 %v6774_v25  ;;  %v434_v25 = vld [vmem:[%s7343_s25 + $0x88] sm:$0xff] }
  0x7e   : > { %1137 = vmatprep.subr.bf16.mxu0 %v10328_v0  ;;  %v7496_v37 = vpack.c.bf16 %v10322_v17, %v434_v25  ;;  %v6794_v25 = vld [vmem:[#allocation5 + $0x78] sm:$0xff]  }
  0x7f   : > { %6309 = vmatpush3.bf16.msra.mxu1 %v6775_v26  ;;  %v7483_v26 = vpack.c.bf16 %v10322_v17, %v432_v13  ;;  %v440_v13 = vld [vmem:[%s7343_s25 + $0xb8] sm:$0xff] }
  0x80   : > { %6310 = vmatprep.subr.bf16.mxu1 %v6777_v33 }
  0x81   : > { %1138 = vmatpush1.bf16.msra.mxu0 %v6776_v35  ;;  %v6788_v35 = vld [vmem:[#allocation5 + $0x110] sm:$0xff]   ;;  %v887_v40 = vrot.slane %v7483_v26, 4 }
  0x82   : > { %1139 = vmatprep.subr.bf16.mxu0 %v10328_v0 }
  0x83   : > { %6311 = vmatpush3.bf16.msra.mxu1 %v6777_v33  ;;  %v7489_v33 = vpack.c.bf16 %v433_v16, %v10322_v17  ;;  %v6800_v16 = vld [vmem:[#allocation5 + $0xb0] sm:$0xff]  }
  0x84   : > { %1621 = vmatprep.subr.bf16.mxu1 %v10328_v0 }
  0x85   : > { %1140 = vmatpush2.bf16.msra.mxu0 %v6778_v36  ;;  %v7493_v36 = vsel %vm862_vm0, %v883_v14, %v884_v15  ;;  %v889_v43 = vrot.slane %v7489_v33, 4  ;;  %v441_v14 = vld [vmem:[%s7343_s25 + $0xc0] sm:$0xff]  ;;  %v442_v15 = vld [vmem:[%s7343_s25 + $0xc8] sm:$0xff] }
  0x86   : > { %6313 = vmatmul.mubr.bf16.vlgmr.msra.gmra.mxu1 %v7416_v45  ;;  %1141 = vmatprep.subr.bf16.mxu0 %v10328_v0 }
  0x87   : > { %1622 = vmatpush1.bf16.msra.mxu1 %v6779_v46  ;;  %6316 = vmatprep.mubr.bf16.mxu1 %v7426_v49  ;;  %v890_v46 = vrot.slane %v7496_v37, 4 }
  0x88   : > { %1623 = vmatprep.subr.bf16.mxu1 %v10328_v0 }
  0x89   : > { %1142 = vmatpush2.bf16.msra.mxu0 %v6780_v52  ;;  %v437_v52 = vld [vmem:[%s7343_s25 + $0xa0] sm:$0xff]  ;;  %v7522_v58 = vsel %vm862_vm0, %v889_v43, %v890_v46 }
  0x8a   : > { %1143 = vmatprep.subr.bf16.mxu0 %v10328_v0  ;;  %v7525_v59 = vpack.c.bf16 %v437_v52, %v10322_v17 }
  0x8b   : > { %1624 = vmatpush1.bf16.msra.mxu1 %v6781_v53  ;;  %v438_v53 = vld [vmem:[%s7343_s25 + $0xa8] sm:$0xff] }
  0x8c   : > { %1625 = vmatprep.subr.bf16.mxu1 %v10328_v0  ;;  %v7528_v60 = vpack.c.bf16 %v10322_v17, %v438_v53  ;;  %v443_v53 = vld [vmem:[%s7343_s25 + $0xd0] sm:$0xff] }
  0x8d   : > { %1144 = vmatpush2.bf16.msra.mxu0 %v6782_v54  ;;  %v7512_v54 = vsel %vm862_vm0, %v886_v38, %v887_v40  ;;  %v7560_v40 = vpack.c.bf16 %v10322_v17, %v442_v15  ;;  %v6811_v15 = vld [vmem:[#allocation5 + $0x98] sm:$0xff]  }
  0x8e   : > { %6317 = vmatmul.mubr.bf16.gmra.mxu1 %v7448_v63  ;;  %1145 = vmatprep.subr.bf16.mxu0 %v10328_v0  ;;  %v896_v11 = vrot.slane %v7528_v60, 4 }
  0x8f   : > { %1626 = vmatpush1.bf16.msra.mxu1 %v6783_v1  ;;  %6320 = vmatprep.mubr.bf16.mxu1 %v7458_v5  ;;  %v6795_v1 = vld [vmem:[#allocation5 + $0xb8] sm:$0xff]   ;;  %v902_v52 = vrot.slane %v7560_v40, 4 }
  0x90   : > { %1627 = vmatprep.subr.bf16.mxu1 %v10328_v0 }
  0x91   : > { %1146 = vmatpush2.bf16.msra.mxu0 %v6784_v8  ;;  %v892_v8 = vrot.slane %v7515_v56, 4 }
  0x92   : > { %1147 = vmatprep.subr.bf16.mxu0 %v10328_v0 }
  0x93   : > { %1628 = vmatpush1.bf16.msra.mxu1 %v6785_v10  ;;  %v895_v10 = vrot.slane %v7525_v59, 4 }
  0x94   : > { %1629 = vmatprep.subr.bf16.mxu1 %v10328_v0 }
  0x95   : > { %1148 = vmatpush2.bf16.msra.mxu0 %v6786_v22  ;;  %v7543_v22 = vsel %vm862_vm0, %v892_v8, %v893_v9  ;;  %v7554_v38 = vsel %vm862_vm0, %v895_v10, %v896_v11  ;;  %v6797_v9 = vld [vmem:[#allocation5 + $0x68] sm:$0xff]   ;;  %v7578_v10 = vpack.c.bf16 %v443_v53, %v10322_v17 }
  0x96   : > { %6321 = vmatmul.mubr.bf16.gmra.mxu1 %v7486_v28  ;;  %1149 = vmatprep.subr.bf16.mxu0 %v10328_v0 }
  0x97   : > { %1630 = vmatpush1.bf16.msra.mxu1 %v6787_v29  ;;  %6324 = vmatprep.mubr.bf16.mxu1 %v7493_v36  ;;  %v7546_v29 = vpack.c.bf16 %v439_v12, %v10322_v17 }
  0x98   : > { %1631 = vmatprep.subr.bf16.mxu1 %v10328_v0 }
  0x99   : > { %1150 = vmatpush2.bf16.msra.mxu0 %v6788_v35  ;;  %v7549_v35 = vpack.c.bf16 %v10322_v17, %v440_v13 }
  0x9a   : > { %1151 = vmatprep.subr.bf16.mxu0 %v10328_v0 }
  0x9b   : > { %1632 = vmatpush1.bf16.msra.mxu1 %v6790_v39  ;;  %v7557_v39 = vpack.c.bf16 %v441_v14, %v10322_v17  ;;  %v899_v43 = vrot.slane %v7549_v35, 4 }
  0x9c   : > { %1633 = vmatprep.subr.bf16.mxu1 %v10328_v0 }
  0x9d   : > { %1152 = vmatpush2.bf16.msra.mxu0 %v6789_v42  ;;  %v898_v42 = vrot.slane %v7546_v29, 4  ;;  %v901_v46 = vrot.slane %v7557_v39, 4 }
  0x9e   : > { %6325 = vmatmul.mubr.bf16.gmra.mxu1 %v7512_v54  ;;  %1153 = vmatprep.subr.bf16.mxu0 %v10328_v0 }
  0x9f   : > { %1634 = vmatpush1.bf16.msra.mxu1 %v6792_v55  ;;  %6328 = vmatprep.mubr.bf16.mxu1 %v7522_v58  ;;  %v444_v55 = vld [vmem:[%s7343_s25 + $0xd8] sm:$0xff]  ;;  %v7575_v8 = vsel %vm862_vm0, %v898_v42, %v899_v43  ;;  %v7586_v12 = vsel %vm862_vm0, %v901_v46, %v902_v52  ;;  %v6798_v42 = vld [vmem:[#allocation5 + $0x60] sm:$0xff]   ;;  %v447_v46 = vld [vmem:[%s7343_s25 + $0xf0] sm:$0xff] }
  0xa0   : > { %1635 = vmatprep.subr.bf16.mxu1 %v10328_v0  ;;  %v7581_v11 = vpack.c.bf16 %v10322_v17, %v444_v55  ;;  %v6814_v52 = vld [vmem:[#allocation5 + $0x90] sm:$0xff]   ;;  %v6799_v55 = vld [vmem:[#allocation5 + $0x58] sm:$0xff]  }
  0xa1   : > { %1154 = vmatpush2.bf16.msra.mxu0 %v6791_v61  ;;  %v445_v61 = vld [vmem:[%s7343_s25 + $0xe0] sm:$0xff] }
  0xa2   : > { %6348 = vmatprep.subr.bf16.mxu0 %v6795_v1  ;;  %v7589_v13 = vpack.c.bf16 %v445_v61, %v10322_v17  ;;  %v7608_v61 = vpack.c.bf16 %v447_v46, %v10322_v17  ;;  %v6817_v46 = vld [vmem:[#allocation5 + $0x88] sm:$0xff]  }
  0xa3   : > { %1636 = vmatpush1.bf16.msra.mxu1 %v6793_v62  ;;  %v446_v62 = vld [vmem:[%s7343_s25 + $0xe8] sm:$0xff] }
  0xa4   : > { %1156 = vmatmul.mubr.bf16.vlgmr.msra.gmra.mxu0 %v7358_v2  ;;  %1637 = vmatprep.subr.bf16.mxu1 %v10328_v0  ;;  %v7592_v14 = vpack.c.bf16 %v10322_v17, %v446_v62  ;;  %v907_v43 = vrot.slane %v7589_v13, 4  ;;  %10527 = vst [vmem:[#allocation26_spill] sm:$0xff] %v7608_v61 }
  0xa5   : > { %1163 = vmatprep.mubr.bf16.mxu0 %v7385_v27  ;;  %6349 = vmatpush3.bf16.msra.mxu0 %v6795_v1  ;;  %v6808_v1 = vld [vmem:[#allocation5 + $0xa0] sm:$0xff]  }
  0xa6   : > { %6329 = vmatmul.mubr.bf16.gmra.mxu1 %v7543_v22  ;;  %6350 = vmatprep.subr.bf16.mxu0 %v6800_v16 }
  0xa7   : > { %1638 = vmatpush2.bf16.msra.mxu1 %v6794_v25  ;;  %6332 = vmatprep.mubr.bf16.mxu1 %v7554_v38  ;;  %v905_v25 = vrot.slane %v7581_v11, 4 }
  0xa8   : > { %1639 = vmatprep.subr.bf16.mxu1 %v10328_v0 }
  0xa9   : > { %6351 = vmatpush3.bf16.msra.mxu0 %v6800_v16  ;;  %v904_v16 = vrot.slane %v7578_v10, 4 }
  0xaa   : > { %6352 = vmatprep.subr.bf16.mxu0 %v6805_v41 }
  0xab   : > { %1640 = vmatpush2.bf16.msra.mxu1 %v6796_v44  ;;  %v908_v44 = vrot.slane %v7592_v14, 4  ;;  %v7605_v53 = vsel %vm862_vm0, %v904_v16, %v905_v25  ;;  %v10333_v16 = vshll.u32 %v7368_v18, 16  ;;  %v10336_v25 = vshrl.u32 %v7371_v19, 16 }
  0xac   : > { %1164 = vmatmul.mubr.bf16.gmra.mxu0 %v7358_v2  ;;  %1641 = vmatprep.subr.bf16.mxu1 %v10328_v0 }
  0xad   : > { %1171 = vmatprep.mubr.bf16.mxu0 %v7416_v45  ;;  %6353 = vmatpush3.bf16.msra.mxu0 %v6805_v41  ;;  %v448_v41 = vld [vmem:[%s7343_s25 + $0xf8] sm:$0xff] }
  0xae   : > { %6333 = vmatmul.mubr.bf16.gmra.mxu1 %v7575_v8  ;;  %6354 = vmatprep.subr.bf16.mxu0 %v6808_v1  ;;  %v7611_v62 = vpack.c.bf16 %v10322_v17, %v448_v41  ;;  %v6801_v41 = vld [vmem:[#allocation5 + $0x50] sm:$0xff]   ;;  %v498_v17 = vrot.slane %v10333_v16, 4  ;;  %v6802_v16 = vld [vmem:[#allocation5 + $0x48] sm:$0xff]  }
  0xaf   : > { %1642 = vmatpush2.bf16.msra.mxu1 %v6797_v9  ;;  %6336 = vmatprep.mubr.bf16.mxu1 %v7586_v12  ;;  %v7616_v9 = vsel %vm862_vm0, %v907_v43, %v908_v44  ;;  %v910_v43 = vrot.slane %v7608_v61, 4  ;;  %v6820_v61 = vld [vmem:[#allocation5 + $0x80] sm:$0xff]  }
  0xb0   : > { %1643 = vmatprep.subr.bf16.mxu1 %v10328_v0  ;;  %10528 = vst [vmem:[#allocation27_spill] sm:$0xff] %v7611_v62  ;;  %v911_v44 = vrot.slane %v7611_v62, 4  ;;  %v6803_v62 = vld [vmem:[#allocation5 + $0x40] sm:$0xff]  }
  0xb1   : > { %6355 = vmatpush3.bf16.msra.mxu0 %v6808_v1  ;;  %v10332_v1 = vshrl.u32 %v7368_v18, 16  ;;  %v10347_v18 = vshll.u32 %v7397_v31, 16 }
  0xb2   : > { %6356 = vmatprep.subr.bf16.mxu0 %v6811_v15 }
  0xb3   : > { %1644 = vmatpush2.bf16.msra.mxu1 %v6798_v42  ;;  %v10337_v42 = vshll.u32 %v7371_v19, 16  ;;  %v10354_v19 = vshll.u32 %v7403_v34, 16 }
  0xb4   : > { %1172 = vmatmul.mubr.bf16.gmra.mxu0 %v7385_v27  ;;  %1645 = vmatprep.subr.bf16.mxu1 %v10328_v0  ;;  %v486_v27 = vrot.slane %v10328_v0, 3 }
  0xb5   : > { %1179 = vmatprep.mubr.bf16.mxu0 %v7426_v49  ;;  %6357 = vmatpush3.bf16.msra.mxu0 %v6811_v15  ;;  %v7634_v15 = vrot.slane %v10332_v1, 3  ;;  %v506_v20 = vrot.slane %v10337_v42, 4  ;;  %v7646_v1 = vsel %vm862_vm0, %v910_v43, %v911_v44  ;;  %v10346_v42 = vshrl.u32 %v7400_v32, 16 }
  0xb6   : > { %6337 = vmatmul.mubr.bf16.gmra.mxu1 %v7605_v53  ;;  %6358 = vmatprep.subr.bf16.mxu0 %v6814_v52  ;;  %v10531_v43 = vshll.u32 %v7393_v30, 16 }
  0xb7   : > { %6340 = vmatprep.mubr.bf16.mxu1 %v7616_v9  ;;  %1646 = vmatpush2.bf16.msra.mxu1 %v6799_v55  ;;  %v503_v55 = vrot.slane %v10336_v25, 3  ;;  %v10530_v25 = vmov 0  }
  0xb8   : > { %1647 = vmatprep.subr.bf16.mxu1 %v10328_v0  ;;  %v10341_v0 = vshrl.u32 %v7397_v31, 16  ;;  %v515_v44 = vrot.slane %v10531_v43, 4  ;;  %v10533_v43 = vshll.u32 %v7400_v32, 16  ;;  %v10357_v31 = vshll.u32 %v7419_v47, 16 }
  0xb9   : > { %6359 = vmatpush3.bf16.msra.mxu0 %v6814_v52  ;;  %v512_v52 = vrot.slane %v10338_v21, 3  ;;  %v7669_v21 = vrot.slane %v10346_v42, 3  ;;  %v7681_v42 = vor.u32 %v7629_v24, %v486_v27  ;;  %v10534_v32 = vshrl.u32 %v7422_v48, 16 }
  0xba   : > { %6360 = vmatprep.subr.bf16.mxu0 %v6817_v46  ;;  %v7673_v30 = vrot.slane %v10533_v43, 4  ;;  %v507_v43 = vor.u32 %v506_v20, %v503_v55  ;;  %v6806_v20 = vld [vmem:[#allocation5 + $0x1b0] sm:$0xff]  }
  0xbb   : > { %1648 = vmatpush2.bf16.msra.mxu1 %v6801_v41  ;;  %v7661_v41 = vld [vmem:[#allocation5 + $0x238] sm:$0xff]   ;;  %v554_v24 = vrot.slane %v10534_v32, 3  ;;  %v10404_v32 = vshrl.u32 %v7451_v3, 16 }
  0xbc   : > { %1180 = vmatmul.mubr.bf16.gmra.mxu0 %v7416_v45  ;;  %1649 = vmatprep.subr.bf16.mxu1 %v10530_v25  ;;  %v520_v45 = vrot.slane %v10341_v0, 3  ;;  %10532 = vst [vmem:[#allocation29_spill] sm:$0xff] %v7661_v41  ;;  %v10351_v0 = vshrl.u32 %v7403_v34, 16 }
  0xbd   : > { %1187 = vmatprep.mubr.bf16.mxu0 %v7448_v63  ;;  %6361 = vmatpush3.bf16.msra.mxu0 %v6817_v46  ;;  %v523_v46 = vrot.slane %v10347_v18, 4  ;;  %v499_v18 = vor.u32 %v498_v17, %v7634_v15  ;;  %v10360_v17 = vshll.u32 %v7432_v51, 16  ;;  %v6807_v15 = vld [vmem:[#allocation5 + $0x1a8] sm:$0xff]  }
  0xbe   : > { %6341 = vmatmul.mubr.bf16.gmra.mxu1 %v7646_v1  ;;  %6362 = vmatprep.subr.bf16.mxu0 %v6820_v61 }
  0xbf   : > { %6344 = vmatprep.mubr.bf16.mxu1 %v7358_v2  ;;  %1650 = vmatpush2.bf16.msra.mxu1 %v6802_v16  ;;  %v10355_v16 = vshrl.u32 %v7419_v47, 16  ;;  %v10405_v47 = vshrl.u32 %v7432_v51, 16 }
  0xc0   : > { %1651 = vmatprep.subr.bf16.mxu1 %v10530_v25 }
  0xc1   : > { %6363 = vmatpush3.bf16.msra.mxu0 %v6820_v61  ;;  %v537_v61 = vrot.slane %v10351_v0, 3  ;;  %v7695_v27 = vrot.slane %v10355_v16, 3  ;;  %v10535_v0 = vshll.u32 %v7422_v48, 16  ;;  %v10406_v16 = vshll.u32 %v7429_v50, 16 }
  0xc2   : > { %6400 = vmatprep.subr.bf16.mxu0 %v7661_v41  ;;  %v6804_v41 = vld [vmem:[#allocation5 + $0x1b8] sm:$0xff]  }
  0xc3   : > { %1652 = vmatpush2.bf16.msra.mxu1 %v6803_v62  ;;  %v540_v62 = vrot.slane %v10354_v19, 4  ;;  %v557_v34 = vrot.slane %v10535_v0, 4  ;;  %v10407_v19 = vshrl.u32 %v7429_v50, 16 }
  0xc4   : > { %1188 = vmatmul.mubr.bf16.gmra.mxu0 %v7426_v49  ;;  %2302 = vmatprep.subr.bf16.mxu1 %v10530_v25  ;;  %v7699_v49 = vrot.slane %v10357_v31, 4  ;;  %v7711_v31 = vsel %vm482_vm1, %v499_v18, %v507_v43  ;;  %v516_v18 = vor.u32 %v515_v44, %v512_v52  ;;  %v6809_v43 = vld [vmem:[#allocation5 + $0x1a0] sm:$0xff]   ;;  %v571_v52 = vrot.slane %v10405_v47, 3 }
  0xc5   : > { %1195 = vmatprep.mubr.bf16.mxu0 %v7458_v5  ;;  %v7719_v0 = vrot.slane %v10407_v19, 3  ;;  %v574_v44 = vrot.slane %v10360_v17, 4 }
  0xc6   : > { %6345 = vmatmul.mubr.bf16.gmra.mxu1 %v7358_v2 }
  0xc7   : > { %1653 = vmatprep.mubr.bf16.mxu1 %v7681_v42 }
  0xcc   : > { %1196 = vmatmul.mubr.bf16.gmra.mxu0 %v7448_v63  ;;  %v524_v63 = vor.u32 %v523_v46, %v520_v45  ;;  %v533_v45 = vor.u32 %v7673_v30, %v7669_v21  ;;  %v541_v46 = vor.u32 %v540_v62, %v537_v61  ;;  %v550_v21 = vor.u32 %v7699_v49, %v7695_v27  ;;  %v6815_v49 = vld [vmem:[#allocation5 + $0x180] sm:$0xff]  }
  0xcd   : > { %1203 = vmatprep.mubr.bf16.mxu0 %v7486_v28  ;;  %v558_v30 = vor.u32 %v557_v34, %v554_v24  ;;  %v10363_v24 = vshll.u32 %v7461_v6, 16 }
  0xce   : > { %1654 = vmatmul.mubr.bf16.vlgmr.msra.gmra.mxu1 %v7681_v42  ;;  %v7726_v55 = vsel %vm482_vm1, %v516_v18, %v524_v63  ;;  %v10362_v18 = vshrl.u32 %v7454_v4, 16  ;;  %v10361_v63 = vshll.u32 %v7454_v4, 16  ;;  %v7746_v17 = vsel %vm482_vm1, %v533_v45, %v541_v46  ;;  %v6813_v45 = vld [vmem:[#allocation5 + $0x188] sm:$0xff]  }
  0xcf   : > { %2303 = vmatpush1.bf16.msra.mxu1 %v6804_v41  ;;  %1661 = vmatprep.mubr.bf16.mxu1 %v7711_v31  ;;  %v566_v41 = vrot.slane %v10406_v16, 4  ;;  %v7767_v34 = vsel %vm482_vm1, %v550_v21, %v558_v30  ;;  %v10400_v21 = vshll.u32 %v7464_v7, 16  ;;  %v10399_v30 = vshrl.u32 %v7478_v23, 16 }
  0xd0   : > { %2304 = vmatprep.subr.bf16.mxu1 %v10530_v25  ;;  %v588_v62 = vrot.slane %v10362_v18, 3  ;;  %v591_v27 = vrot.slane %v10361_v63, 4  ;;  %v600_v63 = vrot.slane %v10363_v24, 4  ;;  %v6816_v18 = vld [vmem:[#allocation5 + $0x1f8] sm:$0xff]   ;;  %v6819_v24 = vld [vmem:[#allocation5 + $0x1e8] sm:$0xff]  }
  0xd1   : > { %v567_v46 = vor.u32 %v566_v41, %v7719_v0  ;;  %v6818_v41 = vld [vmem:[#allocation5 + $0x1f0] sm:$0xff]  }
  0xd3   : > { %2305 = vmatpush1.bf16.msra.mxu1 %v6806_v20  ;;  %v6810_v20 = vld [vmem:[#allocation5 + $0x198] sm:$0xff]  }
  0xd4   : > { %1204 = vmatmul.mubr.bf16.gmra.mxu0 %v7458_v5  ;;  %2306 = vmatprep.subr.bf16.mxu1 %v10530_v25  ;;  %v10403_v5 = vshll.u32 %v7451_v3, 16 }
  0xd5   : > { %1211 = vmatprep.mubr.bf16.mxu0 %v7493_v36 }
  0xd6   : > { %1662 = vmatmul.mubr.bf16.gmra.mxu1 %v7681_v42  ;;  %v583_v61 = vrot.slane %v10403_v5, 4 }
  0xd7   : > { %1669 = vmatprep.mubr.bf16.mxu1 %v7726_v55  ;;  %2307 = vmatpush1.bf16.msra.mxu1 %v6807_v15  ;;  %v6812_v15 = vld [vmem:[#allocation5 + $0x190] sm:$0xff]  }
  0xd8   : > { %2308 = vmatprep.subr.bf16.mxu1 %v10530_v25 }
  0xdb   : > { %2309 = vmatpush1.bf16.msra.mxu1 %v6809_v43  ;;  %v10402_v43 = vshrl.u32 %v7461_v6, 16 }
  0xdc   : > { %1212 = vmatmul.mubr.bf16.gmra.mxu0 %v7486_v28  ;;  %2310 = vmatprep.subr.bf16.mxu1 %v10530_v25  ;;  %v580_v28 = vrot.slane %v10404_v32, 3 }
  0xdd   : > { %1219 = vmatprep.mubr.bf16.mxu0 %v7512_v54 }
  0xde   : > { %1670 = vmatmul.mubr.bf16.gmra.mxu1 %v7711_v31 }
  0xdf   : > { %1677 = vmatprep.mubr.bf16.mxu1 %v7746_v17  ;;  %2311 = vmatpush1.bf16.msra.mxu1 %v6810_v20  ;;  %v575_v20 = vor.u32 %v574_v44, %v571_v52  ;;  %v584_v52 = vor.u32 %v583_v61, %v580_v28  ;;  %v592_v44 = vor.u32 %v591_v27, %v588_v62  ;;  %v614_v61 = vrot.slane %v10399_v30, 3  ;;  %v6821_v62 = vld [vmem:[#allocation5 + $0x1e0] sm:$0xff]  }
  0xe0   : > { %2312 = vmatprep.subr.bf16.mxu1 %v10530_v25 }
  0xe1   : > { %v7784_v0 = vsel %vm482_vm1, %v567_v46, %v575_v20  ;;  %v10365_v46 = vshrl.u32 %v7483_v26, 16  ;;  %v10364_v20 = vshll.u32 %v7483_v26, 16 }
  0xe3   : > { %2313 = vmatpush1.bf16.msra.mxu1 %v6812_v15  ;;  %v597_v15 = vrot.slane %v10402_v43, 3  ;;  %v10556_v43 = vld [vmem:[#allocation24_spill] sm:$0xff] }
  0xe4   : > { %1220 = vmatmul.mubr.bf16.gmra.mxu0 %v7493_v36  ;;  %2314 = vmatprep.subr.bf16.mxu1 %v10530_v25  ;;  %v10401_v36 = vshrl.u32 %v7464_v7, 16  ;;  %v10558_v32 = vshll.u32 %v10556_v43, 16 }
  0xe5   : > { %1227 = vmatprep.mubr.bf16.mxu0 %v7522_v58  ;;  %v601_v28 = vor.u32 %v600_v63, %v597_v15  ;;  %v10368_v15 = vshll.u32 %v7489_v33, 16 }
  0xe6   : > { %1678 = vmatmul.mubr.bf16.gmra.mxu1 %v7726_v55  ;;  %v1998_v47 = vrot.slane %v10558_v32, 5 }
  0xe7   : > { %1685 = vmatprep.mubr.bf16.mxu1 %v7767_v34  ;;  %2315 = vmatpush1.bf16.msra.mxu1 %v6813_v45  ;;  %v605_v45 = vrot.slane %v10401_v36, 3 }
  0xe8   : > { %2316 = vmatprep.subr.bf16.mxu1 %v10530_v25 }
  0xeb   : > { %2317 = vmatpush1.bf16.msra.mxu1 %v6815_v49  ;;  %v10398_v49 = vshll.u32 %v7478_v23, 16 }
  0xec   : > { %1228 = vmatmul.mubr.bf16.gmra.mxu0 %v7512_v54  ;;  %2318 = vmatprep.subr.bf16.mxu1 %v10530_v25  ;;  %v608_v54 = vrot.slane %v10400_v21, 4 }
  0xed   : > { %1235 = vmatprep.mubr.bf16.mxu0 %v7543_v22 }
  0xee   : > { %1686 = vmatmul.mubr.bf16.gmra.mxu1 %v7746_v17  ;;  %v609_v27 = vor.u32 %v608_v54, %v605_v45  ;;  %v6824_v45 = vld [vmem:[#allocation5 + $0x1d0] sm:$0xff]  }
  0xef   : > { %1693 = vmatprep.mubr.bf16.mxu1 %v7784_v0  ;;  %2319 = vmatpush2.bf16.msra.mxu1 %v6816_v18  ;;  %v7800_v18 = vsel %vm482_vm1, %v584_v52, %v592_v44  ;;  %v625_v52 = vrot.slane %v10364_v20, 4  ;;  %v6822_v44 = vld [vmem:[#allocation5 + $0x1d8] sm:$0xff]   ;;  %v6826_v20 = vld [vmem:[#allocation5 + $0x1c8] sm:$0xff]  }
  0xf0   : > { %2320 = vmatprep.subr.bf16.mxu1 %v10530_v25  ;;  %v7817_v63 = vsel %vm482_vm1, %v601_v28, %v609_v27  ;;  %v10366_v28 = vshll.u32 %v7496_v37, 16 }
  0xf3   : > { %2321 = vmatpush2.bf16.msra.mxu1 %v6818_v41  ;;  %v622_v41 = vrot.slane %v10365_v46, 3 }
  0xf4   : > { %1236 = vmatmul.mubr.bf16.gmra.mxu0 %v7522_v58  ;;  %2322 = vmatprep.subr.bf16.mxu1 %v10530_v25  ;;  %v617_v58 = vrot.slane %v10398_v49, 4 }
  0xf5   : > { %1243 = vmatprep.mubr.bf16.mxu0 %v7554_v38 }
  0xf6   : > { %1694 = vmatmul.mubr.bf16.gmra.mxu1 %v7767_v34  ;;  %v618_v54 = vor.u32 %v617_v58, %v614_v61  ;;  %v634_v61 = vrot.slane %v10368_v15, 4 }
  0xf7   : > { %1701 = vmatprep.mubr.bf16.mxu1 %v7800_v18  ;;  %2323 = vmatpush2.bf16.msra.mxu1 %v6819_v24  ;;  %v10397_v24 = vshrl.u32 %v7489_v33, 16 }
  0xf8   : > { %2324 = vmatprep.subr.bf16.mxu1 %v10530_v25 }
  0xf9   : > { %v631_v27 = vrot.slane %v10397_v24, 3 }
  0xfb   : > { %2325 = vmatpush2.bf16.msra.mxu1 %v6821_v62  ;;  %v626_v62 = vor.u32 %v625_v52, %v622_v41  ;;  %v642_v41 = vrot.slane %v10366_v28, 4  ;;  %v10371_v52 = vshll.u32 %v7515_v56, 16  ;;  %v10370_v28 = vshll.u32 %v7518_v57, 16 }
  0xfc   : > { %1244 = vmatmul.mubr.bf16.gmra.mxu0 %v7543_v22  ;;  %2326 = vmatprep.subr.bf16.mxu1 %v10530_v25  ;;  %v10367_v22 = vshrl.u32 %v7496_v37, 16 }
  0xfd   : > { %1251 = vmatprep.mubr.bf16.mxu0 %v7575_v8  ;;  %v7832_v46 = vsel %vm482_vm1, %v618_v54, %v626_v62  ;;  %v10369_v62 = vshrl.u32 %v7518_v57, 16 }
  0xfe   : > { %1702 = vmatmul.mubr.bf16.gmra.mxu1 %v7784_v0  ;;  %v639_v58 = vrot.slane %v10367_v22, 3 }
  0xff   : > { %1709 = vmatprep.mubr.bf16.mxu1 %v7817_v63  ;;  %2327 = vmatpush2.bf16.msra.mxu1 %v6822_v44  ;;  %v6828_v44 = vld [vmem:[#allocation5 + $0x1c0] sm:$0xff]  }
 0x100   : > { %2328 = vmatprep.subr.bf16.mxu1 %v10530_v25  ;;  %v643_v54 = vor.u32 %v642_v41, %v639_v58  ;;  %v10375_v58 = vshll.u32 %v7525_v59, 16 }
 0x103   : > { %2329 = vmatpush2.bf16.msra.mxu1 %v6824_v45  ;;  %v635_v45 = vor.u32 %v634_v61, %v631_v27  ;;  %v656_v27 = vrot.slane %v10369_v62, 3  ;;  %v659_v61 = vrot.slane %v10370_v28, 4 }
 0x104   : > { %1252 = vmatmul.mubr.bf16.gmra.mxu0 %v7554_v38  ;;  %2330 = vmatprep.subr.bf16.mxu1 %v10530_v25  ;;  %v10372_v38 = vshrl.u32 %v7515_v56, 16 }
 0x105   : > { %1259 = vmatprep.mubr.bf16.mxu0 %v7586_v12  ;;  %v7853_v15 = vsel %vm482_vm1, %v635_v45, %v643_v54  ;;  %v10373_v45 = vshrl.u32 %v7528_v60, 16  ;;  %v10374_v54 = vshll.u32 %v7528_v60, 16 }
 0x106   : > { %1710 = vmatmul.mubr.bf16.gmra.mxu1 %v7800_v18  ;;  %v648_v22 = vrot.slane %v10372_v38, 3 }
 0x107   : > { %1717 = vmatprep.mubr.bf16.mxu1 %v7832_v46  ;;  %2331 = vmatpush2.bf16.msra.mxu1 %v6826_v20  ;;  %v651_v20 = vrot.slane %v10371_v52, 4  ;;  %v668_v52 = vrot.slane %v10375_v58, 4  ;;  %v673_v38 = vrot.slane %v10373_v45, 3 }
 0x108   : > { %2332 = vmatprep.subr.bf16.mxu1 %v10530_v25 }
 0x109   : > { %v652_v41 = vor.u32 %v651_v20, %v648_v22  ;;  %v676_v22 = vrot.slane %v10374_v54, 4  ;;  %v10379_v20 = vshll.u32 %v7546_v29, 16 }
 0x10b   : > { %2333 = vmatpush2.bf16.msra.mxu1 %v6828_v44  ;;  %v660_v44 = vor.u32 %v659_v61, %v656_v27  ;;  %v677_v61 = vor.u32 %v676_v22, %v673_v38  ;;  %v685_v58 = vrot.slane %v10379_v20, 4 }
 0x10c   : > { %1260 = vmatmul.mubr.bf16.gmra.mxu0 %v7575_v8  ;;  %v10376_v8 = vshrl.u32 %v7525_v59, 16 }
 0x10d   : > { %1267 = vmatprep.mubr.bf16.mxu0 %v7605_v53  ;;  %v7872_v28 = vsel %vm482_vm1, %v652_v41, %v660_v44  ;;  %v10377_v41 = vshrl.u32 %v7549_v35, 16  ;;  %v10378_v44 = vshll.u32 %v7549_v35, 16 }
 0x10e   : > { %1718 = vmatmul.mubr.bf16.gmra.mxu1 %v7817_v63  ;;  %v665_v62 = vrot.slane %v10376_v8, 3 }
 0x10f   : > { %1725 = vmatprep.mubr.bf16.mxu1 %v7853_v15  ;;  %v690_v8 = vrot.slane %v10377_v41, 3  ;;  %v693_v38 = vrot.slane %v10378_v44, 4 }
 0x110   : > { %v669_v27 = vor.u32 %v668_v52, %v665_v62  ;;  %v10383_v52 = vshll.u32 %v7557_v39, 16 }
 0x111   : > { %v694_v22 = vor.u32 %v693_v38, %v690_v8 }
 0x112   : > { %v7891_v54 = vsel %vm482_vm1, %v669_v27, %v677_v61  ;;  %v10381_v27 = vshrl.u32 %v7560_v40, 16  ;;  %v10382_v61 = vshll.u32 %v7560_v40, 16  ;;  %v702_v20 = vrot.slane %v10383_v52, 4 }
 0x114   : > { %1268 = vmatmul.mubr.bf16.gmra.mxu0 %v7586_v12  ;;  %v10380_v12 = vshrl.u32 %v7546_v29, 16  ;;  %v710_v8 = vrot.slane %v10382_v61, 4 }
 0x115   : > { %1275 = vmatprep.mubr.bf16.mxu0 %v7616_v9 }
 0x116   : > { %1726 = vmatmul.mubr.bf16.gmra.mxu1 %v7832_v46  ;;  %v682_v45 = vrot.slane %v10380_v12, 3  ;;  %v707_v12 = vrot.slane %v10381_v27, 3 }
 0x117   : > { %1733 = vmatprep.mubr.bf16.mxu1 %v7872_v28 }
 0x118   : > { %v686_v62 = vor.u32 %v685_v58, %v682_v45  ;;  %v10386_v58 = vshll.u32 %v7578_v10, 16  ;;  %v711_v38 = vor.u32 %v710_v8, %v707_v12  ;;  %v10391_v8 = vshll.u32 %v7592_v14, 16 }
 0x11a   : > { %v7910_v44 = vsel %vm482_vm1, %v686_v62, %v694_v22  ;;  %v10384_v62 = vshrl.u32 %v7581_v11, 16  ;;  %v10385_v22 = vshll.u32 %v7581_v11, 16  ;;  %v719_v61 = vrot.slane %v10386_v58, 4 }
 0x11c   : > { %1276 = vmatmul.mubr.bf16.gmra.mxu0 %v7605_v53  ;;  %v10388_v53 = vshrl.u32 %v7557_v39, 16  ;;  %v724_v52 = vrot.slane %v10384_v62, 3  ;;  %v727_v12 = vrot.slane %v10385_v22, 4  ;;  %v6825_v62 = vld [vmem:[#allocation5 + $0x230] sm:$0xff]  }
 0x11d   : > { %1283 = vmatprep.mubr.bf16.mxu0 %v7646_v1 }
 0x11e   : > { %1734 = vmatmul.mubr.bf16.gmra.mxu1 %v7853_v15  ;;  %v699_v41 = vrot.slane %v10388_v53, 3 }
 0x11f   : > { %1741 = vmatprep.mubr.bf16.mxu1 %v7891_v54 }
 0x120   : > { %v703_v45 = vor.u32 %v702_v20, %v699_v41  ;;  %v10390_v20 = vshll.u32 %v7589_v13, 16  ;;  %v10389_v41 = vshrl.u32 %v7592_v14, 16 }
 0x122   : > { %v741_v58 = vrot.slane %v10389_v41, 3  ;;  %v10537_v41 = vld [vmem:[#allocation26_spill] sm:$0xff] }
 0x124   : > { %1284 = vmatmul.mubr.bf16.gmra.mxu0 %v7616_v9  ;;  %v10387_v9 = vshrl.u32 %v7578_v10, 16 }
 0x125   : > { %1291 = vmatprep.mubr.bf16.mxu0 %v7358_v2  ;;  %v7929_v2 = vsel %vm482_vm1, %v703_v45, %v711_v38  ;;  %v728_v38 = vor.u32 %v727_v12, %v724_v52  ;;  %v10536_v52 = vld [vmem:[#allocation29_spill] sm:$0xff] }
 0x126   : > { %1742 = vmatmul.mubr.bf16.gmra.mxu1 %v7872_v28  ;;  %v716_v27 = vrot.slane %v10387_v9, 3  ;;  %v744_v9 = vrot.slane %v10391_v8, 4  ;;  %v10395_v8 = vshll.u32 %v10537_v41, 16 }
 0x127   : > { %1749 = vmatprep.mubr.bf16.mxu1 %v7910_v44 }
 0x128   : > { %v720_v45 = vor.u32 %v719_v61, %v716_v27  ;;  %v6827_v27 = vld [vmem:[#allocation5 + $0x228] sm:$0xff]   ;;  %v745_v12 = vor.u32 %v744_v9, %v741_v58  ;;  %v753_v9 = vrot.slane %v10395_v8, 4 }
 0x12a   : > { %v7954_v53 = vsel %vm482_vm1, %v720_v45, %v728_v38 }
 0x12c   : > { %1292 = vmatmul.mubr.bf16.gmra.mxu0 %v7646_v1  ;;  %v10392_v1 = vshrl.u32 %v7589_v13, 16 }
 0x12d   : > { %6364 = vmatprep.mubr.bf16.mxu0 %v7711_v31  ;;  %v736_v31 = vrot.slane %v10390_v20, 4  ;;  %v10396_v20 = vshrl.u32 %v10537_v41, 16 }
 0x12e   : > { %1750 = vmatmul.mubr.bf16.gmra.mxu1 %v7891_v54  ;;  %v733_v22 = vrot.slane %v10392_v1, 3 }
 0x12f   : > { %1757 = vmatprep.mubr.bf16.mxu1 %v7929_v2 }
 0x130   : > { %v737_v61 = vor.u32 %v736_v31, %v733_v22  ;;  %v750_v22 = vrot.slane %v10396_v20, 3 }
 0x132   : > { %v7965_v38 = vsel %vm482_vm1, %v737_v61, %v745_v12  ;;  %v6831_v61 = vld [vmem:[#allocation5 + $0x210] sm:$0xff]  }
 0x134   : > { %6365 = vmatmul.mubr.bf16.vlgmr.msra.gmra.mxu0 %v7726_v55  ;;  %v10538_v55 = vld [vmem:[#allocation27_spill] sm:$0xff] }
 0x135   : > { %6368 = vmatprep.mubr.bf16.mxu0 %v7746_v17  ;;  %6401 = vmatpush3.bf16.msra.mxu0 %v10536_v52  ;;  %v10394_v1 = vshrl.u32 %v10538_v55, 16  ;;  %v10393_v45 = vshll.u32 %v10538_v55, 16  ;;  %v6829_v17 = vld [vmem:[#allocation5 + $0x220] sm:$0xff]  }
 0x136   : > { %1758 = vmatmul.mubr.bf16.gmra.mxu1 %v7910_v44  ;;  %6402 = vmatprep.subr.bf16.mxu0 %v6825_v62 }
 0x137   : > { %1765 = vmatprep.mubr.bf16.mxu1 %v7954_v53  ;;  %v758_v58 = vrot.slane %v10394_v1, 3  ;;  %v761_v31 = vrot.slane %v10393_v45, 4  ;;  %v10544_v1 = vld [vmem:[#allocation18_spill] sm:$0xff] }
 0x138   : > { %v10545_v8 = vshrl.u32 %v10544_v1, 16  ;;  %v10546_v20 = vshll.u32 %v10544_v1, 16 }
 0x139   : > { %6403 = vmatpush3.bf16.msra.mxu0 %v6825_v62  ;;  %v6830_v62 = vld [vmem:[#allocation5 + $0x218] sm:$0xff]   ;;  %v762_v52 = vor.u32 %v761_v31, %v758_v58  ;;  %v1977_v58 = vrot.slane %v10530_v25, 5 }
 0x13a   : > { %6404 = vmatprep.subr.bf16.mxu0 %v6827_v27  ;;  %v1983_v25 = vrot.slane %v10545_v8, 4  ;;  %v1984_v24 = vrot.slane %v10546_v20, 5 }
 0x13c   : > { %6369 = vmatmul.mubr.bf16.gmra.mxu0 %v7767_v34  ;;  %v754_v34 = vor.u32 %v753_v9, %v750_v22 }
 0x13d   : > { %6372 = vmatprep.mubr.bf16.mxu0 %v7784_v0  ;;  %6405 = vmatpush3.bf16.msra.mxu0 %v6827_v27  ;;  %v6832_v27 = vld [vmem:[#allocation5 + $0x208] sm:$0xff]  }
 0x13e   : > { %1766 = vmatmul.mubr.bf16.gmra.mxu1 %v7929_v2  ;;  %6406 = vmatprep.subr.bf16.mxu0 %v6829_v17  ;;  %v7981_v12 = vsel %vm482_vm1, %v754_v34, %v762_v52  ;;  %v10539_v34 = vld [vmem:[#allocation28_spill] sm:$0xff] }
 0x13f   : > { %1773 = vmatprep.mubr.bf16.mxu1 %v7965_v38  ;;  %v8002_v52 = vor.u32 %v1977_v58, %v10539_v34  ;;  %v1985_v34 = vor.u32 %v1984_v24, %v1983_v25 }
 0x141   : > { %6407 = vmatpush3.bf16.msra.mxu0 %v6829_v17  ;;  %10540 = vst [vmem:[#allocation29_spill] sm:$0xff] %v8002_v52 }
 0x142   : > { %6408 = vmatprep.subr.bf16.mxu0 %v6830_v62 }
 0x144   : > { %6373 = vmatmul.mubr.bf16.gmra.mxu0 %v7800_v18  ;;  %v6833_v18 = vld [vmem:[#allocation5 + $0x200] sm:$0xff]  }
 0x145   : > { %6376 = vmatprep.mubr.bf16.mxu0 %v7817_v63  ;;  %6409 = vmatpush3.bf16.msra.mxu0 %v6830_v62 }
 0x146   : > { %v7984_v0 = vpop.f32.mrf.mxu1  ;;  %1774 = vmatmul.mubr.bf16.gmra.mxu1 %v7954_v53  ;;  %6410 = vmatprep.subr.bf16.mxu0 %v6831_v61 }
 0x147   : > { %1781 = vmatprep.mubr.bf16.mxu1 %v7981_v12 }
 0x148   : > { %v1334_v22 = vpop.f32.mrf.mxu1 }
 0x149   : > { %6411 = vmatpush3.bf16.msra.mxu0 %v6831_v61 }
 0x14a   : > { %v7988_v17 = vpop.f32.mrf.mxu1  ;;  %6412 = vmatprep.subr.bf16.mxu0 %v6832_v27 }
 0x14c   : > { %v1337_v9 = vpop.f32.mrf.mxu1  ;;  %6377 = vmatmul.mubr.bf16.gmra.mxu0 %v7832_v46  ;;  %v10541_v46 = vld [vmem:[#allocation17_spill] sm:$0xff] }
 0x14d   : > { %6380 = vmatprep.mubr.bf16.mxu0 %v7853_v15  ;;  %6413 = vmatpush3.bf16.msra.mxu0 %v6832_v27  ;;  %v10542_v15 = vshrl.u32 %v10541_v46, 16  ;;  %v10543_v27 = vshll.u32 %v10541_v46, 16 }
 0x14e   : > { %v7992_v63 = vpop.f32.mrf.mxu1  ;;  %1782 = vmatmul.mubr.bf16.gmra.mxu1 %v7965_v38  ;;  %6414 = vmatprep.subr.bf16.mxu0 %v6833_v18 }
 0x14f   : > { %1789 = vmatprep.mubr.bf16.mxu1 %v7681_v42  ;;  %v1980_v61 = vrot.slane %v10542_v15, 4  ;;  %v1981_v45 = vrot.slane %v10543_v27, 5 }
 0x150   : > { %v7997_v31 = vpop.f32.mrf.mxu1 }
 0x151   : > { %6415 = vmatpush3.bf16.msra.mxu0 %v6833_v18  ;;  %v1982_v58 = vor.u32 %v1981_v45, %v1980_v61  ;;  %v10550_v45 = vld [vmem:[#allocation22_spill] sm:$0xff] }
 0x152   : > { %v7999_v62 = vpop.f32.mrf.mxu1  ;;  %v10551_v24 = vshrl.u32 %v10550_v45, 16  ;;  %v10552_v25 = vshll.u32 %v10550_v45, 16 }
 0x153   : > { %v8025_v1 = vsel %vm1975_vm2, %v1982_v58, %v1985_v34 }
 0x154   : > { %v8012_v49 = vpop.f32.mrf.mxu1  ;;  %6381 = vmatmul.mubr.bf16.gmra.mxu0 %v7872_v28  ;;  %v10547_v28 = vld [vmem:[#allocation21_spill] sm:$0xff]  ;;  %v1990_v61 = vrot.slane %v10551_v24, 4  ;;  %v1991_v21 = vrot.slane %v10552_v25, 5 }
 0x155   : > { %6384 = vmatprep.mubr.bf16.mxu0 %v7891_v54  ;;  %v10548_v54 = vshrl.u32 %v10547_v28, 16  ;;  %v10549_v27 = vshll.u32 %v10547_v28, 16 }
 0x156   : > { %v8016_v18 = vpop.f32.mrf.mxu1  ;;  %1790 = vmatmul.mubr.bf16.gmra.mxu1 %v7981_v12 }
 0x157   : > { %2334 = vmatprep.mubr.bf16.mxu1 %v8002_v52  ;;  %v1987_v15 = vrot.slane %v10548_v54, 4  ;;  %v1988_v30 = vrot.slane %v10549_v27, 5  ;;  %v1992_v54 = vor.u32 %v1991_v21, %v1990_v61  ;;  %v10553_v27 = vld [vmem:[#allocation23_spill] sm:$0xff] }
 0x158   : > { %v8020_v46 = vpop.f32.mrf.mxu1  ;;  %v10554_v36 = vshrl.u32 %v10553_v27, 16  ;;  %v10555_v45 = vshll.u32 %v10553_v27, 16 }
 0x159   : > { %v1989_v34 = vor.u32 %v1988_v30, %v1987_v15 }
 0x15a   : > { %v8022_v8 = vpop.f32.mrf.mxu1  ;;  %v1994_v24 = vrot.slane %v10554_v36, 4  ;;  %v1995_v25 = vrot.slane %v10555_v45, 5 }
 0x15b   : > { %v1993_v21 = vsel %vm1975_vm2, %v1989_v34, %v1992_v54  ;;  %v10561_v54 = vld [vmem:[#allocation25_spill] sm:$0xff] }
 0x15c   : > { %v8027_v20 = vpop.f32.mrf.mxu1  ;;  %6385 = vmatmul.mubr.bf16.gmra.mxu0 %v7910_v44  ;;  %v1996_v61 = vor.u32 %v1995_v25, %v1994_v24  ;;  %v10564_v24 = vshrl.u32 %v7422_v48, 16  ;;  %v10565_v25 = vshll.u32 %v7422_v48, 16 }
 0x15d   : > { %6388 = vmatprep.mubr.bf16.mxu0 %v7929_v2  ;;  %v10557_v2 = vshrl.u32 %v10556_v43, 16 }
 0x15e   : > { %v8039_v58 = vpop.f32.mrf.mxu1  ;;  %2335 = vmatmul.mubr.bf16.vlgmr.msra.gmra.mxu1 %v8002_v52 }
 0x15f   : > { %2342 = vmatprep.mubr.bf16.mxu1 %v8025_v1  ;;  %v1997_v5 = vrot.slane %v10557_v2, 4  ;;  %v10562_v2 = vshrl.u32 %v10561_v54, 16 }
 0x160   : > { %v8043_v44 = vpop.f32.mrf.mxu1 }
 0x161   : > { %v1999_v43 = vor.u32 %v1998_v47, %v1997_v5  ;;  %v10563_v47 = vshll.u32 %v10561_v54, 16 }
 0x162   : > { %v8045_v28 = vpop.f32.mrf.mxu1 }
 0x163   : > { %v2002_v5 = vrot.slane %v10563_v47, 5 }
 0x164   : > { %v8055_v16 = vpop.f32.mrf.mxu1  ;;  %v1157_v19 = vpop.f32.mrf.mxu0  ;;  %6389 = vmatmul.mubr.bf16.gmra.mxu0 %v7954_v53 }
 0x165   : > { %v8059_v30 = vadd.f32 %v1334_v22, %v1157_v19  ;;  %6392 = vmatprep.mubr.bf16.mxu0 %v7965_v38  ;;  %v2000_v19 = vsel %vm1975_vm2, %v1996_v61, %v1999_v43 }
 0x166   : > { %v8062_v36 = vpop.f32.mrf.mxu1  ;;  %2343 = vmatmul.mubr.bf16.gmra.mxu1 %v8002_v52  ;;  %v1159_v15 = vpop.f32.mrf.mxu0 }
 0x167   : > { %10559 = vst [vmem:[#allocation26_spill] sm:$0xff] %v8062_v36  ;;  %2350 = vmatprep.mubr.bf16.mxu1 %v1993_v21  ;;  %v2001_v15 = vrot.slane %v10562_v2, 4 }
 0x168   : > { %v8065_v32 = vpop.f32.mrf.mxu1  ;;  %v1160_v27 = vpop.f32.mrf.mxu0 }
 0x169   : > { %v8067_v45 = vadd.f32 %v1337_v9, %v1160_v27  ;;  %v2004_v9 = vrot.slane %v10564_v24, 4  ;;  %v2005_v27 = vrot.slane %v10565_v25, 5  ;;  %v2003_v2 = vor.u32 %v2002_v5, %v2001_v15 }
 0x16a   : > { %v8069_v53 = vpop.f32.mrf.mxu1  ;;  %v1162_v34 = vpop.f32.mrf.mxu0 }
 0x16b   : > { %10560 = vst [vmem:[#allocation27_spill] sm:$0xff] %v8069_v53  ;;  %v2006_v47 = vor.u32 %v2005_v27, %v2004_v9  ;;  %v6834_v9 = vld [vmem:[#allocation7 + $0x178] sm:$0xff]  }
 0x16c   : > { %v8072_v22 = vpop.f32.mrf.mxu1  ;;  %v1165_v38 = vpop.f32.mrf.mxu0  ;;  %6393 = vmatmul.mubr.bf16.gmra.mxu0 %v7981_v12  ;;  %6452 = vmatprep.subr.bf16.mxu1 %v6834_v9 }
 0x16d   : > { %v8084_v34 = vadd.f32 %v7984_v0, %v1165_v38  ;;  %6396 = vmatprep.mubr.bf16.mxu0 %v7681_v42  ;;  %v10568_v38 = vshrl.u32 %v7429_v50, 16  ;;  %6453 = vmatpush3.bf16.msra.mxu1 %v6834_v9 }
 0x16e   : > { %v8087_v61 = vpop.f32.mrf.mxu1  ;;  %2351 = vmatmul.mubr.bf16.gmra.mxu1 %v8025_v1  ;;  %v1167_v12 = vpop.f32.mrf.mxu0 }
 0x16f   : > { %10566 = vst [vmem:[#allocation28_spill] sm:$0xff] %v8087_v61  ;;  %2358 = vmatprep.mubr.bf16.mxu1 %v2000_v19  ;;  %v2008_v25 = vrot.slane %v10568_v38, 4  ;;  %v10569_v61 = vshll.u32 %v7429_v50, 16  ;;  %v10570_v12 = vshrl.u32 %v7432_v51, 16 }
 0x170   : > { %v8090_v43 = vpop.f32.mrf.mxu1  ;;  %v1168_v54 = vpop.f32.mrf.mxu0 }
 0x171   : > { %10567 = vst [vmem:[#allocation17_spill] sm:$0xff] %v8090_v43  ;;  %v8093_v24 = vadd.f32 %v7988_v17, %v1168_v54  ;;  %v2009_v53 = vrot.slane %v10569_v61, 5  ;;  %v2011_v36 = vrot.slane %v10570_v12, 4  ;;  %v10571_v43 = vshll.u32 %v7432_v51, 16 }
 0x172   : > { %v8095_v48 = vpop.f32.mrf.mxu1  ;;  %v1170_v0 = vpop.f32.mrf.mxu0  ;;  %v2007_v17 = vsel %vm1975_vm2, %v2003_v2, %v2006_v47  ;;  %v10574_v12 = vshrl.u32 %v7454_v4, 16 }
 0x173   : > { %v2012_v52 = vrot.slane %v10571_v43, 5  ;;  %v2010_v51 = vor.u32 %v2009_v53, %v2008_v25  ;;  %v10572_v53 = vshrl.u32 %v7451_v3, 16 }
 0x174   : > { %v8105_v15 = vpop.f32.mrf.mxu1  ;;  %v1173_v5 = vpop.f32.mrf.mxu0  ;;  %6397 = vmatmul.mubr.bf16.gmra.mxu0 %v7681_v42 }
 0x175   : > { %v8110_v27 = vadd.f32 %v7997_v31, %v1173_v5  ;;  %6416 = vmatprep.mubr.bf16.mxu0 %v8025_v1  ;;  %v2013_v43 = vor.u32 %v2012_v52, %v2011_v36  ;;  %v2015_v52 = vrot.slane %v10572_v53, 4  ;;  %v10573_v36 = vshll.u32 %v7451_v3, 16 }
 0x176   : > { %v8113_v50 = vpop.f32.mrf.mxu1  ;;  %2359 = vmatmul.mubr.bf16.gmra.mxu1 %v1993_v21  ;;  %v1175_v61 = vpop.f32.mrf.mxu0  ;;  %v10575_v5 = vshll.u32 %v7454_v4, 16 }
 0x177   : > { %2366 = vmatprep.mubr.bf16.mxu1 %v2007_v17  ;;  %v8123_v1 = vsel %vm1975_vm2, %v2010_v51, %v2013_v43  ;;  %v2016_v25 = vrot.slane %v10573_v36, 5 }
 0x178   : > { %v8115_v54 = vpop.f32.mrf.mxu1  ;;  %v1176_v42 = vpop.f32.mrf.mxu0  ;;  %v2019_v9 = vrot.slane %v10575_v5, 5  ;;  %v10580_v5 = vshrl.u32 %v7464_v7, 16 }
 0x179   : > { %v8118_v2 = vadd.f32 %v8012_v49, %v1176_v42  ;;  %v2018_v49 = vrot.slane %v10574_v12, 4  ;;  %v2017_v42 = vor.u32 %v2016_v25, %v2015_v52  ;;  %v10579_v12 = vshll.u32 %v7461_v6, 16 }
 0x17a   : > { %v8120_v47 = vpop.f32.mrf.mxu1  ;;  %v1178_v31 = vpop.f32.mrf.mxu0 }
 0x17b   : > { %v2020_v31 = vor.u32 %v2019_v9, %v2018_v49 }
 0x17c   : > { %v8125_v0 = vpop.f32.mrf.mxu1  ;;  %v1181_v38 = vpop.f32.mrf.mxu0  ;;  %6417 = vmatmul.mubr.bf16.vlgmr.msra.gmra.mxu0 %v1993_v21 }
 0x17d   : > { %v8136_v61 = vadd.f32 %v7992_v63, %v1181_v38  ;;  %6420 = vmatprep.mubr.bf16.mxu0 %v2000_v19  ;;  %v10578_v63 = vshrl.u32 %v7461_v6, 16 }
 0x17e   : > { %v8138_v51 = vpop.f32.mrf.mxu1  ;;  %2367 = vmatmul.mubr.bf16.gmra.mxu1 %v2000_v19  ;;  %v1183_v21 = vpop.f32.mrf.mxu0  ;;  %v2023_v19 = vrot.slane %v10579_v12, 5 }
 0x17f   : > { %10576 = vst [vmem:[#allocation18_spill] sm:$0xff] %v8138_v51  ;;  %2374 = vmatprep.mubr.bf16.mxu1 %v8123_v1  ;;  %v2022_v38 = vrot.slane %v10578_v63, 4  ;;  %v2025_v21 = vrot.slane %v10580_v5, 4  ;;  %v10581_v51 = vshll.u32 %v7464_v7, 16  ;;  %v10583_v7 = vshrl.u32 %v7478_v23, 16  ;;  %v6835_v63 = vld [vmem:[#allocation7 + $0x170] sm:$0xff]  }
 0x180   : > { %v8141_v43 = vpop.f32.mrf.mxu1  ;;  %v1184_v3 = vpop.f32.mrf.mxu0  ;;  %v10586_v5 = vshrl.u32 %v7483_v26, 16  ;;  %6454 = vmatprep.subr.bf16.mxu1 %v6835_v63 }
 0x181   : > { %10577 = vst [vmem:[#allocation21_spill] sm:$0xff] %v8141_v43  ;;  %v8144_v53 = vadd.f32 %v7999_v62, %v1184_v3  ;;  %v2026_v43 = vrot.slane %v10581_v51, 5  ;;  %v8159_v62 = vsel %vm1975_vm2, %v2017_v42, %v2020_v31  ;;  %v2024_v3 = vor.u32 %v2023_v19, %v2022_v38  ;;  %6455 = vmatpush3.bf16.msra.mxu1 %v6835_v63 }
 0x182   : > { %v8146_v4 = vpop.f32.mrf.mxu1  ;;  %v1186_v36 = vpop.f32.mrf.mxu0  ;;  %v2029_v51 = vrot.slane %v10583_v7, 4 }
 0x183   : > { %v2027_v36 = vor.u32 %v2026_v43, %v2025_v21  ;;  %v10588_v43 = vshrl.u32 %v7489_v33, 16  ;;  %v10589_v21 = vshll.u32 %v7489_v33, 16 }
 0x184   : > { %v8156_v52 = vpop.f32.mrf.mxu1  ;;  %v1189_v25 = vpop.f32.mrf.mxu0  ;;  %6421 = vmatmul.mubr.bf16.gmra.mxu0 %v2007_v17 }
 0x185   : > { %v8162_v49 = vadd.f32 %v8020_v46, %v1189_v25  ;;  %6424 = vmatprep.mubr.bf16.mxu0 %v8123_v1  ;;  %v10585_v46 = vshll.u32 %v7478_v23, 16  ;;  %v2032_v25 = vrot.slane %v10586_v5, 4  ;;  %v2036_v38 = vrot.slane %v10588_v43, 4 }
 0x186   : > { %v8165_v6 = vpop.f32.mrf.mxu1  ;;  %2375 = vmatmul.mubr.bf16.gmra.mxu1 %v2007_v17  ;;  %v1191_v9 = vpop.f32.mrf.mxu0  ;;  %v10587_v17 = vshll.u32 %v7483_v26, 16  ;;  %v2037_v7 = vrot.slane %v10589_v21, 5  ;;  %v10591_v23 = vshll.u32 %v7496_v37, 16 }
 0x187   : > { %10582 = vst [vmem:[#allocation22_spill] sm:$0xff] %v8165_v6  ;;  %2382 = vmatprep.mubr.bf16.mxu1 %v8159_v62  ;;  %v2030_v31 = vrot.slane %v10585_v46, 5  ;;  %v10590_v6 = vshrl.u32 %v7496_v37, 16 }
 0x188   : > { %v8170_v12 = vpop.f32.mrf.mxu1  ;;  %v1192_v42 = vpop.f32.mrf.mxu0  ;;  %v2033_v9 = vrot.slane %v10587_v17, 5  ;;  %v2040_v46 = vrot.slane %v10591_v23, 5  ;;  %v8192_v17 = vsel %vm1975_vm2, %v2024_v3, %v2027_v36  ;;  %v10592_v36 = vshrl.u32 %v7515_v56, 16 }
 0x189   : > { %10584 = vst [vmem:[#allocation23_spill] sm:$0xff] %v8170_v12  ;;  %v8181_v19 = vadd.f32 %v8027_v20, %v1192_v42  ;;  %v2039_v12 = vrot.slane %v10590_v6, 4  ;;  %v2031_v33 = vor.u32 %v2030_v31, %v2029_v51  ;;  %v2038_v6 = vor.u32 %v2037_v7, %v2036_v38 }
 0x18a   : > { %v8189_v5 = vpop.f32.mrf.mxu1  ;;  %v1194_v26 = vpop.f32.mrf.mxu0  ;;  %v2034_v37 = vor.u32 %v2033_v9, %v2032_v25  ;;  %v2043_v63 = vrot.slane %v10592_v36, 4  ;;  %v10594_v31 = vshrl.u32 %v7518_v57, 16  ;;  %v10597_v36 = vshll.u32 %v7525_v59, 16 }
 0x18b   : > { %v2041_v21 = vor.u32 %v2040_v46, %v2039_v12  ;;  %v10595_v12 = vshll.u32 %v7518_v57, 16 }
 0x18c   : > { %v8194_v43 = vpop.f32.mrf.mxu1  ;;  %v1197_v20 = vpop.f32.mrf.mxu0  ;;  %6425 = vmatmul.mubr.bf16.gmra.mxu0 %v8159_v62  ;;  %v2046_v25 = vrot.slane %v10594_v31, 4  ;;  %v8218_v46 = vsel %vm1975_vm2, %v2031_v33, %v2034_v37  ;;  %v2051_v57 = vrot.slane %v10597_v36, 5 }
 0x18d   : > { %v8198_v42 = vadd.f32 %v8016_v18, %v1197_v20  ;;  %6428 = vmatprep.mubr.bf16.mxu0 %v8192_v17  ;;  %v10593_v18 = vshll.u32 %v7515_v56, 16  ;;  %v2047_v9 = vrot.slane %v10595_v12, 5 }
 0x18e   : > { %v1655_v23 = vpop.f32.mrf.mxu1  ;;  %2383 = vmatmul.mubr.bf16.gmra.mxu1 %v8123_v1  ;;  %v1199_v3 = vpop.f32.mrf.mxu0 }
 0x18f   : > { %v8205_v26 = vadd.f32 %v1655_v23, %v8059_v30  ;;  %2390 = vmatprep.mubr.bf16.mxu1 %v8192_v17  ;;  %v2044_v51 = vrot.slane %v10593_v18, 5  ;;  %v8221_v30 = vsel %vm1975_vm2, %v2038_v6, %v2041_v21  ;;  %v10596_v23 = vshrl.u32 %v7525_v59, 16  ;;  %v6837_v59 = vld [vmem:[#allocation7 + $0xf8] sm:$0xff]  }
 0x190   : > { %v1657_v38 = vpop.f32.mrf.mxu1  ;;  %v1200_v1 = vpop.f32.mrf.mxu0  ;;  %v10598_v18 = vshrl.u32 %v7528_v60, 16  ;;  %v2048_v6 = vor.u32 %v2047_v9, %v2046_v25 }
 0x191   : > { %v8215_v7 = vadd.f32 %v8022_v8, %v1200_v1  ;;  %v2050_v3 = vrot.slane %v10596_v23, 4  ;;  %v10599_v8 = vshll.u32 %v7528_v60, 16  ;;  %v2045_v37 = vor.u32 %v2044_v51, %v2043_v63  ;;  %v6836_v1 = vld [vmem:[#allocation7 + $0x138] sm:$0xff]  }
 0x192   : > { %v1658_v20 = vpop.f32.mrf.mxu1  ;;  %v1202_v56 = vpop.f32.mrf.mxu0  ;;  %v2053_v31 = vrot.slane %v10598_v18, 4  ;;  %5864 = vmatprep.subr.bf16.mxu0 %v6836_v1  ;;  %v10606_v1 = vshrl.u32 %v7560_v40, 16 }
 0x193   : > { %v2054_v12 = vrot.slane %v10599_v8, 5  ;;  %v8232_v33 = vadd.f32 %v1658_v20, %v8067_v45  ;;  %v2052_v36 = vor.u32 %v2051_v57, %v2050_v3  ;;  %v8245_v51 = vsel %vm1975_vm2, %v2045_v37, %v2048_v6  ;;  %5865 = vmatpush3.bf16.msra.mxu0 %v6837_v59  ;;  %v6838_v37 = vld [vmem:[#allocation7 + $0x168] sm:$0xff]  }
 0x194   : > { %v1660_v21 = vpop.f32.mrf.mxu1  ;;  %v1205_v38 = vpop.f32.mrf.mxu0  ;;  %6429 = vmatmul.mubr.bf16.gmra.mxu0 %v8218_v46  ;;  %v10602_v3 = vshrl.u32 %v7549_v35, 16  ;;  %v10604_v8 = vshrl.u32 %v7557_v39, 16  ;;  %v10607_v59 = vshll.u32 %v7560_v40, 16  ;;  %6456 = vmatprep.subr.bf16.mxu1 %v6838_v37 }
 0x195   : > { %v8236_v56 = vadd.f32 %v8043_v44, %v1205_v38  ;;  %6432 = vmatprep.mubr.bf16.mxu0 %v8221_v30  ;;  %v2055_v45 = vor.u32 %v2054_v12, %v2053_v31  ;;  %v10600_v44 = vshrl.u32 %v7546_v29, 16  ;;  %v10605_v21 = vshll.u32 %v7557_v39, 16  ;;  %6457 = vmatpush3.bf16.msra.mxu1 %v6838_v37 }
 0x196   : > { %v1663_v23 = vpop.f32.mrf.mxu1  ;;  %2391 = vmatmul.mubr.bf16.gmra.mxu1 %v8159_v62  ;;  %v1207_v60 = vpop.f32.mrf.mxu0  ;;  %v10601_v62 = vshll.u32 %v7546_v29, 16  ;;  %v2060_v57 = vrot.slane %v10602_v3, 4  ;;  %v2064_v12 = vrot.slane %v10604_v8, 4  ;;  %v2067_v29 = vrot.slane %v10606_v1, 4  ;;  %v6840_v8 = vld [vmem:[#allocation7 + $0xf0] sm:$0xff]  }
 0x197   : > { %v8241_v63 = vadd.f32 %v1663_v23, %v8084_v34  ;;  %2398 = vmatprep.mubr.bf16.mxu1 %v8218_v46  ;;  %v2057_v25 = vrot.slane %v10600_v44, 4  ;;  %v10603_v34 = vshll.u32 %v7549_v35, 16  ;;  %v2065_v38 = vrot.slane %v10605_v21, 5 }
 0x198   : > { %v1665_v9 = vpop.f32.mrf.mxu1  ;;  %v1208_v20 = vpop.f32.mrf.mxu0  ;;  %v2058_v18 = vrot.slane %v10601_v62, 5  ;;  %v2068_v23 = vrot.slane %v10607_v59, 5  ;;  %v8267_v35 = vsel %vm1975_vm2, %v2052_v36, %v2055_v45  ;;  %v6839_v36 = vld [vmem:[#allocation7 + $0x130] sm:$0xff]  }
 0x199   : > { %v2061_v31 = vrot.slane %v10603_v34, 5  ;;  %v8258_v6 = vadd.f32 %v8055_v16, %v1208_v20  ;;  %v2066_v3 = vor.u32 %v2065_v38, %v2064_v12  ;;  %5866 = vmatprep.subr.bf16.mxu0 %v6839_v36  ;;  %v10610_v12 = vshrl.u32 %v7581_v11, 16 }
 0x19a   : > { %v1666_v60 = vpop.f32.mrf.mxu1  ;;  %v1210_v44 = vpop.f32.mrf.mxu0  ;;  %v2059_v39 = vor.u32 %v2058_v18, %v2057_v25  ;;  %v2069_v34 = vor.u32 %v2068_v23, %v2067_v29  ;;  %v10608_v18 = vshrl.u32 %v7578_v10, 16  ;;  %5867 = vmatpush3.bf16.msra.mxu0 %v6840_v8 }
 0x19b   : > { %v8270_v9 = vadd.f32 %v1666_v60, %v8093_v24  ;;  %v2062_v40 = vor.u32 %v2061_v31, %v2060_v57  ;;  %v10609_v57 = vshll.u32 %v7578_v10, 16  ;;  %v2074_v38 = vrot.slane %v10610_v12, 4 }
 0x19c   : > { %v1668_v16 = vpop.f32.mrf.mxu1  ;;  %v1213_v20 = vpop.f32.mrf.mxu0  ;;  %6433 = vmatmul.mubr.bf16.gmra.mxu0 %v8245_v51  ;;  %v2071_v21 = vrot.slane %v10608_v18, 4  ;;  %v8297_v59 = vsel %vm1975_vm2, %v2066_v3, %v2069_v34  ;;  %v10612_v10 = vshrl.u32 %v7589_v13, 16  ;;  %v6841_v18 = vld [vmem:[#allocation7 + $0x128] sm:$0xff]   ;;  %v10616_v12 = vshrl.u32 %v10537_v41, 16 }
 0x19d   : > { %v8274_v62 = vadd.f32 %v8039_v58, %v1213_v20  ;;  %6436 = vmatprep.mubr.bf16.mxu0 %v8267_v35  ;;  %v2072_v31 = vrot.slane %v10609_v57, 5  ;;  %v8294_v29 = vsel %vm1975_vm2, %v2059_v39, %v2062_v40  ;;  %v10613_v16 = vshll.u32 %v7589_v13, 16  ;;  %v6842_v57 = vld [vmem:[#allocation7 + $0xe8] sm:$0xff]   ;;  %5868 = vmatprep.subr.bf16.mxu0 %v6841_v18 }
 0x19e   : > { %v1671_v45 = vpop.f32.mrf.mxu1  ;;  %2399 = vmatmul.mubr.bf16.gmra.mxu1 %v8192_v17  ;;  %v1215_v24 = vpop.f32.mrf.mxu0  ;;  %v10611_v17 = vshll.u32 %v7581_v11, 16  ;;  %v2078_v44 = vrot.slane %v10612_v10, 4  ;;  %v10614_v11 = vshrl.u32 %v7592_v14, 16  ;;  %5869 = vmatpush3.bf16.msra.mxu0 %v6842_v57  ;;  %v10620_v57 = vld [vmem:[#allocation29_spill] sm:$0xff] }
 0x19f   : > { %v8279_v37 = vadd.f32 %v1671_v45, %v8110_v27  ;;  %2406 = vmatprep.mubr.bf16.mxu1 %v8221_v30  ;;  %v2079_v20 = vrot.slane %v10613_v16, 5  ;;  %v2073_v34 = vor.u32 %v2072_v31, %v2071_v21 }
 0x1a0   : > { %v1673_v25 = vpop.f32.mrf.mxu1  ;;  %v1216_v58 = vpop.f32.mrf.mxu0  ;;  %v2075_v1 = vrot.slane %v10611_v17, 5  ;;  %v2081_v36 = vrot.slane %v10614_v11, 4  ;;  %v10617_v17 = vshll.u32 %v10537_v41, 16  ;;  %v6843_v11 = vld [vmem:[#allocation7 + $0x160] sm:$0xff]  }
 0x1a1   : > { %v8291_v27 = vadd.f32 %v8045_v28, %v1216_v58  ;;  %v10615_v28 = vshll.u32 %v7592_v14, 16  ;;  %v2080_v14 = vor.u32 %v2079_v20, %v2078_v44  ;;  %6458 = vmatprep.subr.bf16.mxu1 %v6843_v11 }
 0x1a2   : > { %v1674_v23 = vpop.f32.mrf.mxu1  ;;  %v1218_v60 = vpop.f32.mrf.mxu0  ;;  %v2076_v24 = vor.u32 %v2075_v1, %v2074_v38  ;;  %v2085_v38 = vrot.slane %v10616_v12, 4  ;;  %v2086_v1 = vrot.slane %v10617_v17, 5  ;;  %6459 = vmatpush3.bf16.msra.mxu1 %v6843_v11 }
 0x1a3   : > { %v2082_v45 = vrot.slane %v10615_v28, 5  ;;  %v8308_v39 = vadd.f32 %v1674_v23, %v8118_v2  ;;  %v10619_v60 = vshll.u32 %v10538_v55, 16 }
 0x1a4   : > { %v1676_v40 = vpop.f32.mrf.mxu1  ;;  %v1221_v3 = vpop.f32.mrf.mxu0  ;;  %6437 = vmatmul.mubr.bf16.gmra.mxu0 %v8294_v29  ;;  %v2087_v41 = vor.u32 %v2086_v1, %v2085_v38  ;;  %v6847_v1 = vld [vmem:[#allocation7 + $0xd8] sm:$0xff]  }
 0x1a5   : > { %v8312_v8 = vadd.f32 %v8065_v32, %v1221_v3  ;;  %6440 = vmatprep.mubr.bf16.mxu0 %v8297_v59  ;;  %v2083_v58 = vor.u32 %v2082_v45, %v2081_v36  ;;  %v8321_v32 = vsel %vm1975_vm2, %v2073_v34, %v2076_v24  ;;  %v2089_v10 = vrot.slane %v10619_v60, 5 }
 0x1a6   : > { %v1679_v13 = vpop.f32.mrf.mxu1  ;;  %2407 = vmatmul.mubr.bf16.gmra.mxu1 %v8218_v46  ;;  %v1223_v25 = vpop.f32.mrf.mxu0 }
 0x1a7   : > { %v8317_v2 = vadd.f32 %v1679_v13, %v8136_v61  ;;  %2414 = vmatprep.mubr.bf16.mxu1 %v8245_v51  ;;  %v10618_v61 = vshrl.u32 %v10538_v55, 16  ;;  %v8335_v20 = vsel %vm1975_vm2, %v2080_v14, %v2083_v58  ;;  %v6845_v13 = vld [vmem:[#allocation7 + $0xe0] sm:$0xff]  }
 0x1a8   : > { %v1681_v21 = vpop.f32.mrf.mxu1  ;;  %v1224_v31 = vpop.f32.mrf.mxu0 }
 0x1a9   : > { %v8326_v46 = vadd.f32 %v8072_v22, %v1224_v31  ;;  %v2088_v23 = vrot.slane %v10618_v61, 4 }
 0x1aa   : > { %v1682_v44 = vpop.f32.mrf.mxu1  ;;  %v1226_v16 = vpop.f32.mrf.mxu0 }
 0x1ab   : > { %v8338_v36 = vadd.f32 %v1682_v44, %v8144_v53  ;;  %v2090_v55 = vor.u32 %v2089_v10, %v2088_v23  ;;  %v6844_v53 = vld [vmem:[#allocation7 + $0x120] sm:$0xff]  }
 0x1ac   : > { %v1684_v22 = vpop.f32.mrf.mxu1  ;;  %v8340_v28 = vpop.f32.mrf.mxu0  ;;  %6441 = vmatmul.mubr.bf16.gmra.mxu0 %v8321_v32  ;;  %5870 = vmatprep.subr.bf16.mxu0 %v6844_v53 }
 0x1ad   : > { %6444 = vmatprep.mubr.bf16.mxu0 %v8335_v20  ;;  %v8352_v25 = vsel %vm1975_vm2, %v2087_v41, %v2090_v55  ;;  %5871 = vmatpush3.bf16.msra.mxu0 %v6845_v13  ;;  %v6849_v13 = vld [vmem:[#allocation7 + $0x110] sm:$0xff]  }
 0x1ae   : > { %v1687_v45 = vpop.f32.mrf.mxu1  ;;  %2415 = vmatmul.mubr.bf16.gmra.mxu1 %v8221_v30  ;;  %v1231_v40 = vpop.f32.mrf.mxu0 }
 0x1af   : > { %v8346_v3 = vadd.f32 %v1687_v45, %v8162_v49  ;;  %2422 = vmatprep.mubr.bf16.mxu1 %v8267_v35 }
 0x1b0   : > { %v1689_v34 = vpop.f32.mrf.mxu1  ;;  %v8349_v24 = vpop.f32.mrf.mxu0 }
 0x1b2   : > { %v1690_v14 = vpop.f32.mrf.mxu1  ;;  %v1234_v58 = vpop.f32.mrf.mxu0 }
 0x1b3   : > { %v8355_v30 = vadd.f32 %v1690_v14, %v8181_v19  ;;  %v6846_v19 = vld [vmem:[#allocation7 + $0x118] sm:$0xff]  }
 0x1b4   : > { %v1692_v18 = vpop.f32.mrf.mxu1  ;;  %v8357_v49 = vpop.f32.mrf.mxu0  ;;  %6445 = vmatmul.mubr.bf16.gmra.mxu0 %v8352_v25  ;;  %5872 = vmatprep.subr.bf16.mxu0 %v6846_v19 }
 0x1b5   : > { %6448 = vmatprep.mubr.bf16.mxu0 %v10620_v57  ;;  %5873 = vmatpush3.bf16.msra.mxu0 %v6847_v1  ;;  %v6850_v18 = vld [vmem:[#allocation7 + $0xd0] sm:$0xff]  }
 0x1b6   : > { %v1695_v21 = vpop.f32.mrf.mxu1  ;;  %2423 = vmatmul.mubr.bf16.gmra.mxu1 %v8245_v51  ;;  %v1239_v31 = vpop.f32.mrf.mxu0  ;;  %5874 = vmatprep.subr.bf16.mxu0 %v6849_v13 }
 0x1b7   : > { %v8363_v12 = vadd.f32 %v1695_v21, %v8198_v42  ;;  %2430 = vmatprep.mubr.bf16.mxu1 %v8294_v29  ;;  %v6848_v42 = vld [vmem:[#allocation7 + $0x158] sm:$0xff]  }
 0x1b8   : > { %v1697_v38 = vpop.f32.mrf.mxu1  ;;  %v8366_v17 = vpop.f32.mrf.mxu0  ;;  %6460 = vmatprep.subr.bf16.mxu1 %v6848_v42 }
 0x1b9   : > { %6461 = vmatpush3.bf16.msra.mxu1 %v6848_v42  ;;  %5875 = vmatpush3.bf16.msra.mxu0 %v6850_v18  ;;  %v6851_v38 = vld [vmem:[#allocation7 + $0x108] sm:$0xff]   ;;  %v6854_v42 = vld [vmem:[#allocation7 + $0x100] sm:$0xff]  }
 0x1ba   : > { %v1698_v61 = vpop.f32.mrf.mxu1  ;;  %v1242_v23 = vpop.f32.mrf.mxu0  ;;  %5876 = vmatprep.subr.bf16.mxu0 %v6851_v38 }
 0x1bb   : > { %v8369_v60 = vadd.f32 %v1698_v61, %v8215_v7  ;;  %v6853_v23 = vld [vmem:[#allocation7 + $0x150] sm:$0xff]  }
 0x1bc   : > { %v1700_v10 = vpop.f32.mrf.mxu1  ;;  %v8371_v51 = vpop.f32.mrf.mxu0  ;;  %6449 = vmatmul.mubr.bf16.gmra.mxu0 %v10620_v57  ;;  %6462 = vmatprep.subr.bf16.mxu1 %v6853_v23 }
 0x1bd   : > { %6463 = vmatpush3.bf16.msra.mxu1 %v6853_v23  ;;  %v10623_v23 = vld [vmem:[#allocation17_spill] sm:$0xff] }
 0x1be   : > { %v1703_v44 = vpop.f32.mrf.mxu1  ;;  %2431 = vmatmul.mubr.bf16.gmra.mxu1 %v8267_v35  ;;  %v1247_v16 = vpop.f32.mrf.mxu0 }
 0x1bf   : > { %v8376_v11 = vadd.f32 %v1703_v44, %v8236_v56  ;;  %2438 = vmatprep.mubr.bf16.mxu1 %v8297_v59 }
 0x1c0   : > { %v1705_v7 = vpop.f32.mrf.mxu1  ;;  %v8379_v22 = vpop.f32.mrf.mxu0 }
 0x1c2   : > { %v1706_v41 = vpop.f32.mrf.mxu1  ;;  %v1250_v55 = vpop.f32.mrf.mxu0 }
 0x1c3   : > { %v8382_v45 = vadd.f32 %v1706_v41, %v8258_v6 }
 0x1c4   : > { %v1708_v40 = vpop.f32.mrf.mxu1  ;;  %v8384_v53 = vpop.f32.mrf.mxu0 }
 0x1c6   : > { %v1711_v35 = vpop.f32.mrf.mxu1  ;;  %2439 = vmatmul.mubr.bf16.gmra.mxu1 %v8294_v29  ;;  %v1255_v34 = vpop.f32.mrf.mxu0 }
 0x1c7   : > { %v8388_v56 = vadd.f32 %v1711_v35, %v8274_v62  ;;  %2446 = vmatprep.mubr.bf16.mxu1 %v8321_v32  ;;  %v6852_v62 = vld [vmem:[#allocation7 + $0xc8] sm:$0xff]  }
 0x1c8   : > { %v1713_v14 = vpop.f32.mrf.mxu1  ;;  %v8391_v58 = vpop.f32.mrf.mxu0  ;;  %5877 = vmatpush3.bf16.msra.mxu0 %v6852_v62  ;;  %v6856_v34 = vld [vmem:[#allocation7 + $0x148] sm:$0xff]  }
 0x1c9   : > { %5878 = vmatprep.subr.bf16.mxu0 %v6854_v42  ;;  %6464 = vmatprep.subr.bf16.mxu1 %v6856_v34  ;;  %v1415_v42 = vadd.f32 %v10623_v23, %v8357_v49 }
 0x1ca   : > { %v1714_v6 = vpop.f32.mrf.mxu1  ;;  %v1258_v21 = vpop.f32.mrf.mxu0  ;;  %6465 = vmatpush3.bf16.msra.mxu1 %v6856_v34 }
 0x1cb   : > { %v8394_v31 = vadd.f32 %v1714_v6, %v8291_v27  ;;  %v10622_v21 = vld [vmem:[#allocation27_spill] sm:$0xff] }
 0x1cc   : > { %v1716_v29 = vpop.f32.mrf.mxu1  ;;  %v8396_v19 = vpop.f32.mrf.mxu0  ;;  %v1410_v38 = vadd.f32 %v10622_v21, %v8349_v24 }
 0x1ce   : > { %v1719_v1 = vpop.f32.mrf.mxu1  ;;  %2447 = vmatmul.mubr.bf16.gmra.mxu1 %v8297_v59  ;;  %v1263_v61 = vpop.f32.mrf.mxu0  ;;  %v6855_v59 = vld [vmem:[#allocation7 + $0xc0] sm:$0xff]  }
 0x1cf   : > { %v8400_v10 = vadd.f32 %v1719_v1, %v8312_v8  ;;  %2454 = vmatprep.mubr.bf16.mxu1 %v8335_v20  ;;  %v10621_v8 = vld [vmem:[#allocation26_spill] sm:$0xff]  ;;  %5879 = vmatpush3.bf16.msra.mxu0 %v6855_v59 }
 0x1d0   : > { %v1721_v27 = vpop.f32.mrf.mxu1  ;;  %v8403_v44 = vpop.f32.mrf.mxu0  ;;  %v1407_v35 = vadd.f32 %v10621_v8, %v8340_v28 }
 0x1d2   : > { %v1722_v16 = vpop.f32.mrf.mxu1  ;;  %v1266_v7 = vpop.f32.mrf.mxu0 }
 0x1d3   : > { %v8406_v41 = vadd.f32 %v1722_v16, %v8326_v46 }
 0x1d4   : > { %v1724_v55 = vpop.f32.mrf.mxu1  ;;  %v8408_v40 = vpop.f32.mrf.mxu0 }
 0x1d5   : > { %v1418_v55 = vadd.f32 %v8105_v15, %v8366_v17 }
 0x1d6   : > { %v1727_v13 = vpop.f32.mrf.mxu1  ;;  %2455 = vmatmul.mubr.bf16.gmra.mxu1 %v8321_v32  ;;  %v1271_v14 = vpop.f32.mrf.mxu0  ;;  %v6857_v32 = vld [vmem:[#allocation7 + $0x140] sm:$0xff]  }
 0x1d7   : > { %v8413_v18 = vadd.f32 %v1727_v13, %v1407_v35  ;;  %2462 = vmatprep.mubr.bf16.mxu1 %v8352_v25  ;;  %6466 = vmatprep.subr.bf16.mxu1 %v6857_v32 }
 0x1d8   : > { %v1729_v46 = vpop.f32.mrf.mxu1  ;;  %v8416_v6 = vpop.f32.mrf.mxu0  ;;  %6467 = vmatpush3.bf16.msra.mxu1 %v6857_v32 }
 0x1d9   : > { %v8440_v46 = vld [vmem:[#allocation7 + $0xb8] sm:$0xff]  }
 0x1da   : > { %v1730_v29 = vpop.f32.mrf.mxu1  ;;  %v1274_v28 = vpop.f32.mrf.mxu0  ;;  %6500 = vmatprep.subr.bf16.mxu0 %v8440_v46 }
 0x1db   : > { %v8420_v62 = vadd.f32 %v1730_v29, %v1410_v38  ;;  %v1426_v29 = vadd.f32 %v8095_v48, %v8379_v22  ;;  %v1434_v48 = vadd.f32 %v8125_v0, %v8391_v58 }
 0x1dc   : > { %v1732_v1 = vpop.f32.mrf.mxu1  ;;  %v8422_v61 = vpop.f32.mrf.mxu0 }
 0x1de   : > { %v1735_v27 = vpop.f32.mrf.mxu1  ;;  %2463 = vmatmul.mubr.bf16.gmra.mxu1 %v8335_v20  ;;  %v1279_v16 = vpop.f32.mrf.mxu0  ;;  %v10624_v20 = vld [vmem:[#allocation28_spill] sm:$0xff] }
 0x1df   : > { %v8427_v7 = vadd.f32 %v1735_v27, %v1415_v42  ;;  %2470 = vmatprep.mubr.bf16.mxu1 %v10620_v57  ;;  %v1423_v14 = vadd.f32 %v10624_v20, %v8371_v51 }
 0x1e0   : > { %v1737_v24 = vpop.f32.mrf.mxu1  ;;  %v8430_v59 = vpop.f32.mrf.mxu0 }
 0x1e2   : > { %v1738_v8 = vpop.f32.mrf.mxu1  ;;  %v1282_v35 = vpop.f32.mrf.mxu0 }
 0x1e3   : > { %v8434_v34 = vadd.f32 %v1738_v8, %v1418_v55 }
 0x1e4   : > { %v1740_v49 = vpop.f32.mrf.mxu1  ;;  %v8436_v13 = vpop.f32.mrf.mxu0 }
 0x1e6   : > { %v1743_v57 = vpop.f32.mrf.mxu1  ;;  %2471 = vmatmul.mubr.bf16.gmra.mxu1 %v8352_v25  ;;  %v1287_v21 = vpop.f32.mrf.mxu0  ;;  %v1431_v25 = vadd.f32 %v8115_v54, %v8384_v53 }
 0x1e7   : > { %v8443_v38 = vadd.f32 %v1743_v57, %v1423_v14  ;;  %v1439_v14 = vadd.f32 %v8113_v50, %v8396_v19 }
 0x1e8   : > { %v1745_v15 = vpop.f32.mrf.mxu1  ;;  %v8446_v17 = vpop.f32.mrf.mxu0 }
 0x1ea   : > { %v1746_v28 = vpop.f32.mrf.mxu1  ;;  %v1290_v1 = vpop.f32.mrf.mxu0 }
 0x1eb   : > { %v8450_v32 = vadd.f32 %v1746_v28, %v1426_v29  ;;  %v1442_v29 = vadd.f32 %v8120_v47, %v8403_v44 }
 0x1ec   : > { %v1748_v51 = vpop.f32.mrf.mxu1  ;;  %v8452_v23 = vpop.f32.mrf.mxu0 }
 0x1ee   : > { %v1751_v42 = vpop.f32.mrf.mxu1  ;;  %v1295_v27 = vpop.f32.mrf.mxu0 }
 0x1ef   : > { %v8456_v16 = vadd.f32 %v1751_v42, %v1431_v25  ;;  %v10625_v25 = vld [vmem:[#allocation21_spill] sm:$0xff] }
 0x1f0   : > { %v1753_v24 = vpop.f32.mrf.mxu1  ;;  %v8458_v55 = vpop.f32.mrf.mxu0  ;;  %v1447_v42 = vadd.f32 %v10625_v25, %v8408_v40 }
 0x1f2   : > { %v1754_v22 = vpop.f32.mrf.mxu1  ;;  %v1298_v8 = vpop.f32.mrf.mxu0 }
 0x1f3   : > { %v8462_v35 = vadd.f32 %v1754_v22, %v1434_v48  ;;  %v1450_v22 = vadd.f32 %v8156_v52, %v8416_v6 }
 0x1f4   : > { %v1756_v49 = vpop.f32.mrf.mxu1  ;;  %v6366_v20 = vpop.f32.mrf.mxu0 }
 0x1f5   : > { %v8467_v54 = vadd.f32 %v6366_v20, %v8241_v63 }
 0x1f6   : > { %v1759_v53 = vpop.f32.mrf.mxu1  ;;  %v1832_v57 = vpop.f32.mrf.mxu0 }
 0x1f7   : > { %v8469_v21 = vadd.f32 %v1759_v53, %v1439_v14  ;;  %v8472_v15 = vadd.f32 %v1832_v57, %v8205_v26  ;;  %v10626_v53 = vld [vmem:[#allocation18_spill] sm:$0xff] }
 0x1f8   : > { %v1761_v0 = vpop.f32.mrf.mxu1  ;;  %v6367_v58 = vpop.f32.mrf.mxu0  ;;  %v1455_v57 = vadd.f32 %v10626_v53, %v8422_v61 }
 0x1f9   : > { %v8477_v28 = vadd.f32 %v6367_v58, %v8270_v9 }
 0x1fa   : > { %v1762_v1 = vpop.f32.mrf.mxu1  ;;  %v8479_v50 = vpop.f32.mrf.mxu0 }
 0x1fb   : > { %v8481_v63 = vadd.f32 %v1762_v1, %v1442_v29  ;;  %v1458_v1 = vadd.f32 %v8146_v4, %v8430_v59 }
 0x1fc   : > { %v1764_v19 = vpop.f32.mrf.mxu1  ;;  %v6370_v51 = vpop.f32.mrf.mxu0 }
 0x1fd   : > { %v8486_v26 = vadd.f32 %v6370_v51, %v8317_v2 }
 0x1fe   : > { %v1767_v27 = vpop.f32.mrf.mxu1  ;;  %v1848_v24 = vpop.f32.mrf.mxu0 }
 0x1ff   : > { %v8488_v48 = vadd.f32 %v1767_v27, %v1447_v42  ;;  %v8491_v47 = vadd.f32 %v1848_v24, %v8279_v37  ;;  %v10627_v27 = vld [vmem:[#allocation23_spill] sm:$0xff] }
 0x200   : > { %v1769_v9 = vpop.f32.mrf.mxu1  ;;  %v6371_v44 = vpop.f32.mrf.mxu0  ;;  %v1463_v24 = vadd.f32 %v10627_v27, %v8436_v13 }
 0x201   : > { %v8496_v8 = vadd.f32 %v6371_v44, %v8338_v36  ;;  %v6861_v9 = vld [vmem:[#allocation7 + $0x78] sm:$0xff]  }
 0x202   : > { %v1770_v49 = vpop.f32.mrf.mxu1  ;;  %v8498_v40 = vpop.f32.mrf.mxu0  ;;  %6000 = vmatprep.subr.bf16.mxu1 %v6861_v9 }
 0x203   : > { %v8500_v2 = vadd.f32 %v1770_v49, %v1450_v22 }
 0x204   : > { %v1772_v20 = vpop.f32.mrf.mxu1  ;;  %v6374_v14 = vpop.f32.mrf.mxu0 }
 0x205   : > { %v8505_v37 = vadd.f32 %v6374_v14, %v8363_v12  ;;  %v1466_v20 = vadd.f32 %v8194_v43, %v8446_v17 }
 0x206   : > { %v1775_v0 = vpop.f32.mrf.mxu1  ;;  %v1864_v58 = vpop.f32.mrf.mxu0 }
 0x207   : > { %v8507_v29 = vadd.f32 %v1775_v0, %v1455_v57  ;;  %v8510_v52 = vadd.f32 %v1864_v58, %v8346_v3  ;;  %v10628_v58 = vld [vmem:[#allocation22_spill] sm:$0xff] }
 0x208   : > { %v1777_v36 = vpop.f32.mrf.mxu1  ;;  %v6375_v6 = vpop.f32.mrf.mxu0 }
 0x209   : > { %v8515_v19 = vadd.f32 %v6375_v6, %v8369_v60 }
 0x20a   : > { %v1778_v51 = vpop.f32.mrf.mxu1  ;;  %v8517_v61 = vpop.f32.mrf.mxu0 }
 0x20b   : > { %v8519_v12 = vadd.f32 %v1778_v51, %v1458_v1 }
 0x20c   : > { %v1780_v25 = vpop.f32.mrf.mxu1  ;;  %v6378_v42 = vpop.f32.mrf.mxu0 }
 0x20d   : > { %v8524_v3 = vadd.f32 %v6378_v42, %v8388_v56  ;;  %v1474_v25 = vadd.f32 %v8189_v5, %v8458_v55 }
 0x20e   : > { %v1783_v44 = vpop.f32.mrf.mxu1  ;;  %v1880_v22 = vpop.f32.mrf.mxu0 }
 0x20f   : > { %v8526_v4 = vadd.f32 %v1783_v44, %v1463_v24  ;;  %v8529_v60 = vadd.f32 %v1880_v22, %v8376_v11  ;;  %v1471_v11 = vadd.f32 %v10628_v58, %v8452_v23 }
 0x210   : > { %v1785_v59 = vpop.f32.mrf.mxu1  ;;  %v6379_v49 = vpop.f32.mrf.mxu0 }
 0x211   : > { %v8534_v14 = vadd.f32 %v6379_v49, %v8394_v31 }
 0x212   : > { %v1786_v13 = vpop.f32.mrf.mxu1  ;;  %v8536_v56 = vpop.f32.mrf.mxu0 }
 0x213   : > { %v8538_v53 = vadd.f32 %v1786_v13, %v1466_v20 }
 0x214   : > { %v1788_v57 = vpop.f32.mrf.mxu1  ;;  %v6382_v0 = vpop.f32.mrf.mxu0 }
 0x215   : > { %v8543_v36 = vadd.f32 %v6382_v0, %v8413_v18 }
 0x216   : > { %v1791_v6 = vpop.f32.mrf.mxu1  ;;  %v1896_v1 = vpop.f32.mrf.mxu0 }
 0x217   : > { %v1792_v51 = vadd.f32 %v1791_v6, %v1471_v11  ;;  %v8546_v43 = vadd.f32 %v1896_v1, %v8400_v10 }
 0x218   : > { %v1793_v31 = vpop.f32.mrf.mxu1  ;;  %v6383_v17 = vpop.f32.mrf.mxu0 }
 0x219   : > { %v8551_v42 = vadd.f32 %v6383_v17, %v8420_v62 }
 0x21a   : > { %v1794_v27 = vpop.f32.mrf.mxu1  ;;  %v8553_v24 = vpop.f32.mrf.mxu0 }
 0x21b   : > { %v1795_v23 = vadd.f32 %v1794_v27, %v1474_v25 }
 0x21c   : > { %v1796_v18 = vpop.f32.mrf.mxu1  ;;  %v6386_v9 = vpop.f32.mrf.mxu0 }
 0x21d   : > { %v8556_v44 = vadd.f32 %v6386_v9, %v8443_v38 }
 0x21e   : > { %v2336_v22 = vpop.f32.mrf.mxu1  ;;  %v1912_v10 = vpop.f32.mrf.mxu0 }
 0x21f   : > { %v8559_v59 = vadd.f32 %v1912_v10, %v8427_v7 }
 0x220   : > { %v2338_v49 = vpop.f32.mrf.mxu1  ;;  %v6387_v20 = vpop.f32.mrf.mxu0 }
 0x221   : > { %v8562_v5 = vadd.f32 %v6387_v20, %v8450_v32 }
 0x222   : > { %v2339_v62 = vpop.f32.mrf.mxu1  ;;  %v8564_v55 = vpop.f32.mrf.mxu0 }
 0x224   : > { %v2341_v13 = vpop.f32.mrf.mxu1  ;;  %v6390_v57 = vpop.f32.mrf.mxu0 }
 0x225   : > { %v8567_v0 = vadd.f32 %v6390_v57, %v8469_v21 }
 0x226   : > { %v2344_v38 = vpop.f32.mrf.mxu1  ;;  %v1928_v58 = vpop.f32.mrf.mxu0 }
 0x227   : > { %v8570_v11 = vadd.f32 %v1928_v58, %v8456_v16 }
 0x228   : > { %v2346_v7 = vpop.f32.mrf.mxu1  ;;  %v6391_v6 = vpop.f32.mrf.mxu0 }
 0x229   : > { %v8573_v1 = vadd.f32 %v6391_v6, %v8481_v63 }
 0x22a   : > { %v2347_v32 = vpop.f32.mrf.mxu1  ;;  %v8575_v31 = vpop.f32.mrf.mxu0 }
 0x22b   : > { %10629 = vst [vmem:[#allocation24_spill] sm:$0xff] %v8573_v1 }
 0x22c   : > { %v2349_v17 = vpop.f32.mrf.mxu1  ;;  %v6394_v25 = vpop.f32.mrf.mxu0 }
 0x22d   : > { %v8578_v27 = vadd.f32 %v6394_v25, %v8507_v29 }
 0x22e   : > { %v2352_v21 = vpop.f32.mrf.mxu1  ;;  %v1944_v18 = vpop.f32.mrf.mxu0 }
 0x22f   : > { %10630 = vst [vmem:[#allocation25_spill] sm:$0xff] %v8578_v27  ;;  %v8581_v9 = vadd.f32 %v1944_v18, %v8488_v48 }
 0x230   : > { %v2354_v16 = vpop.f32.mrf.mxu1  ;;  %v6395_v10 = vpop.f32.mrf.mxu0 }
 0x231   : > { %10631 = vst [vmem:[#allocation29_spill] sm:$0xff] %v8581_v9  ;;  %v8584_v49 = vadd.f32 %v6395_v10, %v8519_v12 }
 0x232   : > { %v8586_v63 = vpop.f32.mrf.mxu1  ;;  %v8588_v20 = vpop.f32.mrf.mxu0 }
 0x233   : > { %10632 = vst [vmem:[#allocation26_spill] sm:$0xff] %v8584_v49 }
 0x234   : > { %v2357_v13 = vpop.f32.mrf.mxu1  ;;  %v6398_v57 = vpop.f32.mrf.mxu0 }
 0x235   : > { %v8590_v58 = vadd.f32 %v6398_v57, %v1792_v51  ;;  %v8602_v51 = vld [vmem:[%s10308_s2] ss:$0 sm:$0xff] }
 0x236   : > { %v2360_v29 = vpop.f32.mrf.mxu1  ;;  %v1960_v7 = vpop.f32.mrf.mxu0 }
 0x237   : > { %10633 = vst [vmem:[#allocation27_spill] sm:$0xff] %v8590_v58  ;;  %v8593_v6 = vadd.f32 %v1960_v7, %v8526_v4 }
 0x238   : > { %v2362_v48 = vpop.f32.mrf.mxu1  ;;  %v6399_v17 = vpop.f32.mrf.mxu0 }
 0x239   : > { %10634 = vst [vmem:[#allocation17_spill] sm:$0xff] %v8593_v6  ;;  %v8595_v25 = vadd.f32 %v6399_v17, %v1795_v23  ;;  %v8609_v17 = vld [vmem:[%s10309_s3] ss:$0 sm:$0xff]  ;;  %v1836_v6 = vadd.f32 %v8479_v50, %v8232_v33 }
 0x23a   : > { %v2363_v18 = vpop.f32.mrf.mxu1  ;;  %v8597_v12 = vpop.f32.mrf.mxu0 }
 0x23b   : > { %10635 = vst [vmem:[#allocation28_spill] sm:$0xff] %v8595_v25 }
 0x23c   : > { %v2365_v16 = vpop.f32.mrf.mxu1  ;;  %v6418_v10 = vpop.f32.mrf.mxu0 }
 0x23d   : > { %v2522_v49 = vadd.f32 %v6418_v10, %v2344_v38 }
 0x23e   : > { %v2368_v13 = vpop.f32.mrf.mxu1  ;;  %v2513_v57 = vpop.f32.mrf.mxu0 }
 0x23f   : > { %v2658_v4 = vadd.f32 %v2522_v49, %v8467_v54  ;;  %v2514_v7 = vadd.f32 %v2513_v57, %v2336_v22 }
 0x240   : > { %v2370_v48 = vpop.f32.mrf.mxu1  ;;  %v6419_v58 = vpop.f32.mrf.mxu0 }
 0x241   : > { %v2701_v23 = vmul.f32 %v8602_v51, %v2658_v4  ;;  %v2656_v38 = vadd.f32 %v2514_v7, %v8472_v15  ;;  %v2525_v16 = vadd.f32 %v6419_v58, %v2347_v32 }
 0x242   : > { %v8612_v10 = vpop.f32.mrf.mxu1  ;;  %v2516_v25 = vpop.f32.mrf.mxu0 }
 0x243   : > { %v2699_v54 = vmul.f32 %v8602_v51, %v2656_v38  ;;  %v2659_v22 = vadd.f32 %v2525_v16, %v8477_v28  ;;  %v2517_v49 = vadd.f32 %v2516_v25, %v2339_v62  ;;  %v2744_v57 = vadd.f32 %v8609_v17, %v2701_v23 }
 0x244   : > { %v2373_v4 = vpop.f32.mrf.mxu1  ;;  %v6422_v48 = vpop.f32.mrf.mxu0 }
 0x245   : > { %v2742_v27 = vadd.f32 %v8609_v17, %v2699_v54  ;;  %v2702_v15 = vmul.f32 %v8602_v51, %v2659_v22  ;;  %v2657_v32 = vadd.f32 %v2517_v49, %v1836_v6  ;;  %v2538_v58 = vadd.f32 %v6422_v48, %v2360_v29 }
 0x246   : > { %v2376_v7 = vpop.f32.mrf.mxu1  ;;  %v2529_v9 = vpop.f32.mrf.mxu0  ;;  %v2780_v50 = vmax.f32 %v2744_v57, 0.0  ;;  %v1852_v48 = vadd.f32 %v8498_v40, %v8308_v39  ;;  %v10636_v57 = vmov 0.0   ;;  %v1868_v39 = vadd.f32 %v8517_v61, %v8355_v30 }
 0x247   : > { %v2745_v1 = vadd.f32 %v8609_v17, %v2702_v15  ;;  %v2700_v33 = vmul.f32 %v8602_v51, %v2657_v32  ;;  %v2662_v28 = vadd.f32 %v2538_v58, %v8486_v26  ;;  %v2530_v62 = vadd.f32 %v2529_v9, %v2352_v21 }
 0x248   : > { %v2378_v25 = vpop.f32.mrf.mxu1  ;;  %v6423_v23 = vpop.f32.mrf.mxu0  ;;  %v2778_v38 = vmax.f32 %v2742_v27, 0.0 }
 0x249   : > { %v2781_v16 = vmax.f32 %v2745_v1, 0.0  ;;  %v2743_v54 = vadd.f32 %v8609_v17, %v2700_v33  ;;  %v2541_v4 = vadd.f32 %v6423_v23, %v2363_v18  ;;  %v2705_v6 = vmul.f32 %v8602_v51, %v2662_v28 }
 0x24a   : > { %v2660_v29 = vadd.f32 %v2530_v62, %v8491_v47  ;;  %v2379_v22 = vpop.f32.mrf.mxu1  ;;  %v2532_v49 = vpop.f32.mrf.mxu0  ;;  %v8634_v1 = vpack.c.bf16 %v2780_v50, %v10636_v57  ;;  %v2827_v40 = vmul.f32 0.0, %v2778_v38 }
 0x24b   : > { %v8630_v15 = vpack.c.bf16 %v10636_v57, %v2781_v16  ;;  %v2779_v26 = vmax.f32 %v2743_v54, 0.0  ;;  %v2663_v21 = vadd.f32 %v2541_v4, %v8496_v8  ;;  %v2748_v27 = vadd.f32 %v8609_v17, %v2705_v6 }
 0x24c   : > { %10638 = vst [vmem:[#allocation18_spill] sm:$0xff] %v8634_v1  ;;  %v2703_v9 = vmul.f32 %v8602_v51, %v2660_v29  ;;  %v2533_v47 = vadd.f32 %v2532_v49, %v8586_v63  ;;  %v2381_v18 = vpop.f32.mrf.mxu1  ;;  %v6426_v32 = vpop.f32.mrf.mxu0  ;;  %v8644_v8 = vadd.f32 %v8536_v56, %v8382_v45  ;;  %v3310_v56 = vrot.slane %v8634_v1, 4 }
 0x24d   : > { %10637 = vst [vmem:[#allocation21_spill] sm:$0xff] %v8630_v15  ;;  %v2828_v58 = vmul.f32 0.0, %v2779_v26  ;;  %v2706_v33 = vmul.f32 %v8602_v51, %v2663_v21  ;;  %v2554_v62 = vadd.f32 %v6426_v32, %v2376_v7  ;;  %v2784_v63 = vmax.f32 %v2748_v27, 0.0 }
 0x24e   : > { %v2746_v50 = vadd.f32 %v8609_v17, %v2703_v9  ;;  %v2661_v28 = vadd.f32 %v2533_v47, %v1852_v48  ;;  %v2384_v25 = vpop.f32.mrf.mxu1  ;;  %v2545_v23 = vpop.f32.mrf.mxu0  ;;  %v3311_v30 = vrot.slane %v8630_v15, 4  ;;  %v8653_v29 = vpack.c.bf16 %v2827_v40, %v10636_v57 }
 0x24f   : > { %v2749_v16 = vadd.f32 %v8609_v17, %v2706_v33  ;;  %v2546_v54 = vadd.f32 %v2545_v23, %v2368_v13  ;;  %v2666_v4 = vadd.f32 %v2554_v62, %v8505_v37  ;;  %v8656_v7 = vpack.c.bf16 %v10636_v57, %v2828_v58 }
 0x250   : > { %v2782_v61 = vmax.f32 %v2746_v50, 0.0  ;;  %v2704_v38 = vmul.f32 %v8602_v51, %v2661_v28  ;;  %v2386_v6 = vpop.f32.mrf.mxu1  ;;  %v6427_v45 = vpop.f32.mrf.mxu0  ;;  %10639 = vst [vmem:[#allocation23_spill] sm:$0xff] %v8653_v29  ;;  %v8665_v47 = vpack.c.bf16 %v2784_v63, %v10636_v57  ;;  %v8669_v32 = vsel %vm862_vm0, %v3310_v56, %v3311_v30 }
 0x251   : > { %10640 = vst [vmem:[#allocation22_spill] sm:$0xff] %v8656_v7  ;;  %v2785_v49 = vmax.f32 %v2749_v16, 0.0  ;;  %v2664_v13 = vadd.f32 %v2546_v54, %v8510_v52  ;;  %v2709_v37 = vmul.f32 %v8602_v51, %v2666_v4  ;;  %v2557_v21 = vadd.f32 %v6427_v45, %v2379_v22  ;;  %3604 = vmatprep.mubr.bf16.mxu0 %v8669_v32  ;;  %v6859_v4 = vld [vmem:[#allocation7 + $0xb0] sm:$0xff]  }
 0x252   : > { %v8660_v48 = vpack.c.bf16 %v2782_v61, %v10636_v57  ;;  %v2747_v26 = vadd.f32 %v8609_v17, %v2704_v38  ;;  %v2387_v27 = vpop.f32.mrf.mxu1  ;;  %v2548_v9 = vpop.f32.mrf.mxu0  ;;  %10642 = vst [vmem:[#allocation31_spill] sm:$0xff] %v8665_v47  ;;  %v3307_v63 = vrot.slane %v8653_v29, 4  ;;  %v3308_v16 = vrot.slane %v8656_v7, 4 }
 0x253   : > { %v2707_v18 = vmul.f32 %v8602_v51, %v2664_v13  ;;  %v2549_v52 = vadd.f32 %v2548_v9, %v8612_v10  ;;  %v8673_v40 = vpack.c.bf16 %v10636_v57, %v2785_v49  ;;  %v2752_v33 = vadd.f32 %v8609_v17, %v2709_v37 }
 0x254   : > { %10641 = vst [vmem:[#allocation30_spill] sm:$0xff] %v8660_v48  ;;  %v2783_v58 = vmax.f32 %v2747_v26, 0.0  ;;  %v2667_v22 = vadd.f32 %v2557_v21, %v8515_v19  ;;  %v2389_v50 = vpop.f32.mrf.mxu1  ;;  %v6430_v28 = vpop.f32.mrf.mxu0  ;;  %v3313_v19 = vrot.slane %v8660_v48, 4  ;;  %v3316_v9 = vrot.slane %v8665_v47, 4 }
 0x255   : > { %10643 = vst [vmem:[#allocation32_spill] sm:$0xff] %v8673_v40  ;;  %v2750_v62 = vadd.f32 %v8609_v17, %v2707_v18  ;;  %v2665_v23 = vadd.f32 %v2549_v52, %v1868_v39  ;;  %v2788_v54 = vmax.f32 %v2752_v33, 0.0  ;;  %v3309_v39 = vsel %vm862_vm0, %v3307_v63, %v3308_v16  ;;  %v6862_v63 = vld [vmem:[#allocation7 + $0x38] sm:$0xff]  }
 0x256   : > { %v8682_v10 = vpack.c.bf16 %v10636_v57, %v2783_v58  ;;  %v2710_v30 = vmul.f32 %v8602_v51, %v2667_v22  ;;  %v2392_v61 = vpop.f32.mrf.mxu1  ;;  %v2561_v38 = vpop.f32.mrf.mxu0  ;;  %3605 = vmatmul.mubr.bf16.vlgmr.msra.gmra.mxu0 %v3309_v39  ;;  %v3317_v33 = vrot.slane %v8673_v40, 4 }
 0x257   : > { %v2786_v6 = vmax.f32 %v2750_v62, 0.0  ;;  %v2708_v45 = vmul.f32 %v8602_v51, %v2665_v23  ;;  %v2570_v56 = vadd.f32 %v6430_v28, %v2392_v61  ;;  %v2562_v13 = vadd.f32 %v2561_v38, %v2384_v25  ;;  %6501 = vmatpush3.bf16.msra.mxu0 %v8440_v46  ;;  %v6860_v46 = vld [vmem:[#allocation7 + $0xa8] sm:$0xff]   ;;  %v6863_v61 = vld [vmem:[#allocation7 + $0x70] sm:$0xff]  }
 0x258   : > { %10644 = vst [vmem:[#allocation33_spill] sm:$0xff] %v8682_v10  ;;  %v2753_v49 = vadd.f32 %v8609_v17, %v2710_v30  ;;  %v2394_v26 = vpop.f32.mrf.mxu1  ;;  %v6431_v37 = vpop.f32.mrf.mxu0  ;;  %v3314_v21 = vrot.slane %v8682_v10, 4  ;;  %v8692_v18 = vpack.c.bf16 %v2788_v54, %v10636_v57  ;;  %6502 = vmatprep.subr.bf16.mxu0 %v6859_v4 }
 0x259   : > { %v2751_v52 = vadd.f32 %v8609_v17, %v2708_v45  ;;  %v2670_v58 = vadd.f32 %v2570_v56, %v8524_v3  ;;  %v8699_v22 = vpack.c.bf16 %v2786_v6, %v10636_v57  ;;  %v2668_v50 = vadd.f32 %v2562_v13, %v8529_v60 }
 0x25a   : > { %v2789_v25 = vmax.f32 %v2753_v49, 0.0  ;;  %v2395_v28 = vpop.f32.mrf.mxu1  ;;  %v2564_v62 = vpop.f32.mrf.mxu0  ;;  %v8703_v23 = vsel %vm862_vm0, %v3313_v19, %v3314_v21  ;;  %v8713_v6 = vsel %vm862_vm0, %v3316_v9, %v3317_v33  ;;  %v3322_v21 = vrot.slane %v8692_v18, 4 }
 0x25b   : > { %v2787_v16 = vmax.f32 %v2751_v52, 0.0  ;;  %v2713_v3 = vmul.f32 %v8602_v51, %v2670_v58  ;;  %v2573_v54 = vadd.f32 %v6431_v37, %v2395_v28  ;;  %v2565_v30 = vadd.f32 %v2564_v62, %v2387_v27  ;;  %3612 = vmatprep.mubr.bf16.mxu0 %v8703_v23  ;;  %6468 = vmatprep.mubr.bf16.mxu1 %v8703_v23  ;;  %v6865_v52 = vld [vmem:[#allocation7 + $0x30] sm:$0xff]  }
 0x25c   : > { %v8709_v60 = vpack.c.bf16 %v10636_v57, %v2789_v25  ;;  %v2711_v38 = vmul.f32 %v8602_v51, %v2668_v50  ;;  %v2397_v19 = vpop.f32.mrf.mxu1  ;;  %v8715_v45 = vpop.f32.mrf.mxu0  ;;  %6469 = vmatmul.mubr.bf16.vlgmr.msra.gmra.mxu1 %v8713_v6  ;;  %6503 = vmatpush3.bf16.msra.mxu0 %v6859_v4  ;;  %v6864_v25 = vld [vmem:[#allocation7 + $0xa0] sm:$0xff]  }
 0x25d   : > { %v8718_v39 = vpack.c.bf16 %v10636_v57, %v2787_v16  ;;  %v2756_v27 = vadd.f32 %v8609_v17, %v2713_v3  ;;  %v2671_v56 = vadd.f32 %v2573_v54, %v8534_v14  ;;  %v2669_v49 = vadd.f32 %v2565_v30, %v8644_v8  ;;  %6001 = vmatpush3.bf16.msra.mxu1 %v6862_v63  ;;  %v6866_v3 = vld [vmem:[#allocation7 + $0x68] sm:$0xff]  }
 0x25e   : > { %v2754_v13 = vadd.f32 %v8609_v17, %v2711_v38  ;;  %v2400_v26 = vpop.f32.mrf.mxu1  ;;  %v2577_v37 = vpop.f32.mrf.mxu0  ;;  %v3323_v9 = vrot.slane %v8709_v60, 4  ;;  %v3319_v8 = vrot.slane %v8699_v22, 4  ;;  %6504 = vmatprep.subr.bf16.mxu0 %v6860_v46  ;;  %6002 = vmatprep.subr.bf16.mxu1 %v6863_v61 }
 0x25f   : > { %10645 = vst [vmem:[#allocation34_spill] sm:$0xff] %v8718_v39  ;;  %v2714_v58 = vmul.f32 %v8602_v51, %v2671_v56  ;;  %v2712_v33 = vmul.f32 %v8602_v51, %v2669_v49  ;;  %v2578_v14 = vadd.f32 %v2577_v37, %v2400_v26  ;;  %v2792_v50 = vmax.f32 %v2756_v27, 0.0  ;;  %3613 = vmatmul.mubr.bf16.gmra.mxu0 %v8669_v32  ;;  %v6867_v49 = vld [vmem:[#allocation7 + $0x28] sm:$0xff]  }
 0x260   : > { %v2790_v28 = vmax.f32 %v2754_v13, 0.0  ;;  %v2402_v62 = vpop.f32.mrf.mxu1  ;;  %v8731_v16 = vpop.f32.mrf.mxu0  ;;  %v3320_v4 = vrot.slane %v8718_v39, 4  ;;  %v8735_v63 = vsel %vm862_vm0, %v3322_v21, %v3323_v9  ;;  %3620 = vmatprep.mubr.bf16.mxu0 %v8713_v6  ;;  %v1900_v32 = vadd.f32 %v8553_v24, %v8406_v41  ;;  %6505 = vmatpush3.bf16.msra.mxu0 %v6860_v46  ;;  %v6868_v41 = vld [vmem:[#allocation7 + $0x60] sm:$0xff]  }
 0x261   : > { %v2757_v54 = vadd.f32 %v8609_v17, %v2714_v58  ;;  %v2755_v30 = vadd.f32 %v8609_v17, %v2712_v33  ;;  %v2672_v61 = vadd.f32 %v2578_v14, %v8546_v43  ;;  %6003 = vmatpush3.bf16.msra.mxu1 %v6865_v52  ;;  %6506 = vmatprep.subr.bf16.mxu0 %v6864_v25  ;;  %v6869_v43 = vld [vmem:[#allocation7 + $0x98] sm:$0xff]  }
 0x262   : > { %v8744_v38 = vpack.c.bf16 %v2790_v28, %v10636_v57  ;;  %v2403_v19 = vpop.f32.mrf.mxu1  ;;  %v2580_v27 = vpop.f32.mrf.mxu0  ;;  %v8747_v56 = vsel %vm862_vm0, %v3319_v8, %v3320_v4  ;;  %v8752_v24 = vpack.c.bf16 %v2792_v50, %v10636_v57  ;;  %6004 = vmatprep.subr.bf16.mxu1 %v6866_v3  ;;  %v6870_v50 = vld [vmem:[#allocation7 + $0x20] sm:$0xff]  }
 0x263   : > { %v2793_v13 = vmax.f32 %v2757_v54, 0.0  ;;  %v2791_v26 = vmax.f32 %v2755_v30, 0.0  ;;  %v2715_v37 = vmul.f32 %v8602_v51, %v2672_v61  ;;  %v2581_v21 = vadd.f32 %v2580_v27, %v2403_v19  ;;  %6472 = vmatprep.mubr.bf16.mxu1 %v8747_v56  ;;  %v6871_v30 = vld [vmem:[#allocation7 + $0x58] sm:$0xff]   ;;  %v6874_v27 = vld [vmem:[#allocation7 + $0x90] sm:$0xff]  }
 0x264   : > { %v2405_v9 = vpop.f32.mrf.mxu1  ;;  %v8754_v58 = vpop.f32.mrf.mxu0  ;;  %6473 = vmatmul.mubr.bf16.gmra.mxu1 %v8735_v63  ;;  %v3325_v28 = vrot.slane %v8744_v38, 4  ;;  %6507 = vmatpush3.bf16.msra.mxu0 %v6864_v25 }
 0x265   : > { %v8757_v46 = vpack.c.bf16 %v10636_v57, %v2793_v13  ;;  %v8760_v52 = vpack.c.bf16 %v10636_v57, %v2791_v26  ;;  %v2758_v33 = vadd.f32 %v8609_v17, %v2715_v37  ;;  %v2673_v14 = vadd.f32 %v2581_v21, %v1900_v32  ;;  %6005 = vmatpush3.bf16.msra.mxu1 %v6867_v49  ;;  %v6872_v21 = vld [vmem:[#allocation7 + $0x18] sm:$0xff]  }
 0x266   : > { %v2408_v8 = vpop.f32.mrf.mxu1  ;;  %6006 = vmatprep.subr.bf16.mxu1 %v6868_v41  ;;  %6508 = vmatprep.subr.bf16.mxu0 %v6869_v43  ;;  %v3328_v32 = vrot.slane %v8752_v24, 4  ;;  %v2593_v25 = vpop.f32.mrf.mxu0 }
 0x267   : > { %v2794_v62 = vmax.f32 %v2758_v33, 0.0  ;;  %v2716_v4 = vmul.f32 %v8602_v51, %v2673_v14  ;;  %v2586_v3 = vadd.f32 %v8715_v45, %v2408_v8  ;;  %v3326_v54 = vrot.slane %v8760_v52, 4  ;;  %3621 = vmatmul.mubr.bf16.gmra.mxu0 %v8703_v23  ;;  %v6873_v33 = vld [vmem:[#allocation7 + $0x50] sm:$0xff]  }
 0x268   : > { %v2410_v61 = vpop.f32.mrf.mxu1  ;;  %v3329_v19 = vrot.slane %v8757_v46, 4  ;;  %3628 = vmatprep.mubr.bf16.mxu0 %v8747_v56  ;;  %6509 = vmatpush3.bf16.msra.mxu0 %v6869_v43  ;;  %v8786_v8 = vpop.f32.mrf.mxu0  ;;  %v6875_v43 = vld [vmem:[#allocation7 + $0x10] sm:$0xff]  }
 0x269   : > { %v2759_v49 = vadd.f32 %v8609_v17, %v2716_v4  ;;  %v2674_v13 = vadd.f32 %v2586_v3, %v8543_v36  ;;  %v8775_v45 = vsel %vm862_vm0, %v3325_v28, %v3326_v54  ;;  %v8778_v26 = vpack.c.bf16 %v2794_v62, %v10636_v57  ;;  %6007 = vmatpush3.bf16.msra.mxu1 %v6870_v50  ;;  %v6879_v28 = vld [vmem:[#allocation7 + $0x88] sm:$0xff]  }
 0x26a   : > { %v2411_v23 = vpop.f32.mrf.mxu1  ;;  %6476 = vmatprep.mubr.bf16.mxu1 %v8775_v45  ;;  %v8782_v37 = vsel %vm862_vm0, %v3328_v32, %v3329_v19  ;;  %6008 = vmatprep.subr.bf16.mxu1 %v6871_v30  ;;  %v6876_v19 = vld [vmem:[#allocation7 + $0x48] sm:$0xff]  }
 0x26b   : > { %v2795_v41 = vmax.f32 %v2759_v49, 0.0  ;;  %v2717_v9 = vmul.f32 %v8602_v51, %v2674_v13  ;;  %v2589_v36 = vadd.f32 %v8731_v16, %v2411_v23  ;;  %6510 = vmatprep.subr.bf16.mxu0 %v6874_v27  ;;  %v3331_v16 = vrot.slane %v8778_v26, 4  ;;  %v6882_v13 = vld [vmem:[#allocation7 + $0x80] sm:$0xff]  }
 0x26c   : > { %v2413_v14 = vpop.f32.mrf.mxu1  ;;  %6477 = vmatmul.mubr.bf16.gmra.mxu1 %v8782_v37  ;;  %6511 = vmatpush3.bf16.msra.mxu0 %v6874_v27 }
 0x26d   : > { %v8789_v62 = vpack.c.bf16 %v10636_v57, %v2795_v41  ;;  %v2760_v4 = vadd.f32 %v8609_v17, %v2717_v9  ;;  %v2675_v50 = vadd.f32 %v2589_v36, %v8551_v42  ;;  %6009 = vmatpush3.bf16.msra.mxu1 %v6872_v21  ;;  %v2596_v42 = vpop.f32.mrf.mxu0  ;;  %6512 = vmatprep.subr.bf16.mxu0 %v6879_v28  ;;  %v6878_v14 = vld [vmem:[#allocation7 + $0x40] sm:$0xff]  }
 0x26e   : > { %v2416_v3 = vpop.f32.mrf.mxu1  ;;  %6010 = vmatprep.subr.bf16.mxu1 %v6873_v33  ;;  %v1916_v9 = vadd.f32 %v8564_v55, %v8434_v34  ;;  %v10412_v55 = vshll.u32 %v8630_v15, 16 }
 0x26f   : > { %v2796_v54 = vmax.f32 %v2760_v4, 0.0  ;;  %v2718_v30 = vmul.f32 %v8602_v51, %v2675_v50  ;;  %v2594_v61 = vadd.f32 %v2593_v25, %v2416_v3  ;;  %v3332_v32 = vrot.slane %v8789_v62, 4  ;;  %3629 = vmatmul.mubr.bf16.gmra.mxu0 %v8713_v6  ;;  %v6877_v6 = vld [vmem:[#allocation7 + $0x8] sm:$0xff]   ;;  %v8811_v50 = vpop.f32.mrf.mxu0 }
 0x270   : > { %v2418_v49 = vpop.f32.mrf.mxu1  ;;  %3636 = vmatprep.mubr.bf16.mxu0 %v8735_v63  ;;  %6513 = vmatpush3.bf16.msra.mxu0 %v6879_v28  ;;  %v10417_v3 = vshrl.u32 %v8630_v15, 16  ;;  %v10411_v28 = vshrl.u32 %v8634_v1, 16 }
 0x271   : > { %v2761_v23 = vadd.f32 %v8609_v17, %v2718_v30  ;;  %v2676_v21 = vadd.f32 %v2594_v61, %v8559_v59  ;;  %v8802_v41 = vsel %vm862_vm0, %v3331_v16, %v3332_v32  ;;  %v8805_v25 = vpack.c.bf16 %v2796_v54, %v10636_v57  ;;  %6011 = vmatpush3.bf16.msra.mxu1 %v6875_v43  ;;  %v6884_v16 = vld [vmem:[#allocation7 + $0x1f8] sm:$0xff]  }
 0x272   : > { %v2419_v27 = vpop.f32.mrf.mxu1  ;;  %6480 = vmatprep.mubr.bf16.mxu1 %v8802_v41  ;;  %6012 = vmatprep.subr.bf16.mxu1 %v6876_v19  ;;  %v10410_v32 = vshll.u32 %v8634_v1, 16 }
 0x273   : > { %v2797_v36 = vmax.f32 %v2761_v23, 0.0  ;;  %v2719_v33 = vmul.f32 %v8602_v51, %v2676_v21  ;;  %v2597_v59 = vadd.f32 %v2596_v42, %v2419_v27  ;;  %6514 = vmatprep.subr.bf16.mxu0 %v6882_v13  ;;  %v3334_v61 = vrot.slane %v8805_v25, 4  ;;  %v6880_v21 = vld [vmem:[#allocation7] sm:$0xff]  }
 0x274   : > { %v2421_v4 = vpop.f32.mrf.mxu1  ;;  %6515 = vmatpush3.bf16.msra.mxu0 %v6882_v13 }
 0x275   : > { %v8815_v43 = vpack.c.bf16 %v10636_v57, %v2797_v36  ;;  %v2762_v54 = vadd.f32 %v8609_v17, %v2719_v33  ;;  %v2677_v34 = vadd.f32 %v2597_v59, %v1916_v9  ;;  %6013 = vmatpush3.bf16.msra.mxu1 %v6877_v6  ;;  %v2609_v9 = vpop.f32.mrf.mxu0  ;;  %v2927_v6 = vrot.slane %v10417_v3, 3  ;;  %v8828_v36 = vld [vmem:[#allocation7 + $0x238] sm:$0xff]   ;;  %6136 = vmatprep.subr.bf16.mxu0 %v6884_v16 }
 0x276   : > { %v2424_v30 = vpop.f32.mrf.mxu1  ;;  %6014 = vmatprep.subr.bf16.mxu1 %v6878_v14  ;;  %v2919_v4 = vrot.slane %v10411_v28, 3  ;;  %v1932_v16 = vadd.f32 %v8575_v31, %v8462_v35  ;;  %v10423_v3 = vshrl.u32 %v8778_v26, 16 }
 0x277   : > { %v2798_v19 = vmax.f32 %v2762_v54, 0.0  ;;  %v2720_v49 = vmul.f32 %v8602_v51, %v2677_v34  ;;  %v2602_v42 = vadd.f32 %v8754_v58, %v2424_v30  ;;  %v3335_v23 = vrot.slane %v8815_v43, 4  ;;  %3637 = vmatmul.mubr.bf16.gmra.mxu0 %v8747_v56 }
 0x278   : > { %v2426_v27 = vpop.f32.mrf.mxu1  ;;  %3644 = vmatprep.mubr.bf16.mxu0 %v8775_v45  ;;  %v2930_v56 = vrot.slane %v10412_v55, 4 }
 0x279   : > { %v2763_v33 = vadd.f32 %v8609_v17, %v2720_v49  ;;  %v2678_v59 = vadd.f32 %v2602_v42, %v8556_v44  ;;  %v8834_v58 = vsel %vm862_vm0, %v3334_v61, %v3335_v23  ;;  %v8839_v13 = vpack.c.bf16 %v2798_v19, %v10636_v57  ;;  %6015 = vmatpush3.bf16.msra.mxu1 %v6880_v21  ;;  %v8854_v27 = vpop.f32.mrf.mxu0 }
 0x27a   : > { %v2427_v14 = vpop.f32.mrf.mxu1  ;;  %6481 = vmatmul.mubr.bf16.gmra.mxu1 %v8834_v58  ;;  %v2922_v44 = vrot.slane %v10410_v32, 4  ;;  %v10414_v61 = vshrl.u32 %v8653_v29, 16  ;;  %v10413_v19 = vshll.u32 %v8653_v29, 16  ;;  %v10416_v49 = vshrl.u32 %v8656_v7, 16  ;;  %6644 = vmatprep.subr.bf16.mxu1 %v8828_v36 }
 0x27b   : > { %v2799_v54 = vmax.f32 %v2763_v33, 0.0  ;;  %v2721_v34 = vmul.f32 %v8602_v51, %v2678_v59  ;;  %v2605_v30 = vadd.f32 %v8786_v8, %v2427_v14  ;;  %v10415_v42 = vshll.u32 %v8656_v7, 16 }
 0x27c   : > { %v2429_v23 = vpop.f32.mrf.mxu1  ;;  %v2931_v21 = vor.u32 %v2930_v56, %v2927_v6  ;;  %v8864_v33 = vadd.f32 %v8588_v20, %v8500_v2  ;;  %v8868_v59 = vadd.f32 %v8597_v12, %v8538_v53  ;;  %v2923_v32 = vor.u32 %v2922_v44, %v2919_v4  ;;  %v2612_v6 = vpop.f32.mrf.mxu0 }
 0x27d   : > { %v8858_v35 = vpack.c.bf16 %v10636_v57, %v2799_v54  ;;  %v2764_v31 = vadd.f32 %v8609_v17, %v2721_v34  ;;  %v2679_v8 = vadd.f32 %v2605_v30, %v8562_v5  ;;  %v3337_v23 = vrot.slane %v8839_v13, 4 }
 0x27e   : > { %v2432_v14 = vpop.f32.mrf.mxu1  ;;  %v8876_v2 = vrot.slane %v10414_v61, 3  ;;  %v8880_v53 = vrot.slane %v10413_v19, 4  ;;  %v8884_v20 = vrot.slane %v10416_v49, 3  ;;  %v8888_v12 = vrot.slane %v10415_v42, 4 }
 0x27f   : > { %v2800_v28 = vmax.f32 %v2764_v31, 0.0  ;;  %v2722_v54 = vmul.f32 %v8602_v51, %v2679_v8  ;;  %v2610_v55 = vadd.f32 %v2609_v9, %v2432_v14  ;;  %v3338_v34 = vrot.slane %v8858_v35, 4  ;;  %3645 = vmatmul.mubr.bf16.gmra.mxu0 %v8735_v63 }
 0x280   : > { %v2434_v5 = vpop.f32.mrf.mxu1  ;;  %3652 = vmatprep.mubr.bf16.mxu0 %v8782_v37  ;;  %v8897_v4 = vsel %vm482_vm1, %v2923_v32, %v2931_v21  ;;  %v8908_v21 = vpop.f32.mrf.mxu0  ;;  %v10419_v19 = vshll.u32 %v8752_v24, 16  ;;  %v10421_v49 = vshll.u32 %v8757_v46, 16 }
 0x281   : > { %v2765_v63 = vadd.f32 %v8609_v17, %v2722_v54  ;;  %v2680_v9 = vadd.f32 %v2610_v55, %v8570_v11  ;;  %v8894_v56 = vsel %vm862_vm0, %v3337_v23, %v3338_v34  ;;  %v8900_v44 = vpack.c.bf16 %v2800_v28, %v10636_v57 }
 0x282   : > { %v2435_v30 = vpop.f32.mrf.mxu1  ;;  %6484 = vmatprep.mubr.bf16.mxu1 %v8894_v56  ;;  %v10418_v11 = vshrl.u32 %v8752_v24, 16  ;;  %v10420_v54 = vshrl.u32 %v8682_v10, 16  ;;  %v3024_v42 = vrot.slane %v10419_v19, 4 }
 0x283   : > { %10646 = vst [vmem:[#allocation35_spill] sm:$0xff] %v8900_v44  ;;  %v2801_v55 = vmax.f32 %v2765_v63, 0.0  ;;  %v2723_v14 = vmul.f32 %v8602_v51, %v2680_v9  ;;  %v2613_v23 = vadd.f32 %v2612_v6, %v2435_v30  ;;  %v10422_v9 = vshrl.u32 %v8757_v46, 16 }
 0x284   : > { %v2437_v32 = vpop.f32.mrf.mxu1  ;;  %v3021_v5 = vrot.slane %v10418_v11, 3  ;;  %v8931_v8 = vrot.slane %v10420_v54, 3  ;;  %v10424_v54 = vshll.u32 %v8778_v26, 16  ;;  %v10444_v15 = vshrl.u32 %v8900_v44, 16 }
 0x285   : > { %v8916_v61 = vpack.c.bf16 %v10636_v57, %v2801_v55  ;;  %v2766_v63 = vadd.f32 %v8609_v17, %v2723_v14  ;;  %v2681_v6 = vadd.f32 %v2613_v23, %v1932_v16  ;;  %v3340_v32 = vrot.slane %v8900_v44, 4  ;;  %v2625_v23 = vpop.f32.mrf.mxu0 }
 0x286   : > { %v2440_v30 = vpop.f32.mrf.mxu1  ;;  %v3025_v19 = vor.u32 %v3024_v42, %v3021_v5  ;;  %v3029_v31 = vrot.slane %v10422_v9, 3  ;;  %v3038_v5 = vrot.slane %v10423_v3, 3  ;;  %v10435_v3 = vshrl.u32 %v8805_v25, 16 }
 0x287   : > { %10647 = vst [vmem:[#allocation36_spill] sm:$0xff] %v8916_v61  ;;  %v2802_v11 = vmax.f32 %v2766_v63, 0.0  ;;  %v2724_v34 = vmul.f32 %v8602_v51, %v2681_v6  ;;  %v2618_v55 = vadd.f32 %v8811_v50, %v2440_v30  ;;  %v3341_v14 = vrot.slane %v8916_v61, 4  ;;  %3653 = vmatmul.mubr.bf16.gmra.mxu0 %v8775_v45 }
 0x288   : > { %v2442_v16 = vpop.f32.mrf.mxu1  ;;  %v3032_v63 = vrot.slane %v10421_v49, 4  ;;  %3660 = vmatprep.mubr.bf16.mxu0 %v8802_v41 }
 0x289   : > { %v8938_v6 = vpack.c.bf16 %v2802_v11, %v10636_v57  ;;  %v2767_v50 = vadd.f32 %v8609_v17, %v2724_v34  ;;  %v2682_v45 = vadd.f32 %v2618_v55, %v8567_v0  ;;  %v8944_v30 = vsel %vm862_vm0, %v3340_v32, %v3341_v14  ;;  %v8954_v14 = vpop.f32.mrf.mxu0 }
 0x28a   : > { %v2443_v16 = vpop.f32.mrf.mxu1  ;;  %6485 = vmatmul.mubr.bf16.gmra.mxu1 %v8944_v30  ;;  %v3033_v42 = vor.u32 %v3032_v63, %v3029_v31  ;;  %v10425_v11 = vshrl.u32 %v8789_v62, 16  ;;  %v3041_v31 = vrot.slane %v10424_v54, 4  ;;  %v10434_v54 = vshll.u32 %v8805_v25, 16 }
 0x28b   : > { %v2803_v49 = vmax.f32 %v2767_v50, 0.0  ;;  %v2725_v34 = vmul.f32 %v8602_v51, %v2682_v45  ;;  %v2621_v0 = vadd.f32 %v8854_v27, %v2443_v16  ;;  %v3343_v55 = vrot.slane %v8938_v6, 4  ;;  %v10649_v16 = vld [vmem:[#allocation24_spill] sm:$0xff] }
 0x28c   : > { %v2445_v32 = vpop.f32.mrf.mxu1  ;;  %v8957_v9 = vsel %vm482_vm1, %v3025_v19, %v3033_v42  ;;  %v3046_v63 = vrot.slane %v10425_v11, 3  ;;  %v10432_v50 = vshll.u32 %v8789_v62, 16  ;;  %v3042_v19 = vor.u32 %v3041_v31, %v3038_v5 }
 0x28d   : > { %10648 = vst [vmem:[#allocation37_spill] sm:$0xff] %v8957_v9  ;;  %v8965_v45 = vpack.c.bf16 %v10636_v57, %v2803_v49  ;;  %v2768_v27 = vadd.f32 %v8609_v17, %v2725_v34  ;;  %v2683_v32 = vadd.f32 %v2621_v0, %v10649_v16  ;;  %v10433_v11 = vshrl.u32 %v8815_v43, 16  ;;  %v2628_v0 = vpop.f32.mrf.mxu0 }
 0x28e   : > { %v2448_v28 = vpop.f32.mrf.mxu1  ;;  %v3049_v42 = vrot.slane %v10432_v50, 4  ;;  %v3055_v5 = vrot.slane %v10435_v3, 3  ;;  %v3058_v31 = vrot.slane %v10434_v54, 4 }
 0x28f   : > { %v2804_v29 = vmax.f32 %v2768_v27, 0.0  ;;  %v2726_v7 = vmul.f32 %v8602_v51, %v2683_v32  ;;  %v2626_v49 = vadd.f32 %v2625_v23, %v2448_v28  ;;  %v3344_v1 = vrot.slane %v8965_v45, 4  ;;  %3661 = vmatmul.mubr.bf16.gmra.mxu0 %v8782_v37  ;;  %v10651_v23 = vld [vmem:[#allocation29_spill] sm:$0xff] }
 0x290   : > { %v2450_v34 = vpop.f32.mrf.mxu1  ;;  %v3050_v16 = vor.u32 %v3049_v42, %v3046_v63  ;;  %v3063_v50 = vrot.slane %v10433_v11, 3  ;;  %3668 = vmatprep.mubr.bf16.mxu0 %v8834_v58  ;;  %v10436_v11 = vshll.u32 %v8815_v43, 16 }
 0x291   : > { %v8984_v27 = vpack.c.bf16 %v2804_v29, %v10636_v57  ;;  %v2769_v28 = vadd.f32 %v8609_v17, %v2726_v7  ;;  %v2684_v32 = vadd.f32 %v2626_v49, %v10651_v23  ;;  %v8990_v37 = vsel %vm862_vm0, %v3343_v55, %v3344_v1  ;;  %v9000_v1 = vpop.f32.mrf.mxu0 }
 0x292   : > { %v2451_v63 = vpop.f32.mrf.mxu1  ;;  %6488 = vmatprep.mubr.bf16.mxu1 %v8990_v37  ;;  %v8994_v42 = vsel %vm482_vm1, %v3042_v19, %v3050_v16  ;;  %v3059_v34 = vor.u32 %v3058_v31, %v3055_v5  ;;  %v10437_v29 = vshrl.u32 %v8839_v13, 16  ;;  %v3066_v55 = vrot.slane %v10436_v11, 4 }
 0x293   : > { %10650 = vst [vmem:[#allocation24_spill] sm:$0xff] %v8984_v27  ;;  %10652 = vst [vmem:[#allocation29_spill] sm:$0xff] %v8994_v42  ;;  %v2805_v54 = vmax.f32 %v2769_v28, 0.0  ;;  %v2727_v7 = vmul.f32 %v8602_v51, %v2684_v32  ;;  %v2629_v49 = vadd.f32 %v2628_v0, %v2451_v63  ;;  %v3346_v23 = vrot.slane %v8984_v27, 4 }
 0x294   : > { %v2453_v3 = vpop.f32.mrf.mxu1  ;;  %v3072_v19 = vrot.slane %v10437_v29, 3  ;;  %v10443_v16 = vshll.u32 %v8839_v13, 16  ;;  %v10442_v5 = vshrl.u32 %v8858_v35, 16  ;;  %v3067_v63 = vor.u32 %v3066_v55, %v3063_v50 }
 0x295   : > { %v9009_v31 = vpack.c.bf16 %v10636_v57, %v2805_v54  ;;  %v2770_v0 = vadd.f32 %v8609_v17, %v2727_v7  ;;  %v2685_v28 = vadd.f32 %v2629_v49, %v8864_v33  ;;  %v10445_v3 = vshll.u32 %v8858_v35, 16  ;;  %v2641_v49 = vpop.f32.mrf.mxu0 }
 0x296   : > { %v2456_v32 = vpop.f32.mrf.mxu1  ;;  %v3075_v11 = vrot.slane %v10443_v16, 4  ;;  %v3080_v29 = vrot.slane %v10442_v5, 3  ;;  %v9024_v50 = vsel %vm482_vm1, %v3059_v34, %v3067_v63  ;;  %v10449_v63 = vshrl.u32 %v8916_v61, 16 }
 0x297   : > { %v2806_v42 = vmax.f32 %v2770_v0, 0.0  ;;  %v2728_v54 = vmul.f32 %v8602_v51, %v2685_v28  ;;  %v2634_v9 = vadd.f32 %v8908_v21, %v2456_v32  ;;  %v3347_v7 = vrot.slane %v9009_v31, 4  ;;  %3669 = vmatmul.mubr.bf16.gmra.mxu0 %v8802_v41  ;;  %10653 = vst [vmem:[#allocation38_spill] sm:$0xff] %v9024_v50  ;;  %v10654_v32 = vld [vmem:[#allocation25_spill] sm:$0xff] }
 0x298   : > { %v2458_v33 = vpop.f32.mrf.mxu1  ;;  %v3076_v55 = vor.u32 %v3075_v11, %v3072_v19  ;;  %v3083_v5 = vrot.slane %v10445_v3, 4  ;;  %v3089_v0 = vrot.slane %v10444_v15, 3  ;;  %3676 = vmatprep.mubr.bf16.mxu0 %v8894_v56  ;;  %v10447_v19 = vshll.u32 %v8900_v44, 16 }
 0x299   : > { %v9031_v28 = vpack.c.bf16 %v2806_v42, %v10636_v57  ;;  %v2771_v21 = vadd.f32 %v8609_v17, %v2728_v54  ;;  %v2686_v16 = vadd.f32 %v2634_v9, %v10654_v32  ;;  %v9037_v41 = vsel %vm862_vm0, %v3346_v23, %v3347_v7  ;;  %v9046_v23 = vpop.f32.mrf.mxu0 }
 0x29a   : > { %v2459_v34 = vpop.f32.mrf.mxu1  ;;  %6489 = vmatmul.mubr.bf16.gmra.mxu1 %v9037_v41  ;;  %v3084_v11 = vor.u32 %v3083_v5, %v3080_v29  ;;  %v10452_v42 = vshll.u32 %v8916_v61, 16  ;;  %v3092_v29 = vrot.slane %v10447_v19, 4  ;;  %v3097_v5 = vrot.slane %v10449_v63, 3 }
 0x29b   : > { %v2807_v33 = vmax.f32 %v2771_v21, 0.0  ;;  %v2729_v54 = vmul.f32 %v8602_v51, %v2686_v16  ;;  %v2637_v9 = vadd.f32 %v8954_v14, %v2459_v34  ;;  %v3349_v32 = vrot.slane %v9031_v28, 4  ;;  %v2644_v44 = vpop.f32.mrf.mxu0 }
 0x29c   : > { %v2461_v15 = vpop.f32.mrf.mxu1  ;;  %v9049_v7 = vsel %vm482_vm1, %v3076_v55, %v3084_v11  ;;  %v3100_v21 = vrot.slane %v10452_v42, 4  ;;  %v10460_v3 = vshrl.u32 %v8938_v6, 16  ;;  %v3093_v11 = vor.u32 %v3092_v29, %v3089_v0 }
 0x29d   : > { %10655 = vst [vmem:[#allocation25_spill] sm:$0xff] %v9049_v7  ;;  %v9058_v16 = vpack.c.bf16 %v10636_v57, %v2807_v33  ;;  %v2772_v14 = vadd.f32 %v8609_v17, %v2729_v54  ;;  %v10656_v15 = vld [vmem:[#allocation26_spill] sm:$0xff]  ;;  %v10459_v19 = vshll.u32 %v8938_v6, 16  ;;  %v10456_v50 = vshrl.u32 %v8965_v45, 16 }
 0x29e   : > { %v2687_v34 = vadd.f32 %v2637_v9, %v10656_v15  ;;  %v2464_v55 = vpop.f32.mrf.mxu1  ;;  %v3101_v7 = vor.u32 %v3100_v21, %v3097_v5  ;;  %v3106_v0 = vrot.slane %v10460_v3, 3 }
 0x29f   : > { %v2808_v63 = vmax.f32 %v2772_v14, 0.0  ;;  %v2642_v42 = vadd.f32 %v2641_v49, %v2464_v55  ;;  %v3350_v33 = vrot.slane %v9058_v16, 4  ;;  %3677 = vmatmul.mubr.bf16.gmra.mxu0 %v8834_v58  ;;  %v3109_v29 = vrot.slane %v10459_v19, 4  ;;  %v10658_v58 = vld [vmem:[#allocation17_spill] sm:$0xff] }
 0x2a0   : > { %v2730_v61 = vmul.f32 %v8602_v51, %v2687_v34  ;;  %v2466_v54 = vpop.f32.mrf.mxu1  ;;  %v9069_v9 = vsel %vm482_vm1, %v3093_v11, %v3101_v7  ;;  %v3114_v5 = vrot.slane %v10456_v50, 3  ;;  %3684 = vmatprep.mubr.bf16.mxu0 %v8944_v30  ;;  %v10455_v34 = vshll.u32 %v8965_v45, 16 }
 0x2a1   : > { %10657 = vst [vmem:[#allocation26_spill] sm:$0xff] %v9069_v9  ;;  %v9078_v51 = vpack.c.bf16 %v2808_v63, %v10636_v57  ;;  %v2688_v21 = vadd.f32 %v2642_v42, %v10658_v58  ;;  %v9084_v7 = vsel %vm862_vm0, %v3349_v32, %v3350_v33  ;;  %v3110_v15 = vor.u32 %v3109_v29, %v3106_v0 }
 0x2a2   : > { %v2773_v49 = vadd.f32 %v8609_v17, %v2730_v61  ;;  %v2467_v14 = vpop.f32.mrf.mxu1  ;;  %6492 = vmatprep.mubr.bf16.mxu1 %v9084_v7  ;;  %v10457_v55 = vshrl.u32 %v8984_v27, 16  ;;  %v10458_v63 = vshll.u32 %v8984_v27, 16  ;;  %v6914_v17 = vld [vmem:[%s10308_s2] ss:$0 sm:$0xff]  ;;  %v3117_v54 = vrot.slane %v10455_v34, 4 }
 0x2a3   : > { %v2731_v61 = vmul.f32 %v6914_v17, %v2688_v21  ;;  %v2645_v42 = vadd.f32 %v2644_v44, %v2467_v14  ;;  %v3352_v32 = vrot.slane %v9078_v51, 4  ;;  %v6915_v44 = vld [vmem:[%s10309_s3] ss:$0 sm:$0xff]  ;;  %v10464_v19 = vshrl.u32 %v9031_v28, 16 }
 0x2a4   : > { %v2809_v11 = vmax.f32 %v2773_v49, 0.0  ;;  %v2469_v33 = vpop.f32.mrf.mxu1  ;;  %v3123_v0 = vrot.slane %v10457_v55, 3  ;;  %v3126_v29 = vrot.slane %v10458_v63, 4  ;;  %v10477_v49 = vshrl.u32 %v9009_v31, 16 }
 0x2a5   : > { %v2774_v21 = vadd.f32 %v6915_v44, %v2731_v61  ;;  %v2689_v14 = vadd.f32 %v2645_v42, %v8868_v59  ;;  %v10466_v33 = vshll.u32 %v9009_v31, 16  ;;  %v3118_v50 = vor.u32 %v3117_v54, %v3114_v5 }
 0x2a6   : > { %v9102_v58 = vpack.c.bf16 %v10636_v57, %v2809_v11  ;;  %v2472_v34 = vpop.f32.mrf.mxu1  ;;  %v3127_v55 = vor.u32 %v3126_v29, %v3123_v0  ;;  %v3131_v63 = vrot.slane %v10477_v49, 3  ;;  %v3140_v42 = vrot.slane %v10464_v19, 3 }
 0x2a7   : > { %v2810_v3 = vmax.f32 %v2774_v21, 0.0  ;;  %v2732_v11 = vmul.f32 %v6914_v17, %v2689_v14  ;;  %v2650_v9 = vadd.f32 %v9000_v1, %v2472_v34  ;;  %3685 = vmatmul.mubr.bf16.gmra.mxu0 %v8894_v56  ;;  %v9116_v59 = vsel %vm482_vm1, %v3110_v15, %v3118_v50  ;;  %v10659_v34 = vld [vmem:[#allocation27_spill] sm:$0xff] }
 0x2a8   : > { %v3353_v27 = vrot.slane %v9102_v58, 4  ;;  %v2474_v61 = vpop.f32.mrf.mxu1  ;;  %v3134_v5 = vrot.slane %v10466_v33, 4  ;;  %v10465_v54 = vshll.u32 %v9031_v28, 16  ;;  %3692 = vmatprep.mubr.bf16.mxu0 %v8990_v37  ;;  %v10467_v14 = vshrl.u32 %v9058_v16, 16 }
 0x2a9   : > { %v9124_v0 = vpack.c.bf16 %v2810_v3, %v10636_v57  ;;  %v2775_v1 = vadd.f32 %v6915_v44, %v2732_v11  ;;  %v2690_v29 = vadd.f32 %v2650_v9, %v10659_v34  ;;  %v10476_v3 = vshll.u32 %v9058_v16, 16 }
 0x2aa   : > { %v9129_v56 = vsel %vm862_vm0, %v3352_v32, %v3353_v27  ;;  %v2475_v50 = vpop.f32.mrf.mxu1  ;;  %v3135_v15 = vor.u32 %v3134_v5, %v3131_v63  ;;  %v3143_v21 = vrot.slane %v10465_v54, 4  ;;  %v3148_v63 = vrot.slane %v10467_v14, 3 }
 0x2ab   : > { %6493 = vmatmul.mubr.bf16.gmra.mxu1 %v9129_v56  ;;  %v2811_v61 = vmax.f32 %v2775_v1, 0.0  ;;  %v2733_v11 = vmul.f32 %v6914_v17, %v2690_v29  ;;  %v2653_v9 = vadd.f32 %v9046_v23, %v2475_v50  ;;  %v3355_v34 = vrot.slane %v9124_v0, 4  ;;  %v10660_v29 = vld [vmem:[#allocation28_spill] sm:$0xff] }
 0x2ac   : > { %v2477_v19 = vpop.f32.mrf.mxu1  ;;  %v9139_v27 = vsel %vm482_vm1, %v3127_v55, %v3135_v15  ;;  %v3144_v32 = vor.u32 %v3143_v21, %v3140_v42  ;;  %v3151_v5 = vrot.slane %v10476_v3, 4  ;;  %v10474_v23 = vshrl.u32 %v9078_v51, 16 }
 0x2ad   : > { %v9146_v54 = vpack.c.bf16 %v10636_v57, %v2811_v61  ;;  %v2776_v1 = vadd.f32 %v6915_v44, %v2733_v11  ;;  %v2691_v33 = vadd.f32 %v2653_v9, %v10660_v29  ;;  %v10469_v19 = vshll.u32 %v9078_v51, 16 }
 0x2ae   : > { %v3152_v50 = vor.u32 %v3151_v5, %v3148_v63  ;;  %v10468_v55 = vshrl.u32 %v9102_v58, 16  ;;  %v10471_v42 = vshll.u32 %v9102_v58, 16  ;;  %v3157_v61 = vrot.slane %v10474_v23, 3 }
 0x2af   : > { %v2812_v15 = vmax.f32 %v2776_v1, 0.0  ;;  %v2734_v21 = vmul.f32 %v6914_v17, %v2691_v33  ;;  %v3356_v14 = vrot.slane %v9146_v54, 4  ;;  %3693 = vmatmul.mubr.bf16.gmra.mxu0 %v8944_v30  ;;  %v3160_v9 = vrot.slane %v10469_v19, 4 }
 0x2b0   : > { %v9158_v11 = vsel %vm482_vm1, %v3144_v32, %v3152_v50  ;;  %v3165_v63 = vrot.slane %v10468_v55, 3  ;;  %v3168_v5 = vrot.slane %v10471_v42, 4  ;;  %3700 = vmatprep.mubr.bf16.mxu0 %v9037_v41  ;;  %v10470_v30 = vshrl.u32 %v9124_v0, 16 }
 0x2b1   : > { %v2861_v17 = vmul.f32 0.0, %v2812_v15  ;;  %v2777_v33 = vadd.f32 %v6915_v44, %v2734_v21  ;;  %v9168_v1 = vsel %vm862_vm0, %v3355_v34, %v3356_v14  ;;  %v3161_v32 = vor.u32 %v3160_v9, %v3157_v61 }
 0x2b2   : > { %6496 = vmatprep.mubr.bf16.mxu1 %v9168_v1  ;;  %v3169_v29 = vor.u32 %v3168_v5, %v3165_v63  ;;  %v10472_v50 = vshll.u32 %v9124_v0, 16  ;;  %v10473_v55 = vshrl.u32 %v9146_v54, 16  ;;  %v3174_v44 = vrot.slane %v10470_v30, 3 }
 0x2b3   : > { %v9175_v19 = vpack.c.bf16 %v2861_v17, %v10636_v57  ;;  %v2813_v15 = vmax.f32 %v2777_v33, 0.0  ;;  %v10475_v14 = vshll.u32 %v9146_v54, 16  ;;  %v10480_v5 = vshrl.u32 %v8673_v40, 16 }
 0x2b4   : > { %v9182_v21 = vsel %vm482_vm1, %v3161_v32, %v3169_v29  ;;  %v3177_v61 = vrot.slane %v10472_v50, 4  ;;  %v3182_v9 = vrot.slane %v10473_v55, 3  ;;  %v10481_v30 = vshll.u32 %v8673_v40, 16 }
 0x2b5   : > { %v2862_v63 = vmul.f32 0.0, %v2813_v15  ;;  %v3185_v17 = vrot.slane %v10475_v14, 4  ;;  %v10479_v33 = vshrl.u32 %v9175_v19, 16  ;;  %v10484_v32 = vshrl.u32 %v8718_v39, 16 }
 0x2b6   : > { %v10478_v29 = vshll.u32 %v9175_v19, 16  ;;  %v10487_v15 = vshll.u32 %v8718_v39, 16  ;;  %v3178_v55 = vor.u32 %v3177_v61, %v3174_v44  ;;  %v3358_v14 = vrot.slane %v9175_v19, 4 }
 0x2b7   : > { %v9197_v50 = vpack.c.bf16 %v10636_v57, %v2862_v63  ;;  %v3186_v23 = vor.u32 %v3185_v17, %v3182_v9  ;;  %3701 = vmatmul.mubr.bf16.gmra.mxu0 %v8990_v37  ;;  %v3191_v49 = vrot.slane %v10479_v33, 3  ;;  %v10662_v61 = vshll.u32 %v8682_v10, 16 }
 0x2b8   : > { %v3194_v42 = vrot.slane %v10478_v29, 4  ;;  %3708 = vmatprep.mubr.bf16.mxu0 %v9084_v7  ;;  %v2961_v17 = vrot.slane %v10480_v5, 3  ;;  %v2964_v29 = vrot.slane %v10481_v30, 4  ;;  %v2978_v33 = vrot.slane %v10484_v32, 3 }
 0x2b9   : > { %v3359_v57 = vrot.slane %v9197_v50, 4  ;;  %v9210_v63 = vsel %vm482_vm1, %v3178_v55, %v3186_v23  ;;  %v10488_v44 = vshrl.u32 %v9197_v50, 16  ;;  %v10489_v37 = vshll.u32 %v9197_v50, 16 }
 0x2ba   : > { %10661 = vst [vmem:[#allocation17_spill] sm:$0xff] %v9210_v63  ;;  %v2947_v9 = vrot.slane %v10662_v61, 4  ;;  %v2981_v23 = vrot.slane %v10487_v15, 4  ;;  %v10663_v5 = vshrl.u32 %v8660_v48, 16  ;;  %v10664_v30 = vshll.u32 %v8660_v48, 16 }
 0x2bb   : > { %v3360_v3 = vsel %vm862_vm0, %v3358_v14, %v3359_v57  ;;  %v3199_v55 = vrot.slane %v10488_v44, 3  ;;  %v3202_v61 = vrot.slane %v10489_v37, 4  ;;  %v10665_v32 = vshrl.u32 %v8665_v47, 16 }
 0x2bc   : > { %6497 = vmatmul.mubr.bf16.gmra.mxu1 %v3360_v3  ;;  %v2936_v34 = vrot.slane %v10663_v5, 3  ;;  %v2939_v40 = vrot.slane %v10664_v30, 4  ;;  %v10666_v14 = vshll.u32 %v8665_v47, 16  ;;  %v10667_v15 = vshrl.u32 %v8699_v22, 16 }
 0x2bd   : > { %v2953_v10 = vrot.slane %v10665_v32, 3  ;;  %4070 = vmatprep.mubr.bf16.mxu1 %v8897_v4  ;;  %v10668_v37 = vshll.u32 %v8699_v22, 16  ;;  %v3195_v39 = vor.u32 %v3194_v42, %v3191_v49  ;;  %v3203_v63 = vor.u32 %v3202_v61, %v3199_v55  ;;  %v9255_v42 = vld [vmem:[#allocation7 + $0x230] sm:$0xff]  }
 0x2be   : > { %v2956_v57 = vrot.slane %v10666_v14, 4  ;;  %v2970_v44 = vrot.slane %v10667_v15, 3  ;;  %v2914_v5 = vor.u32 %v8888_v12, %v8884_v20  ;;  %v2948_v30 = vor.u32 %v2947_v9, %v8931_v8 }
 0x2bf   : > { %v2973_v3 = vrot.slane %v10668_v37, 4  ;;  %v2965_v48 = vor.u32 %v2964_v29, %v2961_v17  ;;  %v2982_v32 = vor.u32 %v2981_v23, %v2978_v33  ;;  %v9246_v47 = vsel %vm482_vm1, %v3195_v39, %v3203_v63  ;;  %3709 = vmatmul.mubr.bf16.gmra.mxu0 %v9037_v41 }
 0x2c0   : > { %v2985_v14 = vshrl.u32 %v8692_v18, 16  ;;  %v10498_v15 = vshll.u32 %v8692_v18, 16  ;;  %v2993_v37 = vshrl.u32 %v8709_v60, 16  ;;  %3716 = vmatprep.mubr.bf16.mxu0 %v9129_v56  ;;  %v2906_v20 = vor.u32 %v8880_v53, %v8876_v2 }
 0x2c1   : > { %v2940_v12 = vor.u32 %v2939_v40, %v2936_v34  ;;  %v2957_v8 = vor.u32 %v2956_v57, %v2953_v10  ;;  %v2974_v49 = vor.u32 %v2973_v3, %v2970_v44  ;;  %v2996_v39 = vshll.u32 %v8709_v60, 16 }
 0x2c2   : > { %v10497_v41 = vshrl.u32 %v8760_v52, 16  ;;  %v2915_v33 = vsel %vm482_vm1, %v2906_v20, %v2914_v5  ;;  %v9271_v40 = vrot.slane %v2985_v14, 3  ;;  %v9275_v10 = vrot.slane %v10498_v15, 4 }
 0x2c3   : > { %v9261_v29 = vsel %vm482_vm1, %v2940_v12, %v2948_v30  ;;  %v9264_v63 = vsel %vm482_vm1, %v2957_v8, %v2965_v48  ;;  %v9267_v9 = vsel %vm482_vm1, %v2974_v49, %v2982_v32  ;;  %v9279_v2 = vrot.slane %v2993_v37, 3 }
 0x2c4   : > { %4071 = vmatmul.mubr.bf16.vlgmr.msra.gmra.mxu1 %v2915_v33  ;;  %v10669_v53 = vshrl.u32 %v8752_v24, 16  ;;  %v3002_v34 = vshrl.u32 %v8744_v38, 16  ;;  %v3005_v44 = vshll.u32 %v8744_v38, 16  ;;  %v10670_v17 = vshll.u32 %v8752_v24, 16 }
 0x2c5   : > { %4078 = vmatprep.mubr.bf16.mxu1 %v9261_v29  ;;  %6652 = vmatpush3.bf16.msra.mxu1 %v8828_v36  ;;  %v10671_v55 = vshrl.u32 %v8757_v46, 16  ;;  %v9294_v57 = vrot.slane %v2996_v39, 4  ;;  %v9298_v3 = vrot.slane %v10497_v41, 3  ;;  %v9300_v36 = vld [vmem:[#allocation7 + $0x228] sm:$0xff]   ;;  %v10672_v5 = vshll.u32 %v8757_v46, 16 }
 0x2c6   : > { %v4409_v48 = vrot.slane %v10669_v53, 4  ;;  %v4410_v23 = vrot.slane %v10670_v17, 5  ;;  %6645 = vmatprep.subr.bf16.mxu1 %v9255_v42  ;;  %v10673_v24 = vshrl.u32 %v8778_v26, 16  ;;  %v10674_v12 = vshll.u32 %v8778_v26, 16 }
 0x2c7   : > { %v4412_v61 = vrot.slane %v10671_v55, 4  ;;  %v4413_v30 = vrot.slane %v10672_v5, 5  ;;  %v10675_v49 = vshrl.u32 %v8789_v62, 16  ;;  %v10676_v53 = vshll.u32 %v8789_v62, 16  ;;  %3717 = vmatmul.mubr.bf16.gmra.mxu0 %v9084_v7 }
 0x2c8   : > { %v4416_v32 = vrot.slane %v10673_v24, 4  ;;  %v4411_v20 = vor.u32 %v4410_v23, %v4409_v48  ;;  %v4417_v8 = vrot.slane %v10674_v12, 5  ;;  %v3013_v55 = vshll.u32 %v8760_v52, 16  ;;  %3724 = vmatprep.mubr.bf16.mxu0 %v9168_v1 }
 0x2c9   : > { %v4419_v33 = vrot.slane %v10675_v49, 4  ;;  %v4420_v17 = vrot.slane %v10676_v53, 5  ;;  %v4414_v41 = vor.u32 %v4413_v30, %v4412_v61  ;;  %v10677_v46 = vshrl.u32 %v8805_v25, 16  ;;  %6653 = vmatpush3.bf16.msra.mxu1 %v9255_v42  ;;  %v9325_v61 = vld [vmem:[#allocation7 + $0x220] sm:$0xff]  }
 0x2ca   : > { %v10678_v24 = vshll.u32 %v8805_v25, 16  ;;  %v4418_v26 = vor.u32 %v4417_v8, %v4416_v32  ;;  %v10679_v62 = vshrl.u32 %v8815_v43, 16  ;;  %v10680_v7 = vshll.u32 %v8815_v43, 16  ;;  %6646 = vmatprep.subr.bf16.mxu1 %v9300_v36 }
 0x2cb   : > { %v4423_v5 = vrot.slane %v10677_v46, 4  ;;  %v4421_v23 = vor.u32 %v4420_v17, %v4419_v33  ;;  %v9328_v30 = vsel %vm1975_vm2, %v4411_v20, %v4414_v41  ;;  %v10681_v1 = vshrl.u32 %v8839_v13, 16  ;;  %v10685_v20 = vld [vmem:[#allocation35_spill] sm:$0xff] }
 0x2cc   : > { %v4424_v48 = vrot.slane %v10678_v24, 5  ;;  %v4426_v12 = vrot.slane %v10679_v62, 4  ;;  %v4427_v49 = vrot.slane %v10680_v7, 5  ;;  %v10682_v32 = vshll.u32 %v8839_v13, 16  ;;  %4079 = vmatmul.mubr.bf16.gmra.mxu1 %v8897_v4 }
 0x2cd   : > { %v4430_v53 = vrot.slane %v10681_v1, 4  ;;  %v9335_v33 = vsel %vm1975_vm2, %v4418_v26, %v4421_v23  ;;  %v10683_v43 = vshrl.u32 %v8858_v35, 16  ;;  %v10684_v24 = vshll.u32 %v8858_v35, 16  ;;  %v10688_v1 = vld [vmem:[#allocation36_spill] sm:$0xff]  ;;  %4086 = vmatprep.mubr.bf16.mxu1 %v9264_v63  ;;  %6654 = vmatpush3.bf16.msra.mxu1 %v9300_v36 }
 0x2ce   : > { %v4425_v25 = vor.u32 %v4424_v48, %v4423_v5  ;;  %v4431_v8 = vrot.slane %v10682_v32, 5  ;;  %v4428_v17 = vor.u32 %v4427_v49, %v4426_v12  ;;  %v10686_v5 = vshrl.u32 %v10685_v20, 16  ;;  %6647 = vmatprep.subr.bf16.mxu1 %v9325_v61 }
 0x2cf   : > { %v4433_v46 = vrot.slane %v10683_v43, 4  ;;  %v4434_v62 = vrot.slane %v10684_v24, 5  ;;  %v10687_v7 = vshll.u32 %v10685_v20, 16  ;;  %v10689_v32 = vshrl.u32 %v10688_v1, 16  ;;  %3725 = vmatmul.mubr.bf16.gmra.mxu0 %v9129_v56 }
 0x2d0   : > { %v4432_v41 = vor.u32 %v4431_v8, %v4430_v53  ;;  %v4437_v48 = vrot.slane %v10686_v5, 4  ;;  %v9351_v23 = vsel %vm1975_vm2, %v4425_v25, %v4428_v17  ;;  %v10690_v4 = vshll.u32 %v10688_v1, 16  ;;  %v9358_v8 = vld [vmem:[#allocation7 + $0x218] sm:$0xff]   ;;  %6516 = vmatprep.mubr.bf16.mxu0 %v9261_v29 }
 0x2d1   : > { %v4438_v13 = vrot.slane %v10687_v7, 5  ;;  %v4440_v26 = vrot.slane %v10689_v32, 4  ;;  %v4435_v35 = vor.u32 %v4434_v62, %v4433_v46  ;;  %v10691_v49 = vshrl.u32 %v8938_v6, 16  ;;  %v10695_v1 = vld [vmem:[#allocation24_spill] sm:$0xff]  ;;  %6655 = vmatpush3.bf16.msra.mxu1 %v9325_v61 }
 0x2d2   : > { %v4441_v12 = vrot.slane %v10690_v4, 5  ;;  %v10692_v24 = vshll.u32 %v8938_v6, 16  ;;  %v10693_v5 = vshrl.u32 %v8965_v45, 16  ;;  %v10694_v25 = vshll.u32 %v8965_v45, 16  ;;  %6648 = vmatprep.subr.bf16.mxu1 %v9358_v8 }
 0x2d3   : > { %v4444_v53 = vrot.slane %v10691_v49, 4  ;;  %v4439_v43 = vor.u32 %v4438_v13, %v4437_v48  ;;  %v9367_v46 = vsel %vm1975_vm2, %v4432_v41, %v4435_v35  ;;  %v10696_v32 = vshrl.u32 %v10695_v1, 16 }
 0x2d4   : > { %v4445_v20 = vrot.slane %v10692_v24, 5  ;;  %v4447_v7 = vrot.slane %v10693_v5, 4  ;;  %v4448_v17 = vrot.slane %v10694_v25, 5  ;;  %v4442_v62 = vor.u32 %v4441_v12, %v4440_v26  ;;  %4087 = vmatmul.mubr.bf16.gmra.mxu1 %v9261_v29 }
 0x2d5   : > { %v4451_v4 = vrot.slane %v10696_v32, 4  ;;  %v10697_v49 = vshll.u32 %v10695_v1, 16  ;;  %v10698_v13 = vshrl.u32 %v9009_v31, 16  ;;  %v10699_v45 = vshll.u32 %v9009_v31, 16  ;;  %4094 = vmatprep.mubr.bf16.mxu1 %v9267_v9  ;;  %6656 = vmatpush3.bf16.msra.mxu1 %v9358_v8 }
 0x2d6   : > { %v4446_v6 = vor.u32 %v4445_v20, %v4444_v53  ;;  %v4449_v48 = vor.u32 %v4448_v17, %v4447_v7  ;;  %v9381_v41 = vsel %vm1975_vm2, %v4439_v43, %v4442_v62  ;;  %v10700_v35 = vshrl.u32 %v9031_v28, 16  ;;  %v9388_v20 = vld [vmem:[#allocation7 + $0x210] sm:$0xff]  }
 0x2d7   : > { %v4452_v15 = vrot.slane %v10697_v49, 5  ;;  %v4454_v24 = vrot.slane %v10698_v13, 4  ;;  %v4455_v5 = vrot.slane %v10699_v45, 5  ;;  %v10701_v56 = vshll.u32 %v9031_v28, 16  ;;  %6649 = vmatprep.subr.bf16.mxu1 %v9388_v20  ;;  %6517 = vmatmul.mubr.bf16.vlgmr.msra.gmra.mxu0 %v9264_v63 }
 0x2d8   : > { %v4458_v12 = vrot.slane %v10700_v35, 4  ;;  %v9391_v31 = vsel %vm1975_vm2, %v4446_v6, %v4449_v48  ;;  %v10702_v25 = vshrl.u32 %v9058_v16, 16  ;;  %v10703_v43 = vshll.u32 %v9058_v16, 16  ;;  %v6885_v35 = vld [vmem:[#allocation7 + $0x1b8] sm:$0xff]   ;;  %6520 = vmatprep.mubr.bf16.mxu0 %v9267_v9 }
 0x2d9   : > { %v4453_v26 = vor.u32 %v4452_v15, %v4451_v4  ;;  %v4459_v53 = vrot.slane %v10701_v56, 5  ;;  %v4456_v7 = vor.u32 %v4455_v5, %v4454_v24  ;;  %v10704_v1 = vshrl.u32 %v9078_v51, 16  ;;  %6137 = vmatpush3.bf16.msra.mxu0 %v6885_v35  ;;  %6657 = vmatpush3.bf16.msra.mxu1 %v9388_v20  ;;  %v9453_v35 = vld [vmem:[#allocation7 + $0x200] sm:$0xff]  }
 0x2da   : > { %v4461_v17 = vrot.slane %v10702_v25, 4  ;;  %v4462_v15 = vrot.slane %v10703_v43, 5  ;;  %v10705_v28 = vshll.u32 %v9078_v51, 16  ;;  %v10706_v49 = vshrl.u32 %v9102_v58, 16 }
 0x2db   : > { %v4460_v62 = vor.u32 %v4459_v53, %v4458_v12  ;;  %v4465_v32 = vrot.slane %v10704_v1, 4  ;;  %v9405_v6 = vsel %vm1975_vm2, %v4453_v26, %v4456_v7  ;;  %v10707_v24 = vshll.u32 %v9102_v58, 16  ;;  %v6886_v58 = vld [vmem:[#allocation7 + $0x1f0] sm:$0xff]  }
 0x2dc   : > { %v4466_v4 = vrot.slane %v10705_v28, 5  ;;  %v4468_v13 = vrot.slane %v10706_v49, 4  ;;  %v4463_v48 = vor.u32 %v4462_v15, %v4461_v17  ;;  %v10708_v45 = vshrl.u32 %v9124_v0, 16  ;;  %6138 = vmatprep.subr.bf16.mxu0 %v6886_v58  ;;  %4095 = vmatmul.mubr.bf16.gmra.mxu1 %v9264_v63  ;;  %v6893_v63 = vld [vmem:[#allocation7 + $0x1a0] sm:$0xff]  }
 0x2dd   : > { %v4469_v16 = vrot.slane %v10707_v24, 5  ;;  %v10709_v12 = vshll.u32 %v9124_v0, 16  ;;  %v10710_v29 = vshrl.u32 %v9146_v54, 16  ;;  %v10711_v53 = vshll.u32 %v9146_v54, 16 }
 0x2de   : > { %v4472_v5 = vrot.slane %v10708_v45, 4  ;;  %v4467_v51 = vor.u32 %v4466_v4, %v4465_v32  ;;  %v9421_v25 = vsel %vm1975_vm2, %v4460_v62, %v4463_v48  ;;  %v10712_v43 = vshrl.u32 %v9175_v19, 16  ;;  %v9427_v32 = vld [vmem:[#allocation7 + $0x208] sm:$0xff]  }
 0x2df   : > { %v4473_v56 = vrot.slane %v10709_v12, 5  ;;  %v4475_v26 = vrot.slane %v10710_v29, 4  ;;  %v4476_v7 = vrot.slane %v10711_v53, 5  ;;  %v4470_v17 = vor.u32 %v4469_v16, %v4468_v13  ;;  %v6888_v16 = vld [vmem:[#allocation7 + $0x1b0] sm:$0xff]   ;;  %6650 = vmatprep.subr.bf16.mxu1 %v9427_v32  ;;  %v6890_v29 = vld [vmem:[#allocation7 + $0x1a8] sm:$0xff]   ;;  %v6891_v53 = vld [vmem:[#allocation7 + $0x1e0] sm:$0xff]  }
 0x2e0   : > { %v4479_v15 = vrot.slane %v10712_v43, 4  ;;  %v10713_v1 = vshll.u32 %v9175_v19, 16  ;;  %v10714_v54 = vshrl.u32 %v9197_v50, 16  ;;  %v10715_v24 = vshll.u32 %v9197_v50, 16  ;;  %6139 = vmatpush3.bf16.msra.mxu0 %v6888_v16  ;;  %6658 = vmatpush3.bf16.msra.mxu1 %v9427_v32  ;;  %v6896_v43 = vld [vmem:[#allocation7 + $0x1d0] sm:$0xff]  }
 0x2e1   : > { %v4474_v28 = vor.u32 %v4473_v56, %v4472_v5  ;;  %v4477_v4 = vor.u32 %v4476_v7, %v4475_v26  ;;  %v2999_v62 = vor.u32 %v9294_v57, %v9279_v2  ;;  %v3015_v13 = vrot.slane %v3013_v55, 4  ;;  %6651 = vmatprep.subr.bf16.mxu1 %v9453_v35  ;;  %v9463_v7 = vld [vmem:[#allocation8 + $0x38] sm:$0xff]  }
 0x2e2   : > { %v4480_v0 = vrot.slane %v10713_v1, 5  ;;  %v4482_v49 = vrot.slane %v10714_v54, 4  ;;  %v4483_v45 = vrot.slane %v10715_v24, 5  ;;  %v9439_v19 = vsel %vm1975_vm2, %v4467_v51, %v4470_v17  ;;  %v6889_v51 = vld [vmem:[#allocation7 + $0x1e8] sm:$0xff]   ;;  %v6895_v17 = vld [vmem:[#allocation7 + $0x198] sm:$0xff]   ;;  %v10717_v1 = vld [vmem:[#allocation29_spill] sm:$0xff] }
 0x2e3   : > { %v9443_v5 = vsel %vm1975_vm2, %v4474_v28, %v4477_v4  ;;  %v2991_v12 = vor.u32 %v9275_v10, %v9271_v40  ;;  %v3004_v2 = vrot.slane %v3002_v34, 3  ;;  %v3007_v57 = vrot.slane %v3005_v44, 4  ;;  %6140 = vmatprep.subr.bf16.mxu0 %v6889_v51  ;;  %v6899_v28 = vld [vmem:[#allocation7 + $0x1c8] sm:$0xff]   ;;  %v6902_v24 = vld [vmem:[#allocation7 + $0x180] sm:$0xff]  }
 0x2e4   : > { %v4481_v48 = vor.u32 %v4480_v0, %v4479_v15  ;;  %v4484_v50 = vor.u32 %v4483_v45, %v4482_v49  ;;  %v3016_v10 = vor.u32 %v3015_v13, %v9298_v3  ;;  %6141 = vmatpush3.bf16.msra.mxu0 %v6890_v29  ;;  %v6894_v3 = vld [vmem:[#allocation7 + $0x1d8] sm:$0xff]   ;;  %6659 = vmatpush3.bf16.msra.mxu1 %v9453_v35  ;;  %v10716_v15 = vld [vmem:[#allocation37_spill] sm:$0xff]  ;;  %v6898_v0 = vld [vmem:[#allocation7 + $0x190] sm:$0xff]  }
 0x2e5   : > { %v3000_v40 = vsel %vm482_vm1, %v2991_v12, %v2999_v62  ;;  %v3008_v26 = vor.u32 %v3007_v57, %v3004_v2  ;;  %6142 = vmatprep.subr.bf16.mxu0 %v6891_v53  ;;  %6596 = vmatprep.subr.bf16.mxu1 %v9463_v7  ;;  %v6900_v4 = vld [vmem:[#allocation7 + $0x188] sm:$0xff]   ;;  %v10719_v49 = vld [vmem:[#allocation25_spill] sm:$0xff]  ;;  %v6916_v45 = vld [vmem:[#allocation7 + $0x238] sm:$0xff]  }
 0x2e6   : > { %v9456_v56 = vsel %vm1975_vm2, %v4481_v48, %v4484_v50  ;;  %4102 = vmatprep.mubr.bf16.mxu1 %v3000_v40  ;;  %6521 = vmatmul.mubr.bf16.gmra.mxu0 %v3000_v40  ;;  %v10718_v54 = vld [vmem:[#allocation38_spill] sm:$0xff]  ;;  %v10721_v13 = vld [vmem:[#allocation21_spill] sm:$0xff] }
 0x2e7   : > { %v3017_v58 = vsel %vm482_vm1, %v3008_v26, %v3016_v10  ;;  %4103 = vmatmul.mubr.bf16.gmra.mxu1 %v9267_v9  ;;  %v6901_v9 = vld [vmem:[#allocation7 + $0x1c0] sm:$0xff]   ;;  %v10720_v62 = vld [vmem:[#allocation26_spill] sm:$0xff]  ;;  %v10722_v48 = vshrl.u32 %v10721_v13, 16  ;;  %v10723_v50 = vshll.u32 %v10721_v13, 16 }
 0x2e8   : > { %6524 = vmatprep.mubr.bf16.mxu0 %v3017_v58  ;;  %4110 = vmatprep.mubr.bf16.mxu1 %v3017_v58  ;;  %v10724_v2 = vld [vmem:[#allocation17_spill] sm:$0xff]  ;;  %v10725_v57 = vld [vmem:[#allocation18_spill] sm:$0xff] }
 0x2e9   : > { %6143 = vmatpush3.bf16.msra.mxu0 %v6893_v63  ;;  %v4370_v16 = vrot.slane %v10722_v48, 4  ;;  %v4371_v12 = vrot.slane %v10723_v50, 5  ;;  %v10726_v51 = vshrl.u32 %v10725_v57, 16  ;;  %v10727_v10 = vshll.u32 %v10725_v57, 16  ;;  %v10737_v50 = vld [vmem:[#allocation30_spill] sm:$0xff] }
 0x2ea   : > { %6144 = vmatprep.subr.bf16.mxu0 %v6894_v3 }
 0x2eb   : > { %v4368_v29 = vrot.slane %v10727_v10, 5  ;;  %v4372_v26 = vor.u32 %v4371_v12, %v4370_v16  ;;  %v10738_v12 = vshrl.u32 %v10737_v50, 16 }
 0x2ed   : > { %6145 = vmatpush3.bf16.msra.mxu0 %v6895_v17  ;;  %v4374_v57 = vrot.slane %v10738_v12, 4 }
 0x2ee   : > { %6525 = vmatmul.mubr.bf16.gmra.mxu0 %v10716_v15  ;;  %6146 = vmatprep.subr.bf16.mxu0 %v6896_v43 }
 0x2ef   : > { %6528 = vmatprep.mubr.bf16.mxu0 %v10717_v1  ;;  %4111 = vmatmul.mubr.bf16.gmra.mxu1 %v3000_v40  ;;  %v4367_v40 = vrot.slane %v10726_v51, 4 }
 0x2f0   : > { %4118 = vmatprep.mubr.bf16.mxu1 %v10716_v15 }
 0x2f1   : > { %6147 = vmatpush3.bf16.msra.mxu0 %v6898_v0  ;;  %v4369_v53 = vor.u32 %v4368_v29, %v4367_v40 }
 0x2f2   : > { %6148 = vmatprep.subr.bf16.mxu0 %v6899_v28 }
 0x2f5   : > { %6149 = vmatpush3.bf16.msra.mxu0 %v6900_v4 }
 0x2f6   : > { %6529 = vmatmul.mubr.bf16.gmra.mxu0 %v10718_v54  ;;  %6150 = vmatprep.subr.bf16.mxu0 %v6901_v9 }
 0x2f7   : > { %6532 = vmatprep.mubr.bf16.mxu0 %v10719_v49  ;;  %4119 = vmatmul.mubr.bf16.gmra.mxu1 %v3017_v58  ;;  %v10728_v58 = vld [vmem:[#allocation22_spill] sm:$0xff] }
 0x2f8   : > { %4126 = vmatprep.mubr.bf16.mxu1 %v10717_v1  ;;  %v10729_v63 = vshrl.u32 %v10728_v58, 16  ;;  %v10730_v17 = vshll.u32 %v10728_v58, 16 }
 0x2f9   : > { %6151 = vmatpush3.bf16.msra.mxu0 %v6902_v24 }
 0x2fa   : > { %6548 = vmatprep.subr.bf16.mxu0 %v6916_v45  ;;  %v4363_v3 = vrot.slane %v10729_v63, 4  ;;  %v4364_v43 = vrot.slane %v10730_v17, 5  ;;  %v10740_v17 = vld [vmem:[#allocation32_spill] sm:$0xff] }
 0x2fc   : > { %v4365_v40 = vor.u32 %v4364_v43, %v4363_v3  ;;  %v10743_v43 = vld [vmem:[#allocation31_spill] sm:$0xff] }
 0x2fe   : > { %6533 = vmatmul.mubr.bf16.gmra.mxu0 %v10720_v62 }
 0x2ff   : > { %6536 = vmatprep.mubr.bf16.mxu0 %v9116_v59  ;;  %4127 = vmatmul.mubr.bf16.gmra.mxu1 %v10716_v15  ;;  %v4373_v15 = vsel %vm1975_vm2, %v4369_v53, %v4372_v26 }
 0x300   : > { %4134 = vmatprep.mubr.bf16.mxu1 %v10718_v54 }
 0x306   : > { %6537 = vmatmul.mubr.bf16.gmra.mxu0 %v9139_v27 }
 0x307   : > { %6540 = vmatprep.mubr.bf16.mxu0 %v9158_v11  ;;  %4135 = vmatmul.mubr.bf16.gmra.mxu1 %v10717_v1  ;;  %v10731_v1 = vld [vmem:[#allocation33_spill] sm:$0xff] }
 0x308   : > { %4142 = vmatprep.mubr.bf16.mxu1 %v10719_v49  ;;  %v10732_v0 = vshrl.u32 %v10731_v1, 16  ;;  %v10733_v4 = vshll.u32 %v10731_v1, 16  ;;  %v10741_v1 = vshrl.u32 %v10740_v17, 16 }
 0x30a   : > { %v4377_v28 = vrot.slane %v10732_v0, 4  ;;  %v4378_v9 = vrot.slane %v10733_v4, 5  ;;  %v4384_v0 = vrot.slane %v10741_v1, 4  ;;  %v10742_v4 = vshll.u32 %v10740_v17, 16 }
 0x30b   : > { %v10749_v1 = vshrl.u32 %v8699_v22, 16 }
 0x30c   : > { %v4379_v10 = vor.u32 %v4378_v9, %v4377_v28  ;;  %v4385_v3 = vrot.slane %v10742_v4, 5  ;;  %v10744_v28 = vshrl.u32 %v10743_v43, 16 }
 0x30e   : > { %6541 = vmatmul.mubr.bf16.gmra.mxu0 %v9182_v21  ;;  %v4381_v9 = vrot.slane %v10744_v28, 4 }
 0x30f   : > { %6544 = vmatprep.mubr.bf16.mxu0 %v10724_v2  ;;  %4143 = vmatmul.mubr.bf16.gmra.mxu1 %v10718_v54  ;;  %v10734_v54 = vld [vmem:[#allocation23_spill] sm:$0xff] }
 0x310   : > { %4150 = vmatprep.mubr.bf16.mxu1 %v10720_v62  ;;  %v10735_v24 = vshrl.u32 %v10734_v54, 16  ;;  %v10736_v48 = vshll.u32 %v10734_v54, 16  ;;  %v10745_v54 = vshll.u32 %v10743_v43, 16 }
 0x312   : > { %v4360_v13 = vrot.slane %v10735_v24, 4  ;;  %v4361_v16 = vrot.slane %v10736_v48, 5  ;;  %v4382_v24 = vrot.slane %v10745_v54, 5 }
 0x314   : > { %v4362_v29 = vor.u32 %v4361_v16, %v4360_v13  ;;  %v4386_v16 = vor.u32 %v4385_v3, %v4384_v0  ;;  %v4383_v12 = vor.u32 %v4382_v24, %v4381_v9  ;;  %v10750_v0 = vshll.u32 %v8699_v22, 16 }
 0x316   : > { %6545 = vmatmul.mubr.bf16.gmra.mxu0 %v9246_v47  ;;  %v10739_v47 = vshll.u32 %v10737_v50, 16  ;;  %v4366_v53 = vsel %vm1975_vm2, %v4362_v29, %v4365_v40  ;;  %v5880_v58 = vpop.f32.mrf.mxu0  ;;  %v4389_v4 = vrot.slane %v10750_v0, 5  ;;  %v4403_v0 = vrot.slane %v3005_v44, 5 }
 0x317   : > { %4729 = vmatprep.mubr.bf16.mxu0 %v4373_v15  ;;  %4151 = vmatmul.mubr.bf16.gmra.mxu1 %v10719_v49 }
 0x318   : > { %v4375_v51 = vrot.slane %v10739_v47, 5  ;;  %4158 = vmatprep.mubr.bf16.mxu1 %v9116_v59  ;;  %v5881_v49 = vpop.f32.mrf.mxu0 }
 0x319   : > { %v5882_v13 = vadd.f32 %v5881_v49, %v5880_v58 }
 0x31a   : > { %v4376_v26 = vor.u32 %v4375_v51, %v4374_v57  ;;  %v5883_v48 = vpop.f32.mrf.mxu0 }
 0x31c   : > { %v9517_v63 = vsel %vm1975_vm2, %v4376_v26, %v4379_v10  ;;  %v6470_v50 = vpop.f32.mrf.mxu1  ;;  %v9536_v10 = vsel %vm1975_vm2, %v4383_v12, %v4386_v16 }
 0x31e   : > { %4730 = vmatmul.mubr.bf16.vlgmr.msra.gmra.mxu0 %v4366_v53  ;;  %v3767_v47 = vpop.f32.mrf.mxu1 }
 0x31f   : > { %4737 = vmatprep.mubr.bf16.mxu0 %v9517_v63  ;;  %6549 = vmatpush3.bf16.msra.mxu0 %v6916_v45  ;;  %v5884_v45 = vpop.f32.mrf.mxu0  ;;  %v9533_v40 = vadd.f32 %v5882_v13, %v3767_v47  ;;  %v10751_v47 = vshll.u32 %v8692_v18, 16 }
 0x320   : > { %6550 = vmatprep.subr.bf16.mxu0 %v9255_v42  ;;  %4159 = vmatmul.mubr.bf16.gmra.mxu1 %v10720_v62  ;;  %v5885_v57 = vadd.f32 %v5884_v45, %v5883_v48  ;;  %v10746_v62 = vld [vmem:[#allocation34_spill] sm:$0xff] }
 0x321   : > { %4166 = vmatprep.mubr.bf16.mxu1 %v9139_v27  ;;  %v5886_v51 = vpop.f32.mrf.mxu0  ;;  %v10747_v29 = vshrl.u32 %v10746_v62, 16  ;;  %v10748_v53 = vshll.u32 %v10746_v62, 16 }
 0x323   : > { %6551 = vmatpush3.bf16.msra.mxu0 %v9255_v42  ;;  %v4391_v26 = vrot.slane %v10747_v29, 4  ;;  %v4392_v58 = vrot.slane %v10748_v53, 5  ;;  %v6471_v42 = vpop.f32.mrf.mxu1  ;;  %v5887_v17 = vpop.f32.mrf.mxu0 }
 0x324   : > { %6552 = vmatprep.subr.bf16.mxu0 %v9300_v36  ;;  %v5888_v3 = vadd.f32 %v5887_v17, %v5886_v51  ;;  %v4396_v51 = vrot.slane %v10751_v47, 5  ;;  %v4406_v17 = vrot.slane %v3013_v55, 5 }
 0x325   : > { %v3770_v49 = vpop.f32.mrf.mxu1  ;;  %v5889_v43 = vpop.f32.mrf.mxu0  ;;  %v4393_v9 = vor.u32 %v4392_v58, %v4391_v26 }
 0x326   : > { %4738 = vmatmul.mubr.bf16.gmra.mxu0 %v4373_v15  ;;  %v4388_v15 = vrot.slane %v10749_v1, 4  ;;  %v9549_v28 = vadd.f32 %v5885_v57, %v3770_v49  ;;  %v9552_v54 = vadd.f32 %v6470_v50, %v5888_v3  ;;  %v4399_v50 = vrot.slane %v2996_v39, 5 }
 0x327   : > { %4745 = vmatprep.mubr.bf16.mxu0 %v9536_v10  ;;  %6553 = vmatpush3.bf16.msra.mxu0 %v9300_v36  ;;  %v6474_v36 = vpop.f32.mrf.mxu1  ;;  %v5890_v24 = vpop.f32.mrf.mxu0  ;;  %v4395_v57 = vrot.slane %v2985_v14, 4 }
 0x328   : > { %6554 = vmatprep.subr.bf16.mxu0 %v9325_v61  ;;  %4167 = vmatmul.mubr.bf16.gmra.mxu1 %v9116_v59  ;;  %v4390_v22 = vor.u32 %v4389_v4, %v4388_v15  ;;  %v5891_v13 = vadd.f32 %v5890_v24, %v5889_v43  ;;  %v4398_v59 = vrot.slane %v2993_v37, 4  ;;  %v4402_v15 = vrot.slane %v3002_v34, 4 }
 0x329   : > { %4174 = vmatprep.mubr.bf16.mxu1 %v9158_v11  ;;  %v5892_v48 = vpop.f32.mrf.mxu0  ;;  %v3783_v16 = vpop.f32.mrf.mxu1  ;;  %v4397_v26 = vor.u32 %v4396_v51, %v4395_v57  ;;  %v6907_v57 = vld [vmem:[#allocation8 + $0x30] sm:$0xff]  }
 0x32a   : > { %v9559_v45 = vsel %vm1975_vm2, %v4390_v22, %v4393_v9  ;;  %v9565_v12 = vadd.f32 %v6471_v42, %v5891_v13  ;;  %v4400_v60 = vor.u32 %v4399_v50, %v4398_v59  ;;  %v4404_v43 = vor.u32 %v4403_v0, %v4402_v15  ;;  %v6910_v15 = vld [vmem:[#allocation8 + $0x18] sm:$0xff]  }
 0x32b   : > { %6555 = vmatpush3.bf16.msra.mxu0 %v9325_v61  ;;  %v5893_v61 = vpop.f32.mrf.mxu0  ;;  %v6475_v37 = vpop.f32.mrf.mxu1 }
 0x32c   : > { %6556 = vmatprep.subr.bf16.mxu0 %v9358_v8  ;;  %v5894_v62 = vadd.f32 %v5893_v61, %v5892_v48  ;;  %v9582_v58 = vsel %vm1975_vm2, %v4397_v26, %v4400_v60 }
 0x32d   : > { %v5895_v29 = vpop.f32.mrf.mxu0  ;;  %v3786_v14 = vpop.f32.mrf.mxu1 }
 0x32e   : > { %4746 = vmatmul.mubr.bf16.gmra.mxu0 %v9517_v63  ;;  %v9575_v39 = vadd.f32 %v5894_v62, %v3783_v16 }
 0x32f   : > { %4753 = vmatprep.mubr.bf16.mxu0 %v9559_v45  ;;  %6557 = vmatpush3.bf16.msra.mxu0 %v9358_v8  ;;  %v5896_v8 = vpop.f32.mrf.mxu0  ;;  %v6478_v3 = vpop.f32.mrf.mxu1 }
 0x330   : > { %6558 = vmatprep.subr.bf16.mxu0 %v9388_v20  ;;  %4175 = vmatmul.mubr.bf16.gmra.mxu1 %v9139_v27  ;;  %v5897_v18 = vadd.f32 %v5896_v8, %v5895_v29  ;;  %v10752_v27 = vshrl.u32 %v8760_v52, 16  ;;  %v6908_v29 = vld [vmem:[#allocation8 + $0x28] sm:$0xff]  }
 0x331   : > { %4182 = vmatprep.mubr.bf16.mxu1 %v9182_v21  ;;  %v5898_v53 = vpop.f32.mrf.mxu0  ;;  %v3799_v9 = vpop.f32.mrf.mxu1 }
 0x332   : > { %v4405_v42 = vrot.slane %v10752_v27, 4  ;;  %v9588_v1 = vadd.f32 %v5897_v18, %v3786_v14 }
 0x333   : > { %6559 = vmatpush3.bf16.msra.mxu0 %v9388_v20  ;;  %v5899_v20 = vpop.f32.mrf.mxu0 }
 0x334   : > { %6560 = vmatprep.subr.bf16.mxu0 %v9427_v32  ;;  %v5900_v4 = vadd.f32 %v5899_v20, %v5898_v53  ;;  %v4407_v52 = vor.u32 %v4406_v17, %v4405_v42  ;;  %v6909_v53 = vld [vmem:[#allocation8 + $0x20] sm:$0xff]  }
 0x335   : > { %v5901_v49 = vpop.f32.mrf.mxu0 }
 0x336   : > { %4754 = vmatmul.mubr.bf16.gmra.mxu0 %v9536_v10  ;;  %v9598_v55 = vadd.f32 %v6474_v36, %v5900_v4  ;;  %v4408_v44 = vsel %vm1975_vm2, %v4404_v43, %v4407_v52  ;;  %v6479_v36 = vpop.f32.mrf.mxu1  ;;  %v6911_v43 = vld [vmem:[#allocation8 + $0x10] sm:$0xff]  }
 0x337   : > { %4761 = vmatprep.mubr.bf16.mxu0 %v9582_v58  ;;  %6561 = vmatpush3.bf16.msra.mxu0 %v9427_v32  ;;  %v5902_v32 = vpop.f32.mrf.mxu0 }
 0x338   : > { %6562 = vmatprep.subr.bf16.mxu0 %v9453_v35  ;;  %4183 = vmatmul.mubr.bf16.gmra.mxu1 %v9158_v11  ;;  %v5903_v34 = vadd.f32 %v5902_v32, %v5901_v49  ;;  %v3802_v16 = vpop.f32.mrf.mxu1 }
 0x339   : > { %4190 = vmatprep.mubr.bf16.mxu1 %v10724_v2  ;;  %v5904_v38 = vpop.f32.mrf.mxu0 }
 0x33a   : > { %v9604_v24 = vadd.f32 %v6475_v37, %v5903_v34  ;;  %v6482_v51 = vpop.f32.mrf.mxu1 }
 0x33b   : > { %6563 = vmatpush3.bf16.msra.mxu0 %v9453_v35  ;;  %v5905_v11 = vpop.f32.mrf.mxu0 }
 0x33c   : > { %v5906_v22 = vadd.f32 %v5905_v11, %v5904_v38  ;;  %v3815_v8 = vpop.f32.mrf.mxu1  ;;  %v6912_v11 = vld [vmem:[#allocation8 + $0x8] sm:$0xff]  }
 0x33d   : > { %v5907_v13 = vpop.f32.mrf.mxu0 }
 0x33e   : > { %4762 = vmatmul.mubr.bf16.gmra.mxu0 %v9559_v45  ;;  %v9607_v2 = vadd.f32 %v5906_v22, %v3799_v9  ;;  %v6483_v42 = vpop.f32.mrf.mxu1 }
 0x33f   : > { %4769 = vmatprep.mubr.bf16.mxu0 %v4408_v44  ;;  %v5908_v35 = vpop.f32.mrf.mxu0 }
 0x340   : > { %4191 = vmatmul.mubr.bf16.gmra.mxu1 %v9182_v21  ;;  %v5909_v48 = vadd.f32 %v5908_v35, %v5907_v13  ;;  %v3818_v4 = vpop.f32.mrf.mxu1 }
 0x341   : > { %6572 = vmatprep.mubr.bf16.mxu1 %v4408_v44  ;;  %v5910_v59 = vpop.f32.mrf.mxu0 }
 0x342   : > { %v9610_v50 = vadd.f32 %v5909_v48, %v3802_v16  ;;  %v6913_v16 = vld [vmem:[#allocation8] sm:$0xff]  }
 0x343   : > { %v5911_v61 = vpop.f32.mrf.mxu0 }
 0x344   : > { %v5912_v47 = vadd.f32 %v5911_v61, %v5910_v59 }
 0x345   : > { %v5913_v62 = vpop.f32.mrf.mxu0 }
 0x346   : > { %4770 = vmatmul.mubr.bf16.gmra.mxu0 %v9582_v58  ;;  %v9614_v21 = vadd.f32 %v6478_v3, %v5912_v47 }
 0x347   : > { %4777 = vmatprep.mubr.bf16.mxu0 %v9328_v30  ;;  %v5914_v37 = vpop.f32.mrf.mxu0 }
 0x348   : > { %6573 = vmatmul.mubr.bf16.vlgmr.msra.gmra.mxu1 %v9328_v30  ;;  %v5915_v60 = vadd.f32 %v5914_v37, %v5913_v62 }
 0x349   : > { %6576 = vmatprep.mubr.bf16.mxu1 %v9335_v33  ;;  %6597 = vmatpush3.bf16.msra.mxu1 %v9463_v7  ;;  %v5916_v26 = vpop.f32.mrf.mxu0 }
 0x34a   : > { %6598 = vmatprep.subr.bf16.mxu1 %v6907_v57  ;;  %v9618_v18 = vadd.f32 %v6479_v36, %v5915_v60  ;;  %v6486_v52 = vpop.f32.mrf.mxu1 }
 0x34b   : > { %v5917_v14 = vpop.f32.mrf.mxu0 }
 0x34c   : > { %v5918_v27 = vadd.f32 %v5917_v14, %v5916_v26 }
 0x34d   : > { %6599 = vmatpush3.bf16.msra.mxu1 %v6907_v57  ;;  %v5919_v17 = vpop.f32.mrf.mxu0 }
 0x34e   : > { %4778 = vmatmul.mubr.bf16.gmra.mxu0 %v4408_v44  ;;  %6600 = vmatprep.subr.bf16.mxu1 %v6908_v29  ;;  %v9622_v7 = vadd.f32 %v5918_v27, %v3815_v8  ;;  %v3831_v44 = vpop.f32.mrf.mxu1 }
 0x34f   : > { %4785 = vmatprep.mubr.bf16.mxu0 %v9335_v33  ;;  %v5920_v20 = vpop.f32.mrf.mxu0 }
 0x350   : > { %6577 = vmatmul.mubr.bf16.gmra.mxu1 %v9351_v23  ;;  %v5921_v0 = vadd.f32 %v5920_v20, %v5919_v17  ;;  %v6487_v35 = vpop.f32.mrf.mxu1 }
 0x351   : > { %6580 = vmatprep.mubr.bf16.mxu1 %v9367_v46  ;;  %6601 = vmatpush3.bf16.msra.mxu1 %v6908_v29  ;;  %v5922_v3 = vpop.f32.mrf.mxu0 }
 0x352   : > { %6602 = vmatprep.subr.bf16.mxu1 %v6909_v53  ;;  %v9626_v49 = vadd.f32 %v5921_v0, %v3818_v4  ;;  %v3834_v47 = vpop.f32.mrf.mxu1  ;;  %v6918_v0 = vld [vmem:[%s7343_s25 + $0x8] sm:$0xff] }
 0x353   : > { %v5923_v32 = vpop.f32.mrf.mxu0 }
 0x354   : > { %v5924_v34 = vadd.f32 %v5923_v32, %v5922_v3 }
 0x355   : > { %6603 = vmatpush3.bf16.msra.mxu1 %v6909_v53  ;;  %v5925_v9 = vpop.f32.mrf.mxu0 }
 0x356   : > { %4786 = vmatmul.mubr.bf16.gmra.mxu0 %v9328_v30  ;;  %6604 = vmatprep.subr.bf16.mxu1 %v6910_v15  ;;  %v9630_v38 = vadd.f32 %v6482_v51, %v5924_v34 }
 0x357   : > { %4793 = vmatprep.mubr.bf16.mxu0 %v9351_v23  ;;  %v5926_v30 = vpop.f32.mrf.mxu0 }
 0x358   : > { %6581 = vmatmul.mubr.bf16.gmra.mxu1 %v9381_v41  ;;  %v5927_v22 = vadd.f32 %v5926_v30, %v5925_v9 }
 0x359   : > { %6584 = vmatprep.mubr.bf16.mxu1 %v9391_v31  ;;  %6605 = vmatpush3.bf16.msra.mxu1 %v6910_v15  ;;  %v5928_v36 = vpop.f32.mrf.mxu0  ;;  %v6917_v15 = vld [vmem:[%s7343_s25] sm:$0xff] }
 0x35a   : > { %6606 = vmatprep.subr.bf16.mxu1 %v6911_v43  ;;  %v9634_v13 = vadd.f32 %v6483_v42, %v5927_v22  ;;  %v6490_v62 = vpop.f32.mrf.mxu1  ;;  %v5161_v4 = vpack.c.bf16 %v6918_v0, %v6917_v15  ;;  %v6919_v22 = vld [vmem:[%s7343_s25 + $0x20] sm:$0xff]  ;;  %v6924_v15 = vld [vmem:[%s7343_s25 + $0x48] sm:$0xff] }
 0x35b   : > { %v5929_v48 = vpop.f32.mrf.mxu0 }
 0x35c   : > { %v5930_v59 = vadd.f32 %v5929_v48, %v5928_v36  ;;  %v3847_v26 = vpop.f32.mrf.mxu1  ;;  %v6920_v36 = vld [vmem:[%s7343_s25 + $0x28] sm:$0xff] }
 0x35d   : > { %6607 = vmatpush3.bf16.msra.mxu1 %v6911_v43  ;;  %v5931_v61 = vpop.f32.mrf.mxu0 }
 0x35e   : > { %4794 = vmatmul.mubr.bf16.gmra.mxu0 %v9335_v33  ;;  %6608 = vmatprep.subr.bf16.mxu1 %v6912_v11  ;;  %v9638_v57 = vadd.f32 %v5930_v59, %v3831_v44 }
 0x35f   : > { %4801 = vmatprep.mubr.bf16.mxu0 %v9367_v46  ;;  %v5932_v33 = vpop.f32.mrf.mxu0 }
 0x360   : > { %6585 = vmatmul.mubr.bf16.gmra.mxu1 %v9405_v6  ;;  %v5933_v51 = vadd.f32 %v5932_v33, %v5931_v61  ;;  %v10753_v61 = vld [vmem:[#allocation20_spill] sm:$0xff] }
 0x361   : > { %6588 = vmatprep.mubr.bf16.mxu1 %v9421_v25  ;;  %6609 = vmatpush3.bf16.msra.mxu1 %v6912_v11  ;;  %v5934_v37 = vpop.f32.mrf.mxu0 }
 0x362   : > { %6610 = vmatprep.subr.bf16.mxu1 %v6913_v16  ;;  %v9642_v29 = vadd.f32 %v5933_v51, %v3834_v47  ;;  %v10754_v47 = vld [vmem:[#allocation19_spill] sm:$0xff] }
 0x363   : > { %v5935_v60 = vpop.f32.mrf.mxu0  ;;  %v10755_v33 = vpack.c.bf16 %v10753_v61, %v10754_v47 }
 0x364   : > { %v5936_v8 = vadd.f32 %v5935_v60, %v5934_v37 }
 0x365   : > { %6611 = vmatpush3.bf16.msra.mxu1 %v6913_v16  ;;  %v5937_v14 = vpop.f32.mrf.mxu0 }
 0x366   : > { %4802 = vmatmul.mubr.bf16.gmra.mxu0 %v9351_v23  ;;  %v9646_v53 = vadd.f32 %v6486_v52, %v5936_v8  ;;  %v6491_v23 = vpop.f32.mrf.mxu1 }
 0x367   : > { %4809 = vmatprep.mubr.bf16.mxu0 %v9381_v41  ;;  %v5938_v27 = vpop.f32.mrf.mxu0 }
 0x368   : > { %6589 = vmatmul.mubr.bf16.gmra.mxu1 %v9439_v19  ;;  %v5939_v42 = vadd.f32 %v5938_v27, %v5937_v14  ;;  %v3850_v32 = vpop.f32.mrf.mxu1  ;;  %v6922_v14 = vld [vmem:[%s7343_s25 + $0x38] sm:$0xff] }
 0x369   : > { %6592 = vmatprep.mubr.bf16.mxu1 %v9443_v5  ;;  %v5940_v17 = vpop.f32.mrf.mxu0 }
 0x36a   : > { %v9650_v20 = vadd.f32 %v6487_v35, %v5939_v42  ;;  %v5163_v35 = vpack.c.bf16 %v6920_v36, %v6919_v22  ;;  %v6925_v22 = vld [vmem:[%s7343_s25 + $0x50] sm:$0xff]  ;;  %v6926_v36 = vld [vmem:[%s7343_s25 + $0x58] sm:$0xff] }
 0x36b   : > { %v5941_v3 = vpop.f32.mrf.mxu0  ;;  %v6494_v9 = vpop.f32.mrf.mxu1 }
 0x36c   : > { %v5942_v52 = vadd.f32 %v5941_v3, %v5940_v17  ;;  %v6923_v17 = vld [vmem:[%s7343_s25 + $0x40] sm:$0xff] }
 0x36d   : > { %v5943_v43 = vpop.f32.mrf.mxu0  ;;  %v3863_v48 = vpop.f32.mrf.mxu1  ;;  %v5165_v0 = vpack.c.bf16 %v6924_v15, %v6923_v17 }
 0x36e   : > { %4810 = vmatmul.mubr.bf16.gmra.mxu0 %v9367_v46  ;;  %v9656_v34 = vadd.f32 %v5942_v52, %v3847_v26  ;;  %v6921_v26 = vld [vmem:[%s7343_s25 + $0x30] sm:$0xff] }
 0x36f   : > { %4817 = vmatprep.mubr.bf16.mxu0 %v9391_v31  ;;  %v5944_v46 = vpop.f32.mrf.mxu0  ;;  %v6495_v51 = vpop.f32.mrf.mxu1  ;;  %v5164_v27 = vpack.c.bf16 %v6922_v14, %v6921_v26 }
 0x370   : > { %6593 = vmatmul.mubr.bf16.gmra.mxu1 %v9456_v56  ;;  %v5945_v44 = vadd.f32 %v5944_v46, %v5943_v43 }
 0x371   : > { %6612 = vmatprep.mubr.bf16.mxu1 %v5161_v4  ;;  %v5946_v30 = vpop.f32.mrf.mxu0 }
 0x372   : > { %v9659_v11 = vadd.f32 %v5945_v44, %v3850_v32 }
 0x373   : > { %v5947_v56 = vpop.f32.mrf.mxu0 }
 0x374   : > { %v5948_v16 = vadd.f32 %v5947_v56, %v5946_v30 }
 0x375   : > { %v5949_v59 = vpop.f32.mrf.mxu0 }
 0x376   : > { %4818 = vmatmul.mubr.bf16.gmra.mxu0 %v9381_v41  ;;  %v9667_v41 = vadd.f32 %v6490_v62, %v5948_v16  ;;  %v3866_v62 = vpop.f32.mrf.mxu1  ;;  %v6927_v16 = vld [vmem:[%s7343_s25 + $0x60] sm:$0xff] }
 0x377   : > { %4825 = vmatprep.mubr.bf16.mxu0 %v9405_v6  ;;  %v5950_v37 = vpop.f32.mrf.mxu0 }
 0x378   : > { %6613 = vmatmul.mubr.bf16.vlgmr.msra.gmra.mxu1 %v10755_v33  ;;  %v5951_v60 = vadd.f32 %v5950_v37, %v5949_v59  ;;  %v6928_v59 = vld [vmem:[%s7343_s25 + $0x68] sm:$0xff] }
 0x379   : > { %6616 = vmatprep.mubr.bf16.mxu1 %v5163_v35  ;;  %v5952_v8 = vpop.f32.mrf.mxu0  ;;  %v5166_v35 = vpack.c.bf16 %v6926_v36, %v6925_v22 }
 0x37a   : > { %v9672_v42 = vadd.f32 %v6491_v23, %v5951_v60 }
 0x37b   : > { %v5953_v4 = vpop.f32.mrf.mxu0 }
 0x37c   : > { %v5954_v3 = vadd.f32 %v5953_v4, %v5952_v8  ;;  %v9677_v32 = vpop.f32.mrf.mxu1 }
 0x37d   : > { %v5955_v52 = vpop.f32.mrf.mxu0 }
 0x37e   : > { %4826 = vmatmul.mubr.bf16.gmra.mxu0 %v9391_v31  ;;  %v9679_v31 = vadd.f32 %v5954_v3, %v3863_v48  ;;  %v3879_v43 = vpop.f32.mrf.mxu1  ;;  %v5167_v48 = vpack.c.bf16 %v6928_v59, %v6927_v16 }
 0x37f   : > { %4833 = vmatprep.mubr.bf16.mxu0 %v9421_v25  ;;  %v5956_v23 = vpop.f32.mrf.mxu0 }
 0x380   : > { %6617 = vmatmul.mubr.bf16.gmra.mxu1 %v5164_v27  ;;  %v5957_v46 = vadd.f32 %v5956_v23, %v5955_v52  ;;  %v9682_v30 = vpop.f32.mrf.mxu1  ;;  %v6931_v52 = vld [vmem:[%s7343_s25 + $0x80] sm:$0xff]  ;;  %v6932_v23 = vld [vmem:[%s7343_s25 + $0x88] sm:$0xff] }
 0x381   : > { %6620 = vmatprep.mubr.bf16.mxu1 %v5165_v0  ;;  %v5958_v44 = vpop.f32.mrf.mxu0  ;;  %v6929_v0 = vld [vmem:[%s7343_s25 + $0x70] sm:$0xff] }
 0x382   : > { %v9686_v56 = vadd.f32 %v5957_v46, %v3866_v62  ;;  %v3882_v47 = vpop.f32.mrf.mxu1  ;;  %v6930_v62 = vld [vmem:[%s7343_s25 + $0x78] sm:$0xff] }
 0x383   : > { %v5959_v61 = vpop.f32.mrf.mxu0  ;;  %v5168_v4 = vpack.c.bf16 %v6930_v62, %v6929_v0 }
 0x384   : > { %v5960_v33 = vadd.f32 %v5959_v61, %v5958_v44  ;;  %v6016_v60 = vpop.f32.mrf.mxu1 }
 0x385   : > { %v5961_v37 = vpop.f32.mrf.mxu0 }
 0x386   : > { %4834 = vmatmul.mubr.bf16.gmra.mxu0 %v9405_v6  ;;  %v9691_v6 = vadd.f32 %v6494_v9, %v5960_v33  ;;  %v6017_v26 = vpop.f32.mrf.mxu1  ;;  %v5169_v9 = vpack.c.bf16 %v6932_v23, %v6931_v52 }
 0x387   : > { %4841 = vmatprep.mubr.bf16.mxu0 %v9439_v19  ;;  %v5962_v8 = vpop.f32.mrf.mxu0  ;;  %v6018_v27 = vadd.f32 %v6017_v26, %v6016_v60  ;;  %v6933_v60 = vld [vmem:[%s7343_s25 + $0x90] sm:$0xff] }
 0x388   : > { %6621 = vmatmul.mubr.bf16.gmra.mxu1 %v5166_v35  ;;  %v5963_v14 = vadd.f32 %v5962_v8, %v5961_v37  ;;  %v6019_v15 = vpop.f32.mrf.mxu1  ;;  %v6934_v8 = vld [vmem:[%s7343_s25 + $0x98] sm:$0xff] }
 0x389   : > { %6624 = vmatprep.mubr.bf16.mxu1 %v5167_v48  ;;  %v5964_v17 = vpop.f32.mrf.mxu0  ;;  %v4073_v46 = vadd.f32 %v6018_v27, %v9533_v40  ;;  %v5170_v26 = vpack.c.bf16 %v6934_v8, %v6933_v60  ;;  %v6935_v27 = vld [vmem:[%s7343_s25 + $0xa0] sm:$0xff] }
 0x38a   : > { %v9696_v3 = vadd.f32 %v6495_v51, %v5963_v14  ;;  %v6020_v22 = vpop.f32.mrf.mxu1 }
 0x38b   : > { %v5965_v44 = vpop.f32.mrf.mxu0  ;;  %v6021_v35 = vadd.f32 %v6020_v22, %v6019_v15 }
 0x38c   : > { %v5966_v36 = vadd.f32 %v5965_v44, %v5964_v17  ;;  %v6022_v16 = vpop.f32.mrf.mxu1  ;;  %v6936_v17 = vld [vmem:[%s7343_s25 + $0xa8] sm:$0xff] }
 0x38e   : > { %4842 = vmatmul.mubr.bf16.gmra.mxu0 %v9421_v25  ;;  %v5967_v25 = vpop.f32.mrf.mxu0  ;;  %v9702_v59 = vadd.f32 %v5966_v36, %v3879_v43  ;;  %v6023_v48 = vpop.f32.mrf.mxu1 }
 0x38f   : > { %4849 = vmatprep.mubr.bf16.mxu0 %v9443_v5  ;;  %v4076_v5 = vadd.f32 %v6021_v35, %v9549_v28  ;;  %v6024_v40 = vadd.f32 %v6023_v48, %v6022_v16  ;;  %v5171_v28 = vpack.c.bf16 %v6936_v17, %v6935_v27  ;;  %v6937_v35 = vld [vmem:[%s7343_s25 + $0xb0] sm:$0xff]  ;;  %v6939_v48 = vld [vmem:[%s7343_s25 + $0xc0] sm:$0xff] }
 0x390   : > { %6625 = vmatmul.mubr.bf16.gmra.mxu1 %v5168_v4  ;;  %v5968_v51 = vpop.f32.mrf.mxu0  ;;  %v6025_v37 = vpop.f32.mrf.mxu1 }
 0x391   : > { %6628 = vmatprep.mubr.bf16.mxu1 %v5169_v9  ;;  %v5969_v61 = vadd.f32 %v5968_v51, %v5967_v25  ;;  %v4081_v43 = vadd.f32 %v6024_v40, %v9552_v54  ;;  %v6938_v25 = vld [vmem:[%s7343_s25 + $0xb8] sm:$0xff] }
 0x392   : > { %v5970_v33 = vpop.f32.mrf.mxu0  ;;  %v6026_v0 = vpop.f32.mrf.mxu1  ;;  %v5172_v16 = vpack.c.bf16 %v6938_v25, %v6937_v35 }
 0x393   : > { %v9708_v14 = vadd.f32 %v5969_v61, %v3882_v47  ;;  %v6027_v4 = vadd.f32 %v6026_v0, %v6025_v37  ;;  %v6940_v61 = vld [vmem:[%s7343_s25 + $0xc8] sm:$0xff]  ;;  %v6942_v0 = vld [vmem:[%s7343_s25 + $0xd8] sm:$0xff] }
 0x394   : > { %v5971_v15 = vpop.f32.mrf.mxu0  ;;  %v6028_v52 = vpop.f32.mrf.mxu1  ;;  %v5173_v40 = vpack.c.bf16 %v6940_v61, %v6939_v48  ;;  %v6945_v61 = vld [vmem:[%s7343_s25 + $0xf0] sm:$0xff] }
 0x395   : > { %v5972_v62 = vadd.f32 %v5971_v15, %v5970_v33  ;;  %v4084_v47 = vadd.f32 %v6027_v4, %v9565_v12  ;;  %v6941_v15 = vld [vmem:[%s7343_s25 + $0xd0] sm:$0xff] }
 0x396   : > { %4850 = vmatmul.mubr.bf16.gmra.mxu0 %v9439_v19  ;;  %v5973_v19 = vpop.f32.mrf.mxu0  ;;  %v6029_v54 = vpop.f32.mrf.mxu1 }
 0x397   : > { %6564 = vmatprep.mubr.bf16.mxu0 %v9517_v63  ;;  %v9715_v23 = vadd.f32 %v9677_v32, %v5972_v62  ;;  %v6030_v44 = vadd.f32 %v6029_v54, %v6028_v52  ;;  %v5174_v62 = vpack.c.bf16 %v6942_v0, %v6941_v15  ;;  %v6944_v52 = vld [vmem:[%s7343_s25 + $0xe8] sm:$0xff] }
 0x398   : > { %6629 = vmatmul.mubr.bf16.gmra.mxu1 %v5170_v26  ;;  %v5974_v63 = vpop.f32.mrf.mxu0  ;;  %v6031_v36 = vpop.f32.mrf.mxu1 }
 0x399   : > { %6632 = vmatprep.mubr.bf16.mxu1 %v5171_v28  ;;  %v5975_v9 = vadd.f32 %v5974_v63, %v5973_v19  ;;  %v4089_v12 = vadd.f32 %v6030_v44, %v9575_v39  ;;  %v6943_v19 = vld [vmem:[%s7343_s25 + $0xe0] sm:$0xff] }
 0x39a   : > { %v6518_v22 = vpop.f32.mrf.mxu0  ;;  %v6032_v37 = vpop.f32.mrf.mxu1 }
 0x39b   : > { %v9722_v51 = vadd.f32 %v9682_v30, %v5975_v9  ;;  %v9724_v32 = vadd.f32 %v6518_v22, %v4081_v43  ;;  %v6033_v60 = vadd.f32 %v6032_v37, %v6031_v36 }
 0x39c   : > { %v4233_v33 = vpop.f32.mrf.mxu0  ;;  %v6034_v26 = vpop.f32.mrf.mxu1 }
 0x39d   : > { %10756 = vst [vmem:[#allocation27_spill] sm:$0xff] %v9724_v32 }
 0x39e   : > { %6565 = vmatmul.mubr.bf16.vlgmr.msra.gmra.mxu0 %v9536_v10  ;;  %v9730_v10 = vadd.f32 %v4233_v33, %v4073_v46  ;;  %v6519_v8 = vpop.f32.mrf.mxu0  ;;  %v6035_v43 = vpop.f32.mrf.mxu1 }
 0x39f   : > { %6568 = vmatprep.mubr.bf16.mxu0 %v9559_v45  ;;  %v9732_v30 = vadd.f32 %v6519_v8, %v4084_v47  ;;  %v4092_v45 = vadd.f32 %v6033_v60, %v9588_v1  ;;  %v6036_v17 = vadd.f32 %v6035_v43, %v6034_v26  ;;  %v5175_v47 = vpack.c.bf16 %v6944_v52, %v6943_v19 }
 0x3a0   : > { %10757 = vst [vmem:[#allocation28_spill] sm:$0xff] %v9730_v10  ;;  %6633 = vmatmul.mubr.bf16.gmra.mxu1 %v5172_v16  ;;  %v4236_v39 = vpop.f32.mrf.mxu0  ;;  %v6037_v46 = vpop.f32.mrf.mxu1 }
 0x3a1   : > { %10758 = vst [vmem:[#allocation35_spill] sm:$0xff] %v9732_v30  ;;  %6636 = vmatprep.mubr.bf16.mxu1 %v5173_v40  ;;  %v9735_v27 = vadd.f32 %v4236_v39, %v4076_v5  ;;  %v4097_v4 = vadd.f32 %v6036_v17, %v9598_v55  ;;  %v6946_v40 = vld [vmem:[%s7343_s25 + $0xf8] sm:$0xff] }
 0x3a2   : > { %v6038_v1 = vpop.f32.mrf.mxu1  ;;  %v5176_v33 = vpack.c.bf16 %v6946_v40, %v6945_v61 }
 0x3a3   : > { %10759 = vst [vmem:[#allocation36_spill] sm:$0xff] %v9735_v27  ;;  %v6039_v5 = vadd.f32 %v6038_v1, %v6037_v46 }
 0x3a5   : > { %v4100_v22 = vadd.f32 %v6039_v5, %v9604_v24 }
 0x3a6   : > { %v6522_v28 = vpop.f32.mrf.mxu0  ;;  %6569 = vmatmul.mubr.bf16.gmra.mxu0 %v9582_v58 }
 0x3a7   : > { %v9745_v9 = vadd.f32 %v6522_v28, %v4097_v4  ;;  %v6040_v58 = vpop.f32.mrf.mxu1 }
 0x3a8   : > { %v4249_v63 = vpop.f32.mrf.mxu0  ;;  %6637 = vmatmul.mubr.bf16.gmra.mxu1 %v5174_v62 }
 0x3a9   : > { %v9743_v54 = vadd.f32 %v4249_v63, %v4089_v12  ;;  %10761 = vst [vmem:[#allocation37_spill] sm:$0xff] %v9745_v9  ;;  %6640 = vmatprep.mubr.bf16.mxu1 %v5175_v47  ;;  %v6041_v55 = vpop.f32.mrf.mxu1 }
 0x3aa   : > { %v6523_v44 = vpop.f32.mrf.mxu0  ;;  %v6042_v25 = vadd.f32 %v6041_v55, %v6040_v58 }
 0x3ab   : > { %10760 = vst [vmem:[#allocation24_spill] sm:$0xff] %v9743_v54  ;;  %v9750_v16 = vadd.f32 %v6523_v44, %v4100_v22  ;;  %v6043_v12 = vpop.f32.mrf.mxu1 }
 0x3ac   : > { %v4252_v36 = vpop.f32.mrf.mxu0  ;;  %v4105_v37 = vadd.f32 %v6042_v25, %v9607_v2 }
 0x3ad   : > { %v9748_v35 = vadd.f32 %v4252_v36, %v4092_v45  ;;  %10763 = vst [vmem:[#allocation38_spill] sm:$0xff] %v9750_v16  ;;  %v6044_v8 = vpop.f32.mrf.mxu1 }
 0x3ae   : > { %v6526_v48 = vpop.f32.mrf.mxu0  ;;  %v6045_v24 = vadd.f32 %v6044_v8, %v6043_v12 }
 0x3af   : > { %10762 = vst [vmem:[#allocation29_spill] sm:$0xff] %v9748_v35  ;;  %v6046_v43 = vpop.f32.mrf.mxu1 }
 0x3b0   : > { %v4265_v60 = vpop.f32.mrf.mxu0  ;;  %6641 = vmatmul.mubr.bf16.gmra.mxu1 %v5176_v33  ;;  %v4108_v45 = vadd.f32 %v6045_v24, %v9610_v50 }
 0x3b1   : > { %v9755_v26 = vadd.f32 %v4265_v60, %v4105_v37  ;;  %v6047_v28 = vpop.f32.mrf.mxu1 }
 0x3b2   : > { %v6527_v39 = vpop.f32.mrf.mxu0  ;;  %v6048_v15 = vadd.f32 %v6047_v28, %v6046_v43 }
 0x3b3   : > { %v6049_v62 = vpop.f32.mrf.mxu1 }
 0x3b4   : > { %v4268_v17 = vpop.f32.mrf.mxu0  ;;  %v4113_v4 = vadd.f32 %v6048_v15, %v9614_v21 }
 0x3b5   : > { %v9758_v46 = vadd.f32 %v4268_v17, %v4108_v45  ;;  %v6050_v19 = vpop.f32.mrf.mxu1 }
 0x3b6   : > { %v6530_v0 = vpop.f32.mrf.mxu0  ;;  %v6051_v52 = vadd.f32 %v6050_v19, %v6049_v62  ;;  %v9761_v47 = vadd.f32 %v6526_v48, %v4113_v4 }
 0x3b7   : > { %v6052_v1 = vpop.f32.mrf.mxu1 }
 0x3b8   : > { %v4281_v2 = vpop.f32.mrf.mxu0  ;;  %v4116_v5 = vadd.f32 %v6051_v52, %v9618_v18 }
 0x3b9   : > { %v6053_v50 = vpop.f32.mrf.mxu1 }
 0x3ba   : > { %v6531_v63 = vpop.f32.mrf.mxu0  ;;  %v6054_v58 = vadd.f32 %v6053_v50, %v6052_v1  ;;  %v9764_v22 = vadd.f32 %v6527_v39, %v4116_v5 }
 0x3bb   : > { %v6055_v55 = vpop.f32.mrf.mxu1 }
 0x3bc   : > { %v4284_v44 = vpop.f32.mrf.mxu0  ;;  %v4121_v25 = vadd.f32 %v6054_v58, %v9622_v7 }
 0x3bd   : > { %v6056_v21 = vpop.f32.mrf.mxu1 }
 0x3be   : > { %v6534_v36 = vpop.f32.mrf.mxu0  ;;  %v6057_v61 = vadd.f32 %v6056_v21, %v6055_v55  ;;  %v9767_v40 = vadd.f32 %v4281_v2, %v4121_v25 }
 0x3bf   : > { %v6058_v33 = vpop.f32.mrf.mxu1 }
 0x3c0   : > { %v4297_v12 = vpop.f32.mrf.mxu0  ;;  %v4124_v37 = vadd.f32 %v6057_v61, %v9626_v49 }
 0x3c1   : > { %v6059_v18 = vpop.f32.mrf.mxu1 }
 0x3c2   : > { %v6535_v48 = vpop.f32.mrf.mxu0  ;;  %v6060_v8 = vadd.f32 %v6059_v18, %v6058_v33  ;;  %v9770_v24 = vadd.f32 %v4284_v44, %v4124_v37 }
 0x3c3   : > { %v6061_v43 = vpop.f32.mrf.mxu1 }
 0x3c4   : > { %v4300_v60 = vpop.f32.mrf.mxu0  ;;  %v4129_v45 = vadd.f32 %v6060_v8, %v9630_v38 }
 0x3c5   : > { %v6062_v17 = vpop.f32.mrf.mxu1 }
 0x3c6   : > { %v9772_v39 = vpop.f32.mrf.mxu0  ;;  %v9775_v28 = vadd.f32 %v6530_v0, %v4129_v45  ;;  %v6063_v15 = vadd.f32 %v6062_v17, %v6061_v43 }
 0x3c7   : > { %v6064_v4 = vpop.f32.mrf.mxu1 }
 0x3c8   : > { %v4313_v7 = vpop.f32.mrf.mxu0  ;;  %v4132_v49 = vadd.f32 %v6063_v15, %v9634_v13 }
 0x3c9   : > { %v6065_v19 = vpop.f32.mrf.mxu1 }
 0x3ca   : > { %v9777_v62 = vpop.f32.mrf.mxu0  ;;  %v9780_v52 = vadd.f32 %v6531_v63, %v4132_v49  ;;  %v6066_v1 = vadd.f32 %v6065_v19, %v6064_v4 }
 0x3cb   : > { %v6067_v44 = vpop.f32.mrf.mxu1 }
 0x3cc   : > { %v4316_v2 = vpop.f32.mrf.mxu0  ;;  %v4137_v38 = vadd.f32 %v6066_v1, %v9638_v57 }
 0x3cd   : > { %v6068_v58 = vpop.f32.mrf.mxu1 }
 0x3ce   : > { %v9782_v5 = vpop.f32.mrf.mxu0  ;;  %v9785_v0 = vadd.f32 %v4297_v12, %v4137_v38  ;;  %v6069_v55 = vadd.f32 %v6068_v58, %v6067_v44 }
 0x3cf   : > { %v6070_v21 = vpop.f32.mrf.mxu1 }
 0x3d0   : > { %v4329_v50 = vpop.f32.mrf.mxu0  ;;  %v4140_v13 = vadd.f32 %v6069_v55, %v9642_v29 }
 0x3d1   : > { %v6071_v63 = vpop.f32.mrf.mxu1 }
 0x3d2   : > { %v9787_v25 = vpop.f32.mrf.mxu0  ;;  %v9792_v33 = vadd.f32 %v4300_v60, %v4140_v13  ;;  %v6072_v37 = vadd.f32 %v6071_v63, %v6070_v21 }
 0x3d3   : > { %v6073_v8 = vpop.f32.mrf.mxu1 }
 0x3d4   : > { %v9790_v61 = vpop.f32.mrf.mxu0  ;;  %v4145_v57 = vadd.f32 %v6072_v37, %v9646_v53 }
 0x3d5   : > { %v6074_v12 = vpop.f32.mrf.mxu1 }
 0x3d6   : > { %v9794_v18 = vpop.f32.mrf.mxu0  ;;  %v9799_v45 = vadd.f32 %v6534_v36, %v4145_v57  ;;  %v6075_v17 = vadd.f32 %v6074_v12, %v6073_v8 }
 0x3d7   : > { %v6076_v29 = vpop.f32.mrf.mxu1 }
 0x3d8   : > { %v9797_v43 = vpop.f32.mrf.mxu0  ;;  %v4148_v4 = vadd.f32 %v6075_v17, %v9650_v20 }
 0x3d9   : > { %v6077_v60 = vpop.f32.mrf.mxu1 }
 0x3da   : > { %v9801_v15 = vpop.f32.mrf.mxu0  ;;  %v9806_v19 = vadd.f32 %v6535_v48, %v4148_v4  ;;  %v6078_v1 = vadd.f32 %v6077_v60, %v6076_v29 }
 0x3db   : > { %v6079_v38 = vpop.f32.mrf.mxu1 }
 0x3dc   : > { %v9804_v49 = vpop.f32.mrf.mxu0  ;;  %v4153_v53 = vadd.f32 %v6078_v1, %v9656_v34 }
 0x3dd   : > { %v6080_v55 = vpop.f32.mrf.mxu1 }
 0x3de   : > { %v6152_v44 = vpop.f32.mrf.mxu0  ;;  %v9809_v36 = vadd.f32 %v4313_v7, %v4153_v53  ;;  %v6081_v13 = vadd.f32 %v6080_v55, %v6079_v38 }
 0x3e0   : > { %v6153_v58 = vpop.f32.mrf.mxu0  ;;  %v6082_v37 = vpop.f32.mrf.mxu1  ;;  %v4156_v20 = vadd.f32 %v6081_v13, %v9659_v11 }
 0x3e1   : > { %v9811_v21 = vadd.f32 %v6153_v58, %v6152_v44 }
 0x3e2   : > { %v6155_v63 = vpop.f32.mrf.mxu0  ;;  %v6083_v57 = vpop.f32.mrf.mxu1  ;;  %v9814_v48 = vadd.f32 %v4316_v2, %v4156_v20 }
 0x3e3   : > { %10764 = vst [vmem:[#allocation25_spill] sm:$0xff] %v9811_v21  ;;  %v6084_v17 = vadd.f32 %v6083_v57, %v6082_v37 }
 0x3e4   : > { %v6156_v8 = vpop.f32.mrf.mxu0  ;;  %v6085_v34 = vpop.f32.mrf.mxu1 }
 0x3e5   : > { %v9816_v12 = vadd.f32 %v6156_v8, %v6155_v63  ;;  %v4161_v4 = vadd.f32 %v6084_v17, %v9667_v41 }
 0x3e6   : > { %v6158_v29 = vpop.f32.mrf.mxu0  ;;  %v6086_v60 = vpop.f32.mrf.mxu1 }
 0x3e7   : > { %10765 = vst [vmem:[#allocation26_spill] sm:$0xff] %v9816_v12  ;;  %v9820_v1 = vadd.f32 %v9772_v39, %v4161_v4  ;;  %v6087_v38 = vadd.f32 %v6086_v60, %v6085_v34 }
 0x3e8   : > { %v6159_v7 = vpop.f32.mrf.mxu0  ;;  %v6088_v53 = vpop.f32.mrf.mxu1 }
 0x3e9   : > { %10766 = vst [vmem:[#allocation21_spill] sm:$0xff] %v9820_v1  ;;  %v9822_v44 = vadd.f32 %v6159_v7, %v6158_v29  ;;  %v4164_v2 = vadd.f32 %v6087_v38, %v9672_v42 }
 0x3ea   : > { %v6161_v11 = vpop.f32.mrf.mxu0  ;;  %v6089_v55 = vpop.f32.mrf.mxu1 }
 0x3eb   : > { %10767 = vst [vmem:[#allocation17_spill] sm:$0xff] %v9822_v44  ;;  %v9826_v13 = vadd.f32 %v9777_v62, %v4164_v2  ;;  %v6090_v41 = vadd.f32 %v6089_v55, %v6088_v53 }
 0x3ec   : > { %v6162_v58 = vpop.f32.mrf.mxu0  ;;  %v6091_v20 = vpop.f32.mrf.mxu1 }
 0x3ed   : > { %10768 = vst [vmem:[#allocation18_spill] sm:$0xff] %v9826_v13  ;;  %v9828_v63 = vadd.f32 %v6162_v58, %v6161_v11  ;;  %v4169_v39 = vadd.f32 %v6090_v41, %v9679_v31 }
 0x3ee   : > { %v6164_v37 = vpop.f32.mrf.mxu0  ;;  %v6092_v57 = vpop.f32.mrf.mxu1 }
 0x3ef   : > { %10769 = vst [vmem:[#allocation22_spill] sm:$0xff] %v9828_v63  ;;  %v9831_v17 = vadd.f32 %v4329_v50, %v4169_v39  ;;  %v6093_v34 = vadd.f32 %v6092_v57, %v6091_v20 }
 0x3f0   : > { %v6165_v8 = vpop.f32.mrf.mxu0  ;;  %v6094_v4 = vpop.f32.mrf.mxu1 }
 0x3f1   : > { %10770 = vst [vmem:[#allocation33_spill] sm:$0xff] %v9831_v17  ;;  %v9833_v29 = vadd.f32 %v6165_v8, %v6164_v37  ;;  %v4172_v7 = vadd.f32 %v6093_v34, %v9686_v56 }
 0x3f2   : > { %v6167_v42 = vpop.f32.mrf.mxu0  ;;  %v6095_v60 = vpop.f32.mrf.mxu1 }
 0x3f3   : > { %10771 = vst [vmem:[#allocation23_spill] sm:$0xff] %v9833_v29  ;;  %v9837_v38 = vadd.f32 %v9790_v61, %v4172_v7  ;;  %v6096_v53 = vadd.f32 %v6095_v60, %v6094_v4 }
 0x3f4   : > { %v6168_v62 = vpop.f32.mrf.mxu0  ;;  %v6097_v2 = vpop.f32.mrf.mxu1 }
 0x3f5   : > { %10772 = vst [vmem:[#allocation30_spill] sm:$0xff] %v9837_v38  ;;  %v9839_v11 = vadd.f32 %v6168_v62, %v6167_v42  ;;  %v4177_v50 = vadd.f32 %v6096_v53, %v9691_v6 }
 0x3f6   : > { %v6170_v31 = vpop.f32.mrf.mxu0  ;;  %v6098_v55 = vpop.f32.mrf.mxu1 }
 0x3f7   : > { %10773 = vst [vmem:[#allocation32_spill] sm:$0xff] %v9839_v11  ;;  %v9843_v41 = vadd.f32 %v9782_v5, %v4177_v50  ;;  %v6099_v56 = vadd.f32 %v6098_v55, %v6097_v2 }
 0x3f8   : > { %v6171_v58 = vpop.f32.mrf.mxu0  ;;  %v6100_v39 = vpop.f32.mrf.mxu1 }
 0x3f9   : > { %10774 = vst [vmem:[#allocation31_spill] sm:$0xff] %v9843_v41  ;;  %v9845_v37 = vadd.f32 %v6171_v58, %v6170_v31  ;;  %v4180_v61 = vadd.f32 %v6099_v56, %v9696_v3 }
 0x3fa   : > { %v6173_v20 = vpop.f32.mrf.mxu0  ;;  %v6101_v57 = vpop.f32.mrf.mxu1 }
 0x3fb   : > { %10775 = vst [vmem:[#allocation34_spill] sm:$0xff] %v9845_v37  ;;  %v9849_v34 = vadd.f32 %v9787_v25, %v4180_v61  ;;  %v6102_v6 = vadd.f32 %v6101_v57, %v6100_v39 }
 0x3fc   : > { %v6174_v8 = vpop.f32.mrf.mxu0  ;;  %v6103_v7 = vpop.f32.mrf.mxu1 }
 0x3fd   : > { %10776 = vst [vmem:[#allocation20_spill] sm:$0xff] %v9849_v34  ;;  %v9851_v42 = vadd.f32 %v6174_v8, %v6173_v20  ;;  %v4185_v5 = vadd.f32 %v6102_v6, %v9702_v59 }
 0x3fe   : > { %v6176_v4 = vpop.f32.mrf.mxu0  ;;  %v6104_v60 = vpop.f32.mrf.mxu1 }
 0x3ff   : > { %10777 = vst [vmem:[#allocation19_spill] sm:$0xff] %v9851_v42  ;;  %v9855_v53 = vadd.f32 %v9797_v43, %v4185_v5  ;;  %v6105_v2 = vadd.f32 %v6104_v60, %v6103_v7 }
 0x400   : > { %v6177_v62 = vpop.f32.mrf.mxu0  ;;  %v6106_v50 = vpop.f32.mrf.mxu1 }
 0x401   : > { %10778 = vst [vmem:[#allocation39_spill] sm:$0xff] %v9855_v53  ;;  %v6178_v31 = vadd.f32 %v6177_v62, %v6176_v4  ;;  %v4188_v58 = vadd.f32 %v6105_v2, %v9708_v14 }
 0x402   : > { %v6179_v3 = vpop.f32.mrf.mxu0  ;;  %v6107_v55 = vpop.f32.mrf.mxu1 }
 0x403   : > { %v9859_v56 = vadd.f32 %v9804_v49, %v4188_v58  ;;  %v6108_v39 = vadd.f32 %v6107_v55, %v6106_v50 }
 0x404   : > { %v6180_v25 = vpop.f32.mrf.mxu0  ;;  %v6109_v59 = vpop.f32.mrf.mxu1 }
 0x405   : > { %10779 = vst [vmem:[#allocation40_spill] sm:$0xff] %v9859_v56  ;;  %v6181_v20 = vadd.f32 %v6180_v25, %v6179_v3  ;;  %v4193_v8 = vadd.f32 %v6108_v39, %v9715_v23 }
 0x406   : > { %v6182_v61 = vpop.f32.mrf.mxu0  ;;  %v6110_v43 = vpop.f32.mrf.mxu1 }
 0x407   : > { %v9863_v6 = vadd.f32 %v9794_v18, %v4193_v8  ;;  %v6111_v4 = vadd.f32 %v6110_v43, %v6109_v59 }
 0x408   : > { %v6183_v57 = vpop.f32.mrf.mxu0  ;;  %v6574_v5 = vpop.f32.mrf.mxu1 }
 0x409   : > { %10780 = vst [vmem:[#allocation41_spill] sm:$0xff] %v9863_v6  ;;  %v4196_v14 = vadd.f32 %v6111_v4, %v9722_v51  ;;  %v6184_v6 = vadd.f32 %v6183_v57, %v6182_v61 }
 0x40a   : > { %v6185_v7 = vpop.f32.mrf.mxu0  ;;  %v4924_v60 = vpop.f32.mrf.mxu1 }
 0x40b   : > { %v9867_v49 = vadd.f32 %v9801_v15, %v4196_v14  ;;  %v4925_v2 = vadd.f32 %v6178_v31, %v4924_v60  ;;  %v4933_v41 = vadd.f32 %v6574_v5, %v6184_v6 }
 0x40c   : > { %v6186_v62 = vpop.f32.mrf.mxu0  ;;  %v6575_v50 = vpop.f32.mrf.mxu1 }
 0x40d   : > { %10781 = vst [vmem:[#allocation42_spill] sm:$0xff] %v9867_v49  ;;  %v9870_v23 = vadd.f32 %v4925_v2, %v9755_v26  ;;  %v5029_v6 = vadd.f32 %v4933_v41, %v9761_v47 }
 0x40e   : > { %v6188_v3 = vpop.f32.mrf.mxu0  ;;  %v4927_v25 = vpop.f32.mrf.mxu1 }
 0x40f   : > { %v4928_v18 = vadd.f32 %v6181_v20, %v4927_v25 }
 0x410   : > { %v6189_v58 = vpop.f32.mrf.mxu0  ;;  %v6578_v39 = vpop.f32.mrf.mxu1 }
 0x411   : > { %v9873_v59 = vadd.f32 %v4928_v18, %v9758_v46  ;;  %v6190_v13 = vadd.f32 %v6189_v58, %v6188_v3 }
 0x412   : > { %v6191_v55 = vpop.f32.mrf.mxu0  ;;  %v4940_v8 = vpop.f32.mrf.mxu1 }
 0x414   : > { %v6192_v51 = vpop.f32.mrf.mxu0  ;;  %v6579_v4 = vpop.f32.mrf.mxu1 }
 0x416   : > { %v6194_v43 = vpop.f32.mrf.mxu0  ;;  %v4943_v14 = vpop.f32.mrf.mxu1 }
 0x418   : > { %v6195_v15 = vpop.f32.mrf.mxu0  ;;  %v9875_v60 = vpop.f32.mrf.mxu1 }
 0x41a   : > { %v6197_v31 = vpop.f32.mrf.mxu0  ;;  %v4956_v26 = vpop.f32.mrf.mxu1 }
 0x41c   : > { %v6198_v35 = vpop.f32.mrf.mxu0  ;;  %v9877_v11 = vpop.f32.mrf.mxu1 }
 0x41d   : > { %v6199_v1 = vadd.f32 %v6198_v35, %v6197_v31  ;;  %v9917_v35 = vld [vmem:[%s10311_s5] ss:$0 sm:$0xff] }
 0x41e   : > { %v6200_v2 = vpop.f32.mrf.mxu0  ;;  %v9879_v25 = vpop.f32.mrf.mxu1  ;;  %v5068_v41 = vmul.f32 %v9917_v35, %v5029_v6 }
 0x420   : > { %v6201_v20 = vpop.f32.mrf.mxu0  ;;  %v9881_v46 = vpop.f32.mrf.mxu1 }
 0x421   : > { %10782 = vst [vmem:[#allocation43_spill] sm:$0xff] %v9881_v46 }
 0x422   : > { %v6203_v16 = vpop.f32.mrf.mxu0  ;;  %v9883_v54 = vpop.f32.mrf.mxu1 }
 0x424   : > { %v6204_v18 = vpop.f32.mrf.mxu0  ;;  %v9885_v29 = vpop.f32.mrf.mxu1 }
 0x425   : > { %10783 = vst [vmem:[#allocation44_spill] sm:$0xff] %v9885_v29 }
 0x426   : > { %v6206_v42 = vpop.f32.mrf.mxu0  ;;  %v9887_v37 = vpop.f32.mrf.mxu1 }
 0x428   : > { %v6207_v9 = vpop.f32.mrf.mxu0  ;;  %v9889_v12 = vpop.f32.mrf.mxu1 }
 0x429   : > { %10784 = vst [vmem:[#allocation45_spill] sm:$0xff] %v9889_v12  ;;  %v6187_v12 = vadd.f32 %v6186_v62, %v6185_v7  ;;  %v6202_v7 = vadd.f32 %v6201_v20, %v6200_v2  ;;  %v6208_v58 = vadd.f32 %v6207_v9, %v6206_v42  ;;  %v9938_v9 = vld [vmem:[%s10312_s6] ss:$0 sm:$0xff] }
 0x42a   : > { %v6209_v27 = vpop.f32.mrf.mxu0  ;;  %v9891_v49 = vpop.f32.mrf.mxu1 }
 0x42b   : > { %10785 = vst [vmem:[#allocation46_spill] sm:$0xff] %v9891_v49  ;;  %v6196_v49 = vadd.f32 %v6195_v15, %v6194_v43  ;;  %v4936_v46 = vadd.f32 %v6575_v50, %v6187_v12  ;;  %v6205_v50 = vadd.f32 %v6204_v18, %v6203_v16 }
 0x42c   : > { %v6210_v30 = vpop.f32.mrf.mxu0  ;;  %v9893_v63 = vpop.f32.mrf.mxu1 }
 0x42d   : > { %10786 = vst [vmem:[#allocation47_spill] sm:$0xff] %v9893_v63  ;;  %v6193_v63 = vadd.f32 %v6192_v51, %v6191_v55  ;;  %v4949_v5 = vadd.f32 %v6578_v39, %v6196_v49  ;;  %v5030_v12 = vadd.f32 %v4936_v46, %v9764_v22  ;;  %v6211_v39 = vadd.f32 %v6210_v30, %v6209_v27 }
 0x42e   : > { %v6212_v56 = vpop.f32.mrf.mxu0  ;;  %v9895_v21 = vpop.f32.mrf.mxu1  ;;  %v5066_v22 = vmul.f32 %v9917_v35, %v9870_v23  ;;  %v4957_v51 = vadd.f32 %v6202_v7, %v4956_v26 }
 0x42f   : > { %10787 = vst [vmem:[#allocation48_spill] sm:$0xff] %v9895_v21  ;;  %v4944_v61 = vadd.f32 %v6193_v63, %v4943_v14  ;;  %v5033_v49 = vadd.f32 %v4949_v5, %v9775_v28  ;;  %v5069_v16 = vmul.f32 %v9917_v35, %v5030_v12 }
 0x430   : > { %v6213_v10 = vpop.f32.mrf.mxu0  ;;  %v9897_v44 = vpop.f32.mrf.mxu1  ;;  %v5035_v15 = vadd.f32 %v4957_v51, %v9785_v0  ;;  %v5105_v31 = vadd.f32 %v9938_v9, %v5066_v22 }
 0x431   : > { %10788 = vst [vmem:[#allocation49_spill] sm:$0xff] %v9897_v44  ;;  %v4941_v44 = vadd.f32 %v6190_v13, %v4940_v8  ;;  %v5032_v63 = vadd.f32 %v4944_v61, %v9770_v24  ;;  %v5067_v24 = vmul.f32 %v9917_v35, %v9873_v59  ;;  %v6214_v30 = vadd.f32 %v6213_v10, %v6212_v56 }
 0x432   : > { %v6215_v32 = vpop.f32.mrf.mxu0  ;;  %v9899_v34 = vpop.f32.mrf.mxu1  ;;  %v5072_v8 = vmul.f32 %v9917_v35, %v5033_v49  ;;  %v5107_v59 = vadd.f32 %v9938_v9, %v5068_v41  ;;  %v9959_v26 = vadd.f32 %v9938_v9, %v5069_v16  ;;  %v5074_v6 = vmul.f32 %v9917_v35, %v5035_v15 }
 0x433   : > { %10789 = vst [vmem:[#allocation50_spill] sm:$0xff] %v9899_v34  ;;  %v5031_v13 = vadd.f32 %v4941_v44, %v9767_v40  ;;  %v5071_v27 = vmul.f32 %v9917_v35, %v5032_v63  ;;  %v9962_v2 = vadd.f32 %v9938_v9, %v5067_v24  ;;  %v5137_v12 = vmax.f32 %v5105_v31, 0.0 }
 0x434   : > { %v6216_v53 = vpop.f32.mrf.mxu0  ;;  %v9903_v17 = vpop.f32.mrf.mxu1  ;;  %v5139_v46 = vmax.f32 %v5107_v59, 0.0  ;;  %v9976_v18 = vadd.f32 %v9938_v9, %v5072_v8 }
 0x435   : > { %10790 = vst [vmem:[#allocation51_spill] sm:$0xff] %v9903_v17  ;;  %v4952_v17 = vadd.f32 %v6579_v4, %v6199_v1  ;;  %v5070_v28 = vmul.f32 %v9917_v35, %v5031_v13  ;;  %v4968_v4 = vadd.f32 %v9877_v11, %v6211_v39  ;;  %v6217_v10 = vadd.f32 %v6216_v53, %v6215_v32 }
 0x436   : > { %v9901_v38 = vpop.f32.mrf.mxu0  ;;  %v9907_v21 = vpop.f32.mrf.mxu1  ;;  %v5140_v13 = vmax.f32 %v9959_v26, 0.0  ;;  %v5138_v63 = vmax.f32 %v9962_v2, 0.0  ;;  %v5143_v22 = vmax.f32 %v9976_v18, 0.0  ;;  %v10793_v2 = vld [vmem:[#allocation21_spill] sm:$0xff] }
 0x437   : > { %v5034_v55 = vadd.f32 %v4952_v17, %v9780_v52  ;;  %v4960_v52 = vadd.f32 %v6205_v50, %v9879_v25  ;;  %v4965_v17 = vadd.f32 %v9875_v60, %v6208_v58  ;;  %v4973_v60 = vadd.f32 %v6214_v30, %v9883_v54 }
 0x438   : > { %v9905_v29 = vpop.f32.mrf.mxu0  ;;  %v9911_v34 = vpop.f32.mrf.mxu1  ;;  %v9965_v11 = vadd.f32 %v9938_v9, %v5070_v28  ;;  %v9972_v25 = vadd.f32 %v9938_v9, %v5071_v27  ;;  %v5038_v54 = vadd.f32 %v4968_v4, %v9806_v19  ;;  %v10008_v27 = vadd.f32 %v9938_v9, %v5074_v6  ;;  %v10792_v4 = vld [vmem:[#allocation44_spill] sm:$0xff] }
 0x439   : > { %v5073_v43 = vmul.f32 %v9917_v35, %v5034_v55  ;;  %v5036_v20 = vadd.f32 %v4960_v52, %v9792_v33  ;;  %v5037_v32 = vadd.f32 %v4965_v17, %v9799_v45  ;;  %v4976_v33 = vadd.f32 %v6217_v10, %v9887_v37  ;;  %v10795_v6 = vld [vmem:[#allocation48_spill] sm:$0xff] }
 0x43a   : > { %v9909_v57 = vpop.f32.mrf.mxu0  ;;  %v9919_v3 = vpop.f32.mrf.mxu1  ;;  %v6220_v45 = vadd.f32 %v9905_v29, %v9901_v38  ;;  %v5039_v19 = vadd.f32 %v4973_v60, %v9809_v36  ;;  %v5141_v50 = vmax.f32 %v9965_v11, 0.0  ;;  %v9997_v29 = vld [vmem:[%s10314_s8] ss:$0 sm:$0xff]  ;;  %v5142_v36 = vmax.f32 %v9972_v25, 0.0 }
 0x43b   : > { %v9979_v61 = vadd.f32 %v9938_v9, %v5073_v43  ;;  %v5075_v58 = vmul.f32 %v9917_v35, %v5036_v20  ;;  %v5076_v41 = vmul.f32 %v9917_v35, %v5037_v32  ;;  %v5077_v55 = vmul.f32 %v9917_v35, %v5038_v54  ;;  %v10794_v32 = vld [vmem:[#allocation46_spill] sm:$0xff] }
 0x43c   : > { %v6222_v62 = vpop.f32.mrf.mxu0  ;;  %v9926_v1 = vpop.f32.mrf.mxu1  ;;  %v5040_v16 = vadd.f32 %v4976_v33, %v9814_v48  ;;  %v5078_v52 = vmul.f32 %v9917_v35, %v5039_v19  ;;  %v5145_v18 = vmax.f32 %v10008_v27, 0.0  ;;  %v10796_v19 = vld [vmem:[#allocation18_spill] sm:$0xff]  ;;  %v10810_v27 = vld [vmem:[#allocation25_spill] sm:$0xff] }
 0x43d   : > { %v6223_v37 = vadd.f32 %v6222_v62, %v9909_v57  ;;  %v5144_v51 = vmax.f32 %v9979_v61, 0.0  ;;  %v10791_v57 = vld [vmem:[#allocation43_spill] sm:$0xff]  ;;  %v10014_v31 = vadd.f32 %v9938_v9, %v5076_v41  ;;  %v10026_v60 = vadd.f32 %v9938_v9, %v5077_v55  ;;  %v10797_v41 = vld [vmem:[#allocation45_spill] sm:$0xff] }
 0x43e   : > { %v9924_v47 = vpop.f32.mrf.mxu0  ;;  %v9933_v44 = vpop.f32.mrf.mxu1  ;;  %v4981_v62 = vadd.f32 %v10791_v57, %v6220_v45  ;;  %v5079_v26 = vmul.f32 %v9917_v35, %v5040_v16  ;;  %v10798_v16 = vld [vmem:[#allocation47_spill] sm:$0xff]  ;;  %v10804_v61 = vld [vmem:[#allocation49_spill] sm:$0xff] }
 0x43f   : > { %v4984_v59 = vadd.f32 %v10792_v4, %v6223_v37  ;;  %v5147_v55 = vmax.f32 %v10014_v31, 0.0 }
 0x440   : > { %v6225_v40 = vpop.f32.mrf.mxu0  ;;  %v9947_v23 = vpop.f32.mrf.mxu1  ;;  %v5041_v20 = vadd.f32 %v4981_v62, %v10793_v2  ;;  %v10053_v4 = vadd.f32 %v9938_v9, %v5079_v26 }
 0x441   : > { %v6226_v24 = vadd.f32 %v6225_v40, %v9924_v47  ;;  %v10017_v47 = vadd.f32 %v9938_v9, %v5075_v58  ;;  %v5042_v58 = vadd.f32 %v4984_v59, %v10796_v19  ;;  %v10800_v59 = vld [vmem:[#allocation30_spill] sm:$0xff] }
 0x442   : > { %v6227_v42 = vpop.f32.mrf.mxu0  ;;  %v9954_v14 = vpop.f32.mrf.mxu1 }
 0x444   : > { %v6228_v56 = vpop.f32.mrf.mxu0  ;;  %v9969_v53 = vpop.f32.mrf.mxu1 }
 0x445   : > { %v6229_v17 = vadd.f32 %v6228_v56, %v6227_v42 }
 0x446   : > { %v6230_v0 = vpop.f32.mrf.mxu0  ;;  %v9985_v7 = vpop.f32.mrf.mxu1 }
 0x447   : > { %v4992_v33 = vadd.f32 %v6229_v17, %v10795_v6 }
 0x448   : > { %v6231_v5 = vpop.f32.mrf.mxu0  ;;  %v6622_v49 = vpop.f32.mrf.mxu1 }
 0x449   : > { %v5323_v39 = vadd.f32 %v6622_v49, %v9997_v29  ;;  %v6232_v15 = vadd.f32 %v6231_v5, %v6230_v0  ;;  %v4989_v0 = vadd.f32 %v6226_v24, %v10794_v32  ;;  %v5148_v24 = vmax.f32 %v10026_v60, 0.0 }
 0x44a   : > { %v6233_v38 = vpop.f32.mrf.mxu0  ;;  %v5314_v30 = vpop.f32.mrf.mxu1  ;;  %v10067_v32 = vadd.f32 %v9926_v1, %v9997_v29 }
 0x44b   : > { %v5419_v8 = vadd.f32 %v5323_v39, %v5139_v46  ;;  %v5315_v43 = vadd.f32 %v9997_v29, %v5314_v30  ;;  %v4997_v37 = vadd.f32 %v10797_v41, %v6232_v15  ;;  %v5146_v39 = vmax.f32 %v10017_v47, 0.0  ;;  %v10803_v41 = vld [vmem:[#allocation50_spill] sm:$0xff] }
 0x44c   : > { %v6234_v28 = vpop.f32.mrf.mxu0  ;;  %v6623_v10 = vpop.f32.mrf.mxu1  ;;  %v10049_v30 = vadd.f32 %v9911_v34, %v9997_v29  ;;  %v10062_v34 = vadd.f32 %v9997_v29, %v9919_v3 }
 0x44d   : > { %v6235_v40 = vadd.f32 %v6234_v28, %v6233_v38  ;;  %5451 = vst [vmem:[%s10021_s1 + $0x50] sm:$0xff] %v5419_v8  ;;  %v5417_v42 = vadd.f32 %v5315_v43, %v5137_v12  ;;  %v5326_v56 = vadd.f32 %v6623_v10, %v9997_v29  ;;  %v10036_v12 = vadd.f32 %v9938_v9, %v5078_v52  ;;  %v10799_v52 = vld [vmem:[#allocation33_spill] sm:$0xff] }
 0x44e   : > { %v6236_v48 = vpop.f32.mrf.mxu0  ;;  %v5317_v46 = vpop.f32.mrf.mxu1  ;;  %v5080_v28 = vmul.f32 %v9917_v35, %v5041_v20  ;;  %v5043_v17 = vadd.f32 %v4989_v0, %v10799_v52 }
 0x44f   : > { %5449 = vst [vmem:[%s10021_s1 + $0x40] sm:$0xff] %v5417_v42  ;;  %v5420_v45 = vadd.f32 %v5326_v56, %v5140_v13  ;;  %v5318_v5 = vadd.f32 %v9997_v29, %v5317_v46  ;;  %v5000_v57 = vadd.f32 %v10798_v16, %v6235_v40  ;;  %v5149_v31 = vmax.f32 %v10036_v12, 0.0  ;;  %v10801_v42 = vld [vmem:[#allocation31_spill] sm:$0xff] }
 0x450   : > { %v6237_v54 = vpop.f32.mrf.mxu0  ;;  %v6626_v49 = vpop.f32.mrf.mxu1  ;;  %v5081_v40 = vmul.f32 %v9917_v35, %v5042_v58  ;;  %v5045_v56 = vadd.f32 %v4997_v37, %v10801_v42  ;;  %v5082_v3 = vmul.f32 %v9917_v35, %v5043_v17  ;;  %v10080_v1 = vadd.f32 %v9938_v9, %v5080_v28 }
 0x451   : > { %5452 = vst [vmem:[%s10021_s1 + $0x58] sm:$0xff] %v5420_v45  ;;  %v5418_v13 = vadd.f32 %v5318_v5, %v5138_v63  ;;  %v5339_v62 = vadd.f32 %v6626_v49, %v9997_v29  ;;  %v5044_v63 = vadd.f32 %v4992_v33, %v10800_v59  ;;  %v6238_v2 = vadd.f32 %v6237_v54, %v6236_v48 }
 0x452   : > { %v6239_v38 = vpop.f32.mrf.mxu0  ;;  %v5330_v43 = vpop.f32.mrf.mxu1  ;;  %v10077_v33 = vadd.f32 %v9997_v29, %v9933_v44  ;;  %v5150_v45 = vmax.f32 %v10053_v4, 0.0  ;;  %v10090_v44 = vadd.f32 %v9947_v23, %v9997_v29  ;;  %v5084_v58 = vmul.f32 %v9917_v35, %v5045_v56 }
 0x453   : > { %5450 = vst [vmem:[%s10021_s1 + $0x48] sm:$0xff] %v5418_v13  ;;  %v5423_v15 = vadd.f32 %v5339_v62, %v5143_v22  ;;  %v5331_v10 = vadd.f32 %v9997_v29, %v5330_v43  ;;  %v10802_v22 = vld [vmem:[#allocation20_spill] sm:$0xff]  ;;  %v5083_v5 = vmul.f32 %v9917_v35, %v5044_v63  ;;  %v5005_v37 = vadd.f32 %v6238_v2, %v10803_v41 }
 0x454   : > { %v6240_v8 = vpop.f32.mrf.mxu0  ;;  %v6627_v20 = vpop.f32.mrf.mxu1  ;;  %v5046_v0 = vadd.f32 %v5000_v57, %v10802_v22  ;;  %v10095_v57 = vadd.f32 %v9938_v9, %v5081_v40  ;;  %v10105_v28 = vadd.f32 %v9997_v29, %v9954_v14  ;;  %v5151_v59 = vmax.f32 %v10080_v1, 0.0  ;;  %v10806_v40 = vld [vmem:[#allocation41_spill] sm:$0xff] }
 0x455   : > { %5455 = vst [vmem:[%s10021_s1 + $0x70] sm:$0xff] %v5423_v15  ;;  %v5421_v46 = vadd.f32 %v5331_v10, %v5141_v50  ;;  %v5342_v6 = vadd.f32 %v6627_v20, %v9997_v29  ;;  %v6241_v52 = vadd.f32 %v6240_v8, %v6239_v38  ;;  %v10109_v63 = vadd.f32 %v9938_v9, %v5082_v3  ;;  %v10805_v38 = vld [vmem:[#allocation39_spill] sm:$0xff] }
 0x456   : > { %v6242_v26 = vpop.f32.mrf.mxu0  ;;  %v5333_v54 = vpop.f32.mrf.mxu1  ;;  %v5085_v13 = vmul.f32 %v9917_v35, %v5046_v0  ;;  %v10118_v14 = vadd.f32 %v9969_v53, %v9997_v29  ;;  %v5047_v8 = vadd.f32 %v5005_v37, %v10805_v38  ;;  %v5152_v0 = vmax.f32 %v10095_v57, 0.0 }
 0x457   : > { %5453 = vst [vmem:[%s10021_s1 + $0x60] sm:$0xff] %v5421_v46  ;;  %v5424_v50 = vadd.f32 %v5342_v6, %v5144_v51  ;;  %v5334_v19 = vadd.f32 %v9997_v29, %v5333_v54  ;;  %v5008_v46 = vadd.f32 %v6241_v52, %v9907_v21  ;;  %v10808_v6 = vld [vmem:[#allocation51_spill] sm:$0xff] }
 0x458   : > { %v6243_v48 = vpop.f32.mrf.mxu0  ;;  %v6630_v16 = vpop.f32.mrf.mxu1  ;;  %v10131_v53 = vadd.f32 %v9938_v9, %v5085_v13  ;;  %v5086_v21 = vmul.f32 %v9917_v35, %v5047_v8 }
 0x459   : > { %v6244_v11 = vadd.f32 %v6243_v48, %v6242_v26  ;;  %5456 = vst [vmem:[%s10021_s1 + $0x78] sm:$0xff] %v5424_v50  ;;  %v5422_v62 = vadd.f32 %v5334_v19, %v5142_v36  ;;  %v5355_v23 = vadd.f32 %v6630_v16, %v9997_v29  ;;  %v10114_v36 = vadd.f32 %v9938_v9, %v5083_v5 }
 0x45a   : > { %v6245_v49 = vpop.f32.mrf.mxu0  ;;  %v5346_v43 = vpop.f32.mrf.mxu1  ;;  %v10123_v26 = vadd.f32 %v9938_v9, %v5084_v58  ;;  %v5153_v5 = vmax.f32 %v10109_v63, 0.0  ;;  %v5156_v52 = vmax.f32 %v10131_v53, 0.0 }
 0x45b   : > { %v5013_v51 = vadd.f32 %v10804_v61, %v6244_v11  ;;  %5454 = vst [vmem:[%s10021_s1 + $0x68] sm:$0xff] %v5422_v62  ;;  %v5427_v10 = vadd.f32 %v5355_v23, %v5147_v55  ;;  %v5347_v25 = vadd.f32 %v9997_v29, %v5346_v43  ;;  %v10807_v55 = vld [vmem:[#allocation17_spill] sm:$0xff]  ;;  %v10809_v11 = vld [vmem:[#allocation27_spill] sm:$0xff]  ;;  %v5154_v58 = vmax.f32 %v10114_v36, 0.0  ;;  %v10811_v61 = vld [vmem:[#allocation28_spill] sm:$0xff] }
 0x45c   : > { %v6246_v17 = vpop.f32.mrf.mxu0  ;;  %v6631_v2 = vpop.f32.mrf.mxu1  ;;  %v5155_v57 = vmax.f32 %v10123_v26, 0.0  ;;  %v10812_v62 = vld [vmem:[#allocation22_spill] sm:$0xff] }
 0x45d   : > { %v6247_v15 = vadd.f32 %v6246_v17, %v6245_v49  ;;  %v5049_v42 = vadd.f32 %v5013_v51, %v10806_v40  ;;  %5459 = vst [vmem:[%s10021_s1 + $0x90] sm:$0xff] %v5427_v10  ;;  %v5425_v22 = vadd.f32 %v5347_v25, %v5145_v18  ;;  %v5358_v54 = vadd.f32 %v6631_v2, %v9997_v29  ;;  %v10813_v17 = vld [vmem:[#allocation40_spill] sm:$0xff]  ;;  %v10816_v2 = vld [vmem:[#allocation26_spill] sm:$0xff] }
 0x45e   : > { %v6566_v56 = vpop.f32.mrf.mxu0  ;;  %v5349_v1 = vpop.f32.mrf.mxu1  ;;  %v10152_v43 = vadd.f32 %v5008_v46, %v10813_v17 }
 0x45f   : > { %v4901_v20 = vadd.f32 %v6566_v56, %v10807_v55  ;;  %v5016_v3 = vadd.f32 %v10808_v6, %v6247_v15  ;;  %5457 = vst [vmem:[%s10021_s1 + $0x80] sm:$0xff] %v5425_v22  ;;  %v5350_v19 = vadd.f32 %v9997_v29, %v5349_v1  ;;  %v5088_v41 = vmul.f32 %v9917_v35, %v5049_v42  ;;  %v10814_v15 = vld [vmem:[#allocation42_spill] sm:$0xff]  ;;  %v10815_v42 = vld [vmem:[#allocation35_spill] sm:$0xff]  ;;  %v10817_v1 = vld [vmem:[#allocation36_spill] sm:$0xff] }
 0x460   : > { %v4892_v48 = vpop.f32.mrf.mxu0  ;;  %v5428_v37 = vadd.f32 %v5358_v54, %v5148_v24  ;;  %v6634_v16 = vpop.f32.mrf.mxu1  ;;  %v10169_v6 = vadd.f32 %v9938_v9, %v5086_v21 }
 0x461   : > { %v5021_v50 = vadd.f32 %v4901_v20, %v10809_v11  ;;  %v4893_v18 = vadd.f32 %v10810_v27, %v4892_v48  ;;  %v5050_v10 = vadd.f32 %v5016_v3, %v10814_v15  ;;  %v5426_v60 = vadd.f32 %v5350_v19, %v5146_v39 }
 0x462   : > { %v6567_v49 = vpop.f32.mrf.mxu0  ;;  %5460 = vst [vmem:[%s10021_s1 + $0x98] sm:$0xff] %v5428_v37  ;;  %v5371_v25 = vadd.f32 %v6634_v16, %v9997_v29  ;;  %v5362_v38 = vpop.f32.mrf.mxu1  ;;  %v10166_v39 = vadd.f32 %v9938_v9, %v5088_v41 }
 0x463   : > { %v5060_v13 = vmul.f32 %v9917_v35, %v5021_v50  ;;  %v5019_v51 = vadd.f32 %v4893_v18, %v10811_v61  ;;  %v4904_v23 = vadd.f32 %v6567_v49, %v10812_v62  ;;  %5458 = vst [vmem:[%s10021_s1 + $0x88] sm:$0xff] %v5426_v60  ;;  %v5363_v46 = vadd.f32 %v9997_v29, %v5362_v38  ;;  %v10818_v50 = vld [vmem:[#allocation34_spill] sm:$0xff]  ;;  %v10819_v61 = vld [vmem:[#allocation37_spill] sm:$0xff]  ;;  %v10820_v62 = vld [vmem:[#allocation23_spill] sm:$0xff] }
 0x464   : > { %v4895_v24 = vpop.f32.mrf.mxu0  ;;  %v5431_v20 = vadd.f32 %v5371_v25, %v5151_v59  ;;  %v6635_v47 = vpop.f32.mrf.mxu1  ;;  %v5089_v59 = vmul.f32 %v9917_v35, %v5050_v10  ;;  %v5159_v63 = vmax.f32 %v10166_v39, 0.0  ;;  %v5157_v39 = vmax.f32 %v10169_v6, 0.0 }
 0x465   : > { %v5099_v8 = vadd.f32 %v9938_v9, %v5060_v13  ;;  %v5058_v40 = vmul.f32 %v9917_v35, %v5019_v51  ;;  %v5022_v56 = vadd.f32 %v4904_v23, %v10815_v42  ;;  %v4896_v55 = vadd.f32 %v10816_v2, %v4895_v24  ;;  %v10821_v24 = vld [vmem:[#allocation19_spill] sm:$0xff] }
 0x466   : > { %v6570_v22 = vpop.f32.mrf.mxu0  ;;  %5463 = vst [vmem:[%s10021_s1 + $0xb0] sm:$0xff] %v5431_v20  ;;  %v5429_v18 = vadd.f32 %v5363_v46, %v5149_v31  ;;  %v5374_v21 = vadd.f32 %v6635_v47, %v9997_v29  ;;  %v5365_v41 = vpop.f32.mrf.mxu1  ;;  %v10823_v20 = vld [vmem:[#allocation38_spill] sm:$0xff]  ;;  %v10824_v46 = vld [vmem:[#allocation32_spill] sm:$0xff] }
 0x467   : > { %v5131_v3 = vmax.f32 %v5099_v8, 0.0  ;;  %v5097_v48 = vadd.f32 %v9938_v9, %v5058_v40  ;;  %v5061_v54 = vmul.f32 %v9917_v35, %v5022_v56  ;;  %v5020_v11 = vadd.f32 %v4896_v55, %v10817_v1  ;;  %v10822_v8 = vld [vmem:[#allocation24_spill] sm:$0xff] }
 0x468   : > { %v4917_v27 = vadd.f32 %v6570_v22, %v10818_v50  ;;  %v4908_v19 = vpop.f32.mrf.mxu0  ;;  %5461 = vst [vmem:[%s10021_s1 + $0xa0] sm:$0xff] %v5429_v18  ;;  %v5432_v12 = vadd.f32 %v5374_v21, %v5152_v0  ;;  %v5366_v17 = vadd.f32 %v9997_v29, %v5365_v41  ;;  %v6638_v15 = vpop.f32.mrf.mxu1  ;;  %v5087_v18 = vmul.f32 %v9917_v35, %v10152_v43 }
 0x469   : > { %v5411_v37 = vadd.f32 %v10049_v30, %v5131_v3  ;;  %v5129_v49 = vmax.f32 %v5097_v48, 0.0  ;;  %v5100_v16 = vadd.f32 %v9938_v9, %v5061_v54  ;;  %v5059_v13 = vmul.f32 %v9917_v35, %v5020_v11  ;;  %v10825_v11 = vld [vmem:[#allocation29_spill] sm:$0xff] }
 0x46a   : > { %v5025_v51 = vadd.f32 %v4917_v27, %v10819_v61  ;;  %v4909_v23 = vadd.f32 %v10820_v62, %v4908_v19  ;;  %v6571_v31 = vpop.f32.mrf.mxu0  ;;  %5464 = vst [vmem:[%s10021_s1 + $0xb8] sm:$0xff] %v5432_v12  ;;  %v5430_v0 = vadd.f32 %v5366_v17, %v5150_v45  ;;  %v5387_v56 = vadd.f32 %v6638_v15, %v9997_v29  ;;  %v5378_v2 = vpop.f32.mrf.mxu1 }
 0x46b   : > { %5443 = vst [vmem:[%s10021_s1 + $0x10] sm:$0xff] %v5411_v37  ;;  %v5409_v30 = vadd.f32 %v10062_v34, %v5129_v49  ;;  %v5132_v10 = vmax.f32 %v5100_v16, 0.0  ;;  %v5098_v60 = vadd.f32 %v9938_v9, %v5059_v13  ;;  %v4920_v25 = vadd.f32 %v6571_v31, %v10821_v24 }
 0x46c   : > { %v5064_v38 = vmul.f32 %v9917_v35, %v5025_v51  ;;  %v5023_v40 = vadd.f32 %v4909_v23, %v10822_v8  ;;  %v4911_v42 = vpop.f32.mrf.mxu0  ;;  %5462 = vst [vmem:[%s10021_s1 + $0xa8] sm:$0xff] %v5430_v0  ;;  %v5435_v4 = vadd.f32 %v5387_v56, %v5155_v57  ;;  %v5379_v45 = vadd.f32 %v9997_v29, %v5378_v2  ;;  %v6639_v54 = vpop.f32.mrf.mxu1 }
 0x46d   : > { %5441 = vst [vmem:[%s10021_s1] sm:$0xff] %v5409_v30  ;;  %v5412_v34 = vadd.f32 %v10067_v32, %v5132_v10  ;;  %v5130_v55 = vmax.f32 %v5098_v60, 0.0  ;;  %v5026_v22 = vadd.f32 %v4920_v25, %v10823_v20  ;;  %v4912_v47 = vadd.f32 %v10824_v46, %v4911_v42 }
 0x46e   : > { %v5103_v3 = vadd.f32 %v9938_v9, %v5064_v38  ;;  %v5062_v48 = vmul.f32 %v9917_v35, %v5023_v40  ;;  %v5390_v27 = vadd.f32 %v6639_v54, %v9997_v29  ;;  %5467 = vst [vmem:[%s10021_s1 + $0xd0] sm:$0xff] %v5435_v4  ;;  %v5433_v57 = vadd.f32 %v5379_v45, %v5153_v5  ;;  %v5381_v21 = vpop.f32.mrf.mxu1 }
 0x46f   : > { %5444 = vst [vmem:[%s10021_s1 + $0x18] sm:$0xff] %v5412_v34  ;;  %v5410_v32 = vadd.f32 %v10077_v33, %v5130_v55  ;;  %v5065_v1 = vmul.f32 %v9917_v35, %v5026_v22  ;;  %v5024_v50 = vadd.f32 %v4912_v47, %v10825_v11  ;;  %v5382_v43 = vadd.f32 %v9997_v29, %v5381_v21 }
 0x470   : > { %v5135_v19 = vmax.f32 %v5103_v3, 0.0  ;;  %v5101_v26 = vadd.f32 %v9938_v9, %v5062_v48  ;;  %v5436_v37 = vadd.f32 %v5390_v27, %v5156_v52  ;;  %5465 = vst [vmem:[%s10021_s1 + $0xc0] sm:$0xff] %v5433_v57  ;;  %v6642_v5 = vpop.f32.mrf.mxu1  ;;  %v5128_v13 = vadd.f32 %v9938_v9, %v5089_v59 }
 0x471   : > { %5442 = vst [vmem:[%s10021_s1 + $0x8] sm:$0xff] %v5410_v32  ;;  %v5104_v33 = vadd.f32 %v9938_v9, %v5065_v1  ;;  %v5063_v41 = vmul.f32 %v9917_v35, %v5024_v50  ;;  %v5434_v35 = vadd.f32 %v5382_v43, %v5154_v58  ;;  %v5403_v53 = vadd.f32 %v6642_v5, %v9997_v29 }
 0x472   : > { %v5415_v49 = vadd.f32 %v10090_v44, %v5135_v19  ;;  %v5133_v16 = vmax.f32 %v5101_v26, 0.0  ;;  %5468 = vst [vmem:[%s10021_s1 + $0xd8] sm:$0xff] %v5436_v37  ;;  %v5302_v44 = vadd.f32 %v9997_v29, %v9985_v7  ;;  %v5394_v59 = vpop.f32.mrf.mxu1  ;;  %v5126_v62 = vadd.f32 %v9938_v9, %v5087_v18 }
 0x473   : > { %v5136_v61 = vmax.f32 %v5104_v33, 0.0  ;;  %v5102_v51 = vadd.f32 %v9938_v9, %v5063_v41  ;;  %5466 = vst [vmem:[%s10021_s1 + $0xc8] sm:$0xff] %v5434_v35  ;;  %v5439_v23 = vadd.f32 %v5403_v53, %v5159_v63  ;;  %v5395_v12 = vadd.f32 %v9997_v29, %v5394_v59 }
 0x474   : > { %5447 = vst [vmem:[%s10021_s1 + $0x30] sm:$0xff] %v5415_v49  ;;  %v5413_v52 = vadd.f32 %v10105_v28, %v5133_v16  ;;  %v6643_v7 = vpop.f32.mrf.mxu1  ;;  %v5160_v31 = vmax.f32 %v5128_v13, 0.0  ;;  %v5158_v15 = vmax.f32 %v5126_v62, 0.0 }
 0x475   : > { %v5416_v36 = vadd.f32 %v10118_v14, %v5136_v61  ;;  %v5134_v58 = vmax.f32 %v5102_v51, 0.0  ;;  %5471 = vst [vmem:[%s10021_s1 + $0xf0] sm:$0xff] %v5439_v23  ;;  %v5437_v6 = vadd.f32 %v5395_v12, %v5157_v39  ;;  %v5406_v9 = vadd.f32 %v6643_v7, %v9997_v29 }
 0x476   : > { %5445 = vst [vmem:[%s10021_s1 + $0x20] sm:$0xff] %v5413_v52  ;;  %v5397_v14 = vpop.f32.mrf.mxu1 }
 0x477   : > { %5448 = vst [vmem:[%s10021_s1 + $0x38] sm:$0xff] %v5416_v36  ;;  %v5414_v28 = vadd.f32 %v5302_v44, %v5134_v58  ;;  %5469 = vst [vmem:[%s10021_s1 + $0xe0] sm:$0xff] %v5437_v6  ;;  %v5440_v17 = vadd.f32 %v5406_v9, %v5160_v31  ;;  %v5398_v30 = vadd.f32 %v9997_v29, %v5397_v14 }
 0x479   : > { %5446 = vst [vmem:[%s10021_s1 + $0x28] sm:$0xff] %v5414_v28  ;;  %5472 = vst [vmem:[%s10021_s1 + $0xf8] sm:$0xff] %v5440_v17  ;;  %v5438_v10 = vadd.f32 %v5398_v30, %v5158_v15 }
 0x47b   : > { %5470 = vst [vmem:[%s10021_s1 + $0xe8] sm:$0xff] %v5438_v10 }
 0x47c   : > { %7066 = shalt.err (!%p7063_p13)
}
 0x47d   : > { %s7067_s15 = scalar_lea.hbm %s10254_s19, 4096  ;;  %s7071_s22 = scalar_lea.hbm %s10315_s9, 8192 }
 0x47e   : > { %p7068_p1 = scmp.ne.s32.totalorder %s10254_s19, %s7067_s15  ;;  %p7072_p12 = scmp.lt.s32.totalorder %s10254_s19, %s10315_s9 }
 0x47f   : > { %p7073_p5 = scmp.lt.s32.totalorder %s7071_s22, %s7067_s15 }
 0x480   : > { %p7069_p4 = pnand %p7068_p1, %p7307_p0 }
 0x481   : > { %p7074_p3 = por %p7073_p5, %p7072_p12 }
 0x482   : > { %p7070_p8 = pneg %p7069_p4 }
 0x484   : > { %p7075_p10 = pnand %p7074_p3, %p7070_p8 }
 0x486   : > { %7078 = shalt.err (!%p7075_p10)
}
 0x487   : > { %s7155_s26 = smov 128   ;;  %s7156_s7 = smov 8  }
 0x488   : > { %6674 = dma.vmem_to_hbm [thread:$0]  (%p7307_p0), %s10256_s4, 4096, %s10254_s19, %s5474_s12, %s7155_s26, %s7155_s26, %s7156_s7  }
 0x489 PF: > { %s10826_s17 = sld [smem:[#allocation15_spill]]  ;;  %s5505_s21 = sand.u32 1, %s7121_s30  }
 0x48a   : > { %p10828_p11 = scmp.ge.s32.totalorder %s7141_s14, 2  ;;  %s5506_s18 = scalar_lea.sflag [#allocation4], %s5505_s21 }
 0x48f   : > { %p10827_p2 = scmp.ne.s32.totalorder %s10826_s17, 0 }
 0x491   : > { %p6691_p7 = pnand %p10828_p11, %p10827_p2 }
 0x493   : > { %p6692_p6 = pneg %p6691_p7 }
 0x495   : > { %7116 = dma.done.wait (%p6692_p6), %s5506_s18, 4096  }
 0x496   : > { %7118 = vsyncadd (%p6692_p6), %s5506_s18, 4294963200  ;;  %s27_s14 = sadd.s32 1, %s7141_s14   ;;  %s10829_s24 = sld [smem:[#allocation16_spill]] }
 0x497   : > { %p24_p9 = scmp.ge.s32.totalorder %s27_s14, 4   ;;  %s10830_s30 = smov %s7125_s10 }
 0x498   : > { %s10831_s10 = smov %s7129_s11  ;;  %s10832_s11 = smov %s7319_s16 }
 0x499   : > { %s10833_s12 = smov %s7137_s13  ;;  %26 = sbr.rel (!%p24_p9) target bundleno = 12 (0xc), region = 117 }
 0x49c   : > { %s10834_s13 = smov %s10829_s24 }
 0x49e   :  { %5511 = vsyncpa [#allocation3], 1 }
 0x49f   :  { %5513 = vsyncpa [#allocation3 + $0x1], 1 }
 0x4a0   :  { %5514 = vsyncpa [#allocation6], 1 }
 0x4a1   :  { %5515 = vsyncpa [#allocation9], 1 }
 0x4a2   :  { %5516 = vsyncpa [#allocation4], 1 }
 0x4a3   :  { %5518 = vsyncpa [#allocation4 + $0x1], 1 }

</bundles_post_ra>
